<compile_context>
chip_gen: v7x
topology: tpu7x:2x2x1
jax: 0.10.0
libtpu: 0.0.40
codegen_flags: <defaults>
</compile_context>

<pallas_src>
import functools

import jax
import jax.numpy as jnp
from jax.experimental import pallas as pl
from jax.experimental.pallas import tpu as pltpu


GROWTH = 16
NUM_LAYERS = 30
TRANS_OUT = GROWTH * 2                          # 32
TOTAL_FEATS = TRANS_OUT + NUM_LAYERS * GROWTH   # 512
OUT_PAD = 128                                   # lane-dense output width
TILE_N = 8                                      # f32 sublane quantum


# ----------------------------------------------------------------------------
# Fused Pallas kernel: whole DenseNet forward for one batch tile.
# ----------------------------------------------------------------------------
def _densenet_fused_kernel(x_ref, wt_ref, bt_ref, w1_ref, b1_ref,
                           w2_ref, b2_ref, wf_ref, bf_ref, wo_ref, bo_ref,
                           out_ref, acc_ref, *, num_layers, growth, trans_out):
    # Zero the activation scratch once: the tail beyond the currently-built
    # width must be zero so the zero-padded W1 rows contribute nothing.
    acc_ref[...] = jnp.zeros_like(acc_ref)

    # transition: ReLU(x @ Wt + bt) -> columns [0, 32)
    t = jnp.dot(x_ref[...], wt_ref[...], preferred_element_type=jnp.float32)
    acc_ref[:, 0:trans_out] = jnp.maximum(t + bt_ref[...], 0.0)

    # 30 DenseLayers, statically unrolled (gives the scheduler cross-layer
    # visibility to overlap the small 16x16 dot with the next 512x16 MXU push).
    for i in range(num_layers):
        h1 = jnp.dot(acc_ref[...], w1_ref[i],
                     preferred_element_type=jnp.float32)
        h1 = jnp.maximum(h1 + b1_ref[i], 0.0)
        h2 = jnp.dot(h1, w2_ref[i], preferred_element_type=jnp.float32)
        h2 = jnp.maximum(h2 + b2_ref[i], 0.0)
        off = trans_out + growth * i            # static offset
        acc_ref[:, off:off + growth] = h2       # == torch.cat((x, out), dim=1)

    # final_dense: ReLU(acc @ Wf + bf) -> (tile_n, 32)
    f = jnp.dot(acc_ref[...], wf_ref[...], preferred_element_type=jnp.float32)
    f = jnp.maximum(f + bf_ref[...], 0.0)

    # output layer, lane-dense (Wo/bo zero-padded to 128 cols)
    o = jnp.dot(f, wo_ref[...], preferred_element_type=jnp.float32) + bo_ref[...]
    out_ref[...] = o.astype(out_ref.dtype)


# ----------------------------------------------------------------------------
# Parameter init (deterministic, PyTorch nn.Linear-style uniform bounds)
# ----------------------------------------------------------------------------
def _init_linear(key, in_f, out_f, dtype=jnp.float32):
    kw, kb = jax.random.split(key)
    bound = 1.0 / jnp.sqrt(jnp.asarray(in_f, dtype))
    # stored already transposed: (in_f, out_f)
    w = jax.random.uniform(kw, (in_f, out_f), dtype, -bound, bound)
    b = jax.random.uniform(kb, (out_f,), dtype, -bound, bound)
    return w, b


def init_densenet_params(key, in_features, out_features,
                         growth_rate=GROWTH, num_layers=NUM_LAYERS):
    keys = jax.random.split(key, 3 + 2 * num_layers)
    params = {}
    params["transition"] = _init_linear(keys[0], in_features, growth_rate * 2)
    layers = []
    feats = growth_rate * 2
    for i in range(num_layers):
        w1, b1 = _init_linear(keys[1 + 2 * i], feats, growth_rate)
        w2, b2 = _init_linear(keys[2 + 2 * i], growth_rate, growth_rate)
        layers.append((w1, b1, w2, b2))
        feats += growth_rate
    params["layers"] = layers
    params["final_dense"] = _init_linear(keys[1 + 2 * num_layers], feats,
                                         growth_rate * 2)
    params["output"] = _init_linear(keys[2 + 2 * num_layers], growth_rate * 2,
                                    out_features)
    return params


def pack_densenet_params(params, *, growth_rate=GROWTH,
                         num_layers=NUM_LAYERS, out_pad=OUT_PAD):
    """Pack per-layer weights into a few stacked/padded arrays (~1 MB f32)."""
    wt, bt = params["transition"]
    total = wt.shape[1] + num_layers * growth_rate   # 512
    w1s, b1s, w2s, b2s = [], [], [], []
    for (w1, b1, w2, b2) in params["layers"]:
        w1p = jnp.zeros((total, growth_rate), w1.dtype).at[:w1.shape[0]].set(w1)
        w1s.append(w1p)
        b1s.append(b1.reshape(1, growth_rate))
        w2s.append(w2)
        b2s.append(b2.reshape(1, growth_rate))
    wf, bf = params["final_dense"]
    wo, bo = params["output"]
    out_f = wo.shape[1]
    wo_p = jnp.zeros((wo.shape[0], out_pad), wo.dtype).at[:, :out_f].set(wo)
    bo_p = jnp.zeros((1, out_pad), bo.dtype).at[0, :out_f].set(bo)
    # TODO(synk): on v6e/v7x the packed weights could be stored in bfloat16
    # (keep f32 MXU accumulation); kept f32 here for bit-faithful semantics.
    return dict(
        wt=wt, bt=bt.reshape(1, -1),
        w1=jnp.stack(w1s), b1=jnp.stack(b1s),
        w2=jnp.stack(w2s), b2=jnp.stack(b2s),
        wf=wf, bf=bf.reshape(1, -1),
        wo=wo_p, bo=bo_p,
    )


# ----------------------------------------------------------------------------
# Fused forward wrapper (one pallas_call for the whole network)
# ----------------------------------------------------------------------------
def densenet_forward(packed, x, out_features):
    n, in_f = x.shape
    n_pad = ((n + TILE_N - 1) // TILE_N) * TILE_N   # pad batch to sublane quantum
    if n_pad != n:
        x = jnp.pad(x, ((0, n_pad - n), (0, 0)))
    grid = (n_pad // TILE_N,)

    wt, bt = packed["wt"], packed["bt"]
    w1, b1 = packed["w1"], packed["b1"]
    w2, b2 = packed["w2"], packed["b2"]
    wf, bf = packed["wf"], packed["bf"]
    wo, bo = packed["wo"], packed["bo"]
    num_layers, total_feats, growth = w1.shape
    trans_out = wt.shape[1]
    out_pad = wo.shape[1]

    kernel = functools.partial(_densenet_fused_kernel,
                               num_layers=num_layers,
                               growth=growth,
                               trans_out=trans_out)

    out = pl.pallas_call(
        kernel,
        out_shape=jax.ShapeDtypeStruct((n_pad, out_pad), x.dtype),
        grid_spec=pltpu.PrefetchScalarGridSpec(
            num_scalar_prefetch=0,
            grid=grid,
            in_specs=[
                pl.BlockSpec((TILE_N, in_f), lambda i: (i, 0)),   # x (batch tile)
                pl.BlockSpec(wt.shape, lambda i: (0, 0)),         # transition W
                pl.BlockSpec(bt.shape, lambda i: (0, 0)),
                pl.BlockSpec(w1.shape, lambda i: (0, 0, 0)),      # stacked W1
                pl.BlockSpec(b1.shape, lambda i: (0, 0, 0)),
                pl.BlockSpec(w2.shape, lambda i: (0, 0, 0)),      # stacked W2
                pl.BlockSpec(b2.shape, lambda i: (0, 0, 0)),
                pl.BlockSpec(wf.shape, lambda i: (0, 0)),         # final_dense
                pl.BlockSpec(bf.shape, lambda i: (0, 0)),
                pl.BlockSpec(wo.shape, lambda i: (0, 0)),         # output (padded)
                pl.BlockSpec(bo.shape, lambda i: (0, 0)),
            ],
            out_specs=pl.BlockSpec((TILE_N, out_pad), lambda i: (i, 0)),
            scratch_shapes=[pltpu.VMEM((TILE_N, total_feats), jnp.float32)],
        ),
        compiler_params=pltpu.CompilerParams(
            dimension_semantics=("parallel",),
        ),
    )(x, wt, bt, w1, b1, w2, b2, wf, bf, wo, bo)
    return out[:n, :out_features]


# ----------------------------------------------------------------------------
# Pure-JAX reference (mirrors the PyTorch forward) for a correctness check
# ----------------------------------------------------------------------------
def densenet_reference(params, x):
    wt, bt = params["transition"]
    out = jnp.maximum(x @ wt + bt, 0.0)
    for (w1, b1, w2, b2) in params["layers"]:
        h = jnp.maximum(out @ w1 + b1, 0.0)
        h = jnp.maximum(h @ w2 + b2, 0.0)
        out = jnp.concatenate([out, h], axis=1)
    wf, bf = params["final_dense"]
    out = jnp.maximum(out @ wf + bf, 0.0)
    wo, bo = params["output"]
    return out @ wo + bo


# TODO(synk): AngularPenaltySMLoss / PositiveParameter are constructed in
# __init__ but unused in DenseNet.forward, so they are not implemented here.

if __name__ == "__main__":
    IN_FEATURES = 24
    OUT_FEATURES = 10
    BATCH = 2

    key = jax.random.PRNGKey(0)
    pkey, xkey = jax.random.split(key)
    params = init_densenet_params(pkey, IN_FEATURES, OUT_FEATURES)
    packed = pack_densenet_params(params)
    x = jax.random.normal(xkey, (BATCH, IN_FEATURES), jnp.float32)

    fwd = jax.jit(functools.partial(densenet_forward, packed,
                                    out_features=OUT_FEATURES))
    out = fwd(x)
    jax.block_until_ready(out)
    assert out.shape == (BATCH, OUT_FEATURES)

    ref = densenet_reference(params, x)
    assert jnp.allclose(out, ref, rtol=1e-3, atol=1e-3), (
        "max abs err = %f" % float(jnp.max(jnp.abs(out - ref))))
    print("KERNEL_OK")
</pallas_src>

<mosaic_0001>
module attributes {stable_mosaic.version = 11 : i64} {
  func.func @_densenet_fused_kernel(%arg0: i32, %arg1: memref<8x24xf32, #tpu.memory_space<vmem>>, %arg2: memref<24x32xf32, #tpu.memory_space<vmem>>, %arg3: memref<1x32xf32, #tpu.memory_space<vmem>>, %arg4: memref<30x512x16xf32, #tpu.memory_space<vmem>>, %arg5: memref<30x1x16xf32, #tpu.memory_space<vmem>>, %arg6: memref<30x16x16xf32, #tpu.memory_space<vmem>>, %arg7: memref<30x1x16xf32, #tpu.memory_space<vmem>>, %arg8: memref<512x32xf32, #tpu.memory_space<vmem>>, %arg9: memref<1x32xf32, #tpu.memory_space<vmem>>, %arg10: memref<32x128xf32, #tpu.memory_space<vmem>>, %arg11: memref<1x128xf32, #tpu.memory_space<vmem>>, %arg12: memref<8x128xf32, #tpu.memory_space<vmem>>, %arg13: memref<8x512xf32, #tpu.memory_space<vmem>>) attributes {dimension_semantics = [#tpu.dimension_semantics<parallel>], iteration_bounds = array<i64: 1>, scalar_prefetch = 0 : i64, scratch_operands = 1 : i64, tpu.core_type = #tpu.core_type<tc>, window_params = [{transform_indices = @transform_0, window_bounds = array<i64: 8, 24>}, {pipeline_mode = #tpu.pipeline_mode<synchronous>, transform_indices = @transform_1, window_bounds = array<i64: 24, 32>}, {pipeline_mode = #tpu.pipeline_mode<synchronous>, transform_indices = @transform_2, window_bounds = array<i64: 1, 32>}, {pipeline_mode = #tpu.pipeline_mode<synchronous>, transform_indices = @transform_3, window_bounds = array<i64: 30, 512, 16>}, {pipeline_mode = #tpu.pipeline_mode<synchronous>, transform_indices = @transform_4, window_bounds = array<i64: 30, 1, 16>}, {pipeline_mode = #tpu.pipeline_mode<synchronous>, transform_indices = @transform_5, window_bounds = array<i64: 30, 16, 16>}, {pipeline_mode = #tpu.pipeline_mode<synchronous>, transform_indices = @transform_6, window_bounds = array<i64: 30, 1, 16>}, {pipeline_mode = #tpu.pipeline_mode<synchronous>, transform_indices = @transform_7, window_bounds = array<i64: 512, 32>}, {pipeline_mode = #tpu.pipeline_mode<synchronous>, transform_indices = @transform_8, window_bounds = array<i64: 1, 32>}, {pipeline_mode = #tpu.pipeline_mode<synchronous>, transform_indices = @transform_9, window_bounds = array<i64: 32, 128>}, {pipeline_mode = #tpu.pipeline_mode<synchronous>, transform_indices = @transform_10, window_bounds = array<i64: 1, 128>}, {transform_indices = @transform_11, window_bounds = array<i64: 8, 128>}]} {
    %cst = arith.constant 0.000000e+00 : f32
    %0 = vector.broadcast %cst : f32 to vector<8x512xf32>
    %c0 = arith.constant 0 : index
    %c0_0 = arith.constant 0 : index
    %1 = vector.load %arg13[%c0, %c0_0] : memref<8x512xf32, #tpu.memory_space<vmem>>, vector<8x512xf32>
    tpu.vector_store %arg13[%c0, %c0_0], %0 {strides = array<i32>} : memref<8x512xf32, #tpu.memory_space<vmem>>, vector<8x512xf32>,
    %c0_1 = arith.constant 0 : index
    %c0_2 = arith.constant 0 : index
    %2 = vector.load %arg1[%c0_1, %c0_2] : memref<8x24xf32, #tpu.memory_space<vmem>>, vector<8x24xf32>
    %c0_3 = arith.constant 0 : index
    %c0_4 = arith.constant 0 : index
    %3 = vector.load %arg2[%c0_3, %c0_4] : memref<24x32xf32, #tpu.memory_space<vmem>>, vector<24x32xf32>
    %cst_5 = arith.constant dense<0.000000e+00> : vector<8x32xf32>
    %4 = tpu.matmul %2, %3, %cst_5 {dimension_numbers = #tpu.dot_dimension_numbers<[1], [0], [0], [1], [0, 0, 1, 1], [], []>} : vector<8x24xf32>, vector<24x32xf32>, vector<8x32xf32> -> vector<8x32xf32>
    %c0_6 = arith.constant 0 : index
    %c0_7 = arith.constant 0 : index
    %5 = vector.load %arg3[%c0_6, %c0_7] : memref<1x32xf32, #tpu.memory_space<vmem>>, vector<1x32xf32>
    %6 = vector.broadcast %5 : vector<1x32xf32> to vector<8x32xf32>
    %7 = arith.addf %4, %6 : vector<8x32xf32>
    %cst_8 = arith.constant 0.000000e+00 : f32
    %8 = vector.broadcast %cst_8 : f32 to vector<8x32xf32>
    %9 = arith.maximumf %7, %8 : vector<8x32xf32>
    %c0_9 = arith.constant 0 : index
    %c0_10 = arith.constant 0 : index
    %10 = vector.load %arg13[%c0_9, %c0_10] : memref<8x512xf32, #tpu.memory_space<vmem>>, vector<8x32xf32>
    tpu.vector_store %arg13[%c0_9, %c0_10], %9 {strides = array<i32>} : memref<8x512xf32, #tpu.memory_space<vmem>>, vector<8x32xf32>,
    %c0_11 = arith.constant 0 : index
    %c0_12 = arith.constant 0 : index
    %11 = vector.load %arg13[%c0_11, %c0_12] : memref<8x512xf32, #tpu.memory_space<vmem>>, vector<8x512xf32>
    %c0_13 = arith.constant 0 : index
    %c0_14 = arith.constant 0 : index
    %c0_15 = arith.constant 0 : index
    %12 = vector.load %arg4[%c0_13, %c0_14, %c0_15] : memref<30x512x16xf32, #tpu.memory_space<vmem>>, vector<1x512x16xf32>
    %13 = vector.shape_cast %12 : vector<1x512x16xf32> to vector<512x16xf32>
    %cst_16 = arith.constant dense<0.000000e+00> : vector<8x16xf32>
    %14 = tpu.matmul %11, %13, %cst_16 {dimension_numbers = #tpu.dot_dimension_numbers<[1], [0], [0], [1], [0, 0, 1, 1], [], []>} : vector<8x512xf32>, vector<512x16xf32>, vector<8x16xf32> -> vector<8x16xf32>
    %c0_17 = arith.constant 0 : index
    %c0_18 = arith.constant 0 : index
    %c0_19 = arith.constant 0 : index
    %15 = vector.load %arg5[%c0_17, %c0_18, %c0_19] : memref<30x1x16xf32, #tpu.memory_space<vmem>>, vector<1x1x16xf32>
    %16 = vector.shape_cast %15 : vector<1x1x16xf32> to vector<1x16xf32>
    %17 = vector.broadcast %16 : vector<1x16xf32> to vector<8x16xf32>
    %18 = arith.addf %14, %17 : vector<8x16xf32>
    %cst_20 = arith.constant 0.000000e+00 : f32
    %19 = vector.broadcast %cst_20 : f32 to vector<8x16xf32>
    %20 = arith.maximumf %18, %19 : vector<8x16xf32>
    %c0_21 = arith.constant 0 : index
    %c0_22 = arith.constant 0 : index
    %c0_23 = arith.constant 0 : index
    %21 = vector.load %arg6[%c0_21, %c0_22, %c0_23] : memref<30x16x16xf32, #tpu.memory_space<vmem>>, vector<1x16x16xf32>
    %22 = vector.shape_cast %21 : vector<1x16x16xf32> to vector<16x16xf32>
    %cst_24 = arith.constant dense<0.000000e+00> : vector<8x16xf32>
    %23 = tpu.matmul %20, %22, %cst_24 {dimension_numbers = #tpu.dot_dimension_numbers<[1], [0], [0], [1], [0, 0, 1, 1], [], []>} : vector<8x16xf32>, vector<16x16xf32>, vector<8x16xf32> -> vector<8x16xf32>
    %c0_25 = arith.constant 0 : index
    %c0_26 = arith.constant 0 : index
    %c0_27 = arith.constant 0 : index
    %24 = vector.load %arg7[%c0_25, %c0_26, %c0_27] : memref<30x1x16xf32, #tpu.memory_space<vmem>>, vector<1x1x16xf32>
    %25 = vector.shape_cast %24 : vector<1x1x16xf32> to vector<1x16xf32>
    %26 = vector.broadcast %25 : vector<1x16xf32> to vector<8x16xf32>
    %27 = arith.addf %23, %26 : vector<8x16xf32>
    %cst_28 = arith.constant 0.000000e+00 : f32
    %28 = vector.broadcast %cst_28 : f32 to vector<8x16xf32>
    %29 = arith.maximumf %27, %28 : vector<8x16xf32>
    %c0_29 = arith.constant 0 : index
    %c32 = arith.constant 32 : index
    %30 = vector.load %arg13[%c0_29, %c32] : memref<8x512xf32, #tpu.memory_space<vmem>>, vector<8x16xf32>
    tpu.vector_store %arg13[%c0_29, %c32], %29 {strides = array<i32>} : memref<8x512xf32, #tpu.memory_space<vmem>>, vector<8x16xf32>,
    %c0_30 = arith.constant 0 : index
    %c0_31 = arith.constant 0 : index
    %31 = vector.load %arg13[%c0_30, %c0_31] : memref<8x512xf32, #tpu.memory_space<vmem>>, vector<8x512xf32>
    %c1 = arith.constant 1 : index
    %c0_32 = arith.constant 0 : index
    %c0_33 = arith.constant 0 : index
    %32 = vector.load %arg4[%c1, %c0_32, %c0_33] : memref<30x512x16xf32, #tpu.memory_space<vmem>>, vector<1x512x16xf32>
    %33 = vector.shape_cast %32 : vector<1x512x16xf32> to vector<512x16xf32>
    %cst_34 = arith.constant dense<0.000000e+00> : vector<8x16xf32>
    %34 = tpu.matmul %31, %33, %cst_34 {dimension_numbers = #tpu.dot_dimension_numbers<[1], [0], [0], [1], [0, 0, 1, 1], [], []>} : vector<8x512xf32>, vector<512x16xf32>, vector<8x16xf32> -> vector<8x16xf32>
    %c1_35 = arith.constant 1 : index
    %c0_36 = arith.constant 0 : index
    %c0_37 = arith.constant 0 : index
    %35 = vector.load %arg5[%c1_35, %c0_36, %c0_37] : memref<30x1x16xf32, #tpu.memory_space<vmem>>, vector<1x1x16xf32>
    %36 = vector.shape_cast %35 : vector<1x1x16xf32> to vector<1x16xf32>
    %37 = vector.broadcast %36 : vector<1x16xf32> to vector<8x16xf32>
    %38 = arith.addf %34, %37 : vector<8x16xf32>
    %cst_38 = arith.constant 0.000000e+00 : f32
    %39 = vector.broadcast %cst_38 : f32 to vector<8x16xf32>
    %40 = arith.maximumf %38, %39 : vector<8x16xf32>
    %c1_39 = arith.constant 1 : index
    %c0_40 = arith.constant 0 : index
    %c0_41 = arith.constant 0 : index
    %41 = vector.load %arg6[%c1_39, %c0_40, %c0_41] : memref<30x16x16xf32, #tpu.memory_space<vmem>>, vector<1x16x16xf32>
    %42 = vector.shape_cast %41 : vector<1x16x16xf32> to vector<16x16xf32>
    %cst_42 = arith.constant dense<0.000000e+00> : vector<8x16xf32>
    %43 = tpu.matmul %40, %42, %cst_42 {dimension_numbers = #tpu.dot_dimension_numbers<[1], [0], [0], [1], [0, 0, 1, 1], [], []>} : vector<8x16xf32>, vector<16x16xf32>, vector<8x16xf32> -> vector<8x16xf32>
    %c1_43 = arith.constant 1 : index
    %c0_44 = arith.constant 0 : index
    %c0_45 = arith.constant 0 : index
    %44 = vector.load %arg7[%c1_43, %c0_44, %c0_45] : memref<30x1x16xf32, #tpu.memory_space<vmem>>, vector<1x1x16xf32>
    %45 = vector.shape_cast %44 : vector<1x1x16xf32> to vector<1x16xf32>
    %46 = vector.broadcast %45 : vector<1x16xf32> to vector<8x16xf32>
    %47 = arith.addf %43, %46 : vector<8x16xf32>
    %cst_46 = arith.constant 0.000000e+00 : f32
    %48 = vector.broadcast %cst_46 : f32 to vector<8x16xf32>
    %49 = arith.maximumf %47, %48 : vector<8x16xf32>
    %c0_47 = arith.constant 0 : index
    %c48 = arith.constant 48 : index
    %50 = vector.load %arg13[%c0_47, %c48] : memref<8x512xf32, #tpu.memory_space<vmem>>, vector<8x16xf32>
    tpu.vector_store %arg13[%c0_47, %c48], %49 {strides = array<i32>} : memref<8x512xf32, #tpu.memory_space<vmem>>, vector<8x16xf32>,
    %c0_48 = arith.constant 0 : index
    %c0_49 = arith.constant 0 : index
    %51 = vector.load %arg13[%c0_48, %c0_49] : memref<8x512xf32, #tpu.memory_space<vmem>>, vector<8x512xf32>
    %c2 = arith.constant 2 : index
    %c0_50 = arith.constant 0 : index
    %c0_51 = arith.constant 0 : index
    %52 = vector.load %arg4[%c2, %c0_50, %c0_51] : memref<30x512x16xf32, #tpu.memory_space<vmem>>, vector<1x512x16xf32>
    %53 = vector.shape_cast %52 : vector<1x512x16xf32> to vector<512x16xf32>
    %cst_52 = arith.constant dense<0.000000e+00> : vector<8x16xf32>
    %54 = tpu.matmul %51, %53, %cst_52 {dimension_numbers = #tpu.dot_dimension_numbers<[1], [0], [0], [1], [0, 0, 1, 1], [], []>} : vector<8x512xf32>, vector<512x16xf32>, vector<8x16xf32> -> vector<8x16xf32>
    %c2_53 = arith.constant 2 : index
    %c0_54 = arith.constant 0 : index
    %c0_55 = arith.constant 0 : index
    %55 = vector.load %arg5[%c2_53, %c0_54, %c0_55] : memref<30x1x16xf32, #tpu.memory_space<vmem>>, vector<1x1x16xf32>
    %56 = vector.shape_cast %55 : vector<1x1x16xf32> to vector<1x16xf32>
    %57 = vector.broadcast %56 : vector<1x16xf32> to vector<8x16xf32>
    %58 = arith.addf %54, %57 : vector<8x16xf32>
    %cst_56 = arith.constant 0.000000e+00 : f32
    %59 = vector.broadcast %cst_56 : f32 to vector<8x16xf32>
    %60 = arith.maximumf %58, %59 : vector<8x16xf32>
    %c2_57 = arith.constant 2 : index
    %c0_58 = arith.constant 0 : index
    %c0_59 = arith.constant 0 : index
    %61 = vector.load %arg6[%c2_57, %c0_58, %c0_59] : memref<30x16x16xf32, #tpu.memory_space<vmem>>, vector<1x16x16xf32>
    %62 = vector.shape_cast %61 : vector<1x16x16xf32> to vector<16x16xf32>
    %cst_60 = arith.constant dense<0.000000e+00> : vector<8x16xf32>
    %63 = tpu.matmul %60, %62, %cst_60 {dimension_numbers = #tpu.dot_dimension_numbers<[1], [0], [0], [1], [0, 0, 1, 1], [], []>} : vector<8x16xf32>, vector<16x16xf32>, vector<8x16xf32> -> vector<8x16xf32>
    %c2_61 = arith.constant 2 : index
    %c0_62 = arith.constant 0 : index
    %c0_63 = arith.constant 0 : index
    %64 = vector.load %arg7[%c2_61, %c0_62, %c0_63] : memref<30x1x16xf32, #tpu.memory_space<vmem>>, vector<1x1x16xf32>
    %65 = vector.shape_cast %64 : vector<1x1x16xf32> to vector<1x16xf32>
    %66 = vector.broadcast %65 : vector<1x16xf32> to vector<8x16xf32>
    %67 = arith.addf %63, %66 : vector<8x16xf32>
    %cst_64 = arith.constant 0.000000e+00 : f32
    %68 = vector.broadcast %cst_64 : f32 to vector<8x16xf32>
    %69 = arith.maximumf %67, %68 : vector<8x16xf32>
    %c0_65 = arith.constant 0 : index
    %c64 = arith.constant 64 : index
    %70 = vector.load %arg13[%c0_65, %c64] : memref<8x512xf32, #tpu.memory_space<vmem>>, vector<8x16xf32>
    tpu.vector_store %arg13[%c0_65, %c64], %69 {strides = array<i32>} : memref<8x512xf32, #tpu.memory_space<vmem>>, vector<8x16xf32>,
    %c0_66 = arith.constant 0 : index
    %c0_67 = arith.constant 0 : index
    %71 = vector.load %arg13[%c0_66, %c0_67] : memref<8x512xf32, #tpu.memory_space<vmem>>, vector<8x512xf32>
    %c3 = arith.constant 3 : index
    %c0_68 = arith.constant 0 : index
    %c0_69 = arith.constant 0 : index
    %72 = vector.load %arg4[%c3, %c0_68, %c0_69] : memref<30x512x16xf32, #tpu.memory_space<vmem>>, vector<1x512x16xf32>
    %73 = vector.shape_cast %72 : vector<1x512x16xf32> to vector<512x16xf32>
    %cst_70 = arith.constant dense<0.000000e+00> : vector<8x16xf32>
    %74 = tpu.matmul %71, %73, %cst_70 {dimension_numbers = #tpu.dot_dimension_numbers<[1], [0], [0], [1], [0, 0, 1, 1], [], []>} : vector<8x512xf32>, vector<512x16xf32>, vector<8x16xf32> -> vector<8x16xf32>
    %c3_71 = arith.constant 3 : index
    %c0_72 = arith.constant 0 : index
    %c0_73 = arith.constant 0 : index
    %75 = vector.load %arg5[%c3_71, %c0_72, %c0_73] : memref<30x1x16xf32, #tpu.memory_space<vmem>>, vector<1x1x16xf32>
    %76 = vector.shape_cast %75 : vector<1x1x16xf32> to vector<1x16xf32>
    %77 = vector.broadcast %76 : vector<1x16xf32> to vector<8x16xf32>
    %78 = arith.addf %74, %77 : vector<8x16xf32>
    %cst_74 = arith.constant 0.000000e+00 : f32
    %79 = vector.broadcast %cst_74 : f32 to vector<8x16xf32>
    %80 = arith.maximumf %78, %79 : vector<8x16xf32>
    %c3_75 = arith.constant 3 : index
    %c0_76 = arith.constant 0 : index
    %c0_77 = arith.constant 0 : index
    %81 = vector.load %arg6[%c3_75, %c0_76, %c0_77] : memref<30x16x16xf32, #tpu.memory_space<vmem>>, vector<1x16x16xf32>
    %82 = vector.shape_cast %81 : vector<1x16x16xf32> to vector<16x16xf32>
    %cst_78 = arith.constant dense<0.000000e+00> : vector<8x16xf32>
    %83 = tpu.matmul %80, %82, %cst_78 {dimension_numbers = #tpu.dot_dimension_numbers<[1], [0], [0], [1], [0, 0, 1, 1], [], []>} : vector<8x16xf32>, vector<16x16xf32>, vector<8x16xf32> -> vector<8x16xf32>
    %c3_79 = arith.constant 3 : index
    %c0_80 = arith.constant 0 : index
    %c0_81 = arith.constant 0 : index
    %84 = vector.load %arg7[%c3_79, %c0_80, %c0_81] : memref<30x1x16xf32, #tpu.memory_space<vmem>>, vector<1x1x16xf32>
    %85 = vector.shape_cast %84 : vector<1x1x16xf32> to vector<1x16xf32>
    %86 = vector.broadcast %85 : vector<1x16xf32> to vector<8x16xf32>
    %87 = arith.addf %83, %86 : vector<8x16xf32>
    %cst_82 = arith.constant 0.000000e+00 : f32
    %88 = vector.broadcast %cst_82 : f32 to vector<8x16xf32>
    %89 = arith.maximumf %87, %88 : vector<8x16xf32>
    %c0_83 = arith.constant 0 : index
    %c80 = arith.constant 80 : index
    %90 = vector.load %arg13[%c0_83, %c80] : memref<8x512xf32, #tpu.memory_space<vmem>>, vector<8x16xf32>
    tpu.vector_store %arg13[%c0_83, %c80], %89 {strides = array<i32>} : memref<8x512xf32, #tpu.memory_space<vmem>>, vector<8x16xf32>,
    %c0_84 = arith.constant 0 : index
    %c0_85 = arith.constant 0 : index
    %91 = vector.load %arg13[%c0_84, %c0_85] : memref<8x512xf32, #tpu.memory_space<vmem>>, vector<8x512xf32>
    %c4 = arith.constant 4 : index
    %c0_86 = arith.constant 0 : index
    %c0_87 = arith.constant 0 : index
    %92 = vector.load %arg4[%c4, %c0_86, %c0_87] : memref<30x512x16xf32, #tpu.memory_space<vmem>>, vector<1x512x16xf32>
    %93 = vector.shape_cast %92 : vector<1x512x16xf32> to vector<512x16xf32>
    %cst_88 = arith.constant dense<0.000000e+00> : vector<8x16xf32>
    %94 = tpu.matmul %91, %93, %cst_88 {dimension_numbers = #tpu.dot_dimension_numbers<[1], [0], [0], [1], [0, 0, 1, 1], [], []>} : vector<8x512xf32>, vector<512x16xf32>, vector<8x16xf32> -> vector<8x16xf32>
    %c4_89 = arith.constant 4 : index
    %c0_90 = arith.constant 0 : index
    %c0_91 = arith.constant 0 : index
    %95 = vector.load %arg5[%c4_89, %c0_90, %c0_91] : memref<30x1x16xf32, #tpu.memory_space<vmem>>, vector<1x1x16xf32>
    %96 = vector.shape_cast %95 : vector<1x1x16xf32> to vector<1x16xf32>
    %97 = vector.broadcast %96 : vector<1x16xf32> to vector<8x16xf32>
    %98 = arith.addf %94, %97 : vector<8x16xf32>
    %cst_92 = arith.constant 0.000000e+00 : f32
    %99 = vector.broadcast %cst_92 : f32 to vector<8x16xf32>
    %100 = arith.maximumf %98, %99 : vector<8x16xf32>
    %c4_93 = arith.constant 4 : index
    %c0_94 = arith.constant 0 : index
    %c0_95 = arith.constant 0 : index
    %101 = vector.load %arg6[%c4_93, %c0_94, %c0_95] : memref<30x16x16xf32, #tpu.memory_space<vmem>>, vector<1x16x16xf32>
    %102 = vector.shape_cast %101 : vector<1x16x16xf32> to vector<16x16xf32>
    %cst_96 = arith.constant dense<0.000000e+00> : vector<8x16xf32>
    %103 = tpu.matmul %100, %102, %cst_96 {dimension_numbers = #tpu.dot_dimension_numbers<[1], [0], [0], [1], [0, 0, 1, 1], [], []>} : vector<8x16xf32>, vector<16x16xf32>, vector<8x16xf32> -> vector<8x16xf32>
    %c4_97 = arith.constant 4 : index
    %c0_98 = arith.constant 0 : index
    %c0_99 = arith.constant 0 : index
    %104 = vector.load %arg7[%c4_97, %c0_98, %c0_99] : memref<30x1x16xf32, #tpu.memory_space<vmem>>, vector<1x1x16xf32>
    %105 = vector.shape_cast %104 : vector<1x1x16xf32> to vector<1x16xf32>
    %106 = vector.broadcast %105 : vector<1x16xf32> to vector<8x16xf32>
    %107 = arith.addf %103, %106 : vector<8x16xf32>
    %cst_100 = arith.constant 0.000000e+00 : f32
    %108 = vector.broadcast %cst_100 : f32 to vector<8x16xf32>
    %109 = arith.maximumf %107, %108 : vector<8x16xf32>
    %c0_101 = arith.constant 0 : index
    %c96 = arith.constant 96 : index
    %110 = vector.load %arg13[%c0_101, %c96] : memref<8x512xf32, #tpu.memory_space<vmem>>, vector<8x16xf32>
    tpu.vector_store %arg13[%c0_101, %c96], %109 {strides = array<i32>} : memref<8x512xf32, #tpu.memory_space<vmem>>, vector<8x16xf32>,
    %c0_102 = arith.constant 0 : index
    %c0_103 = arith.constant 0 : index
    %111 = vector.load %arg13[%c0_102, %c0_103] : memref<8x512xf32, #tpu.memory_space<vmem>>, vector<8x512xf32>
    %c5 = arith.constant 5 : index
    %c0_104 = arith.constant 0 : index
    %c0_105 = arith.constant 0 : index
    %112 = vector.load %arg4[%c5, %c0_104, %c0_105] : memref<30x512x16xf32, #tpu.memory_space<vmem>>, vector<1x512x16xf32>
    %113 = vector.shape_cast %112 : vector<1x512x16xf32> to vector<512x16xf32>
    %cst_106 = arith.constant dense<0.000000e+00> : vector<8x16xf32>
    %114 = tpu.matmul %111, %113, %cst_106 {dimension_numbers = #tpu.dot_dimension_numbers<[1], [0], [0], [1], [0, 0, 1, 1], [], []>} : vector<8x512xf32>, vector<512x16xf32>, vector<8x16xf32> -> vector<8x16xf32>
    %c5_107 = arith.constant 5 : index
    %c0_108 = arith.constant 0 : index
    %c0_109 = arith.constant 0 : index
    %115 = vector.load %arg5[%c5_107, %c0_108, %c0_109] : memref<30x1x16xf32, #tpu.memory_space<vmem>>, vector<1x1x16xf32>
    %116 = vector.shape_cast %115 : vector<1x1x16xf32> to vector<1x16xf32>
    %117 = vector.broadcast %116 : vector<1x16xf32> to vector<8x16xf32>
    %118 = arith.addf %114, %117 : vector<8x16xf32>
    %cst_110 = arith.constant 0.000000e+00 : f32
    %119 = vector.broadcast %cst_110 : f32 to vector<8x16xf32>
    %120 = arith.maximumf %118, %119 : vector<8x16xf32>
    %c5_111 = arith.constant 5 : index
    %c0_112 = arith.constant 0 : index
    %c0_113 = arith.constant 0 : index
    %121 = vector.load %arg6[%c5_111, %c0_112, %c0_113] : memref<30x16x16xf32, #tpu.memory_space<vmem>>, vector<1x16x16xf32>
    %122 = vector.shape_cast %121 : vector<1x16x16xf32> to vector<16x16xf32>
    %cst_114 = arith.constant dense<0.000000e+00> : vector<8x16xf32>
    %123 = tpu.matmul %120, %122, %cst_114 {dimension_numbers = #tpu.dot_dimension_numbers<[1], [0], [0], [1], [0, 0, 1, 1], [], []>} : vector<8x16xf32>, vector<16x16xf32>, vector<8x16xf32> -> vector<8x16xf32>
    %c5_115 = arith.constant 5 : index
    %c0_116 = arith.constant 0 : index
    %c0_117 = arith.constant 0 : index
    %124 = vector.load %arg7[%c5_115, %c0_116, %c0_117] : memref<30x1x16xf32, #tpu.memory_space<vmem>>, vector<1x1x16xf32>
    %125 = vector.shape_cast %124 : vector<1x1x16xf32> to vector<1x16xf32>
    %126 = vector.broadcast %125 : vector<1x16xf32> to vector<8x16xf32>
    %127 = arith.addf %123, %126 : vector<8x16xf32>
    %cst_118 = arith.constant 0.000000e+00 : f32
    %128 = vector.broadcast %cst_118 : f32 to vector<8x16xf32>
    %129 = arith.maximumf %127, %128 : vector<8x16xf32>
    %c0_119 = arith.constant 0 : index
    %c112 = arith.constant 112 : index
    %130 = vector.load %arg13[%c0_119, %c112] : memref<8x512xf32, #tpu.memory_space<vmem>>, vector<8x16xf32>
    tpu.vector_store %arg13[%c0_119, %c112], %129 {strides = array<i32>} : memref<8x512xf32, #tpu.memory_space<vmem>>, vector<8x16xf32>,
    %c0_120 = arith.constant 0 : index
    %c0_121 = arith.constant 0 : index
    %131 = vector.load %arg13[%c0_120, %c0_121] : memref<8x512xf32, #tpu.memory_space<vmem>>, vector<8x512xf32>
    %c6 = arith.constant 6 : index
    %c0_122 = arith.constant 0 : index
    %c0_123 = arith.constant 0 : index
    %132 = vector.load %arg4[%c6, %c0_122, %c0_123] : memref<30x512x16xf32, #tpu.memory_space<vmem>>, vector<1x512x16xf32>
    %133 = vector.shape_cast %132 : vector<1x512x16xf32> to vector<512x16xf32>
    %cst_124 = arith.constant dense<0.000000e+00> : vector<8x16xf32>
    %134 = tpu.matmul %131, %133, %cst_124 {dimension_numbers = #tpu.dot_dimension_numbers<[1], [0], [0], [1], [0, 0, 1, 1], [], []>} : vector<8x512xf32>, vector<512x16xf32>, vector<8x16xf32> -> vector<8x16xf32>
    %c6_125 = arith.constant 6 : index
    %c0_126 = arith.constant 0 : index
    %c0_127 = arith.constant 0 : index
    %135 = vector.load %arg5[%c6_125, %c0_126, %c0_127] : memref<30x1x16xf32, #tpu.memory_space<vmem>>, vector<1x1x16xf32>
    %136 = vector.shape_cast %135 : vector<1x1x16xf32> to vector<1x16xf32>
    %137 = vector.broadcast %136 : vector<1x16xf32> to vector<8x16xf32>
    %138 = arith.addf %134, %137 : vector<8x16xf32>
    %cst_128 = arith.constant 0.000000e+00 : f32
    %139 = vector.broadcast %cst_128 : f32 to vector<8x16xf32>
    %140 = arith.maximumf %138, %139 : vector<8x16xf32>
    %c6_129 = arith.constant 6 : index
    %c0_130 = arith.constant 0 : index
    %c0_131 = arith.constant 0 : index
    %141 = vector.load %arg6[%c6_129, %c0_130, %c0_131] : memref<30x16x16xf32, #tpu.memory_space<vmem>>, vector<1x16x16xf32>
    %142 = vector.shape_cast %141 : vector<1x16x16xf32> to vector<16x16xf32>
    %cst_132 = arith.constant dense<0.000000e+00> : vector<8x16xf32>
    %143 = tpu.matmul %140, %142, %cst_132 {dimension_numbers = #tpu.dot_dimension_numbers<[1], [0], [0], [1], [0, 0, 1, 1], [], []>} : vector<8x16xf32>, vector<16x16xf32>, vector<8x16xf32> -> vector<8x16xf32>
    %c6_133 = arith.constant 6 : index
    %c0_134 = arith.constant 0 : index
    %c0_135 = arith.constant 0 : index
    %144 = vector.load %arg7[%c6_133, %c0_134, %c0_135] : memref<30x1x16xf32, #tpu.memory_space<vmem>>, vector<1x1x16xf32>
    %145 = vector.shape_cast %144 : vector<1x1x16xf32> to vector<1x16xf32>
    %146 = vector.broadcast %145 : vector<1x16xf32> to vector<8x16xf32>
    %147 = arith.addf %143, %146 : vector<8x16xf32>
    %cst_136 = arith.constant 0.000000e+00 : f32
    %148 = vector.broadcast %cst_136 : f32 to vector<8x16xf32>
    %149 = arith.maximumf %147, %148 : vector<8x16xf32>
    %c0_137 = arith.constant 0 : index
    %c128 = arith.constant 128 : index
    %150 = vector.load %arg13[%c0_137, %c128] : memref<8x512xf32, #tpu.memory_space<vmem>>, vector<8x16xf32>
    tpu.vector_store %arg13[%c0_137, %c128], %149 {strides = array<i32>} : memref<8x512xf32, #tpu.memory_space<vmem>>, vector<8x16xf32>,
    %c0_138 = arith.constant 0 : index
    %c0_139 = arith.constant 0 : index
    %151 = vector.load %arg13[%c0_138, %c0_139] : memref<8x512xf32, #tpu.memory_space<vmem>>, vector<8x512xf32>
    %c7 = arith.constant 7 : index
    %c0_140 = arith.constant 0 : index
    %c0_141 = arith.constant 0 : index
    %152 = vector.load %arg4[%c7, %c0_140, %c0_141] : memref<30x512x16xf32, #tpu.memory_space<vmem>>, vector<1x512x16xf32>
    %153 = vector.shape_cast %152 : vector<1x512x16xf32> to vector<512x16xf32>
    %cst_142 = arith.constant dense<0.000000e+00> : vector<8x16xf32>
    %154 = tpu.matmul %151, %153, %cst_142 {dimension_numbers = #tpu.dot_dimension_numbers<[1], [0], [0], [1], [0, 0, 1, 1], [], []>} : vector<8x512xf32>, vector<512x16xf32>, vector<8x16xf32> -> vector<8x16xf32>
    %c7_143 = arith.constant 7 : index
    %c0_144 = arith.constant 0 : index
    %c0_145 = arith.constant 0 : index
    %155 = vector.load %arg5[%c7_143, %c0_144, %c0_145] : memref<30x1x16xf32, #tpu.memory_space<vmem>>, vector<1x1x16xf32>
    %156 = vector.shape_cast %155 : vector<1x1x16xf32> to vector<1x16xf32>
    %157 = vector.broadcast %156 : vector<1x16xf32> to vector<8x16xf32>
    %158 = arith.addf %154, %157 : vector<8x16xf32>
    %cst_146 = arith.constant 0.000000e+00 : f32
    %159 = vector.broadcast %cst_146 : f32 to vector<8x16xf32>
    %160 = arith.maximumf %158, %159 : vector<8x16xf32>
    %c7_147 = arith.constant 7 : index
    %c0_148 = arith.constant 0 : index
    %c0_149 = arith.constant 0 : index
    %161 = vector.load %arg6[%c7_147, %c0_148, %c0_149] : memref<30x16x16xf32, #tpu.memory_space<vmem>>, vector<1x16x16xf32>
    %162 = vector.shape_cast %161 : vector<1x16x16xf32> to vector<16x16xf32>
    %cst_150 = arith.constant dense<0.000000e+00> : vector<8x16xf32>
    %163 = tpu.matmul %160, %162, %cst_150 {dimension_numbers = #tpu.dot_dimension_numbers<[1], [0], [0], [1], [0, 0, 1, 1], [], []>} : vector<8x16xf32>, vector<16x16xf32>, vector<8x16xf32> -> vector<8x16xf32>
    %c7_151 = arith.constant 7 : index
    %c0_152 = arith.constant 0 : index
    %c0_153 = arith.constant 0 : index
    %164 = vector.load %arg7[%c7_151, %c0_152, %c0_153] : memref<30x1x16xf32, #tpu.memory_space<vmem>>, vector<1x1x16xf32>
    %165 = vector.shape_cast %164 : vector<1x1x16xf32> to vector<1x16xf32>
    %166 = vector.broadcast %165 : vector<1x16xf32> to vector<8x16xf32>
    %167 = arith.addf %163, %166 : vector<8x16xf32>
    %cst_154 = arith.constant 0.000000e+00 : f32
    %168 = vector.broadcast %cst_154 : f32 to vector<8x16xf32>
    %169 = arith.maximumf %167, %168 : vector<8x16xf32>
    %c0_155 = arith.constant 0 : index
    %c144 = arith.constant 144 : index
    %170 = vector.load %arg13[%c0_155, %c144] : memref<8x512xf32, #tpu.memory_space<vmem>>, vector<8x16xf32>
    tpu.vector_store %arg13[%c0_155, %c144], %169 {strides = array<i32>} : memref<8x512xf32, #tpu.memory_space<vmem>>, vector<8x16xf32>,
    %c0_156 = arith.constant 0 : index
    %c0_157 = arith.constant 0 : index
    %171 = vector.load %arg13[%c0_156, %c0_157] : memref<8x512xf32, #tpu.memory_space<vmem>>, vector<8x512xf32>
    %c8 = arith.constant 8 : index
    %c0_158 = arith.constant 0 : index
    %c0_159 = arith.constant 0 : index
    %172 = vector.load %arg4[%c8, %c0_158, %c0_159] : memref<30x512x16xf32, #tpu.memory_space<vmem>>, vector<1x512x16xf32>
    %173 = vector.shape_cast %172 : vector<1x512x16xf32> to vector<512x16xf32>
    %cst_160 = arith.constant dense<0.000000e+00> : vector<8x16xf32>
    %174 = tpu.matmul %171, %173, %cst_160 {dimension_numbers = #tpu.dot_dimension_numbers<[1], [0], [0], [1], [0, 0, 1, 1], [], []>} : vector<8x512xf32>, vector<512x16xf32>, vector<8x16xf32> -> vector<8x16xf32>
    %c8_161 = arith.constant 8 : index
    %c0_162 = arith.constant 0 : index
    %c0_163 = arith.constant 0 : index
    %175 = vector.load %arg5[%c8_161, %c0_162, %c0_163] : memref<30x1x16xf32, #tpu.memory_space<vmem>>, vector<1x1x16xf32>
    %176 = vector.shape_cast %175 : vector<1x1x16xf32> to vector<1x16xf32>
    %177 = vector.broadcast %176 : vector<1x16xf32> to vector<8x16xf32>
    %178 = arith.addf %174, %177 : vector<8x16xf32>
    %cst_164 = arith.constant 0.000000e+00 : f32
    %179 = vector.broadcast %cst_164 : f32 to vector<8x16xf32>
    %180 = arith.maximumf %178, %179 : vector<8x16xf32>
    %c8_165 = arith.constant 8 : index
    %c0_166 = arith.constant 0 : index
    %c0_167 = arith.constant 0 : index
    %181 = vector.load %arg6[%c8_165, %c0_166, %c0_167] : memref<30x16x16xf32, #tpu.memory_space<vmem>>, vector<1x16x16xf32>
    %182 = vector.shape_cast %181 : vector<1x16x16xf32> to vector<16x16xf32>
    %cst_168 = arith.constant dense<0.000000e+00> : vector<8x16xf32>
    %183 = tpu.matmul %180, %182, %cst_168 {dimension_numbers = #tpu.dot_dimension_numbers<[1], [0], [0], [1], [0, 0, 1, 1], [], []>} : vector<8x16xf32>, vector<16x16xf32>, vector<8x16xf32> -> vector<8x16xf32>
    %c8_169 = arith.constant 8 : index
    %c0_170 = arith.constant 0 : index
    %c0_171 = arith.constant 0 : index
    %184 = vector.load %arg7[%c8_169, %c0_170, %c0_171] : memref<30x1x16xf32, #tpu.memory_space<vmem>>, vector<1x1x16xf32>
    %185 = vector.shape_cast %184 : vector<1x1x16xf32> to vector<1x16xf32>
    %186 = vector.broadcast %185 : vector<1x16xf32> to vector<8x16xf32>
    %187 = arith.addf %183, %186 : vector<8x16xf32>
    %cst_172 = arith.constant 0.000000e+00 : f32
    %188 = vector.broadcast %cst_172 : f32 to vector<8x16xf32>
    %189 = arith.maximumf %187, %188 : vector<8x16xf32>
    %c0_173 = arith.constant 0 : index
    %c160 = arith.constant 160 : index
    %190 = vector.load %arg13[%c0_173, %c160] : memref<8x512xf32, #tpu.memory_space<vmem>>, vector<8x16xf32>
    tpu.vector_store %arg13[%c0_173, %c160], %189 {strides = array<i32>} : memref<8x512xf32, #tpu.memory_space<vmem>>, vector<8x16xf32>,
    %c0_174 = arith.constant 0 : index
    %c0_175 = arith.constant 0 : index
    %191 = vector.load %arg13[%c0_174, %c0_175] : memref<8x512xf32, #tpu.memory_space<vmem>>, vector<8x512xf32>
    %c9 = arith.constant 9 : index
    %c0_176 = arith.constant 0 : index
    %c0_177 = arith.constant 0 : index
    %192 = vector.load %arg4[%c9, %c0_176, %c0_177] : memref<30x512x16xf32, #tpu.memory_space<vmem>>, vector<1x512x16xf32>
    %193 = vector.shape_cast %192 : vector<1x512x16xf32> to vector<512x16xf32>
    %cst_178 = arith.constant dense<0.000000e+00> : vector<8x16xf32>
    %194 = tpu.matmul %191, %193, %cst_178 {dimension_numbers = #tpu.dot_dimension_numbers<[1], [0], [0], [1], [0, 0, 1, 1], [], []>} : vector<8x512xf32>, vector<512x16xf32>, vector<8x16xf32> -> vector<8x16xf32>
    %c9_179 = arith.constant 9 : index
    %c0_180 = arith.constant 0 : index
    %c0_181 = arith.constant 0 : index
    %195 = vector.load %arg5[%c9_179, %c0_180, %c0_181] : memref<30x1x16xf32, #tpu.memory_space<vmem>>, vector<1x1x16xf32>
    %196 = vector.shape_cast %195 : vector<1x1x16xf32> to vector<1x16xf32>
    %197 = vector.broadcast %196 : vector<1x16xf32> to vector<8x16xf32>
    %198 = arith.addf %194, %197 : vector<8x16xf32>
    %cst_182 = arith.constant 0.000000e+00 : f32
    %199 = vector.broadcast %cst_182 : f32 to vector<8x16xf32>
    %200 = arith.maximumf %198, %199 : vector<8x16xf32>
    %c9_183 = arith.constant 9 : index
    %c0_184 = arith.constant 0 : index
    %c0_185 = arith.constant 0 : index
    %201 = vector.load %arg6[%c9_183, %c0_184, %c0_185] : memref<30x16x16xf32, #tpu.memory_space<vmem>>, vector<1x16x16xf32>
    %202 = vector.shape_cast %201 : vector<1x16x16xf32> to vector<16x16xf32>
    %cst_186 = arith.constant dense<0.000000e+00> : vector<8x16xf32>
    %203 = tpu.matmul %200, %202, %cst_186 {dimension_numbers = #tpu.dot_dimension_numbers<[1], [0], [0], [1], [0, 0, 1, 1], [], []>} : vector<8x16xf32>, vector<16x16xf32>, vector<8x16xf32> -> vector<8x16xf32>
    %c9_187 = arith.constant 9 : index
    %c0_188 = arith.constant 0 : index
    %c0_189 = arith.constant 0 : index
    %204 = vector.load %arg7[%c9_187, %c0_188, %c0_189] : memref<30x1x16xf32, #tpu.memory_space<vmem>>, vector<1x1x16xf32>
    %205 = vector.shape_cast %204 : vector<1x1x16xf32> to vector<1x16xf32>
    %206 = vector.broadcast %205 : vector<1x16xf32> to vector<8x16xf32>
    %207 = arith.addf %203, %206 : vector<8x16xf32>
    %cst_190 = arith.constant 0.000000e+00 : f32
    %208 = vector.broadcast %cst_190 : f32 to vector<8x16xf32>
    %209 = arith.maximumf %207, %208 : vector<8x16xf32>
    %c0_191 = arith.constant 0 : index
    %c176 = arith.constant 176 : index
    %210 = vector.load %arg13[%c0_191, %c176] : memref<8x512xf32, #tpu.memory_space<vmem>>, vector<8x16xf32>
    tpu.vector_store %arg13[%c0_191, %c176], %209 {strides = array<i32>} : memref<8x512xf32, #tpu.memory_space<vmem>>, vector<8x16xf32>,
    %c0_192 = arith.constant 0 : index
    %c0_193 = arith.constant 0 : index
    %211 = vector.load %arg13[%c0_192, %c0_193] : memref<8x512xf32, #tpu.memory_space<vmem>>, vector<8x512xf32>
    %c10 = arith.constant 10 : index
    %c0_194 = arith.constant 0 : index
    %c0_195 = arith.constant 0 : index
    %212 = vector.load %arg4[%c10, %c0_194, %c0_195] : memref<30x512x16xf32, #tpu.memory_space<vmem>>, vector<1x512x16xf32>
    %213 = vector.shape_cast %212 : vector<1x512x16xf32> to vector<512x16xf32>
    %cst_196 = arith.constant dense<0.000000e+00> : vector<8x16xf32>
    %214 = tpu.matmul %211, %213, %cst_196 {dimension_numbers = #tpu.dot_dimension_numbers<[1], [0], [0], [1], [0, 0, 1, 1], [], []>} : vector<8x512xf32>, vector<512x16xf32>, vector<8x16xf32> -> vector<8x16xf32>
    %c10_197 = arith.constant 10 : index
    %c0_198 = arith.constant 0 : index
    %c0_199 = arith.constant 0 : index
    %215 = vector.load %arg5[%c10_197, %c0_198, %c0_199] : memref<30x1x16xf32, #tpu.memory_space<vmem>>, vector<1x1x16xf32>
    %216 = vector.shape_cast %215 : vector<1x1x16xf32> to vector<1x16xf32>
    %217 = vector.broadcast %216 : vector<1x16xf32> to vector<8x16xf32>
    %218 = arith.addf %214, %217 : vector<8x16xf32>
    %cst_200 = arith.constant 0.000000e+00 : f32
    %219 = vector.broadcast %cst_200 : f32 to vector<8x16xf32>
    %220 = arith.maximumf %218, %219 : vector<8x16xf32>
    %c10_201 = arith.constant 10 : index
    %c0_202 = arith.constant 0 : index
    %c0_203 = arith.constant 0 : index
    %221 = vector.load %arg6[%c10_201, %c0_202, %c0_203] : memref<30x16x16xf32, #tpu.memory_space<vmem>>, vector<1x16x16xf32>
    %222 = vector.shape_cast %221 : vector<1x16x16xf32> to vector<16x16xf32>
    %cst_204 = arith.constant dense<0.000000e+00> : vector<8x16xf32>
    %223 = tpu.matmul %220, %222, %cst_204 {dimension_numbers = #tpu.dot_dimension_numbers<[1], [0], [0], [1], [0, 0, 1, 1], [], []>} : vector<8x16xf32>, vector<16x16xf32>, vector<8x16xf32> -> vector<8x16xf32>
    %c10_205 = arith.constant 10 : index
    %c0_206 = arith.constant 0 : index
    %c0_207 = arith.constant 0 : index
    %224 = vector.load %arg7[%c10_205, %c0_206, %c0_207] : memref<30x1x16xf32, #tpu.memory_space<vmem>>, vector<1x1x16xf32>
    %225 = vector.shape_cast %224 : vector<1x1x16xf32> to vector<1x16xf32>
    %226 = vector.broadcast %225 : vector<1x16xf32> to vector<8x16xf32>
    %227 = arith.addf %223, %226 : vector<8x16xf32>
    %cst_208 = arith.constant 0.000000e+00 : f32
    %228 = vector.broadcast %cst_208 : f32 to vector<8x16xf32>
    %229 = arith.maximumf %227, %228 : vector<8x16xf32>
    %c0_209 = arith.constant 0 : index
    %c192 = arith.constant 192 : index
    %230 = vector.load %arg13[%c0_209, %c192] : memref<8x512xf32, #tpu.memory_space<vmem>>, vector<8x16xf32>
    tpu.vector_store %arg13[%c0_209, %c192], %229 {strides = array<i32>} : memref<8x512xf32, #tpu.memory_space<vmem>>, vector<8x16xf32>,
    %c0_210 = arith.constant 0 : index
    %c0_211 = arith.constant 0 : index
    %231 = vector.load %arg13[%c0_210, %c0_211] : memref<8x512xf32, #tpu.memory_space<vmem>>, vector<8x512xf32>
    %c11 = arith.constant 11 : index
    %c0_212 = arith.constant 0 : index
    %c0_213 = arith.constant 0 : index
    %232 = vector.load %arg4[%c11, %c0_212, %c0_213] : memref<30x512x16xf32, #tpu.memory_space<vmem>>, vector<1x512x16xf32>
    %233 = vector.shape_cast %232 : vector<1x512x16xf32> to vector<512x16xf32>
    %cst_214 = arith.constant dense<0.000000e+00> : vector<8x16xf32>
    %234 = tpu.matmul %231, %233, %cst_214 {dimension_numbers = #tpu.dot_dimension_numbers<[1], [0], [0], [1], [0, 0, 1, 1], [], []>} : vector<8x512xf32>, vector<512x16xf32>, vector<8x16xf32> -> vector<8x16xf32>
    %c11_215 = arith.constant 11 : index
    %c0_216 = arith.constant 0 : index
    %c0_217 = arith.constant 0 : index
    %235 = vector.load %arg5[%c11_215, %c0_216, %c0_217] : memref<30x1x16xf32, #tpu.memory_space<vmem>>, vector<1x1x16xf32>
    %236 = vector.shape_cast %235 : vector<1x1x16xf32> to vector<1x16xf32>
    %237 = vector.broadcast %236 : vector<1x16xf32> to vector<8x16xf32>
    %238 = arith.addf %234, %237 : vector<8x16xf32>
    %cst_218 = arith.constant 0.000000e+00 : f32
    %239 = vector.broadcast %cst_218 : f32 to vector<8x16xf32>
    %240 = arith.maximumf %238, %239 : vector<8x16xf32>
    %c11_219 = arith.constant 11 : index
    %c0_220 = arith.constant 0 : index
    %c0_221 = arith.constant 0 : index
    %241 = vector.load %arg6[%c11_219, %c0_220, %c0_221] : memref<30x16x16xf32, #tpu.memory_space<vmem>>, vector<1x16x16xf32>
    %242 = vector.shape_cast %241 : vector<1x16x16xf32> to vector<16x16xf32>
    %cst_222 = arith.constant dense<0.000000e+00> : vector<8x16xf32>
    %243 = tpu.matmul %240, %242, %cst_222 {dimension_numbers = #tpu.dot_dimension_numbers<[1], [0], [0], [1], [0, 0, 1, 1], [], []>} : vector<8x16xf32>, vector<16x16xf32>, vector<8x16xf32> -> vector<8x16xf32>
    %c11_223 = arith.constant 11 : index
    %c0_224 = arith.constant 0 : index
    %c0_225 = arith.constant 0 : index
    %244 = vector.load %arg7[%c11_223, %c0_224, %c0_225] : memref<30x1x16xf32, #tpu.memory_space<vmem>>, vector<1x1x16xf32>
    %245 = vector.shape_cast %244 : vector<1x1x16xf32> to vector<1x16xf32>
    %246 = vector.broadcast %245 : vector<1x16xf32> to vector<8x16xf32>
    %247 = arith.addf %243, %246 : vector<8x16xf32>
    %cst_226 = arith.constant 0.000000e+00 : f32
    %248 = vector.broadcast %cst_226 : f32 to vector<8x16xf32>
    %249 = arith.maximumf %247, %248 : vector<8x16xf32>
    %c0_227 = arith.constant 0 : index
    %c208 = arith.constant 208 : index
    %250 = vector.load %arg13[%c0_227, %c208] : memref<8x512xf32, #tpu.memory_space<vmem>>, vector<8x16xf32>
    tpu.vector_store %arg13[%c0_227, %c208], %249 {strides = array<i32>} : memref<8x512xf32, #tpu.memory_space<vmem>>, vector<8x16xf32>,
    %c0_228 = arith.constant 0 : index
    %c0_229 = arith.constant 0 : index
    %251 = vector.load %arg13[%c0_228, %c0_229] : memref<8x512xf32, #tpu.memory_space<vmem>>, vector<8x512xf32>
    %c12 = arith.constant 12 : index
    %c0_230 = arith.constant 0 : index
    %c0_231 = arith.constant 0 : index
    %252 = vector.load %arg4[%c12, %c0_230, %c0_231] : memref<30x512x16xf32, #tpu.memory_space<vmem>>, vector<1x512x16xf32>
    %253 = vector.shape_cast %252 : vector<1x512x16xf32> to vector<512x16xf32>
    %cst_232 = arith.constant dense<0.000000e+00> : vector<8x16xf32>
    %254 = tpu.matmul %251, %253, %cst_232 {dimension_numbers = #tpu.dot_dimension_numbers<[1], [0], [0], [1], [0, 0, 1, 1], [], []>} : vector<8x512xf32>, vector<512x16xf32>, vector<8x16xf32> -> vector<8x16xf32>
    %c12_233 = arith.constant 12 : index
    %c0_234 = arith.constant 0 : index
    %c0_235 = arith.constant 0 : index
    %255 = vector.load %arg5[%c12_233, %c0_234, %c0_235] : memref<30x1x16xf32, #tpu.memory_space<vmem>>, vector<1x1x16xf32>
    %256 = vector.shape_cast %255 : vector<1x1x16xf32> to vector<1x16xf32>
    %257 = vector.broadcast %256 : vector<1x16xf32> to vector<8x16xf32>
    %258 = arith.addf %254, %257 : vector<8x16xf32>
    %cst_236 = arith.constant 0.000000e+00 : f32
    %259 = vector.broadcast %cst_236 : f32 to vector<8x16xf32>
    %260 = arith.maximumf %258, %259 : vector<8x16xf32>
    %c12_237 = arith.constant 12 : index
    %c0_238 = arith.constant 0 : index
    %c0_239 = arith.constant 0 : index
    %261 = vector.load %arg6[%c12_237, %c0_238, %c0_239] : memref<30x16x16xf32, #tpu.memory_space<vmem>>, vector<1x16x16xf32>
    %262 = vector.shape_cast %261 : vector<1x16x16xf32> to vector<16x16xf32>
    %cst_240 = arith.constant dense<0.000000e+00> : vector<8x16xf32>
    %263 = tpu.matmul %260, %262, %cst_240 {dimension_numbers = #tpu.dot_dimension_numbers<[1], [0], [0], [1], [0, 0, 1, 1], [], []>} : vector<8x16xf32>, vector<16x16xf32>, vector<8x16xf32> -> vector<8x16xf32>
    %c12_241 = arith.constant 12 : index
    %c0_242 = arith.constant 0 : index
    %c0_243 = arith.constant 0 : index
    %264 = vector.load %arg7[%c12_241, %c0_242, %c0_243] : memref<30x1x16xf32, #tpu.memory_space<vmem>>, vector<1x1x16xf32>
    %265 = vector.shape_cast %264 : vector<1x1x16xf32> to vector<1x16xf32>
    %266 = vector.broadcast %265 : vector<1x16xf32> to vector<8x16xf32>
    %267 = arith.addf %263, %266 : vector<8x16xf32>
    %cst_244 = arith.constant 0.000000e+00 : f32
    %268 = vector.broadcast %cst_244 : f32 to vector<8x16xf32>
    %269 = arith.maximumf %267, %268 : vector<8x16xf32>
    %c0_245 = arith.constant 0 : index
    %c224 = arith.constant 224 : index
    %270 = vector.load %arg13[%c0_245, %c224] : memref<8x512xf32, #tpu.memory_space<vmem>>, vector<8x16xf32>
    tpu.vector_store %arg13[%c0_245, %c224], %269 {strides = array<i32>} : memref<8x512xf32, #tpu.memory_space<vmem>>, vector<8x16xf32>,
    %c0_246 = arith.constant 0 : index
    %c0_247 = arith.constant 0 : index
    %271 = vector.load %arg13[%c0_246, %c0_247] : memref<8x512xf32, #tpu.memory_space<vmem>>, vector<8x512xf32>
    %c13 = arith.constant 13 : index
    %c0_248 = arith.constant 0 : index
    %c0_249 = arith.constant 0 : index
    %272 = vector.load %arg4[%c13, %c0_248, %c0_249] : memref<30x512x16xf32, #tpu.memory_space<vmem>>, vector<1x512x16xf32>
    %273 = vector.shape_cast %272 : vector<1x512x16xf32> to vector<512x16xf32>
    %cst_250 = arith.constant dense<0.000000e+00> : vector<8x16xf32>
    %274 = tpu.matmul %271, %273, %cst_250 {dimension_numbers = #tpu.dot_dimension_numbers<[1], [0], [0], [1], [0, 0, 1, 1], [], []>} : vector<8x512xf32>, vector<512x16xf32>, vector<8x16xf32> -> vector<8x16xf32>
    %c13_251 = arith.constant 13 : index
    %c0_252 = arith.constant 0 : index
    %c0_253 = arith.constant 0 : index
    %275 = vector.load %arg5[%c13_251, %c0_252, %c0_253] : memref<30x1x16xf32, #tpu.memory_space<vmem>>, vector<1x1x16xf32>
    %276 = vector.shape_cast %275 : vector<1x1x16xf32> to vector<1x16xf32>
    %277 = vector.broadcast %276 : vector<1x16xf32> to vector<8x16xf32>
    %278 = arith.addf %274, %277 : vector<8x16xf32>
    %cst_254 = arith.constant 0.000000e+00 : f32
    %279 = vector.broadcast %cst_254 : f32 to vector<8x16xf32>
    %280 = arith.maximumf %278, %279 : vector<8x16xf32>
    %c13_255 = arith.constant 13 : index
    %c0_256 = arith.constant 0 : index
    %c0_257 = arith.constant 0 : index
    %281 = vector.load %arg6[%c13_255, %c0_256, %c0_257] : memref<30x16x16xf32, #tpu.memory_space<vmem>>, vector<1x16x16xf32>
    %282 = vector.shape_cast %281 : vector<1x16x16xf32> to vector<16x16xf32>
    %cst_258 = arith.constant dense<0.000000e+00> : vector<8x16xf32>
    %283 = tpu.matmul %280, %282, %cst_258 {dimension_numbers = #tpu.dot_dimension_numbers<[1], [0], [0], [1], [0, 0, 1, 1], [], []>} : vector<8x16xf32>, vector<16x16xf32>, vector<8x16xf32> -> vector<8x16xf32>
    %c13_259 = arith.constant 13 : index
    %c0_260 = arith.constant 0 : index
    %c0_261 = arith.constant 0 : index
    %284 = vector.load %arg7[%c13_259, %c0_260, %c0_261] : memref<30x1x16xf32, #tpu.memory_space<vmem>>, vector<1x1x16xf32>
    %285 = vector.shape_cast %284 : vector<1x1x16xf32> to vector<1x16xf32>
    %286 = vector.broadcast %285 : vector<1x16xf32> to vector<8x16xf32>
    %287 = arith.addf %283, %286 : vector<8x16xf32>
    %cst_262 = arith.constant 0.000000e+00 : f32
    %288 = vector.broadcast %cst_262 : f32 to vector<8x16xf32>
    %289 = arith.maximumf %287, %288 : vector<8x16xf32>
    %c0_263 = arith.constant 0 : index
    %c240 = arith.constant 240 : index
    %290 = vector.load %arg13[%c0_263, %c240] : memref<8x512xf32, #tpu.memory_space<vmem>>, vector<8x16xf32>
    tpu.vector_store %arg13[%c0_263, %c240], %289 {strides = array<i32>} : memref<8x512xf32, #tpu.memory_space<vmem>>, vector<8x16xf32>,
    %c0_264 = arith.constant 0 : index
    %c0_265 = arith.constant 0 : index
    %291 = vector.load %arg13[%c0_264, %c0_265] : memref<8x512xf32, #tpu.memory_space<vmem>>, vector<8x512xf32>
    %c14 = arith.constant 14 : index
    %c0_266 = arith.constant 0 : index
    %c0_267 = arith.constant 0 : index
    %292 = vector.load %arg4[%c14, %c0_266, %c0_267] : memref<30x512x16xf32, #tpu.memory_space<vmem>>, vector<1x512x16xf32>
    %293 = vector.shape_cast %292 : vector<1x512x16xf32> to vector<512x16xf32>
    %cst_268 = arith.constant dense<0.000000e+00> : vector<8x16xf32>
    %294 = tpu.matmul %291, %293, %cst_268 {dimension_numbers = #tpu.dot_dimension_numbers<[1], [0], [0], [1], [0, 0, 1, 1], [], []>} : vector<8x512xf32>, vector<512x16xf32>, vector<8x16xf32> -> vector<8x16xf32>
    %c14_269 = arith.constant 14 : index
    %c0_270 = arith.constant 0 : index
    %c0_271 = arith.constant 0 : index
    %295 = vector.load %arg5[%c14_269, %c0_270, %c0_271] : memref<30x1x16xf32, #tpu.memory_space<vmem>>, vector<1x1x16xf32>
    %296 = vector.shape_cast %295 : vector<1x1x16xf32> to vector<1x16xf32>
    %297 = vector.broadcast %296 : vector<1x16xf32> to vector<8x16xf32>
    %298 = arith.addf %294, %297 : vector<8x16xf32>
    %cst_272 = arith.constant 0.000000e+00 : f32
    %299 = vector.broadcast %cst_272 : f32 to vector<8x16xf32>
    %300 = arith.maximumf %298, %299 : vector<8x16xf32>
    %c14_273 = arith.constant 14 : index
    %c0_274 = arith.constant 0 : index
    %c0_275 = arith.constant 0 : index
    %301 = vector.load %arg6[%c14_273, %c0_274, %c0_275] : memref<30x16x16xf32, #tpu.memory_space<vmem>>, vector<1x16x16xf32>
    %302 = vector.shape_cast %301 : vector<1x16x16xf32> to vector<16x16xf32>
    %cst_276 = arith.constant dense<0.000000e+00> : vector<8x16xf32>
    %303 = tpu.matmul %300, %302, %cst_276 {dimension_numbers = #tpu.dot_dimension_numbers<[1], [0], [0], [1], [0, 0, 1, 1], [], []>} : vector<8x16xf32>, vector<16x16xf32>, vector<8x16xf32> -> vector<8x16xf32>
    %c14_277 = arith.constant 14 : index
    %c0_278 = arith.constant 0 : index
    %c0_279 = arith.constant 0 : index
    %304 = vector.load %arg7[%c14_277, %c0_278, %c0_279] : memref<30x1x16xf32, #tpu.memory_space<vmem>>, vector<1x1x16xf32>
    %305 = vector.shape_cast %304 : vector<1x1x16xf32> to vector<1x16xf32>
    %306 = vector.broadcast %305 : vector<1x16xf32> to vector<8x16xf32>
    %307 = arith.addf %303, %306 : vector<8x16xf32>
    %cst_280 = arith.constant 0.000000e+00 : f32
    %308 = vector.broadcast %cst_280 : f32 to vector<8x16xf32>
    %309 = arith.maximumf %307, %308 : vector<8x16xf32>
    %c0_281 = arith.constant 0 : index
    %c256 = arith.constant 256 : index
    %310 = vector.load %arg13[%c0_281, %c256] : memref<8x512xf32, #tpu.memory_space<vmem>>, vector<8x16xf32>
    tpu.vector_store %arg13[%c0_281, %c256], %309 {strides = array<i32>} : memref<8x512xf32, #tpu.memory_space<vmem>>, vector<8x16xf32>,
    %c0_282 = arith.constant 0 : index
    %c0_283 = arith.constant 0 : index
    %311 = vector.load %arg13[%c0_282, %c0_283] : memref<8x512xf32, #tpu.memory_space<vmem>>, vector<8x512xf32>
    %c15 = arith.constant 15 : index
    %c0_284 = arith.constant 0 : index
    %c0_285 = arith.constant 0 : index
    %312 = vector.load %arg4[%c15, %c0_284, %c0_285] : memref<30x512x16xf32, #tpu.memory_space<vmem>>, vector<1x512x16xf32>
    %313 = vector.shape_cast %312 : vector<1x512x16xf32> to vector<512x16xf32>
    %cst_286 = arith.constant dense<0.000000e+00> : vector<8x16xf32>
    %314 = tpu.matmul %311, %313, %cst_286 {dimension_numbers = #tpu.dot_dimension_numbers<[1], [0], [0], [1], [0, 0, 1, 1], [], []>} : vector<8x512xf32>, vector<512x16xf32>, vector<8x16xf32> -> vector<8x16xf32>
    %c15_287 = arith.constant 15 : index
    %c0_288 = arith.constant 0 : index
    %c0_289 = arith.constant 0 : index
    %315 = vector.load %arg5[%c15_287, %c0_288, %c0_289] : memref<30x1x16xf32, #tpu.memory_space<vmem>>, vector<1x1x16xf32>
    %316 = vector.shape_cast %315 : vector<1x1x16xf32> to vector<1x16xf32>
    %317 = vector.broadcast %316 : vector<1x16xf32> to vector<8x16xf32>
    %318 = arith.addf %314, %317 : vector<8x16xf32>
    %cst_290 = arith.constant 0.000000e+00 : f32
    %319 = vector.broadcast %cst_290 : f32 to vector<8x16xf32>
    %320 = arith.maximumf %318, %319 : vector<8x16xf32>
    %c15_291 = arith.constant 15 : index
    %c0_292 = arith.constant 0 : index
    %c0_293 = arith.constant 0 : index
    %321 = vector.load %arg6[%c15_291, %c0_292, %c0_293] : memref<30x16x16xf32, #tpu.memory_space<vmem>>, vector<1x16x16xf32>
    %322 = vector.shape_cast %321 : vector<1x16x16xf32> to vector<16x16xf32>
    %cst_294 = arith.constant dense<0.000000e+00> : vector<8x16xf32>
    %323 = tpu.matmul %320, %322, %cst_294 {dimension_numbers = #tpu.dot_dimension_numbers<[1], [0], [0], [1], [0, 0, 1, 1], [], []>} : vector<8x16xf32>, vector<16x16xf32>, vector<8x16xf32> -> vector<8x16xf32>
    %c15_295 = arith.constant 15 : index
    %c0_296 = arith.constant 0 : index
    %c0_297 = arith.constant 0 : index
    %324 = vector.load %arg7[%c15_295, %c0_296, %c0_297] : memref<30x1x16xf32, #tpu.memory_space<vmem>>, vector<1x1x16xf32>
    %325 = vector.shape_cast %324 : vector<1x1x16xf32> to vector<1x16xf32>
    %326 = vector.broadcast %325 : vector<1x16xf32> to vector<8x16xf32>
    %327 = arith.addf %323, %326 : vector<8x16xf32>
    %cst_298 = arith.constant 0.000000e+00 : f32
    %328 = vector.broadcast %cst_298 : f32 to vector<8x16xf32>
    %329 = arith.maximumf %327, %328 : vector<8x16xf32>
    %c0_299 = arith.constant 0 : index
    %c272 = arith.constant 272 : index
    %330 = vector.load %arg13[%c0_299, %c272] : memref<8x512xf32, #tpu.memory_space<vmem>>, vector<8x16xf32>
    tpu.vector_store %arg13[%c0_299, %c272], %329 {strides = array<i32>} : memref<8x512xf32, #tpu.memory_space<vmem>>, vector<8x16xf32>,
    %c0_300 = arith.constant 0 : index
    %c0_301 = arith.constant 0 : index
    %331 = vector.load %arg13[%c0_300, %c0_301] : memref<8x512xf32, #tpu.memory_space<vmem>>, vector<8x512xf32>
    %c16 = arith.constant 16 : index
    %c0_302 = arith.constant 0 : index
    %c0_303 = arith.constant 0 : index
    %332 = vector.load %arg4[%c16, %c0_302, %c0_303] : memref<30x512x16xf32, #tpu.memory_space<vmem>>, vector<1x512x16xf32>
    %333 = vector.shape_cast %332 : vector<1x512x16xf32> to vector<512x16xf32>
    %cst_304 = arith.constant dense<0.000000e+00> : vector<8x16xf32>
    %334 = tpu.matmul %331, %333, %cst_304 {dimension_numbers = #tpu.dot_dimension_numbers<[1], [0], [0], [1], [0, 0, 1, 1], [], []>} : vector<8x512xf32>, vector<512x16xf32>, vector<8x16xf32> -> vector<8x16xf32>
    %c16_305 = arith.constant 16 : index
    %c0_306 = arith.constant 0 : index
    %c0_307 = arith.constant 0 : index
    %335 = vector.load %arg5[%c16_305, %c0_306, %c0_307] : memref<30x1x16xf32, #tpu.memory_space<vmem>>, vector<1x1x16xf32>
    %336 = vector.shape_cast %335 : vector<1x1x16xf32> to vector<1x16xf32>
    %337 = vector.broadcast %336 : vector<1x16xf32> to vector<8x16xf32>
    %338 = arith.addf %334, %337 : vector<8x16xf32>
    %cst_308 = arith.constant 0.000000e+00 : f32
    %339 = vector.broadcast %cst_308 : f32 to vector<8x16xf32>
    %340 = arith.maximumf %338, %339 : vector<8x16xf32>
    %c16_309 = arith.constant 16 : index
    %c0_310 = arith.constant 0 : index
    %c0_311 = arith.constant 0 : index
    %341 = vector.load %arg6[%c16_309, %c0_310, %c0_311] : memref<30x16x16xf32, #tpu.memory_space<vmem>>, vector<1x16x16xf32>
    %342 = vector.shape_cast %341 : vector<1x16x16xf32> to vector<16x16xf32>
    %cst_312 = arith.constant dense<0.000000e+00> : vector<8x16xf32>
    %343 = tpu.matmul %340, %342, %cst_312 {dimension_numbers = #tpu.dot_dimension_numbers<[1], [0], [0], [1], [0, 0, 1, 1], [], []>} : vector<8x16xf32>, vector<16x16xf32>, vector<8x16xf32> -> vector<8x16xf32>
    %c16_313 = arith.constant 16 : index
    %c0_314 = arith.constant 0 : index
    %c0_315 = arith.constant 0 : index
    %344 = vector.load %arg7[%c16_313, %c0_314, %c0_315] : memref<30x1x16xf32, #tpu.memory_space<vmem>>, vector<1x1x16xf32>
    %345 = vector.shape_cast %344 : vector<1x1x16xf32> to vector<1x16xf32>
    %346 = vector.broadcast %345 : vector<1x16xf32> to vector<8x16xf32>
    %347 = arith.addf %343, %346 : vector<8x16xf32>
    %cst_316 = arith.constant 0.000000e+00 : f32
    %348 = vector.broadcast %cst_316 : f32 to vector<8x16xf32>
    %349 = arith.maximumf %347, %348 : vector<8x16xf32>
    %c0_317 = arith.constant 0 : index
    %c288 = arith.constant 288 : index
    %350 = vector.load %arg13[%c0_317, %c288] : memref<8x512xf32, #tpu.memory_space<vmem>>, vector<8x16xf32>
    tpu.vector_store %arg13[%c0_317, %c288], %349 {strides = array<i32>} : memref<8x512xf32, #tpu.memory_space<vmem>>, vector<8x16xf32>,
    %c0_318 = arith.constant 0 : index
    %c0_319 = arith.constant 0 : index
    %351 = vector.load %arg13[%c0_318, %c0_319] : memref<8x512xf32, #tpu.memory_space<vmem>>, vector<8x512xf32>
    %c17 = arith.constant 17 : index
    %c0_320 = arith.constant 0 : index
    %c0_321 = arith.constant 0 : index
    %352 = vector.load %arg4[%c17, %c0_320, %c0_321] : memref<30x512x16xf32, #tpu.memory_space<vmem>>, vector<1x512x16xf32>
    %353 = vector.shape_cast %352 : vector<1x512x16xf32> to vector<512x16xf32>
    %cst_322 = arith.constant dense<0.000000e+00> : vector<8x16xf32>
    %354 = tpu.matmul %351, %353, %cst_322 {dimension_numbers = #tpu.dot_dimension_numbers<[1], [0], [0], [1], [0, 0, 1, 1], [], []>} : vector<8x512xf32>, vector<512x16xf32>, vector<8x16xf32> -> vector<8x16xf32>
    %c17_323 = arith.constant 17 : index
    %c0_324 = arith.constant 0 : index
    %c0_325 = arith.constant 0 : index
    %355 = vector.load %arg5[%c17_323, %c0_324, %c0_325] : memref<30x1x16xf32, #tpu.memory_space<vmem>>, vector<1x1x16xf32>
    %356 = vector.shape_cast %355 : vector<1x1x16xf32> to vector<1x16xf32>
    %357 = vector.broadcast %356 : vector<1x16xf32> to vector<8x16xf32>
    %358 = arith.addf %354, %357 : vector<8x16xf32>
    %cst_326 = arith.constant 0.000000e+00 : f32
    %359 = vector.broadcast %cst_326 : f32 to vector<8x16xf32>
    %360 = arith.maximumf %358, %359 : vector<8x16xf32>
    %c17_327 = arith.constant 17 : index
    %c0_328 = arith.constant 0 : index
    %c0_329 = arith.constant 0 : index
    %361 = vector.load %arg6[%c17_327, %c0_328, %c0_329] : memref<30x16x16xf32, #tpu.memory_space<vmem>>, vector<1x16x16xf32>
    %362 = vector.shape_cast %361 : vector<1x16x16xf32> to vector<16x16xf32>
    %cst_330 = arith.constant dense<0.000000e+00> : vector<8x16xf32>
    %363 = tpu.matmul %360, %362, %cst_330 {dimension_numbers = #tpu.dot_dimension_numbers<[1], [0], [0], [1], [0, 0, 1, 1], [], []>} : vector<8x16xf32>, vector<16x16xf32>, vector<8x16xf32> -> vector<8x16xf32>
    %c17_331 = arith.constant 17 : index
    %c0_332 = arith.constant 0 : index
    %c0_333 = arith.constant 0 : index
    %364 = vector.load %arg7[%c17_331, %c0_332, %c0_333] : memref<30x1x16xf32, #tpu.memory_space<vmem>>, vector<1x1x16xf32>
    %365 = vector.shape_cast %364 : vector<1x1x16xf32> to vector<1x16xf32>
    %366 = vector.broadcast %365 : vector<1x16xf32> to vector<8x16xf32>
    %367 = arith.addf %363, %366 : vector<8x16xf32>
    %cst_334 = arith.constant 0.000000e+00 : f32
    %368 = vector.broadcast %cst_334 : f32 to vector<8x16xf32>
    %369 = arith.maximumf %367, %368 : vector<8x16xf32>
    %c0_335 = arith.constant 0 : index
    %c304 = arith.constant 304 : index
    %370 = vector.load %arg13[%c0_335, %c304] : memref<8x512xf32, #tpu.memory_space<vmem>>, vector<8x16xf32>
    tpu.vector_store %arg13[%c0_335, %c304], %369 {strides = array<i32>} : memref<8x512xf32, #tpu.memory_space<vmem>>, vector<8x16xf32>,
    %c0_336 = arith.constant 0 : index
    %c0_337 = arith.constant 0 : index
    %371 = vector.load %arg13[%c0_336, %c0_337] : memref<8x512xf32, #tpu.memory_space<vmem>>, vector<8x512xf32>
    %c18 = arith.constant 18 : index
    %c0_338 = arith.constant 0 : index
    %c0_339 = arith.constant 0 : index
    %372 = vector.load %arg4[%c18, %c0_338, %c0_339] : memref<30x512x16xf32, #tpu.memory_space<vmem>>, vector<1x512x16xf32>
    %373 = vector.shape_cast %372 : vector<1x512x16xf32> to vector<512x16xf32>
    %cst_340 = arith.constant dense<0.000000e+00> : vector<8x16xf32>
    %374 = tpu.matmul %371, %373, %cst_340 {dimension_numbers = #tpu.dot_dimension_numbers<[1], [0], [0], [1], [0, 0, 1, 1], [], []>} : vector<8x512xf32>, vector<512x16xf32>, vector<8x16xf32> -> vector<8x16xf32>
    %c18_341 = arith.constant 18 : index
    %c0_342 = arith.constant 0 : index
    %c0_343 = arith.constant 0 : index
    %375 = vector.load %arg5[%c18_341, %c0_342, %c0_343] : memref<30x1x16xf32, #tpu.memory_space<vmem>>, vector<1x1x16xf32>
    %376 = vector.shape_cast %375 : vector<1x1x16xf32> to vector<1x16xf32>
    %377 = vector.broadcast %376 : vector<1x16xf32> to vector<8x16xf32>
    %378 = arith.addf %374, %377 : vector<8x16xf32>
    %cst_344 = arith.constant 0.000000e+00 : f32
    %379 = vector.broadcast %cst_344 : f32 to vector<8x16xf32>
    %380 = arith.maximumf %378, %379 : vector<8x16xf32>
    %c18_345 = arith.constant 18 : index
    %c0_346 = arith.constant 0 : index
    %c0_347 = arith.constant 0 : index
    %381 = vector.load %arg6[%c18_345, %c0_346, %c0_347] : memref<30x16x16xf32, #tpu.memory_space<vmem>>, vector<1x16x16xf32>
    %382 = vector.shape_cast %381 : vector<1x16x16xf32> to vector<16x16xf32>
    %cst_348 = arith.constant dense<0.000000e+00> : vector<8x16xf32>
    %383 = tpu.matmul %380, %382, %cst_348 {dimension_numbers = #tpu.dot_dimension_numbers<[1], [0], [0], [1], [0, 0, 1, 1], [], []>} : vector<8x16xf32>, vector<16x16xf32>, vector<8x16xf32> -> vector<8x16xf32>
    %c18_349 = arith.constant 18 : index
    %c0_350 = arith.constant 0 : index
    %c0_351 = arith.constant 0 : index
    %384 = vector.load %arg7[%c18_349, %c0_350, %c0_351] : memref<30x1x16xf32, #tpu.memory_space<vmem>>, vector<1x1x16xf32>
    %385 = vector.shape_cast %384 : vector<1x1x16xf32> to vector<1x16xf32>
    %386 = vector.broadcast %385 : vector<1x16xf32> to vector<8x16xf32>
    %387 = arith.addf %383, %386 : vector<8x16xf32>
    %cst_352 = arith.constant 0.000000e+00 : f32
    %388 = vector.broadcast %cst_352 : f32 to vector<8x16xf32>
    %389 = arith.maximumf %387, %388 : vector<8x16xf32>
    %c0_353 = arith.constant 0 : index
    %c320 = arith.constant 320 : index
    %390 = vector.load %arg13[%c0_353, %c320] : memref<8x512xf32, #tpu.memory_space<vmem>>, vector<8x16xf32>
    tpu.vector_store %arg13[%c0_353, %c320], %389 {strides = array<i32>} : memref<8x512xf32, #tpu.memory_space<vmem>>, vector<8x16xf32>,
    %c0_354 = arith.constant 0 : index
    %c0_355 = arith.constant 0 : index
    %391 = vector.load %arg13[%c0_354, %c0_355] : memref<8x512xf32, #tpu.memory_space<vmem>>, vector<8x512xf32>
    %c19 = arith.constant 19 : index
    %c0_356 = arith.constant 0 : index
    %c0_357 = arith.constant 0 : index
    %392 = vector.load %arg4[%c19, %c0_356, %c0_357] : memref<30x512x16xf32, #tpu.memory_space<vmem>>, vector<1x512x16xf32>
    %393 = vector.shape_cast %392 : vector<1x512x16xf32> to vector<512x16xf32>
    %cst_358 = arith.constant dense<0.000000e+00> : vector<8x16xf32>
    %394 = tpu.matmul %391, %393, %cst_358 {dimension_numbers = #tpu.dot_dimension_numbers<[1], [0], [0], [1], [0, 0, 1, 1], [], []>} : vector<8x512xf32>, vector<512x16xf32>, vector<8x16xf32> -> vector<8x16xf32>
    %c19_359 = arith.constant 19 : index
    %c0_360 = arith.constant 0 : index
    %c0_361 = arith.constant 0 : index
    %395 = vector.load %arg5[%c19_359, %c0_360, %c0_361] : memref<30x1x16xf32, #tpu.memory_space<vmem>>, vector<1x1x16xf32>
    %396 = vector.shape_cast %395 : vector<1x1x16xf32> to vector<1x16xf32>
    %397 = vector.broadcast %396 : vector<1x16xf32> to vector<8x16xf32>
    %398 = arith.addf %394, %397 : vector<8x16xf32>
    %cst_362 = arith.constant 0.000000e+00 : f32
    %399 = vector.broadcast %cst_362 : f32 to vector<8x16xf32>
    %400 = arith.maximumf %398, %399 : vector<8x16xf32>
    %c19_363 = arith.constant 19 : index
    %c0_364 = arith.constant 0 : index
    %c0_365 = arith.constant 0 : index
    %401 = vector.load %arg6[%c19_363, %c0_364, %c0_365] : memref<30x16x16xf32, #tpu.memory_space<vmem>>, vector<1x16x16xf32>
    %402 = vector.shape_cast %401 : vector<1x16x16xf32> to vector<16x16xf32>
    %cst_366 = arith.constant dense<0.000000e+00> : vector<8x16xf32>
    %403 = tpu.matmul %400, %402, %cst_366 {dimension_numbers = #tpu.dot_dimension_numbers<[1], [0], [0], [1], [0, 0, 1, 1], [], []>} : vector<8x16xf32>, vector<16x16xf32>, vector<8x16xf32> -> vector<8x16xf32>
    %c19_367 = arith.constant 19 : index
    %c0_368 = arith.constant 0 : index
    %c0_369 = arith.constant 0 : index
    %404 = vector.load %arg7[%c19_367, %c0_368, %c0_369] : memref<30x1x16xf32, #tpu.memory_space<vmem>>, vector<1x1x16xf32>
    %405 = vector.shape_cast %404 : vector<1x1x16xf32> to vector<1x16xf32>
    %406 = vector.broadcast %405 : vector<1x16xf32> to vector<8x16xf32>
    %407 = arith.addf %403, %406 : vector<8x16xf32>
    %cst_370 = arith.constant 0.000000e+00 : f32
    %408 = vector.broadcast %cst_370 : f32 to vector<8x16xf32>
    %409 = arith.maximumf %407, %408 : vector<8x16xf32>
    %c0_371 = arith.constant 0 : index
    %c336 = arith.constant 336 : index
    %410 = vector.load %arg13[%c0_371, %c336] : memref<8x512xf32, #tpu.memory_space<vmem>>, vector<8x16xf32>
    tpu.vector_store %arg13[%c0_371, %c336], %409 {strides = array<i32>} : memref<8x512xf32, #tpu.memory_space<vmem>>, vector<8x16xf32>,
    %c0_372 = arith.constant 0 : index
    %c0_373 = arith.constant 0 : index
    %411 = vector.load %arg13[%c0_372, %c0_373] : memref<8x512xf32, #tpu.memory_space<vmem>>, vector<8x512xf32>
    %c20 = arith.constant 20 : index
    %c0_374 = arith.constant 0 : index
    %c0_375 = arith.constant 0 : index
    %412 = vector.load %arg4[%c20, %c0_374, %c0_375] : memref<30x512x16xf32, #tpu.memory_space<vmem>>, vector<1x512x16xf32>
    %413 = vector.shape_cast %412 : vector<1x512x16xf32> to vector<512x16xf32>
    %cst_376 = arith.constant dense<0.000000e+00> : vector<8x16xf32>
    %414 = tpu.matmul %411, %413, %cst_376 {dimension_numbers = #tpu.dot_dimension_numbers<[1], [0], [0], [1], [0, 0, 1, 1], [], []>} : vector<8x512xf32>, vector<512x16xf32>, vector<8x16xf32> -> vector<8x16xf32>
    %c20_377 = arith.constant 20 : index
    %c0_378 = arith.constant 0 : index
    %c0_379 = arith.constant 0 : index
    %415 = vector.load %arg5[%c20_377, %c0_378, %c0_379] : memref<30x1x16xf32, #tpu.memory_space<vmem>>, vector<1x1x16xf32>
    %416 = vector.shape_cast %415 : vector<1x1x16xf32> to vector<1x16xf32>
    %417 = vector.broadcast %416 : vector<1x16xf32> to vector<8x16xf32>
    %418 = arith.addf %414, %417 : vector<8x16xf32>
    %cst_380 = arith.constant 0.000000e+00 : f32
    %419 = vector.broadcast %cst_380 : f32 to vector<8x16xf32>
    %420 = arith.maximumf %418, %419 : vector<8x16xf32>
    %c20_381 = arith.constant 20 : index
    %c0_382 = arith.constant 0 : index
    %c0_383 = arith.constant 0 : index
    %421 = vector.load %arg6[%c20_381, %c0_382, %c0_383] : memref<30x16x16xf32, #tpu.memory_space<vmem>>, vector<1x16x16xf32>
    %422 = vector.shape_cast %421 : vector<1x16x16xf32> to vector<16x16xf32>
    %cst_384 = arith.constant dense<0.000000e+00> : vector<8x16xf32>
    %423 = tpu.matmul %420, %422, %cst_384 {dimension_numbers = #tpu.dot_dimension_numbers<[1], [0], [0], [1], [0, 0, 1, 1], [], []>} : vector<8x16xf32>, vector<16x16xf32>, vector<8x16xf32> -> vector<8x16xf32>
    %c20_385 = arith.constant 20 : index
    %c0_386 = arith.constant 0 : index
    %c0_387 = arith.constant 0 : index
    %424 = vector.load %arg7[%c20_385, %c0_386, %c0_387] : memref<30x1x16xf32, #tpu.memory_space<vmem>>, vector<1x1x16xf32>
    %425 = vector.shape_cast %424 : vector<1x1x16xf32> to vector<1x16xf32>
    %426 = vector.broadcast %425 : vector<1x16xf32> to vector<8x16xf32>
    %427 = arith.addf %423, %426 : vector<8x16xf32>
    %cst_388 = arith.constant 0.000000e+00 : f32
    %428 = vector.broadcast %cst_388 : f32 to vector<8x16xf32>
    %429 = arith.maximumf %427, %428 : vector<8x16xf32>
    %c0_389 = arith.constant 0 : index
    %c352 = arith.constant 352 : index
    %430 = vector.load %arg13[%c0_389, %c352] : memref<8x512xf32, #tpu.memory_space<vmem>>, vector<8x16xf32>
    tpu.vector_store %arg13[%c0_389, %c352], %429 {strides = array<i32>} : memref<8x512xf32, #tpu.memory_space<vmem>>, vector<8x16xf32>,
    %c0_390 = arith.constant 0 : index
    %c0_391 = arith.constant 0 : index
    %431 = vector.load %arg13[%c0_390, %c0_391] : memref<8x512xf32, #tpu.memory_space<vmem>>, vector<8x512xf32>
    %c21 = arith.constant 21 : index
    %c0_392 = arith.constant 0 : index
    %c0_393 = arith.constant 0 : index
    %432 = vector.load %arg4[%c21, %c0_392, %c0_393] : memref<30x512x16xf32, #tpu.memory_space<vmem>>, vector<1x512x16xf32>
    %433 = vector.shape_cast %432 : vector<1x512x16xf32> to vector<512x16xf32>
    %cst_394 = arith.constant dense<0.000000e+00> : vector<8x16xf32>
    %434 = tpu.matmul %431, %433, %cst_394 {dimension_numbers = #tpu.dot_dimension_numbers<[1], [0], [0], [1], [0, 0, 1, 1], [], []>} : vector<8x512xf32>, vector<512x16xf32>, vector<8x16xf32> -> vector<8x16xf32>
    %c21_395 = arith.constant 21 : index
    %c0_396 = arith.constant 0 : index
    %c0_397 = arith.constant 0 : index
    %435 = vector.load %arg5[%c21_395, %c0_396, %c0_397] : memref<30x1x16xf32, #tpu.memory_space<vmem>>, vector<1x1x16xf32>
    %436 = vector.shape_cast %435 : vector<1x1x16xf32> to vector<1x16xf32>
    %437 = vector.broadcast %436 : vector<1x16xf32> to vector<8x16xf32>
    %438 = arith.addf %434, %437 : vector<8x16xf32>
    %cst_398 = arith.constant 0.000000e+00 : f32
    %439 = vector.broadcast %cst_398 : f32 to vector<8x16xf32>
    %440 = arith.maximumf %438, %439 : vector<8x16xf32>
    %c21_399 = arith.constant 21 : index
    %c0_400 = arith.constant 0 : index
    %c0_401 = arith.constant 0 : index
    %441 = vector.load %arg6[%c21_399, %c0_400, %c0_401] : memref<30x16x16xf32, #tpu.memory_space<vmem>>, vector<1x16x16xf32>
    %442 = vector.shape_cast %441 : vector<1x16x16xf32> to vector<16x16xf32>
    %cst_402 = arith.constant dense<0.000000e+00> : vector<8x16xf32>
    %443 = tpu.matmul %440, %442, %cst_402 {dimension_numbers = #tpu.dot_dimension_numbers<[1], [0], [0], [1], [0, 0, 1, 1], [], []>} : vector<8x16xf32>, vector<16x16xf32>, vector<8x16xf32> -> vector<8x16xf32>
    %c21_403 = arith.constant 21 : index
    %c0_404 = arith.constant 0 : index
    %c0_405 = arith.constant 0 : index
    %444 = vector.load %arg7[%c21_403, %c0_404, %c0_405] : memref<30x1x16xf32, #tpu.memory_space<vmem>>, vector<1x1x16xf32>
    %445 = vector.shape_cast %444 : vector<1x1x16xf32> to vector<1x16xf32>
    %446 = vector.broadcast %445 : vector<1x16xf32> to vector<8x16xf32>
    %447 = arith.addf %443, %446 : vector<8x16xf32>
    %cst_406 = arith.constant 0.000000e+00 : f32
    %448 = vector.broadcast %cst_406 : f32 to vector<8x16xf32>
    %449 = arith.maximumf %447, %448 : vector<8x16xf32>
    %c0_407 = arith.constant 0 : index
    %c368 = arith.constant 368 : index
    %450 = vector.load %arg13[%c0_407, %c368] : memref<8x512xf32, #tpu.memory_space<vmem>>, vector<8x16xf32>
    tpu.vector_store %arg13[%c0_407, %c368], %449 {strides = array<i32>} : memref<8x512xf32, #tpu.memory_space<vmem>>, vector<8x16xf32>,
    %c0_408 = arith.constant 0 : index
    %c0_409 = arith.constant 0 : index
    %451 = vector.load %arg13[%c0_408, %c0_409] : memref<8x512xf32, #tpu.memory_space<vmem>>, vector<8x512xf32>
    %c22 = arith.constant 22 : index
    %c0_410 = arith.constant 0 : index
    %c0_411 = arith.constant 0 : index
    %452 = vector.load %arg4[%c22, %c0_410, %c0_411] : memref<30x512x16xf32, #tpu.memory_space<vmem>>, vector<1x512x16xf32>
    %453 = vector.shape_cast %452 : vector<1x512x16xf32> to vector<512x16xf32>
    %cst_412 = arith.constant dense<0.000000e+00> : vector<8x16xf32>
    %454 = tpu.matmul %451, %453, %cst_412 {dimension_numbers = #tpu.dot_dimension_numbers<[1], [0], [0], [1], [0, 0, 1, 1], [], []>} : vector<8x512xf32>, vector<512x16xf32>, vector<8x16xf32> -> vector<8x16xf32>
    %c22_413 = arith.constant 22 : index
    %c0_414 = arith.constant 0 : index
    %c0_415 = arith.constant 0 : index
    %455 = vector.load %arg5[%c22_413, %c0_414, %c0_415] : memref<30x1x16xf32, #tpu.memory_space<vmem>>, vector<1x1x16xf32>
    %456 = vector.shape_cast %455 : vector<1x1x16xf32> to vector<1x16xf32>
    %457 = vector.broadcast %456 : vector<1x16xf32> to vector<8x16xf32>
    %458 = arith.addf %454, %457 : vector<8x16xf32>
    %cst_416 = arith.constant 0.000000e+00 : f32
    %459 = vector.broadcast %cst_416 : f32 to vector<8x16xf32>
    %460 = arith.maximumf %458, %459 : vector<8x16xf32>
    %c22_417 = arith.constant 22 : index
    %c0_418 = arith.constant 0 : index
    %c0_419 = arith.constant 0 : index
    %461 = vector.load %arg6[%c22_417, %c0_418, %c0_419] : memref<30x16x16xf32, #tpu.memory_space<vmem>>, vector<1x16x16xf32>
    %462 = vector.shape_cast %461 : vector<1x16x16xf32> to vector<16x16xf32>
    %cst_420 = arith.constant dense<0.000000e+00> : vector<8x16xf32>
    %463 = tpu.matmul %460, %462, %cst_420 {dimension_numbers = #tpu.dot_dimension_numbers<[1], [0], [0], [1], [0, 0, 1, 1], [], []>} : vector<8x16xf32>, vector<16x16xf32>, vector<8x16xf32> -> vector<8x16xf32>
    %c22_421 = arith.constant 22 : index
    %c0_422 = arith.constant 0 : index
    %c0_423 = arith.constant 0 : index
    %464 = vector.load %arg7[%c22_421, %c0_422, %c0_423] : memref<30x1x16xf32, #tpu.memory_space<vmem>>, vector<1x1x16xf32>
    %465 = vector.shape_cast %464 : vector<1x1x16xf32> to vector<1x16xf32>
    %466 = vector.broadcast %465 : vector<1x16xf32> to vector<8x16xf32>
    %467 = arith.addf %463, %466 : vector<8x16xf32>
    %cst_424 = arith.constant 0.000000e+00 : f32
    %468 = vector.broadcast %cst_424 : f32 to vector<8x16xf32>
    %469 = arith.maximumf %467, %468 : vector<8x16xf32>
    %c0_425 = arith.constant 0 : index
    %c384 = arith.constant 384 : index
    %470 = vector.load %arg13[%c0_425, %c384] : memref<8x512xf32, #tpu.memory_space<vmem>>, vector<8x16xf32>
    tpu.vector_store %arg13[%c0_425, %c384], %469 {strides = array<i32>} : memref<8x512xf32, #tpu.memory_space<vmem>>, vector<8x16xf32>,
    %c0_426 = arith.constant 0 : index
    %c0_427 = arith.constant 0 : index
    %471 = vector.load %arg13[%c0_426, %c0_427] : memref<8x512xf32, #tpu.memory_space<vmem>>, vector<8x512xf32>
    %c23 = arith.constant 23 : index
    %c0_428 = arith.constant 0 : index
    %c0_429 = arith.constant 0 : index
    %472 = vector.load %arg4[%c23, %c0_428, %c0_429] : memref<30x512x16xf32, #tpu.memory_space<vmem>>, vector<1x512x16xf32>
    %473 = vector.shape_cast %472 : vector<1x512x16xf32> to vector<512x16xf32>
    %cst_430 = arith.constant dense<0.000000e+00> : vector<8x16xf32>
    %474 = tpu.matmul %471, %473, %cst_430 {dimension_numbers = #tpu.dot_dimension_numbers<[1], [0], [0], [1], [0, 0, 1, 1], [], []>} : vector<8x512xf32>, vector<512x16xf32>, vector<8x16xf32> -> vector<8x16xf32>
    %c23_431 = arith.constant 23 : index
    %c0_432 = arith.constant 0 : index
    %c0_433 = arith.constant 0 : index
    %475 = vector.load %arg5[%c23_431, %c0_432, %c0_433] : memref<30x1x16xf32, #tpu.memory_space<vmem>>, vector<1x1x16xf32>
    %476 = vector.shape_cast %475 : vector<1x1x16xf32> to vector<1x16xf32>
    %477 = vector.broadcast %476 : vector<1x16xf32> to vector<8x16xf32>
    %478 = arith.addf %474, %477 : vector<8x16xf32>
    %cst_434 = arith.constant 0.000000e+00 : f32
    %479 = vector.broadcast %cst_434 : f32 to vector<8x16xf32>
    %480 = arith.maximumf %478, %479 : vector<8x16xf32>
    %c23_435 = arith.constant 23 : index
    %c0_436 = arith.constant 0 : index
    %c0_437 = arith.constant 0 : index
    %481 = vector.load %arg6[%c23_435, %c0_436, %c0_437] : memref<30x16x16xf32, #tpu.memory_space<vmem>>, vector<1x16x16xf32>
    %482 = vector.shape_cast %481 : vector<1x16x16xf32> to vector<16x16xf32>
    %cst_438 = arith.constant dense<0.000000e+00> : vector<8x16xf32>
    %483 = tpu.matmul %480, %482, %cst_438 {dimension_numbers = #tpu.dot_dimension_numbers<[1], [0], [0], [1], [0, 0, 1, 1], [], []>} : vector<8x16xf32>, vector<16x16xf32>, vector<8x16xf32> -> vector<8x16xf32>
    %c23_439 = arith.constant 23 : index
    %c0_440 = arith.constant 0 : index
    %c0_441 = arith.constant 0 : index
    %484 = vector.load %arg7[%c23_439, %c0_440, %c0_441] : memref<30x1x16xf32, #tpu.memory_space<vmem>>, vector<1x1x16xf32>
    %485 = vector.shape_cast %484 : vector<1x1x16xf32> to vector<1x16xf32>
    %486 = vector.broadcast %485 : vector<1x16xf32> to vector<8x16xf32>
    %487 = arith.addf %483, %486 : vector<8x16xf32>
    %cst_442 = arith.constant 0.000000e+00 : f32
    %488 = vector.broadcast %cst_442 : f32 to vector<8x16xf32>
    %489 = arith.maximumf %487, %488 : vector<8x16xf32>
    %c0_443 = arith.constant 0 : index
    %c400 = arith.constant 400 : index
    %490 = vector.load %arg13[%c0_443, %c400] : memref<8x512xf32, #tpu.memory_space<vmem>>, vector<8x16xf32>
    tpu.vector_store %arg13[%c0_443, %c400], %489 {strides = array<i32>} : memref<8x512xf32, #tpu.memory_space<vmem>>, vector<8x16xf32>,
    %c0_444 = arith.constant 0 : index
    %c0_445 = arith.constant 0 : index
    %491 = vector.load %arg13[%c0_444, %c0_445] : memref<8x512xf32, #tpu.memory_space<vmem>>, vector<8x512xf32>
    %c24 = arith.constant 24 : index
    %c0_446 = arith.constant 0 : index
    %c0_447 = arith.constant 0 : index
    %492 = vector.load %arg4[%c24, %c0_446, %c0_447] : memref<30x512x16xf32, #tpu.memory_space<vmem>>, vector<1x512x16xf32>
    %493 = vector.shape_cast %492 : vector<1x512x16xf32> to vector<512x16xf32>
    %cst_448 = arith.constant dense<0.000000e+00> : vector<8x16xf32>
    %494 = tpu.matmul %491, %493, %cst_448 {dimension_numbers = #tpu.dot_dimension_numbers<[1], [0], [0], [1], [0, 0, 1, 1], [], []>} : vector<8x512xf32>, vector<512x16xf32>, vector<8x16xf32> -> vector<8x16xf32>
    %c24_449 = arith.constant 24 : index
    %c0_450 = arith.constant 0 : index
    %c0_451 = arith.constant 0 : index
    %495 = vector.load %arg5[%c24_449, %c0_450, %c0_451] : memref<30x1x16xf32, #tpu.memory_space<vmem>>, vector<1x1x16xf32>
    %496 = vector.shape_cast %495 : vector<1x1x16xf32> to vector<1x16xf32>
    %497 = vector.broadcast %496 : vector<1x16xf32> to vector<8x16xf32>
    %498 = arith.addf %494, %497 : vector<8x16xf32>
    %cst_452 = arith.constant 0.000000e+00 : f32
    %499 = vector.broadcast %cst_452 : f32 to vector<8x16xf32>
    %500 = arith.maximumf %498, %499 : vector<8x16xf32>
    %c24_453 = arith.constant 24 : index
    %c0_454 = arith.constant 0 : index
    %c0_455 = arith.constant 0 : index
    %501 = vector.load %arg6[%c24_453, %c0_454, %c0_455] : memref<30x16x16xf32, #tpu.memory_space<vmem>>, vector<1x16x16xf32>
    %502 = vector.shape_cast %501 : vector<1x16x16xf32> to vector<16x16xf32>
    %cst_456 = arith.constant dense<0.000000e+00> : vector<8x16xf32>
    %503 = tpu.matmul %500, %502, %cst_456 {dimension_numbers = #tpu.dot_dimension_numbers<[1], [0], [0], [1], [0, 0, 1, 1], [], []>} : vector<8x16xf32>, vector<16x16xf32>, vector<8x16xf32> -> vector<8x16xf32>
    %c24_457 = arith.constant 24 : index
    %c0_458 = arith.constant 0 : index
    %c0_459 = arith.constant 0 : index
    %504 = vector.load %arg7[%c24_457, %c0_458, %c0_459] : memref<30x1x16xf32, #tpu.memory_space<vmem>>, vector<1x1x16xf32>
    %505 = vector.shape_cast %504 : vector<1x1x16xf32> to vector<1x16xf32>
    %506 = vector.broadcast %505 : vector<1x16xf32> to vector<8x16xf32>
    %507 = arith.addf %503, %506 : vector<8x16xf32>
    %cst_460 = arith.constant 0.000000e+00 : f32
    %508 = vector.broadcast %cst_460 : f32 to vector<8x16xf32>
    %509 = arith.maximumf %507, %508 : vector<8x16xf32>
    %c0_461 = arith.constant 0 : index
    %c416 = arith.constant 416 : index
    %510 = vector.load %arg13[%c0_461, %c416] : memref<8x512xf32, #tpu.memory_space<vmem>>, vector<8x16xf32>
    tpu.vector_store %arg13[%c0_461, %c416], %509 {strides = array<i32>} : memref<8x512xf32, #tpu.memory_space<vmem>>, vector<8x16xf32>,
    %c0_462 = arith.constant 0 : index
    %c0_463 = arith.constant 0 : index
    %511 = vector.load %arg13[%c0_462, %c0_463] : memref<8x512xf32, #tpu.memory_space<vmem>>, vector<8x512xf32>
    %c25 = arith.constant 25 : index
    %c0_464 = arith.constant 0 : index
    %c0_465 = arith.constant 0 : index
    %512 = vector.load %arg4[%c25, %c0_464, %c0_465] : memref<30x512x16xf32, #tpu.memory_space<vmem>>, vector<1x512x16xf32>
    %513 = vector.shape_cast %512 : vector<1x512x16xf32> to vector<512x16xf32>
    %cst_466 = arith.constant dense<0.000000e+00> : vector<8x16xf32>
    %514 = tpu.matmul %511, %513, %cst_466 {dimension_numbers = #tpu.dot_dimension_numbers<[1], [0], [0], [1], [0, 0, 1, 1], [], []>} : vector<8x512xf32>, vector<512x16xf32>, vector<8x16xf32> -> vector<8x16xf32>
    %c25_467 = arith.constant 25 : index
    %c0_468 = arith.constant 0 : index
    %c0_469 = arith.constant 0 : index
    %515 = vector.load %arg5[%c25_467, %c0_468, %c0_469] : memref<30x1x16xf32, #tpu.memory_space<vmem>>, vector<1x1x16xf32>
    %516 = vector.shape_cast %515 : vector<1x1x16xf32> to vector<1x16xf32>
    %517 = vector.broadcast %516 : vector<1x16xf32> to vector<8x16xf32>
    %518 = arith.addf %514, %517 : vector<8x16xf32>
    %cst_470 = arith.constant 0.000000e+00 : f32
    %519 = vector.broadcast %cst_470 : f32 to vector<8x16xf32>
    %520 = arith.maximumf %518, %519 : vector<8x16xf32>
    %c25_471 = arith.constant 25 : index
    %c0_472 = arith.constant 0 : index
    %c0_473 = arith.constant 0 : index
    %521 = vector.load %arg6[%c25_471, %c0_472, %c0_473] : memref<30x16x16xf32, #tpu.memory_space<vmem>>, vector<1x16x16xf32>
    %522 = vector.shape_cast %521 : vector<1x16x16xf32> to vector<16x16xf32>
    %cst_474 = arith.constant dense<0.000000e+00> : vector<8x16xf32>
    %523 = tpu.matmul %520, %522, %cst_474 {dimension_numbers = #tpu.dot_dimension_numbers<[1], [0], [0], [1], [0, 0, 1, 1], [], []>} : vector<8x16xf32>, vector<16x16xf32>, vector<8x16xf32> -> vector<8x16xf32>
    %c25_475 = arith.constant 25 : index
    %c0_476 = arith.constant 0 : index
    %c0_477 = arith.constant 0 : index
    %524 = vector.load %arg7[%c25_475, %c0_476, %c0_477] : memref<30x1x16xf32, #tpu.memory_space<vmem>>, vector<1x1x16xf32>
    %525 = vector.shape_cast %524 : vector<1x1x16xf32> to vector<1x16xf32>
    %526 = vector.broadcast %525 : vector<1x16xf32> to vector<8x16xf32>
    %527 = arith.addf %523, %526 : vector<8x16xf32>
    %cst_478 = arith.constant 0.000000e+00 : f32
    %528 = vector.broadcast %cst_478 : f32 to vector<8x16xf32>
    %529 = arith.maximumf %527, %528 : vector<8x16xf32>
    %c0_479 = arith.constant 0 : index
    %c432 = arith.constant 432 : index
    %530 = vector.load %arg13[%c0_479, %c432] : memref<8x512xf32, #tpu.memory_space<vmem>>, vector<8x16xf32>
    tpu.vector_store %arg13[%c0_479, %c432], %529 {strides = array<i32>} : memref<8x512xf32, #tpu.memory_space<vmem>>, vector<8x16xf32>,
    %c0_480 = arith.constant 0 : index
    %c0_481 = arith.constant 0 : index
    %531 = vector.load %arg13[%c0_480, %c0_481] : memref<8x512xf32, #tpu.memory_space<vmem>>, vector<8x512xf32>
    %c26 = arith.constant 26 : index
    %c0_482 = arith.constant 0 : index
    %c0_483 = arith.constant 0 : index
    %532 = vector.load %arg4[%c26, %c0_482, %c0_483] : memref<30x512x16xf32, #tpu.memory_space<vmem>>, vector<1x512x16xf32>
    %533 = vector.shape_cast %532 : vector<1x512x16xf32> to vector<512x16xf32>
    %cst_484 = arith.constant dense<0.000000e+00> : vector<8x16xf32>
    %534 = tpu.matmul %531, %533, %cst_484 {dimension_numbers = #tpu.dot_dimension_numbers<[1], [0], [0], [1], [0, 0, 1, 1], [], []>} : vector<8x512xf32>, vector<512x16xf32>, vector<8x16xf32> -> vector<8x16xf32>
    %c26_485 = arith.constant 26 : index
    %c0_486 = arith.constant 0 : index
    %c0_487 = arith.constant 0 : index
    %535 = vector.load %arg5[%c26_485, %c0_486, %c0_487] : memref<30x1x16xf32, #tpu.memory_space<vmem>>, vector<1x1x16xf32>
    %536 = vector.shape_cast %535 : vector<1x1x16xf32> to vector<1x16xf32>
    %537 = vector.broadcast %536 : vector<1x16xf32> to vector<8x16xf32>
    %538 = arith.addf %534, %537 : vector<8x16xf32>
    %cst_488 = arith.constant 0.000000e+00 : f32
    %539 = vector.broadcast %cst_488 : f32 to vector<8x16xf32>
    %540 = arith.maximumf %538, %539 : vector<8x16xf32>
    %c26_489 = arith.constant 26 : index
    %c0_490 = arith.constant 0 : index
    %c0_491 = arith.constant 0 : index
    %541 = vector.load %arg6[%c26_489, %c0_490, %c0_491] : memref<30x16x16xf32, #tpu.memory_space<vmem>>, vector<1x16x16xf32>
    %542 = vector.shape_cast %541 : vector<1x16x16xf32> to vector<16x16xf32>
    %cst_492 = arith.constant dense<0.000000e+00> : vector<8x16xf32>
    %543 = tpu.matmul %540, %542, %cst_492 {dimension_numbers = #tpu.dot_dimension_numbers<[1], [0], [0], [1], [0, 0, 1, 1], [], []>} : vector<8x16xf32>, vector<16x16xf32>, vector<8x16xf32> -> vector<8x16xf32>
    %c26_493 = arith.constant 26 : index
    %c0_494 = arith.constant 0 : index
    %c0_495 = arith.constant 0 : index
    %544 = vector.load %arg7[%c26_493, %c0_494, %c0_495] : memref<30x1x16xf32, #tpu.memory_space<vmem>>, vector<1x1x16xf32>
    %545 = vector.shape_cast %544 : vector<1x1x16xf32> to vector<1x16xf32>
    %546 = vector.broadcast %545 : vector<1x16xf32> to vector<8x16xf32>
    %547 = arith.addf %543, %546 : vector<8x16xf32>
    %cst_496 = arith.constant 0.000000e+00 : f32
    %548 = vector.broadcast %cst_496 : f32 to vector<8x16xf32>
    %549 = arith.maximumf %547, %548 : vector<8x16xf32>
    %c0_497 = arith.constant 0 : index
    %c448 = arith.constant 448 : index
    %550 = vector.load %arg13[%c0_497, %c448] : memref<8x512xf32, #tpu.memory_space<vmem>>, vector<8x16xf32>
    tpu.vector_store %arg13[%c0_497, %c448], %549 {strides = array<i32>} : memref<8x512xf32, #tpu.memory_space<vmem>>, vector<8x16xf32>,
    %c0_498 = arith.constant 0 : index
    %c0_499 = arith.constant 0 : index
    %551 = vector.load %arg13[%c0_498, %c0_499] : memref<8x512xf32, #tpu.memory_space<vmem>>, vector<8x512xf32>
    %c27 = arith.constant 27 : index
    %c0_500 = arith.constant 0 : index
    %c0_501 = arith.constant 0 : index
    %552 = vector.load %arg4[%c27, %c0_500, %c0_501] : memref<30x512x16xf32, #tpu.memory_space<vmem>>, vector<1x512x16xf32>
    %553 = vector.shape_cast %552 : vector<1x512x16xf32> to vector<512x16xf32>
    %cst_502 = arith.constant dense<0.000000e+00> : vector<8x16xf32>
    %554 = tpu.matmul %551, %553, %cst_502 {dimension_numbers = #tpu.dot_dimension_numbers<[1], [0], [0], [1], [0, 0, 1, 1], [], []>} : vector<8x512xf32>, vector<512x16xf32>, vector<8x16xf32> -> vector<8x16xf32>
    %c27_503 = arith.constant 27 : index
    %c0_504 = arith.constant 0 : index
    %c0_505 = arith.constant 0 : index
    %555 = vector.load %arg5[%c27_503, %c0_504, %c0_505] : memref<30x1x16xf32, #tpu.memory_space<vmem>>, vector<1x1x16xf32>
    %556 = vector.shape_cast %555 : vector<1x1x16xf32> to vector<1x16xf32>
    %557 = vector.broadcast %556 : vector<1x16xf32> to vector<8x16xf32>
    %558 = arith.addf %554, %557 : vector<8x16xf32>
    %cst_506 = arith.constant 0.000000e+00 : f32
    %559 = vector.broadcast %cst_506 : f32 to vector<8x16xf32>
    %560 = arith.maximumf %558, %559 : vector<8x16xf32>
    %c27_507 = arith.constant 27 : index
    %c0_508 = arith.constant 0 : index
    %c0_509 = arith.constant 0 : index
    %561 = vector.load %arg6[%c27_507, %c0_508, %c0_509] : memref<30x16x16xf32, #tpu.memory_space<vmem>>, vector<1x16x16xf32>
    %562 = vector.shape_cast %561 : vector<1x16x16xf32> to vector<16x16xf32>
    %cst_510 = arith.constant dense<0.000000e+00> : vector<8x16xf32>
    %563 = tpu.matmul %560, %562, %cst_510 {dimension_numbers = #tpu.dot_dimension_numbers<[1], [0], [0], [1], [0, 0, 1, 1], [], []>} : vector<8x16xf32>, vector<16x16xf32>, vector<8x16xf32> -> vector<8x16xf32>
    %c27_511 = arith.constant 27 : index
    %c0_512 = arith.constant 0 : index
    %c0_513 = arith.constant 0 : index
    %564 = vector.load %arg7[%c27_511, %c0_512, %c0_513] : memref<30x1x16xf32, #tpu.memory_space<vmem>>, vector<1x1x16xf32>
    %565 = vector.shape_cast %564 : vector<1x1x16xf32> to vector<1x16xf32>
    %566 = vector.broadcast %565 : vector<1x16xf32> to vector<8x16xf32>
    %567 = arith.addf %563, %566 : vector<8x16xf32>
    %cst_514 = arith.constant 0.000000e+00 : f32
    %568 = vector.broadcast %cst_514 : f32 to vector<8x16xf32>
    %569 = arith.maximumf %567, %568 : vector<8x16xf32>
    %c0_515 = arith.constant 0 : index
    %c464 = arith.constant 464 : index
    %570 = vector.load %arg13[%c0_515, %c464] : memref<8x512xf32, #tpu.memory_space<vmem>>, vector<8x16xf32>
    tpu.vector_store %arg13[%c0_515, %c464], %569 {strides = array<i32>} : memref<8x512xf32, #tpu.memory_space<vmem>>, vector<8x16xf32>,
    %c0_516 = arith.constant 0 : index
    %c0_517 = arith.constant 0 : index
    %571 = vector.load %arg13[%c0_516, %c0_517] : memref<8x512xf32, #tpu.memory_space<vmem>>, vector<8x512xf32>
    %c28 = arith.constant 28 : index
    %c0_518 = arith.constant 0 : index
    %c0_519 = arith.constant 0 : index
    %572 = vector.load %arg4[%c28, %c0_518, %c0_519] : memref<30x512x16xf32, #tpu.memory_space<vmem>>, vector<1x512x16xf32>
    %573 = vector.shape_cast %572 : vector<1x512x16xf32> to vector<512x16xf32>
    %cst_520 = arith.constant dense<0.000000e+00> : vector<8x16xf32>
    %574 = tpu.matmul %571, %573, %cst_520 {dimension_numbers = #tpu.dot_dimension_numbers<[1], [0], [0], [1], [0, 0, 1, 1], [], []>} : vector<8x512xf32>, vector<512x16xf32>, vector<8x16xf32> -> vector<8x16xf32>
    %c28_521 = arith.constant 28 : index
    %c0_522 = arith.constant 0 : index
    %c0_523 = arith.constant 0 : index
    %575 = vector.load %arg5[%c28_521, %c0_522, %c0_523] : memref<30x1x16xf32, #tpu.memory_space<vmem>>, vector<1x1x16xf32>
    %576 = vector.shape_cast %575 : vector<1x1x16xf32> to vector<1x16xf32>
    %577 = vector.broadcast %576 : vector<1x16xf32> to vector<8x16xf32>
    %578 = arith.addf %574, %577 : vector<8x16xf32>
    %cst_524 = arith.constant 0.000000e+00 : f32
    %579 = vector.broadcast %cst_524 : f32 to vector<8x16xf32>
    %580 = arith.maximumf %578, %579 : vector<8x16xf32>
    %c28_525 = arith.constant 28 : index
    %c0_526 = arith.constant 0 : index
    %c0_527 = arith.constant 0 : index
    %581 = vector.load %arg6[%c28_525, %c0_526, %c0_527] : memref<30x16x16xf32, #tpu.memory_space<vmem>>, vector<1x16x16xf32>
    %582 = vector.shape_cast %581 : vector<1x16x16xf32> to vector<16x16xf32>
    %cst_528 = arith.constant dense<0.000000e+00> : vector<8x16xf32>
    %583 = tpu.matmul %580, %582, %cst_528 {dimension_numbers = #tpu.dot_dimension_numbers<[1], [0], [0], [1], [0, 0, 1, 1], [], []>} : vector<8x16xf32>, vector<16x16xf32>, vector<8x16xf32> -> vector<8x16xf32>
    %c28_529 = arith.constant 28 : index
    %c0_530 = arith.constant 0 : index
    %c0_531 = arith.constant 0 : index
    %584 = vector.load %arg7[%c28_529, %c0_530, %c0_531] : memref<30x1x16xf32, #tpu.memory_space<vmem>>, vector<1x1x16xf32>
    %585 = vector.shape_cast %584 : vector<1x1x16xf32> to vector<1x16xf32>
    %586 = vector.broadcast %585 : vector<1x16xf32> to vector<8x16xf32>
    %587 = arith.addf %583, %586 : vector<8x16xf32>
    %cst_532 = arith.constant 0.000000e+00 : f32
    %588 = vector.broadcast %cst_532 : f32 to vector<8x16xf32>
    %589 = arith.maximumf %587, %588 : vector<8x16xf32>
    %c0_533 = arith.constant 0 : index
    %c480 = arith.constant 480 : index
    %590 = vector.load %arg13[%c0_533, %c480] : memref<8x512xf32, #tpu.memory_space<vmem>>, vector<8x16xf32>
    tpu.vector_store %arg13[%c0_533, %c480], %589 {strides = array<i32>} : memref<8x512xf32, #tpu.memory_space<vmem>>, vector<8x16xf32>,
    %c0_534 = arith.constant 0 : index
    %c0_535 = arith.constant 0 : index
    %591 = vector.load %arg13[%c0_534, %c0_535] : memref<8x512xf32, #tpu.memory_space<vmem>>, vector<8x512xf32>
    %c29 = arith.constant 29 : index
    %c0_536 = arith.constant 0 : index
    %c0_537 = arith.constant 0 : index
    %592 = vector.load %arg4[%c29, %c0_536, %c0_537] : memref<30x512x16xf32, #tpu.memory_space<vmem>>, vector<1x512x16xf32>
    %593 = vector.shape_cast %592 : vector<1x512x16xf32> to vector<512x16xf32>
    %cst_538 = arith.constant dense<0.000000e+00> : vector<8x16xf32>
    %594 = tpu.matmul %591, %593, %cst_538 {dimension_numbers = #tpu.dot_dimension_numbers<[1], [0], [0], [1], [0, 0, 1, 1], [], []>} : vector<8x512xf32>, vector<512x16xf32>, vector<8x16xf32> -> vector<8x16xf32>
    %c29_539 = arith.constant 29 : index
    %c0_540 = arith.constant 0 : index
    %c0_541 = arith.constant 0 : index
    %595 = vector.load %arg5[%c29_539, %c0_540, %c0_541] : memref<30x1x16xf32, #tpu.memory_space<vmem>>, vector<1x1x16xf32>
    %596 = vector.shape_cast %595 : vector<1x1x16xf32> to vector<1x16xf32>
    %597 = vector.broadcast %596 : vector<1x16xf32> to vector<8x16xf32>
    %598 = arith.addf %594, %597 : vector<8x16xf32>
    %cst_542 = arith.constant 0.000000e+00 : f32
    %599 = vector.broadcast %cst_542 : f32 to vector<8x16xf32>
    %600 = arith.maximumf %598, %599 : vector<8x16xf32>
    %c29_543 = arith.constant 29 : index
    %c0_544 = arith.constant 0 : index
    %c0_545 = arith.constant 0 : index
    %601 = vector.load %arg6[%c29_543, %c0_544, %c0_545] : memref<30x16x16xf32, #tpu.memory_space<vmem>>, vector<1x16x16xf32>
    %602 = vector.shape_cast %601 : vector<1x16x16xf32> to vector<16x16xf32>
    %cst_546 = arith.constant dense<0.000000e+00> : vector<8x16xf32>
    %603 = tpu.matmul %600, %602, %cst_546 {dimension_numbers = #tpu.dot_dimension_numbers<[1], [0], [0], [1], [0, 0, 1, 1], [], []>} : vector<8x16xf32>, vector<16x16xf32>, vector<8x16xf32> -> vector<8x16xf32>
    %c29_547 = arith.constant 29 : index
    %c0_548 = arith.constant 0 : index
    %c0_549 = arith.constant 0 : index
    %604 = vector.load %arg7[%c29_547, %c0_548, %c0_549] : memref<30x1x16xf32, #tpu.memory_space<vmem>>, vector<1x1x16xf32>
    %605 = vector.shape_cast %604 : vector<1x1x16xf32> to vector<1x16xf32>
    %606 = vector.broadcast %605 : vector<1x16xf32> to vector<8x16xf32>
    %607 = arith.addf %603, %606 : vector<8x16xf32>
    %cst_550 = arith.constant 0.000000e+00 : f32
    %608 = vector.broadcast %cst_550 : f32 to vector<8x16xf32>
    %609 = arith.maximumf %607, %608 : vector<8x16xf32>
    %c0_551 = arith.constant 0 : index
    %c496 = arith.constant 496 : index
    %610 = vector.load %arg13[%c0_551, %c496] : memref<8x512xf32, #tpu.memory_space<vmem>>, vector<8x16xf32>
    tpu.vector_store %arg13[%c0_551, %c496], %609 {strides = array<i32>} : memref<8x512xf32, #tpu.memory_space<vmem>>, vector<8x16xf32>,
    %c0_552 = arith.constant 0 : index
    %c0_553 = arith.constant 0 : index
    %611 = vector.load %arg13[%c0_552, %c0_553] : memref<8x512xf32, #tpu.memory_space<vmem>>, vector<8x512xf32>
    %c0_554 = arith.constant 0 : index
    %c0_555 = arith.constant 0 : index
    %612 = vector.load %arg8[%c0_554, %c0_555] : memref<512x32xf32, #tpu.memory_space<vmem>>, vector<512x32xf32>
    %cst_556 = arith.constant dense<0.000000e+00> : vector<8x32xf32>
    %613 = tpu.matmul %611, %612, %cst_556 {dimension_numbers = #tpu.dot_dimension_numbers<[1], [0], [0], [1], [0, 0, 1, 1], [], []>} : vector<8x512xf32>, vector<512x32xf32>, vector<8x32xf32> -> vector<8x32xf32>
    %c0_557 = arith.constant 0 : index
    %c0_558 = arith.constant 0 : index
    %614 = vector.load %arg9[%c0_557, %c0_558] : memref<1x32xf32, #tpu.memory_space<vmem>>, vector<1x32xf32>
    %615 = vector.broadcast %614 : vector<1x32xf32> to vector<8x32xf32>
    %616 = arith.addf %613, %615 : vector<8x32xf32>
    %cst_559 = arith.constant 0.000000e+00 : f32
    %617 = vector.broadcast %cst_559 : f32 to vector<8x32xf32>
    %618 = arith.maximumf %616, %617 : vector<8x32xf32>
    %c0_560 = arith.constant 0 : index
    %c0_561 = arith.constant 0 : index
    %619 = vector.load %arg10[%c0_560, %c0_561] : memref<32x128xf32, #tpu.memory_space<vmem>>, vector<32x128xf32>
    %cst_562 = arith.constant dense<0.000000e+00> : vector<8x128xf32>
    %620 = tpu.matmul %618, %619, %cst_562 {dimension_numbers = #tpu.dot_dimension_numbers<[1], [0], [0], [1], [0, 0, 1, 1], [], []>} : vector<8x32xf32>, vector<32x128xf32>, vector<8x128xf32> -> vector<8x128xf32>
    %c0_563 = arith.constant 0 : index
    %c0_564 = arith.constant 0 : index
    %621 = vector.load %arg11[%c0_563, %c0_564] : memref<1x128xf32, #tpu.memory_space<vmem>>, vector<1x128xf32>
    %622 = vector.broadcast %621 : vector<1x128xf32> to vector<8x128xf32>
    %623 = arith.addf %620, %622 : vector<8x128xf32>
    %c0_565 = arith.constant 0 : index
    %c0_566 = arith.constant 0 : index
    %624 = vector.load %arg12[%c0_565, %c0_566] : memref<8x128xf32, #tpu.memory_space<vmem>>, vector<8x128xf32>
    tpu.vector_store %arg12[%c0_565, %c0_566], %623 {strides = array<i32>} : memref<8x128xf32, #tpu.memory_space<vmem>>, vector<8x128xf32>,
    return
  }
  func.func @transform_0(%arg0: i32) -> (i32, i32) {
    %c0_i32 = arith.constant 0 : i32
    %c0_i32_0 = arith.constant 0 : i32
    return %arg0, %c0_i32 : i32, i32
  }
  func.func @transform_1(%arg0: i32) -> (i32, i32) {
    %c0_i32 = arith.constant 0 : i32
    %c0_i32_0 = arith.constant 0 : i32
    %c0_i32_1 = arith.constant 0 : i32
    return %c0_i32, %c0_i32_0 : i32, i32
  }
  func.func @transform_2(%arg0: i32) -> (i32, i32) {
    %c0_i32 = arith.constant 0 : i32
    %c0_i32_0 = arith.constant 0 : i32
    %c0_i32_1 = arith.constant 0 : i32
    return %c0_i32, %c0_i32_0 : i32, i32
  }
  func.func @transform_3(%arg0: i32) -> (i32, i32, i32) {
    %c0_i32 = arith.constant 0 : i32
    %c0_i32_0 = arith.constant 0 : i32
    %c0_i32_1 = arith.constant 0 : i32
    %c0_i32_2 = arith.constant 0 : i32
    return %c0_i32, %c0_i32_0, %c0_i32_1 : i32, i32, i32
  }
  func.func @transform_4(%arg0: i32) -> (i32, i32, i32) {
    %c0_i32 = arith.constant 0 : i32
    %c0_i32_0 = arith.constant 0 : i32
    %c0_i32_1 = arith.constant 0 : i32
    %c0_i32_2 = arith.constant 0 : i32
    return %c0_i32, %c0_i32_0, %c0_i32_1 : i32, i32, i32
  }
  func.func @transform_5(%arg0: i32) -> (i32, i32, i32) {
    %c0_i32 = arith.constant 0 : i32
    %c0_i32_0 = arith.constant 0 : i32
    %c0_i32_1 = arith.constant 0 : i32
    %c0_i32_2 = arith.constant 0 : i32
    return %c0_i32, %c0_i32_0, %c0_i32_1 : i32, i32, i32
  }
  func.func @transform_6(%arg0: i32) -> (i32, i32, i32) {
    %c0_i32 = arith.constant 0 : i32
    %c0_i32_0 = arith.constant 0 : i32
    %c0_i32_1 = arith.constant 0 : i32
    %c0_i32_2 = arith.constant 0 : i32
    return %c0_i32, %c0_i32_0, %c0_i32_1 : i32, i32, i32
  }
  func.func @transform_7(%arg0: i32) -> (i32, i32) {
    %c0_i32 = arith.constant 0 : i32
    %c0_i32_0 = arith.constant 0 : i32
    %c0_i32_1 = arith.constant 0 : i32
    return %c0_i32, %c0_i32_0 : i32, i32
  }
  func.func @transform_8(%arg0: i32) -> (i32, i32) {
    %c0_i32 = arith.constant 0 : i32
    %c0_i32_0 = arith.constant 0 : i32
    %c0_i32_1 = arith.constant 0 : i32
    return %c0_i32, %c0_i32_0 : i32, i32
  }
  func.func @transform_9(%arg0: i32) -> (i32, i32) {
    %c0_i32 = arith.constant 0 : i32
    %c0_i32_0 = arith.constant 0 : i32
    %c0_i32_1 = arith.constant 0 : i32
    return %c0_i32, %c0_i32_0 : i32, i32
  }
  func.func @transform_10(%arg0: i32) -> (i32, i32) {
    %c0_i32 = arith.constant 0 : i32
    %c0_i32_0 = arith.constant 0 : i32
    %c0_i32_1 = arith.constant 0 : i32
    return %c0_i32, %c0_i32_0 : i32, i32
  }
  func.func @transform_11(%arg0: i32) -> (i32, i32) {
    %c0_i32 = arith.constant 0 : i32
    %c0_i32_0 = arith.constant 0 : i32
    return %arg0, %c0_i32 : i32, i32
  }
}

</mosaic_0001>

<bundles_post_ra>
// kernel: densenet_forward.1
= control target key start
LH: loop header
LB: loop body
LE: loop exit
PB: predicated region body
PF: predicated region fallthrough
CT: control target
= control target key end

     0   :  { %16 = vsyncpa [#allocation4], 0  ;;  %s15347_s0 = inlined_call_operand.vmem [shape: f32[8,24], index: 0, kind: input, shape index: {}]   ;;  %s15348_s1 = inlined_call_operand.hbm [shape: f32[24,32], index: 1, kind: input, shape index: {}]   ;;  %s15349_s2 = inlined_call_operand.hbm [shape: f32[1,32], index: 2, kind: input, shape index: {}]   ;;  %s15350_s3 = inlined_call_operand.hbm [shape: f32[30,512,16], index: 3, kind: input, shape index: {}]   ;;  %s15351_s4 = inlined_call_operand.hbm [shape: f32[30,1,16], index: 4, kind: input, shape index: {}]   ;;  %s15352_s5 = inlined_call_operand.hbm [shape: f32[30,16,16], index: 5, kind: input, shape index: {}]   ;;  %s15353_s6 = inlined_call_operand.hbm [shape: f32[30,1,16], index: 6, kind: input, shape index: {}]   ;;  %s15354_s7 = inlined_call_operand.hbm [shape: f32[512,32], index: 7, kind: input, shape index: {}]   ;;  %s15355_s8 = inlined_call_operand.hbm [shape: f32[1,32], index: 8, kind: input, shape index: {}]   ;;  %s15356_s9 = inlined_call_operand.hbm [shape: f32[32,128], index: 9, kind: input, shape index: {}]   ;;  %s15357_s10 = inlined_call_operand.hbm [shape: f32[1,128], index: 10, kind: input, shape index: {}]   ;;  %s15358_s11 = inlined_call_operand.vmem [shape: f32[8,128], index: 11, kind: output, shape index: {}]  }
   0x1   :  { %17 = vsyncpa [#allocation6], 0 }
   0x2   :  { %18 = vsyncpa [#allocation9], 0 }
   0x3   :  { %19 = vsyncpa [#allocation12], 0 }
   0x4   :  { %20 = vsyncpa [#allocation15], 0 }
   0x5   :  { %21 = vsyncpa [#allocation18], 0  ;;  %s14741_s17 = smov [#allocation5]   ;;  %s14742_s19 = smov [#allocation8]  }
   0x6   :  { %s42_s18 = sshll.u32 %s14741_s17, 4  ;;  %s63_s20 = sshll.u32 %s14742_s19, 4  ;;  %s43_s18 = int_to_ptr.vmem [resolvable:$true] %s42_s18  ;;  %s14824_s20 = int_to_ptr.vmem [resolvable:$true] %s63_s20 }
   0x7   :  { %s14509_s23 = scalar_lea.hbm %s15349_s2, 16 }
   0x8   :  { %p14510_p0 = scmp.ne.s32.totalorder %s15349_s2, %s14509_s23  ;;  %p14513_p1 = scmp.lt.u32.totalorder %s14509_s23, %s15349_s2 }
   0xa   :  { %p14515_p2 = pnand %p14513_p1, %p14510_p0 }
   0xc   :  { %14518 = shalt.err (!%p14515_p2)
}
   0xd   :  { %s14519_s28 = scalar_lea.vmem %s43_s18, 16  ;;  %s14523_s29 = scalar_lea.vmem %s43_s18, 32 }
   0xe   :  { %p14520_p3 = scmp.ne.s32.totalorder %s43_s18, %s14519_s28  ;;  %p14524_p4 = scmp.lt.s32.totalorder %s43_s18, %s43_s18 }
   0xf   :  { %p14525_p5 = scmp.lt.s32.totalorder %s14523_s29, %s14519_s28 }
  0x11   :  { %p14526_p6 = por %p14525_p5, %p14524_p4 }
  0x13   :  { %p14527_p7 = pnand %p14526_p6, %p14520_p3 }
  0x15   :  { %14530 = shalt.err (!%p14527_p7)
}
  0x16   :  { %45 = dma.hbm_to_vmem [thread:$0]  %s15349_s2, 16, %s43_s18, [#allocation6]  }
  0x17   :  { %s14531_s15 = scalar_lea.hbm %s15351_s4, 480 }
  0x18   :  { %p14532_p8 = scmp.ne.s32.totalorder %s15351_s4, %s14531_s15  ;;  %p14535_p9 = scmp.lt.u32.totalorder %s14531_s15, %s15351_s4 }
  0x1a   :  { %p14537_p10 = pnand %p14535_p9, %p14532_p8 }
  0x1c   :  { %14540 = shalt.err (!%p14537_p10)
}
  0x1d   :  { %s14541_s22 = scalar_lea.vmem %s14824_s20, 480  ;;  %p14546_p12 = scmp.lt.s32.totalorder %s14824_s20, %s14824_s20 }
  0x1e   :  { %p14542_p11 = scmp.ne.s32.totalorder %s14824_s20, %s14541_s22  ;;  %p14547_p13 = scmp.lt.s32.totalorder %s14541_s22, %s14541_s22 }
  0x20   :  { %p14548_p0 = por %p14547_p13, %p14546_p12 }
  0x22   :  { %p14549_p1 = pnand %p14548_p0, %p14542_p11 }
  0x24   :  { %14552 = shalt.err (!%p14549_p1)
}
  0x25   :  { %s14743_s2 = smov 16   ;;  %s14744_s18 = smov 1  }
  0x26   :  { %69 = dma.hbm_to_vmem [thread:$0]  %s15351_s4, 480, %s14824_s20, [#allocation9], %s14743_s2, %s14743_s2, %s14744_s18  }
  0x27   :  { %s14745_s25 = smov [#allocation11]   ;;  %s14746_s27 = smov [#allocation14]  }
  0x28   :  { %s87_s26 = sshll.u32 %s14745_s25, 4  ;;  %s112_s28 = sshll.u32 %s14746_s27, 4  ;;  %s88_s26 = int_to_ptr.vmem [resolvable:$true] %s87_s26  ;;  %s113_s28 = int_to_ptr.vmem [resolvable:$true] %s112_s28 }
  0x29   :  { %s14553_s12 = scalar_lea.hbm %s15353_s6, 480 }
  0x2a   :  { %p14554_p2 = scmp.ne.s32.totalorder %s15353_s6, %s14553_s12  ;;  %p14557_p3 = scmp.lt.u32.totalorder %s14553_s12, %s15353_s6 }
  0x2c   :  { %p14559_p4 = pnand %p14557_p3, %p14554_p2 }
  0x2e   :  { %14562 = shalt.err (!%p14559_p4)
}
  0x2f   :  { %s14563_s4 = scalar_lea.vmem %s88_s26, 480  ;;  %p14568_p6 = scmp.lt.s32.totalorder %s88_s26, %s88_s26 }
  0x30   :  { %p14564_p5 = scmp.ne.s32.totalorder %s88_s26, %s14563_s4  ;;  %p14569_p7 = scmp.lt.s32.totalorder %s14563_s4, %s14563_s4 }
  0x32   :  { %p14570_p8 = por %p14569_p7, %p14568_p6 }
  0x34   :  { %p14571_p9 = pnand %p14570_p8, %p14564_p5 }
  0x36   :  { %14574 = shalt.err (!%p14571_p9)
}
  0x37   :  { %93 = dma.hbm_to_vmem [thread:$0]  %s15353_s6, 480, %s88_s26, [#allocation12], %s14743_s2, %s14743_s2, %s14744_s18  }
  0x38   :  { %s14575_s22 = scalar_lea.hbm %s15355_s8, 16 }
  0x39   :  { %p14576_p10 = scmp.ne.s32.totalorder %s15355_s8, %s14575_s22  ;;  %p14579_p11 = scmp.lt.u32.totalorder %s14575_s22, %s15355_s8 }
  0x3b   :  { %p14581_p12 = pnand %p14579_p11, %p14576_p10 }
  0x3d   :  { %14584 = shalt.err (!%p14581_p12)
}
  0x3e   :  { %s14585_s29 = scalar_lea.vmem %s113_s28, 16  ;;  %s14589_s30 = scalar_lea.vmem %s113_s28, 32 }
  0x3f   :  { %p14586_p13 = scmp.ne.s32.totalorder %s113_s28, %s14585_s29  ;;  %p14590_p0 = scmp.lt.s32.totalorder %s113_s28, %s113_s28 }
  0x40   :  { %p14591_p1 = scmp.lt.s32.totalorder %s14589_s30, %s14585_s29 }
  0x42   :  { %p14592_p2 = por %p14591_p1, %p14590_p0 }
  0x44   :  { %p14593_p3 = pnand %p14592_p2, %p14586_p13 }
  0x46   :  { %14596 = shalt.err (!%p14593_p3)
}
  0x47   :  { %115 = dma.hbm_to_vmem [thread:$0]  %s15355_s8, 16, %s113_s28, [#allocation15]  }
  0x48   :  { %s14747_s26 = smov [#allocation3]   ;;  %s14597_s15 = scalar_lea.hbm %s15348_s1, 384 }
  0x49   :  { %s29_s12 = sshll.u32 %s14747_s26, 4  ;;  %p14598_p4 = scmp.ne.s32.totalorder %s15348_s1, %s14597_s15  ;;  %s30_s12 = int_to_ptr.vmem [resolvable:$true] %s29_s12 }
  0x4a   :  { %p14601_p5 = scmp.lt.u32.totalorder %s14597_s15, %s15348_s1 }
  0x4c   :  { %p14603_p6 = pnand %p14601_p5, %p14598_p4 }
  0x4e   :  { %14606 = shalt.err (!%p14603_p6)
}
  0x4f   :  { %s14607_s19 = scalar_lea.vmem %s30_s12, 384  ;;  %p14612_p8 = scmp.lt.s32.totalorder %s30_s12, %s30_s12 }
  0x50   :  { %p14608_p7 = scmp.ne.s32.totalorder %s30_s12, %s14607_s19  ;;  %p14613_p9 = scmp.lt.s32.totalorder %s14607_s19, %s14607_s19 }
  0x52   :  { %p14614_p10 = por %p14613_p9, %p14612_p8 }
  0x54   :  { %p14615_p11 = pnand %p14614_p10, %p14608_p7 }
  0x56   :  { %14618 = shalt.err (!%p14615_p11)
}
  0x57   :  { %s14748_s8 = smov 128   ;;  %s14749_s28 = smov 8  }
  0x58   :  { %35 = dma.hbm_to_vmem [thread:$0]  %s15348_s1, 384, %s30_s12, [#allocation4], %s14748_s8, %s14748_s8, %s14749_s28  }
  0x59   :  { %s14750_s23 = smov [#allocation7]   ;;  %s14751_s25 = smov [#allocation10]  }
  0x5a   :  { %s51_s24 = sshll.u32 %s14750_s23, 4  ;;  %s75_s27 = sshll.u32 %s14751_s25, 4  ;;  %s52_s24 = int_to_ptr.vmem [resolvable:$true] %s51_s24  ;;  %s76_s27 = int_to_ptr.vmem [resolvable:$true] %s75_s27 }
  0x5b   :  { %s14619_s6 = scalar_lea.hbm %s15350_s3, 245760 }
  0x5c   :  { %p14620_p12 = scmp.ne.s32.totalorder %s15350_s3, %s14619_s6  ;;  %p14623_p13 = scmp.lt.u32.totalorder %s14619_s6, %s15350_s3 }
  0x5e   :  { %p14625_p0 = pnand %p14623_p13, %p14620_p12 }
  0x60   :  { %14628 = shalt.err (!%p14625_p0)
}
  0x61   :  { %s14629_s1 = scalar_lea.vmem %s52_s24, 245760  ;;  %p14634_p2 = scmp.lt.s32.totalorder %s52_s24, %s52_s24 }
  0x62   :  { %p14630_p1 = scmp.ne.s32.totalorder %s52_s24, %s14629_s1  ;;  %p14635_p3 = scmp.lt.s32.totalorder %s14629_s1, %s14629_s1 }
  0x64   :  { %p14636_p4 = por %p14635_p3, %p14634_p2 }
  0x66   :  { %p14637_p5 = pnand %p14636_p4, %p14630_p1 }
  0x68   :  { %14640 = shalt.err (!%p14637_p5)
}
  0x69   :  { %57 = dma.hbm_to_vmem [thread:$0]  %s15350_s3, 245760, %s52_s24, [#allocation6], %s14748_s8, %s14748_s8, %s14749_s28  }
  0x6a   :  { %s14641_s20 = scalar_lea.hbm %s15352_s5, 7680 }
  0x6b   :  { %p14642_p6 = scmp.ne.s32.totalorder %s15352_s5, %s14641_s20  ;;  %p14645_p7 = scmp.lt.u32.totalorder %s14641_s20, %s15352_s5 }
  0x6d   :  { %p14647_p8 = pnand %p14645_p7, %p14642_p6 }
  0x6f   :  { %14650 = shalt.err (!%p14647_p8)
}
  0x70   :  { %s14651_s23 = scalar_lea.vmem %s76_s27, 7680  ;;  %p14656_p10 = scmp.lt.s32.totalorder %s76_s27, %s76_s27 }
  0x71   :  { %p14652_p9 = scmp.ne.s32.totalorder %s76_s27, %s14651_s23  ;;  %p14657_p11 = scmp.lt.s32.totalorder %s14651_s23, %s14651_s23 }
  0x73   :  { %p14658_p12 = por %p14657_p11, %p14656_p10 }
  0x75   :  { %p14659_p13 = pnand %p14658_p12, %p14652_p9 }
  0x77   :  { %14662 = shalt.err (!%p14659_p13)
}
  0x78   :  { %81 = dma.hbm_to_vmem [thread:$0]  %s15352_s5, 7680, %s76_s27, [#allocation9], %s14748_s8, %s14748_s8, %s14749_s28  }
  0x79   :  { %s14752_s25 = smov [#allocation13]   ;;  %s14753_s30 = smov [#allocation16]  }
  0x7a   :  { %s99_s29 = sshll.u32 %s14752_s25, 4  ;;  %s121_s6 = sshll.u32 %s14753_s30, 4  ;;  %s100_s29 = int_to_ptr.vmem [resolvable:$true] %s99_s29  ;;  %s122_s6 = int_to_ptr.vmem [resolvable:$true] %s121_s6 }
  0x7b   :  { %s14663_s13 = scalar_lea.hbm %s15354_s7, 8192 }
  0x7c   :  { %p14664_p0 = scmp.ne.s32.totalorder %s15354_s7, %s14663_s13  ;;  %p14667_p1 = scmp.lt.u32.totalorder %s14663_s13, %s15354_s7 }
  0x7e   :  { %p14669_p2 = pnand %p14667_p1, %p14664_p0 }
  0x80   :  { %14672 = shalt.err (!%p14669_p2)
}
  0x81   :  { %s14673_s5 = scalar_lea.vmem %s100_s29, 8192  ;;  %p14678_p4 = scmp.lt.s32.totalorder %s100_s29, %s100_s29 }
  0x82   :  { %p14674_p3 = scmp.ne.s32.totalorder %s100_s29, %s14673_s5  ;;  %p14679_p5 = scmp.lt.s32.totalorder %s14673_s5, %s14673_s5 }
  0x84   :  { %p14680_p6 = por %p14679_p5, %p14678_p4 }
  0x86   :  { %p14681_p7 = pnand %p14680_p6, %p14674_p3 }
  0x88   :  { %14684 = shalt.err (!%p14681_p7)
}
  0x89   :  { %105 = dma.hbm_to_vmem [thread:$0]  %s15354_s7, 8192, %s100_s29, [#allocation12], %s14748_s8, %s14748_s8, %s14749_s28  }
  0x8a   :  { %s14685_s17 = scalar_lea.hbm %s15356_s9, 512 }
  0x8b   :  { %p14686_p8 = scmp.ne.s32.totalorder %s15356_s9, %s14685_s17  ;;  %p14689_p9 = scmp.lt.u32.totalorder %s14685_s17, %s15356_s9 }
  0x8d   :  { %p14691_p10 = pnand %p14689_p9, %p14686_p8 }
  0x8f   :  { %14694 = shalt.err (!%p14691_p10)
}
  0x90   :  { %s14695_s3 = scalar_lea.vmem %s122_s6, 512  ;;  %p14700_p12 = scmp.lt.s32.totalorder %s122_s6, %s122_s6 }
  0x91   :  { %p14696_p11 = scmp.ne.s32.totalorder %s122_s6, %s14695_s3  ;;  %p14701_p13 = scmp.lt.s32.totalorder %s14695_s3, %s14695_s3 }
  0x93   :  { %p14702_p0 = por %p14701_p13, %p14700_p12 }
  0x95   :  { %p14703_p1 = pnand %p14702_p0, %p14696_p11 }
  0x97   :  { %14706 = shalt.err (!%p14703_p1)
}
  0x98   :  { %127 = dma.hbm_to_vmem [thread:$0]  %s15356_s9, 512, %s122_s6, [#allocation15], %s14748_s8, %s14748_s8, %s14749_s28  }
  0x99   :  { %s14754_s25 = smov [#allocation17]   ;;  %s14707_s26 = scalar_lea.hbm %s15357_s10, 16 }
  0x9a   :  { %s134_s29 = sshll.u32 %s14754_s25, 4  ;;  %p14708_p2 = scmp.ne.s32.totalorder %s15357_s10, %s14707_s26  ;;  %s135_s29 = int_to_ptr.vmem [resolvable:$true] %s134_s29 }
  0x9b   :  { %p14711_p3 = scmp.lt.u32.totalorder %s14707_s26, %s15357_s10 }
  0x9d   :  { %p14713_p4 = pnand %p14711_p3, %p14708_p2 }
  0x9f   :  { %14716 = shalt.err (!%p14713_p4)
}
  0xa0   :  { %s14717_s15 = scalar_lea.vmem %s135_s29, 16  ;;  %s14721_s9 = scalar_lea.vmem %s135_s29, 32 }
  0xa1   :  { %p14718_p5 = scmp.ne.s32.totalorder %s135_s29, %s14717_s15  ;;  %p14722_p6 = scmp.lt.s32.totalorder %s135_s29, %s135_s29 }
  0xa2   :  { %p14723_p7 = scmp.lt.s32.totalorder %s14721_s9, %s14717_s15 }
  0xa4   :  { %p14724_p8 = por %p14723_p7, %p14722_p6 }
  0xa6   :  { %p14725_p9 = pnand %p14724_p8, %p14718_p5 }
  0xa8   :  { %14728 = shalt.err (!%p14725_p9)
}
  0xa9   :  { %137 = dma.hbm_to_vmem [thread:$0]  %s15357_s10, 16, %s135_s29, [#allocation18]  }
  0xaa   :  { %14729 = dma.done.wait [#allocation4], 384  }
  0xab   :  { %14730 = vsyncadd [#allocation4], 4294966912 }
  0xac   :  { %14731 = dma.done.wait [#allocation6], 245776  }
  0xad   :  { %14732 = vsyncadd [#allocation6], 4294721520 }
  0xae   :  { %14733 = dma.done.wait [#allocation9], 8160  }
  0xaf   :  { %14734 = vsyncadd [#allocation9], 4294959136 }
  0xb0   :  { %14735 = dma.done.wait [#allocation12], 8672  }
  0xb1   :  { %14736 = vsyncadd [#allocation12], 4294958624 }
  0xb2   :  { %14737 = dma.done.wait [#allocation15], 528  }
  0xb3   :  { %14738 = vsyncadd [#allocation15], 4294966768 }
  0xb4   :  { %14739 = dma.done.wait [#allocation18], 16  }
  0xb5   :  { %14740 = vsyncadd [#allocation18], 4294967280  ;;  %v14755_v0 = vmov 0.0|0.0   ;;  %v14756_v1 = vmov 0.0   ;;  %vm14757_vm0 = vmmov 0   ;;  %v173_v2 = vld [vmem:[#allocation3] sm:$0xff] }
  0xb6   :  { %12397 = vmatprep.subr.bf16.mxu0 %v14755_v0  ;;  %168 = vst [vmem:[#allocation2] sm:$0xff] %v14756_v1  ;;  %169 = vst [vmem:[#allocation2 + $0x8] sm:$0xff] %v14756_v1  ;;  %12173 = vmatprep.mubr.msk.f32.mxu0 %vm14757_vm0, %v14756_v1  ;;  %v174_v3 = vld [vmem:[#allocation3 + $0x8] sm:$0xff]  ;;  %v280_v5 = vld [vmem:[#allocation7 + $0x80] sm:$0xff]  ;;  %vm183_vm1 = vcmask 195584   ;;  %vm258_vm2 = vcmask 261120  }
  0xb7   :  { %170 = vst [vmem:[#allocation2 + $0x10] sm:$0xff] %v14756_v1  ;;  %171 = vst [vmem:[#allocation2 + $0x18] sm:$0xff] %v14756_v1  ;;  %399 = vmatprep.mubr.f32.mxu1 %v14756_v1  ;;  %v12398_v4 = vpack.c.bf16 %v174_v3, %v173_v2  ;;  %v281_v6 = vld [vmem:[#allocation7 + $0x88] sm:$0xff]  ;;  %v175_v7 = vld [vmem:[#allocation3 + $0x10] sm:$0xff]  ;;  %vm485_vm3 = vcmask 130048   ;;  %vm564_vm4 = vcmask 392448  }
  0xb8   :  { %v12400_v8 = vpack.c.bf16 %v281_v6, %v280_v5  ;;  %v264_v9 = vld [vmem:[#allocation7] sm:$0xff]  ;;  %v265_v10 = vld [vmem:[#allocation7 + $0x8] sm:$0xff]  ;;  %v282_v18 = vld [vmem:[#allocation7 + $0x90] sm:$0xff]  ;;  %s14759_s5 = smov 48   ;;  %vm873_vm5 = vcmask 523648   ;;  %s14760_s27 = smov 64  }
  0xb9   :  { %v312_v11 = vld [vmem:[#allocation7 + $0x180] sm:$0xff]  ;;  %12399 = vmatpush3.bf16.msra.mxu0 %v12398_v4  ;;  %v12402_v13 = vpack.c.bf16 %v265_v10, %v264_v9  ;;  %v313_v14 = vld [vmem:[#allocation7 + $0x188] sm:$0xff]  ;;  %v283_v19 = vld [vmem:[#allocation7 + $0x98] sm:$0xff]  ;;  %vm1182_vm6 = vcmask 654848   ;;  %s14761_s16 = smov 80   ;;  %vm1491_vm7 = vcmask 786048  }
  0xba   :  { %v172_v12 = vld [vmem:[%s15347_s0] sm:$0xff]  ;;  %12171 = vmatprep.subr.mxu0 %v14756_v1  ;;  %12401 = vmatprep.subr.bf16.mxu1 %v12400_v8  ;;  %v12432_v17 = vpack.c.bf16 %v313_v14, %v312_v11  ;;  %v266_v20 = vld [vmem:[#allocation7 + $0x10] sm:$0xff]  ;;  %v12404_v22 = vpack.c.bf16 %v283_v19, %v282_v18  ;;  %v267_v23 = vld [vmem:[#allocation7 + $0x18] sm:$0xff]  ;;  %s14758_s0 = smov 32   ;;  %s14762_s4 = smov 96   ;;  %vm1800_vm8 = vcmask 917248  }
  0xbb   :  { %v296_v15 = vld [vmem:[#allocation7 + $0x100] sm:$0xff]  ;;  %v297_v16 = vld [vmem:[#allocation7 + $0x108] sm:$0xff]  ;;  %12403 = vmatpush3.bf16.msra.mxu1 %v12402_v13  ;;  %v314_v24 = vld [vmem:[#allocation7 + $0x190] sm:$0xff]  ;;  %v12406_v26 = vpack.c.bf16 %v267_v23, %v266_v20  ;;  %s14763_s20 = smov 112   ;;  %vm2109_vm9 = vcmask 1048448   ;;  %vm2722_vm10 = vcmask 261248  }
  0xbc   :  { %v12434_v21 = vpack.c.bf16 %v297_v16, %v296_v15  ;;  %v315_v25 = vld [vmem:[#allocation7 + $0x198] sm:$0xff]  ;;  %v298_v28 = vld [vmem:[#allocation7 + $0x110] sm:$0xff]  ;;  %v284_v30 = vld [vmem:[#allocation7 + $0xa0] sm:$0xff]  ;;  %12405 = vmatprep.subr.bf16.mxu1 %v12404_v22 }
  0xbd   :  { %v12436_v27 = vpack.c.bf16 %v315_v25, %v314_v24  ;;  %v299_v29 = vld [vmem:[#allocation7 + $0x118] sm:$0xff]  ;;  %12172 = vmatpush3.msra.mxu0 %v175_v7  ;;  %v285_v31 = vld [vmem:[#allocation7 + $0xa8] sm:$0xff]  ;;  %v268_v32 = vld [vmem:[#allocation7 + $0x20] sm:$0xff] }
  0xbe   :  { %v269_v33 = vld [vmem:[#allocation7 + $0x28] sm:$0xff]  ;;  %12174 = vmatmul.mubr.msk.f32.vlgmr.msra.gmra.mrb[0].mxu0 %vm183_vm1, %v172_v12  ;;  %12433 = vmatprep.subr.bf16.mxu0 %v12432_v17  ;;  %v12408_v34 = vpack.c.bf16 %v285_v31, %v284_v30  ;;  %v316_v35 = vld [vmem:[#allocation7 + $0x1a0] sm:$0xff]  ;;  %v12438_v37 = vpack.c.bf16 %v299_v29, %v298_v28  ;;  %v286_v40 = vld [vmem:[#allocation7 + $0xb0] sm:$0xff] }
  0xbf   :  { %v317_v36 = vld [vmem:[#allocation7 + $0x1a8] sm:$0xff]  ;;  %12435 = vmatpush3.bf16.msra.mxu0 %v12434_v21  ;;  %12407 = vmatpush3.bf16.msra.mxu1 %v12406_v26  ;;  %v12410_v38 = vpack.c.bf16 %v269_v33, %v268_v32  ;;  %v300_v39 = vld [vmem:[#allocation7 + $0x120] sm:$0xff]  ;;  %v287_v41 = vld [vmem:[#allocation7 + $0xb8] sm:$0xff] }
  0xc0   :  { %12437 = vmatprep.subr.bf16.mxu0 %v12436_v27  ;;  %12409 = vmatprep.subr.bf16.mxu1 %v12408_v34  ;;  %v12440_v42 = vpack.c.bf16 %v317_v36, %v316_v35  ;;  %v301_v43 = vld [vmem:[#allocation7 + $0x128] sm:$0xff]  ;;  %v12412_v44 = vpack.c.bf16 %v287_v41, %v286_v40  ;;  %v270_v45 = vld [vmem:[#allocation7 + $0x30] sm:$0xff]  ;;  %v271_v46 = vld [vmem:[#allocation7 + $0x38] sm:$0xff] }
  0xc1   :  { %v318_v47 = vld [vmem:[#allocation7 + $0x1b0] sm:$0xff]  ;;  %v319_v48 = vld [vmem:[#allocation7 + $0x1b8] sm:$0xff]  ;;  %469 = vmatprep.mubr.f32.mxu0 %v14756_v1  ;;  %v288_v49 = vld [vmem:[#allocation7 + $0xc0] sm:$0xff]  ;;  %v12442_v51 = vpack.c.bf16 %v301_v43, %v300_v39  ;;  %v12414_v52 = vpack.c.bf16 %v271_v46, %v270_v45 }
  0xc2   :  { %v289_v50 = vld [vmem:[#allocation7 + $0xc8] sm:$0xff]  ;;  %v302_v53 = vld [vmem:[#allocation7 + $0x130] sm:$0xff]  ;;  %v12444_v54 = vpack.c.bf16 %v319_v48, %v318_v47  ;;  %v303_v55 = vld [vmem:[#allocation7 + $0x138] sm:$0xff] }
  0xc3   :  { %12439 = vmatpush3.bf16.msra.mxu0 %v12438_v37  ;;  %12411 = vmatpush3.bf16.msra.mxu1 %v12410_v38  ;;  %v12416_v56 = vpack.c.bf16 %v289_v50, %v288_v49  ;;  %v272_v57 = vld [vmem:[#allocation7 + $0x40] sm:$0xff]  ;;  %v273_v58 = vld [vmem:[#allocation7 + $0x48] sm:$0xff]  ;;  %v12446_v61 = vpack.c.bf16 %v303_v55, %v302_v53  ;;  %v290_v5 = vld [vmem:[#allocation7 + $0xd0] sm:$0xff] }
  0xc4   :  { %12441 = vmatprep.subr.bf16.mxu0 %v12440_v42  ;;  %12413 = vmatprep.subr.bf16.mxu1 %v12412_v44  ;;  %v320_v59 = vld [vmem:[#allocation7 + $0x1c0] sm:$0xff]  ;;  %v321_v60 = vld [vmem:[#allocation7 + $0x1c8] sm:$0xff]  ;;  %v12418_v62 = vpack.c.bf16 %v273_v58, %v272_v57  ;;  %v291_v6 = vld [vmem:[#allocation7 + $0xd8] sm:$0xff] }
  0xc5   :  { %v12448_v63 = vpack.c.bf16 %v321_v60, %v320_v59  ;;  %v304_v2 = vld [vmem:[#allocation7 + $0x140] sm:$0xff]  ;;  %v305_v3 = vld [vmem:[#allocation7 + $0x148] sm:$0xff]  ;;  %v12420_v7 = vpack.c.bf16 %v291_v6, %v290_v5  ;;  %v274_v8 = vld [vmem:[#allocation7 + $0x50] sm:$0xff] }
  0xc6   :  { %v12450_v4 = vpack.c.bf16 %v305_v3, %v304_v2  ;;  %v275_v9 = vld [vmem:[#allocation7 + $0x58] sm:$0xff]  ;;  %v322_v10 = vld [vmem:[#allocation7 + $0x1d0] sm:$0xff]  ;;  %v292_v17 = vld [vmem:[#allocation7 + $0xe0] sm:$0xff] }
  0xc7   :  { %12443 = vmatpush3.bf16.msra.mxu0 %v12442_v51  ;;  %12415 = vmatpush3.bf16.msra.mxu1 %v12414_v52  ;;  %v12422_v11 = vpack.c.bf16 %v275_v9, %v274_v8  ;;  %v323_v12 = vld [vmem:[#allocation7 + $0x1d8] sm:$0xff]  ;;  %v306_v13 = vld [vmem:[#allocation7 + $0x150] sm:$0xff]  ;;  %v293_v18 = vld [vmem:[#allocation7 + $0xe8] sm:$0xff] }
  0xc8   :  { %12445 = vmatprep.subr.bf16.mxu0 %v12444_v54  ;;  %12417 = vmatprep.subr.bf16.mxu1 %v12416_v56  ;;  %v307_v14 = vld [vmem:[#allocation7 + $0x158] sm:$0xff]  ;;  %v12452_v15 = vpack.c.bf16 %v323_v12, %v322_v10  ;;  %v12424_v19 = vpack.c.bf16 %v293_v18, %v292_v17  ;;  %v276_v20 = vld [vmem:[#allocation7 + $0x60] sm:$0xff]  ;;  %v277_v21 = vld [vmem:[#allocation7 + $0x68] sm:$0xff] }
  0xc9   :  { %v12454_v16 = vpack.c.bf16 %v307_v14, %v306_v13  ;;  %v324_v22 = vld [vmem:[#allocation7 + $0x1e0] sm:$0xff]  ;;  %v12426_v23 = vpack.c.bf16 %v277_v21, %v276_v20  ;;  %v325_v24 = vld [vmem:[#allocation7 + $0x1e8] sm:$0xff]  ;;  %v294_v29 = vld [vmem:[#allocation7 + $0xf0] sm:$0xff] }
  0xca   :  { %v308_v25 = vld [vmem:[#allocation7 + $0x160] sm:$0xff]  ;;  %v309_v26 = vld [vmem:[#allocation7 + $0x168] sm:$0xff]  ;;  %v12456_v27 = vpack.c.bf16 %v325_v24, %v324_v22  ;;  %v295_v30 = vld [vmem:[#allocation7 + $0xf8] sm:$0xff] }
  0xcb   :  { %12447 = vmatpush3.bf16.msra.mxu0 %v12446_v61  ;;  %12419 = vmatpush3.bf16.msra.mxu1 %v12418_v62  ;;  %v12458_v28 = vpack.c.bf16 %v309_v26, %v308_v25  ;;  %v278_v31 = vld [vmem:[#allocation7 + $0x70] sm:$0xff]  ;;  %v12428_v32 = vpack.c.bf16 %v295_v30, %v294_v29  ;;  %v279_v33 = vld [vmem:[#allocation7 + $0x78] sm:$0xff]  ;;  %v477_v51 = vld [vmem:[#allocation10 + $0x8] sm:$0xff] }
  0xcc   :  { %12449 = vmatprep.subr.bf16.mxu0 %v12448_v63  ;;  %12421 = vmatprep.subr.bf16.mxu1 %v12420_v7  ;;  %v326_v34 = vld [vmem:[#allocation7 + $0x1f0] sm:$0xff]  ;;  %v327_v35 = vld [vmem:[#allocation7 + $0x1f8] sm:$0xff]  ;;  %v12430_v36 = vpack.c.bf16 %v279_v33, %v278_v31  ;;  %v9805_v54 = vld [vmem:[#allocation8] ss:$0 sm:$0xff] }
  0xcd   :  { %v12460_v37 = vpack.c.bf16 %v327_v35, %v326_v34  ;;  %v310_v38 = vld [vmem:[#allocation7 + $0x170] sm:$0xff]  ;;  %v311_v39 = vld [vmem:[#allocation7 + $0x178] sm:$0xff]  ;;  %v587_v60 = vld [vmem:[#allocation7 + $0x280] sm:$0xff] }
  0xce   :  { %v12462_v40 = vpack.c.bf16 %v311_v39, %v310_v38  ;;  %v9803_v41 = vld [vmem:[#allocation5] ss:$0 sm:$0xff]  ;;  %v588_v61 = vld [vmem:[#allocation7 + $0x288] sm:$0xff]  ;;  %v571_v62 = vld [vmem:[#allocation7 + $0x200] sm:$0xff] }
  0xcf   :  { %12451 = vmatpush3.bf16.msra.mxu0 %v12450_v4  ;;  %12423 = vmatpush3.bf16.msra.mxu1 %v12422_v11  ;;  %v476_v50 = vld [vmem:[#allocation10] sm:$0xff]  ;;  %v12467_v63 = vpack.c.bf16 %v588_v61, %v587_v60  ;;  %v572_v2 = vld [vmem:[#allocation7 + $0x208] sm:$0xff]  ;;  %v589_v9 = vld [vmem:[#allocation7 + $0x290] sm:$0xff] }
  0xd0   :  { %12453 = vmatprep.subr.bf16.mxu0 %v12452_v15  ;;  %12425 = vmatprep.subr.bf16.mxu1 %v12424_v19  ;;  %v12465_v52 = vpack.c.bf16 %v477_v51, %v476_v50  ;;  %v619_v3 = vld [vmem:[#allocation7 + $0x380] sm:$0xff]  ;;  %v620_v4 = vld [vmem:[#allocation7 + $0x388] sm:$0xff]  ;;  %v12469_v5 = vpack.c.bf16 %v572_v2, %v571_v62  ;;  %v590_v11 = vld [vmem:[#allocation7 + $0x298] sm:$0xff] }
  0xd1   :  { %v12499_v6 = vpack.c.bf16 %v620_v4, %v619_v3  ;;  %v603_v7 = vld [vmem:[#allocation7 + $0x300] sm:$0xff]  ;;  %v604_v8 = vld [vmem:[#allocation7 + $0x308] sm:$0xff]  ;;  %v573_v12 = vld [vmem:[#allocation7 + $0x210] sm:$0xff]  ;;  %v12471_v14 = vpack.c.bf16 %v590_v11, %v589_v9 }
  0xd2   :  { %v12501_v10 = vpack.c.bf16 %v604_v8, %v603_v7  ;;  %v574_v13 = vld [vmem:[#allocation7 + $0x218] sm:$0xff]  ;;  %v605_v18 = vld [vmem:[#allocation7 + $0x310] sm:$0xff]  ;;  %v591_v21 = vld [vmem:[#allocation7 + $0x2a0] sm:$0xff] }
  0xd3   :  { %12455 = vmatpush3.bf16.msra.mxu0 %v12454_v16  ;;  %12427 = vmatpush3.bf16.msra.mxu1 %v12426_v23  ;;  %v12473_v15 = vpack.c.bf16 %v574_v13, %v573_v12  ;;  %v621_v16 = vld [vmem:[#allocation7 + $0x390] sm:$0xff]  ;;  %v622_v17 = vld [vmem:[#allocation7 + $0x398] sm:$0xff]  ;;  %v592_v22 = vld [vmem:[#allocation7 + $0x2a8] sm:$0xff] }
  0xd4   :  { %12457 = vmatprep.subr.bf16.mxu0 %v12456_v27  ;;  %12429 = vmatprep.subr.bf16.mxu1 %v12428_v32  ;;  %v12503_v19 = vpack.c.bf16 %v622_v17, %v621_v16  ;;  %v606_v20 = vld [vmem:[#allocation7 + $0x318] sm:$0xff]  ;;  %v12475_v24 = vpack.c.bf16 %v592_v22, %v591_v21  ;;  %v575_v25 = vld [vmem:[#allocation7 + $0x220] sm:$0xff]  ;;  %v576_v26 = vld [vmem:[#allocation7 + $0x228] sm:$0xff] }
  0xd5   :  { %v12505_v23 = vpack.c.bf16 %v606_v20, %v605_v18  ;;  %v623_v27 = vld [vmem:[#allocation7 + $0x3a0] sm:$0xff]  ;;  %v608_v30 = vld [vmem:[#allocation7 + $0x328] sm:$0xff]  ;;  %v12477_v31 = vpack.c.bf16 %v576_v26, %v575_v25  ;;  %v593_v33 = vld [vmem:[#allocation7 + $0x2b0] sm:$0xff] }
  0xd6   :  { %v607_v29 = vld [vmem:[#allocation7 + $0x320] sm:$0xff]  ;;  %v594_v34 = vld [vmem:[#allocation7 + $0x2b8] sm:$0xff]  ;;  %v577_v35 = vld [vmem:[#allocation7 + $0x230] sm:$0xff] }
  0xd7   :  { %12459 = vmatpush3.bf16.msra.mxu0 %v12458_v28  ;;  %12431 = vmatpush3.bf16.msra.mxu1 %v12430_v36  ;;  %v624_v28 = vld [vmem:[#allocation7 + $0x3a8] sm:$0xff]  ;;  %v12509_v36 = vpack.c.bf16 %v608_v30, %v607_v29  ;;  %v578_v38 = vld [vmem:[#allocation7 + $0x238] sm:$0xff]  ;;  %v625_v39 = vld [vmem:[#allocation7 + $0x3b0] sm:$0xff] }
  0xd8   :  { %12461 = vmatprep.subr.bf16.mxu0 %v12460_v37  ;;  %12464 = vmatprep.subr.bf16.mxu1 %v14755_v0  ;;  %v12507_v32 = vpack.c.bf16 %v624_v28, %v623_v27  ;;  %v12479_v37 = vpack.c.bf16 %v594_v34, %v593_v33  ;;  %v579_v51 = vld [vmem:[#allocation7 + $0x240] sm:$0xff]  ;;  %v582_v2 = vld [vmem:[#allocation7 + $0x258] sm:$0xff]  ;;  %v613_v4 = vld [vmem:[#allocation7 + $0x350] sm:$0xff] }
  0xd9   :  { %v599_v8 = vld [vmem:[#allocation7 + $0x2e0] sm:$0xff]  ;;  %v600_v9 = vld [vmem:[#allocation7 + $0x2e8] sm:$0xff]  ;;  %v601_v20 = vld [vmem:[#allocation7 + $0x2f0] sm:$0xff] }
  0xda   :  { %v583_v11 = vld [vmem:[#allocation7 + $0x260] sm:$0xff]  ;;  %v584_v12 = vld [vmem:[#allocation7 + $0x268] sm:$0xff]  ;;  %v602_v21 = vld [vmem:[#allocation7 + $0x2f8] sm:$0xff] }
  0xdb   :  { %12463 = vmatpush3.bf16.msra.mxu0 %v12462_v40  ;;  %v626_v40 = vld [vmem:[#allocation7 + $0x3b8] sm:$0xff]  ;;  %v631_v13 = vld [vmem:[#allocation7 + $0x3e0] sm:$0xff]  ;;  %v616_v17 = vld [vmem:[#allocation7 + $0x368] sm:$0xff] }
  0xdc   :  { %12500 = vmatprep.subr.bf16.mxu0 %v12499_v6  ;;  %v615_v16 = vld [vmem:[#allocation7 + $0x360] sm:$0xff]  ;;  %v585_v22 = vld [vmem:[#allocation7 + $0x270] sm:$0xff]  ;;  %v634_v26 = vld [vmem:[#allocation7 + $0x3f8] sm:$0xff] }
  0xdd   :  { %v633_v25 = vld [vmem:[#allocation7 + $0x3f0] sm:$0xff]  ;;  %v618_v30 = vld [vmem:[#allocation7 + $0x378] sm:$0xff] }
  0xde   :  { %470 = vmatmul.mubr.f32.vlgmr.msra.gmra.mrb[2].mxu0 %v14756_v1  ;;  %v12527_v28 = vpack.c.bf16 %v634_v26, %v633_v25  ;;  %v617_v29 = vld [vmem:[#allocation7 + $0x370] sm:$0xff]  ;;  %v903_v26 = vld [vmem:[#allocation7 + $0x4b8] sm:$0xff] }
  0xdf   :  { %777 = vmatprep.mubr.f32.mxu0 %v14756_v1  ;;  %12502 = vmatpush3.bf16.msra.mxu0 %v12501_v10  ;;  %v12491_v10 = vpack.c.bf16 %v600_v9, %v599_v8  ;;  %v930_v8 = vld [vmem:[#allocation7 + $0x590] sm:$0xff]  ;;  %v931_v9 = vld [vmem:[#allocation7 + $0x598] sm:$0xff] }
  0xe0   :  { %12504 = vmatprep.subr.bf16.mxu0 %v12503_v19  ;;  %v12525_v19 = vpack.c.bf16 %v616_v17, %v615_v16  ;;  %v884_v17 = vld [vmem:[#allocation7 + $0x420] sm:$0xff]  ;;  %v902_v25 = vld [vmem:[#allocation7 + $0x4b0] sm:$0xff] }
  0xe3   :  { %12506 = vmatpush3.bf16.msra.mxu0 %v12505_v23  ;;  %v12495_v23 = vpack.c.bf16 %v602_v21, %v601_v20  ;;  %v933_v20 = vld [vmem:[#allocation7 + $0x5a8] sm:$0xff]  ;;  %v916_v21 = vld [vmem:[#allocation7 + $0x520] sm:$0xff] }
  0xe4   :  { %12508 = vmatprep.subr.bf16.mxu0 %v12507_v32  ;;  %v9806_v32 = vld [vmem:[#allocation11] ss:$0 sm:$0xff] }
  0xe7   :  { %12510 = vmatpush3.bf16.msra.mxu0 %v12509_v36 }
 0x191   :  { %v253_v42 = vpop.f32.mrb[0].mxu0 }
 0x192   :  { %v254_v43 = vadd.f32 %v9803_v41, %v253_v42  ;;  %v12175_v44 = vpop.f32.mrb[1].mxu0  ;;  %v12511_v41 = vpack.c.bf16 %v626_v40, %v625_v39  ;;  %v609_v42 = vld [vmem:[#allocation7 + $0x330] sm:$0xff] }
 0x193   :  { %v595_v44 = vld [vmem:[#allocation7 + $0x2c0] sm:$0xff] }
 0x194   :  { %v257_v45 = vmax.f32 %v254_v43, 0.0  ;;  %v610_v43 = vld [vmem:[#allocation7 + $0x338] sm:$0xff]  ;;  %12512 = vmatprep.subr.bf16.mxu0 %v12511_v41 }
 0x196   :  { %259 = vst.msk [vmem:[#allocation2] sm:$0xff] %vm258_vm2, %v257_v45  ;;  %v596_v45 = vld [vmem:[#allocation7 + $0x2c8] sm:$0xff] }
 0x197   :  { %v12483_v50 = vpack.c.bf16 %v596_v45, %v595_v44 }
 0x19d   :  { %v260_v46 = vld [vmem:[#allocation2] sm:$0xff] }
 0x19e   :  { %400 = vmatmul.mubr.f32.vlgmr.msra.gmra.mrb[0].mxu1 %v260_v46  ;;  %v12481_v46 = vpack.c.bf16 %v578_v38, %v577_v35 }
 0x19f   :  { %12180 = vmatprep.mubr.msk.f32.mxu1 %vm14757_vm0, %v14756_v1  ;;  %12466 = vmatpush3.bf16.msra.mxu1 %v12465_v52  ;;  %v580_v52 = vld [vmem:[#allocation7 + $0x248] sm:$0xff] }
 0x1a0   :  { %12468 = vmatprep.subr.bf16.mxu1 %v12467_v63  ;;  %v12485_v60 = vpack.c.bf16 %v580_v52, %v579_v51  ;;  %v581_v63 = vld [vmem:[#allocation7 + $0x250] sm:$0xff]  ;;  %v896_v52 = vld [vmem:[#allocation7 + $0x480] sm:$0xff] }
 0x1a1   :  { %v12489_v6 = vpack.c.bf16 %v582_v2, %v581_v63  ;;  %v898_v63 = vld [vmem:[#allocation7 + $0x490] sm:$0xff] }
 0x1b1   :  { %v9969_v47 = vpop.f32.mrb[2].mxu0 }
 0x1b2   :  { %v9970_v48 = vpop.f32.mrb[3].mxu0 }
 0x1b3   :  { %v9971_v49 = vadd.f32 %v9970_v48, %v9969_v47  ;;  %v627_v47 = vld [vmem:[#allocation7 + $0x3c0] sm:$0xff]  ;;  %v628_v48 = vld [vmem:[#allocation7 + $0x3c8] sm:$0xff] }
 0x271   :  { %v9934_v53 = vpop.f32.mrb[0].mxu1 }
 0x272   :  { %v9935_v55 = vpop.f32.mrb[1].mxu1 }
 0x273   :  { %v9936_v56 = vadd.f32 %v9935_v55, %v9934_v53  ;;  %v611_v53 = vld [vmem:[#allocation7 + $0x340] sm:$0xff]  ;;  %v612_v55 = vld [vmem:[#allocation7 + $0x348] sm:$0xff] }
 0x274   :  { %v12517_v61 = vpack.c.bf16 %v612_v55, %v611_v53  ;;  %v897_v53 = vld [vmem:[#allocation7 + $0x488] sm:$0xff] }
 0x275   :  { %v402_v57 = vadd.f32 %v9936_v56, %v9805_v54  ;;  %v12515_v54 = vpack.c.bf16 %v628_v48, %v627_v47  ;;  %v597_v56 = vld [vmem:[#allocation7 + $0x2d0] sm:$0xff]  ;;  %v12534_v55 = vpack.c.bf16 %v897_v53, %v896_v52 }
 0x277   :  { %v472_v58 = vadd.f32 %v9971_v49, %v402_v57  ;;  %v12513_v49 = vpack.c.bf16 %v610_v43, %v609_v42  ;;  %v598_v57 = vld [vmem:[#allocation7 + $0x2d8] sm:$0xff]  ;;  %v785_v42 = vld [vmem:[#allocation10 + $0x10] sm:$0xff] }
 0x278   :  { %v12487_v62 = vpack.c.bf16 %v598_v57, %v597_v56  ;;  %v786_v43 = vld [vmem:[#allocation10 + $0x18] sm:$0xff]  ;;  %v881_v56 = vld [vmem:[#allocation7 + $0x408] sm:$0xff]  ;;  %v928_v57 = vld [vmem:[#allocation7 + $0x580] sm:$0xff] }
 0x279   :  { %v475_v59 = vmax.f32 %v472_v58, 0.0  ;;  %v629_v58 = vld [vmem:[#allocation7 + $0x3d0] sm:$0xff]  ;;  %12514 = vmatpush3.bf16.msra.mxu0 %v12513_v49  ;;  %v12532_v44 = vpack.c.bf16 %v786_v43, %v785_v42  ;;  %v888_v43 = vld [vmem:[#allocation7 + $0x440] sm:$0xff] }
 0x27a   :  { %12516 = vmatprep.subr.bf16.mxu0 %v12515_v54  ;;  %v880_v54 = vld [vmem:[#allocation7 + $0x400] sm:$0xff] }
 0x27b   :  { %12181 = vmatmul.mubr.msk.f32.vlgmr.msra.gmra.mrb[2].mxu1 %vm485_vm3, %v475_v59  ;;  %v630_v59 = vld [vmem:[#allocation7 + $0x3d8] sm:$0xff] }
 0x27c   :  { %707 = vmatprep.mubr.f32.mxu1 %v14756_v1  ;;  %12470 = vmatpush3.bf16.msra.mxu1 %v12469_v5  ;;  %v12519_v3 = vpack.c.bf16 %v630_v59, %v629_v58  ;;  %v614_v5 = vld [vmem:[#allocation7 + $0x358] sm:$0xff]  ;;  %v929_v58 = vld [vmem:[#allocation7 + $0x588] sm:$0xff]  ;;  %v12536_v59 = vpack.c.bf16 %v881_v56, %v880_v54 }
 0x27d   :  { %12472 = vmatprep.subr.bf16.mxu1 %v12471_v14  ;;  %12518 = vmatpush3.bf16.msra.mxu0 %v12517_v61  ;;  %v12521_v7 = vpack.c.bf16 %v614_v5, %v613_v4  ;;  %v12493_v14 = vpack.c.bf16 %v584_v12, %v583_v11  ;;  %v912_v61 = vld [vmem:[#allocation7 + $0x500] sm:$0xff]  ;;  %v882_v4 = vld [vmem:[#allocation7 + $0x410] sm:$0xff]  ;;  %v883_v5 = vld [vmem:[#allocation7 + $0x418] sm:$0xff]  ;;  %v12570_v11 = vpack.c.bf16 %v931_v9, %v930_v8 }
 0x27e   :  { %12520 = vmatprep.subr.bf16.mxu0 %v12519_v3  ;;  %v899_v3 = vld [vmem:[#allocation7 + $0x498] sm:$0xff]  ;;  %v924_v8 = vld [vmem:[#allocation7 + $0x560] sm:$0xff]  ;;  %v925_v9 = vld [vmem:[#allocation7 + $0x568] sm:$0xff] }
 0x27f   :  { %v915_v12 = vld [vmem:[#allocation7 + $0x518] sm:$0xff] }
 0x280   :  { %12474 = vmatpush3.bf16.msra.mxu1 %v12473_v15  ;;  %v632_v15 = vld [vmem:[#allocation7 + $0x3e8] sm:$0xff]  ;;  %v891_v56 = vld [vmem:[#allocation7 + $0x458] sm:$0xff] }
 0x281   :  { %12476 = vmatprep.subr.bf16.mxu1 %v12475_v24  ;;  %12522 = vmatpush3.bf16.msra.mxu0 %v12521_v7  ;;  %v12523_v18 = vpack.c.bf16 %v632_v15, %v631_v13  ;;  %v586_v24 = vld [vmem:[#allocation7 + $0x278] sm:$0xff]  ;;  %v12540_v7 = vpack.c.bf16 %v883_v5, %v882_v4  ;;  %v900_v13 = vld [vmem:[#allocation7 + $0x4a0] sm:$0xff]  ;;  %v893_v4 = vld [vmem:[#allocation7 + $0x468] sm:$0xff] }
 0x282   :  { %v12497_v27 = vpack.c.bf16 %v586_v24, %v585_v22  ;;  %v917_v22 = vld [vmem:[#allocation7 + $0x528] sm:$0xff]  ;;  %v940_v5 = vld [vmem:[#allocation7 + $0x5e0] sm:$0xff] }
 0x283   :  { %12524 = vmatprep.subr.bf16.mxu0 %v12523_v18  ;;  %v885_v18 = vld [vmem:[#allocation7 + $0x428] sm:$0xff] }
 0x284   :  { %12478 = vmatpush3.bf16.msra.mxu1 %v12477_v31  ;;  %v12529_v31 = vpack.c.bf16 %v618_v30, %v617_v29  ;;  %v12546_v29 = vpack.c.bf16 %v903_v26, %v902_v25  ;;  %v887_v30 = vld [vmem:[#allocation7 + $0x438] sm:$0xff] }
 0x285   :  { %12480 = vmatprep.subr.bf16.mxu1 %v12479_v37  ;;  %12526 = vmatpush3.bf16.msra.mxu0 %v12525_v19  ;;  %v932_v19 = vld [vmem:[#allocation7 + $0x5a0] sm:$0xff] }
 0x286   :  { %12528 = vmatprep.subr.bf16.mxu0 %v12527_v28  ;;  %v12574_v24 = vpack.c.bf16 %v933_v20, %v932_v19  ;;  %v12576_v28 = vpack.c.bf16 %v917_v22, %v916_v21  ;;  %v926_v21 = vld [vmem:[#allocation7 + $0x570] sm:$0xff]  ;;  %v927_v22 = vld [vmem:[#allocation7 + $0x578] sm:$0xff] }
 0x288   :  { %12482 = vmatpush3.bf16.msra.mxu1 %v12481_v46  ;;  %v9808_v46 = vld [vmem:[#allocation8 + $0x1] ss:$0 sm:$0xff] }
 0x289   :  { %12484 = vmatprep.subr.bf16.mxu1 %v12483_v50  ;;  %12530 = vmatpush3.bf16.msra.mxu0 %v12529_v31  ;;  %v934_v31 = vld [vmem:[#allocation7 + $0x5b0] sm:$0xff] }
 0x28a   :  { %12535 = vmatprep.subr.bf16.mxu0 %v12534_v55  ;;  %v890_v55 = vld [vmem:[#allocation7 + $0x450] sm:$0xff] }
 0x28c   :  { %12486 = vmatpush3.bf16.msra.mxu1 %v12485_v60  ;;  %778 = vmatmul.mubr.f32.vlgmr.msra.gmra.mrb[4].mxu0 %v14756_v1  ;;  %v12566_v60 = vpack.c.bf16 %v929_v58, %v928_v57  ;;  %v922_v58 = vld [vmem:[#allocation7 + $0x550] sm:$0xff] }
 0x28d   :  { %12488 = vmatprep.subr.bf16.mxu1 %v12487_v62  ;;  %1016 = vmatprep.mubr.f32.mxu0 %v14756_v1  ;;  %v913_v62 = vld [vmem:[#allocation7 + $0x508] sm:$0xff] }
 0x28e   :  { %v12568_v2 = vpack.c.bf16 %v913_v62, %v912_v61  ;;  %12537 = vmatpush3.bf16.msra.mxu0 %v12536_v59  ;;  %v923_v59 = vld [vmem:[#allocation7 + $0x558] sm:$0xff]  ;;  %v908_v62 = vld [vmem:[#allocation7 + $0x4e0] sm:$0xff] }
 0x28f   :  { %v12588_v61 = vpack.c.bf16 %v923_v59, %v922_v58  ;;  %v1191_v58 = vld [vmem:[#allocation7 + $0x610] sm:$0xff]  ;;  %v1192_v59 = vld [vmem:[#allocation7 + $0x618] sm:$0xff] }
 0x290   :  { %12490 = vmatpush3.bf16.msra.mxu1 %v12489_v6  ;;  %v12538_v6 = vpack.c.bf16 %v899_v3, %v898_v63  ;;  %v909_v63 = vld [vmem:[#allocation7 + $0x4e8] sm:$0xff]  ;;  %v892_v3 = vld [vmem:[#allocation7 + $0x460] sm:$0xff] }
 0x291   :  { %12492 = vmatprep.subr.bf16.mxu1 %v12491_v10  ;;  %v914_v10 = vld [vmem:[#allocation7 + $0x510] sm:$0xff] }
 0x292   :  { %12539 = vmatprep.subr.bf16.mxu0 %v12538_v6  ;;  %v12572_v15 = vpack.c.bf16 %v915_v12, %v914_v10  ;;  %v12560_v6 = vpack.c.bf16 %v893_v4, %v892_v3  ;;  %v910_v12 = vld [vmem:[#allocation7 + $0x4f0] sm:$0xff]  ;;  %v1224_v3 = vld [vmem:[#allocation7 + $0x718] sm:$0xff]  ;;  %v1209_v4 = vld [vmem:[#allocation7 + $0x6a0] sm:$0xff] }
 0x293   :  { %12541 = vmatpush3.bf16.msra.mxu0 %v12540_v7  ;;  %v941_v7 = vld [vmem:[#allocation7 + $0x5e8] sm:$0xff] }
 0x294   :  { %12494 = vmatpush3.bf16.msra.mxu1 %v12493_v14  ;;  %v901_v14 = vld [vmem:[#allocation7 + $0x4a8] sm:$0xff]  ;;  %v12590_v10 = vpack.c.bf16 %v941_v7, %v940_v5 }
 0x295   :  { %12496 = vmatprep.subr.bf16.mxu1 %v12495_v23  ;;  %v12542_v16 = vpack.c.bf16 %v901_v14, %v900_v13  ;;  %v12544_v23 = vpack.c.bf16 %v885_v18, %v884_v17  ;;  %v911_v13 = vld [vmem:[#allocation7 + $0x4f8] sm:$0xff]  ;;  %v894_v14 = vld [vmem:[#allocation7 + $0x470] sm:$0xff]  ;;  %v1210_v5 = vld [vmem:[#allocation7 + $0x6a8] sm:$0xff] }
 0x296   :  { %v942_v17 = vld [vmem:[#allocation7 + $0x5f0] sm:$0xff]  ;;  %v943_v18 = vld [vmem:[#allocation7 + $0x5f8] sm:$0xff]  ;;  %v12609_v7 = vpack.c.bf16 %v1210_v5, %v1209_v4 }
 0x297   :  { %12543 = vmatprep.subr.bf16.mxu0 %v12542_v16  ;;  %v895_v16 = vld [vmem:[#allocation7 + $0x478] sm:$0xff]  ;;  %v12594_v20 = vpack.c.bf16 %v943_v18, %v942_v17  ;;  %v1195_v18 = vld [vmem:[#allocation7 + $0x630] sm:$0xff] }
 0x298   :  { %12498 = vmatpush3.bf16.msra.mxu1 %v12497_v27  ;;  %v886_v27 = vld [vmem:[#allocation7 + $0x430] sm:$0xff]  ;;  %12545 = vmatpush3.bf16.msra.mxu0 %v12544_v23  ;;  %v12564_v19 = vpack.c.bf16 %v895_v16, %v894_v14  ;;  %v12596_v23 = vpack.c.bf16 %v927_v22, %v926_v21  ;;  %v1212_v17 = vld [vmem:[#allocation7 + $0x6b8] sm:$0xff] }
 0x299   :  { %12531 = vmatprep.subr.bf16.mxu1 %v14755_v0  ;;  %12547 = vmatprep.subr.bf16.mxu0 %v12546_v29  ;;  %v1211_v16 = vld [vmem:[#allocation7 + $0x6b0] sm:$0xff]  ;;  %v1196_v21 = vld [vmem:[#allocation7 + $0x638] sm:$0xff] }
 0x29a   :  { %v1243_v22 = vld [vmem:[#allocation7 + $0x7b0] sm:$0xff] }
 0x29b   :  { %v1203_v4 = vld [vmem:[#allocation7 + $0x670] sm:$0xff] }
 0x34e   :  { %v555_v33 = vpop.f32.mrb[2].mxu1 }
 0x34f   :  { %v556_v34 = vadd.f32 %v9806_v32, %v555_v33  ;;  %v12182_v35 = vpop.f32.mrb[3].mxu1  ;;  %v935_v32 = vld [vmem:[#allocation7 + $0x5b8] sm:$0xff] }
 0x350   :  { %v12578_v33 = vpack.c.bf16 %v935_v32, %v934_v31  ;;  %v919_v35 = vld [vmem:[#allocation7 + $0x538] sm:$0xff] }
 0x351   :  { %v559_v36 = vmax.f32 %v556_v34, 0.0  ;;  %v918_v34 = vld [vmem:[#allocation7 + $0x530] sm:$0xff] }
 0x353   :  { %561 = vrot.lane.b32.xlu0 %v559_v36, %s14758_s0  ;;  %v904_v36 = vld [vmem:[#allocation7 + $0x4c0] sm:$0xff] }
 0x35f   :  { %v10042_v39 = vpop.f32.mrb[4].mxu0 }
 0x360   :  { %v10043_v40 = vpop.f32.mrb[5].mxu0 }
 0x361   :  { %v10044_v41 = vadd.f32 %v10043_v40, %v10042_v39  ;;  %v936_v39 = vld [vmem:[#allocation7 + $0x5c0] sm:$0xff]  ;;  %v937_v40 = vld [vmem:[#allocation7 + $0x5c8] sm:$0xff] }
 0x3c5   :  { %v562_v37 = vpop.permute.xlu0 %561 }
 0x3c6   :  { %565 = vst.msk [vmem:[#allocation2] sm:$0xff] %vm564_vm4, %v562_v37  ;;  %v905_v37 = vld [vmem:[#allocation7 + $0x4c8] sm:$0xff] }
 0x3c7   :  { %v12550_v42 = vpack.c.bf16 %v905_v37, %v904_v36 }
 0x3cd   :  { %v566_v38 = vld [vmem:[#allocation2] sm:$0xff] }
 0x3ce   :  { %708 = vmatmul.mubr.f32.vlgmr.msra.gmra.mrb[4].mxu1 %v566_v38  ;;  %v12548_v38 = vpack.c.bf16 %v887_v30, %v886_v27 }
 0x3cf   :  { %12187 = vmatprep.mubr.msk.f32.mxu1 %vm14757_vm0, %v14756_v1  ;;  %12533 = vmatpush3.bf16.msra.mxu1 %v12532_v44  ;;  %v889_v44 = vld [vmem:[#allocation7 + $0x448] sm:$0xff] }
 0x3d0   :  { %12567 = vmatprep.subr.bf16.mxu1 %v12566_v60  ;;  %12549 = vmatpush3.bf16.msra.mxu0 %v12548_v38  ;;  %v12552_v52 = vpack.c.bf16 %v889_v44, %v888_v43  ;;  %v12556_v60 = vpack.c.bf16 %v891_v56, %v890_v55  ;;  %v9811_v38 = vld [vmem:[#allocation8 + $0x2] ss:$0 sm:$0xff]  ;;  %v1207_v55 = vld [vmem:[#allocation7 + $0x690] sm:$0xff] }
 0x3d1   :  { %12551 = vmatprep.subr.bf16.mxu0 %v12550_v42  ;;  %v1205_v44 = vld [vmem:[#allocation7 + $0x680] sm:$0xff] }
 0x3d4   :  { %12553 = vmatpush3.bf16.msra.mxu0 %v12552_v52 }
 0x4a1   :  { %v10007_v45 = vpop.f32.mrb[4].mxu1 }
 0x4a2   :  { %v10008_v47 = vpop.f32.mrb[5].mxu1 }
 0x4a3   :  { %v10009_v48 = vadd.f32 %v10008_v47, %v10007_v45  ;;  %v920_v45 = vld [vmem:[#allocation7 + $0x540] sm:$0xff]  ;;  %v921_v47 = vld [vmem:[#allocation7 + $0x548] sm:$0xff] }
 0x4a4   :  { %v12584_v53 = vpack.c.bf16 %v921_v47, %v920_v45  ;;  %v1206_v45 = vld [vmem:[#allocation7 + $0x688] sm:$0xff] }
 0x4a5   :  { %v710_v49 = vadd.f32 %v10009_v48, %v9808_v46  ;;  %v12582_v46 = vpack.c.bf16 %v937_v40, %v936_v39  ;;  %v906_v48 = vld [vmem:[#allocation7 + $0x4d0] sm:$0xff]  ;;  %v12601_v47 = vpack.c.bf16 %v1206_v45, %v1205_v44 }
 0x4a7   :  { %v780_v50 = vadd.f32 %v10044_v41, %v710_v49  ;;  %v12580_v41 = vpack.c.bf16 %v919_v35, %v918_v34  ;;  %v907_v49 = vld [vmem:[#allocation7 + $0x4d8] sm:$0xff]  ;;  %v1095_v35 = vld [vmem:[#allocation10 + $0x28] sm:$0xff] }
 0x4a8   :  { %v12554_v54 = vpack.c.bf16 %v907_v49, %v906_v48  ;;  %v1094_v34 = vld [vmem:[#allocation10 + $0x20] sm:$0xff]  ;;  %v1190_v48 = vld [vmem:[#allocation7 + $0x608] sm:$0xff] }
 0x4a9   :  { %v783_v51 = vmax.f32 %v780_v50, 0.0  ;;  %v938_v50 = vld [vmem:[#allocation7 + $0x5d0] sm:$0xff]  ;;  %v12599_v36 = vpack.c.bf16 %v1095_v35, %v1094_v34  ;;  %v1237_v49 = vld [vmem:[#allocation7 + $0x780] sm:$0xff]  ;;  %v1198_v35 = vld [vmem:[#allocation7 + $0x648] sm:$0xff] }
 0x4aa   :  { %12555 = vmatprep.subr.bf16.mxu0 %v12554_v54  ;;  %v1222_v54 = vld [vmem:[#allocation7 + $0x708] sm:$0xff]  ;;  %v1197_v34 = vld [vmem:[#allocation7 + $0x640] sm:$0xff] }
 0x4ab   :  { %12188 = vmatmul.mubr.msk.f32.vlgmr.msra.gmra.mrb[6].mxu1 %vm485_vm3, %v783_v51  ;;  %v939_v51 = vld [vmem:[#allocation7 + $0x5d8] sm:$0xff]  ;;  %12557 = vmatpush3.bf16.msra.mxu0 %v12556_v60  ;;  %v12607_v60 = vpack.c.bf16 %v1192_v59, %v1191_v58  ;;  %v1249_v58 = vld [vmem:[#allocation7 + $0x7e0] sm:$0xff] }
 0x4ac   :  { %1086 = vmatprep.mubr.f32.mxu1 %v14756_v1  ;;  %12569 = vmatpush3.bf16.msra.mxu1 %v12568_v2  ;;  %v12586_v57 = vpack.c.bf16 %v939_v51, %v938_v50  ;;  %v12558_v2 = vpack.c.bf16 %v909_v63, %v908_v62  ;;  %v1238_v50 = vld [vmem:[#allocation7 + $0x788] sm:$0xff]  ;;  %v1240_v62 = vld [vmem:[#allocation7 + $0x798] sm:$0xff]  ;;  %v1223_v63 = vld [vmem:[#allocation7 + $0x710] sm:$0xff] }
 0x4ad   :  { %12571 = vmatprep.subr.bf16.mxu1 %v12570_v11  ;;  %v12592_v11 = vpack.c.bf16 %v925_v9, %v924_v8  ;;  %v12633_v52 = vpack.c.bf16 %v1238_v50, %v1237_v49  ;;  %v1193_v8 = vld [vmem:[#allocation7 + $0x620] sm:$0xff]  ;;  %v1194_v9 = vld [vmem:[#allocation7 + $0x628] sm:$0xff]  ;;  %v1231_v49 = vld [vmem:[#allocation7 + $0x750] sm:$0xff] }
 0x4ae   :  { %12559 = vmatprep.subr.bf16.mxu0 %v12558_v2  ;;  %v12611_v14 = vpack.c.bf16 %v1194_v9, %v1193_v8  ;;  %v1232_v50 = vld [vmem:[#allocation7 + $0x758] sm:$0xff] }
 0x4af   :  { %12561 = vmatpush3.bf16.msra.mxu0 %v12560_v6  ;;  %v12639_v6 = vpack.c.bf16 %v1224_v3, %v1223_v63  ;;  %v1220_v3 = vld [vmem:[#allocation7 + $0x6f8] sm:$0xff] }
 0x4b0   :  { %12573 = vmatpush3.bf16.msra.mxu1 %v12572_v15  ;;  %v12562_v15 = vpack.c.bf16 %v911_v13, %v910_v12  ;;  %v1225_v12 = vld [vmem:[#allocation7 + $0x720] sm:$0xff]  ;;  %v1226_v13 = vld [vmem:[#allocation7 + $0x728] sm:$0xff]  ;;  %v1252_v8 = vld [vmem:[#allocation7 + $0x7f8] sm:$0xff] }
 0x4b1   :  { %12575 = vmatprep.subr.bf16.mxu1 %v12574_v24  ;;  %v9809_v24 = vld [vmem:[#allocation11 + $0x1] ss:$0 sm:$0xff] }
 0x4b2   :  { %12563 = vmatprep.subr.bf16.mxu0 %v12562_v15 }
 0x4b3   :  { %12565 = vmatpush3.bf16.msra.mxu0 %v12564_v19  ;;  %v12643_v19 = vpack.c.bf16 %v1226_v13, %v1225_v12  ;;  %v1236_v12 = vld [vmem:[#allocation7 + $0x778] sm:$0xff] }
 0x4b4   :  { %12577 = vmatpush3.bf16.msra.mxu1 %v12576_v28  ;;  %12634 = vmatprep.subr.bf16.mxu0 %v12633_v52  ;;  %v12655_v52 = vpack.c.bf16 %v1232_v50, %v1231_v49  ;;  %v1500_v49 = vld [vmem:[#allocation7 + $0x810] sm:$0xff]  ;;  %v1501_v50 = vld [vmem:[#allocation7 + $0x818] sm:$0xff] }
 0x4b5   :  { %12579 = vmatprep.subr.bf16.mxu1 %v12578_v33 }
 0x4b8   :  { %12581 = vmatpush3.bf16.msra.mxu1 %v12580_v41 }
 0x4b9   :  { %12583 = vmatprep.subr.bf16.mxu1 %v12582_v46  ;;  %v1189_v46 = vld [vmem:[#allocation7 + $0x600] sm:$0xff] }
 0x4ba   :  { %v12603_v51 = vpack.c.bf16 %v1190_v48, %v1189_v46  ;;  %v1199_v46 = vld [vmem:[#allocation7 + $0x650] sm:$0xff] }
 0x4bc   :  { %12585 = vmatpush3.bf16.msra.mxu1 %v12584_v53  ;;  %v1221_v53 = vld [vmem:[#allocation7 + $0x700] sm:$0xff] }
 0x4bd   :  { %12587 = vmatprep.subr.bf16.mxu1 %v12586_v57  ;;  %v12635_v56 = vpack.c.bf16 %v1222_v54, %v1221_v53  ;;  %v1208_v57 = vld [vmem:[#allocation7 + $0x698] sm:$0xff]  ;;  %v1217_v53 = vld [vmem:[#allocation7 + $0x6e0] sm:$0xff]  ;;  %v1218_v54 = vld [vmem:[#allocation7 + $0x6e8] sm:$0xff] }
 0x4c0   :  { %12589 = vmatpush3.bf16.msra.mxu1 %v12588_v61  ;;  %v1239_v61 = vld [vmem:[#allocation7 + $0x790] sm:$0xff] }
 0x4c1   :  { %12591 = vmatprep.subr.bf16.mxu1 %v12590_v10  ;;  %v12637_v2 = vpack.c.bf16 %v1240_v62, %v1239_v61  ;;  %v1241_v10 = vld [vmem:[#allocation7 + $0x7a0] sm:$0xff]  ;;  %v1234_v61 = vld [vmem:[#allocation7 + $0x768] sm:$0xff] }
 0x4c4   :  { %12593 = vmatpush3.bf16.msra.mxu1 %v12592_v11  ;;  %v1242_v11 = vld [vmem:[#allocation7 + $0x7a8] sm:$0xff] }
 0x4c5   :  { %12595 = vmatprep.subr.bf16.mxu1 %v12594_v20  ;;  %v12641_v15 = vpack.c.bf16 %v1242_v11, %v1241_v10  ;;  %v12613_v20 = vpack.c.bf16 %v1212_v17, %v1211_v16  ;;  %v1235_v11 = vld [vmem:[#allocation7 + $0x770] sm:$0xff] }
 0x4c6   :  { %v12663_v13 = vpack.c.bf16 %v1236_v12, %v1235_v11  ;;  %v1505_v12 = vld [vmem:[#allocation7 + $0x838] sm:$0xff] }
 0x4c8   :  { %12597 = vmatpush3.bf16.msra.mxu1 %v12596_v23  ;;  %v1244_v23 = vld [vmem:[#allocation7 + $0x7b8] sm:$0xff] }
 0x4c9   :  { %12598 = vmatprep.subr.bf16.mxu1 %v14755_v0 }
 0x4cb   :  { %1087 = vmatmul.mubr.f32.vlgmr.msra.gmra.mrb[8].mxu1 %v14756_v1 }
 0x4cc   :  { %12194 = vmatprep.mubr.msk.f32.mxu1 %vm14757_vm0, %v14756_v1  ;;  %12600 = vmatpush3.bf16.msra.mxu1 %v12599_v36  ;;  %v1229_v36 = vld [vmem:[#allocation7 + $0x740] sm:$0xff] }
 0x4cd   :  { %12602 = vmatprep.subr.bf16.mxu1 %v12601_v47  ;;  %v1200_v47 = vld [vmem:[#allocation7 + $0x658] sm:$0xff] }
 0x57e   :  { %v864_v25 = vpop.f32.mrb[6].mxu1 }
 0x57f   :  { %v865_v26 = vadd.f32 %v9809_v24, %v864_v25  ;;  %v12189_v27 = vpop.f32.mrb[7].mxu1  ;;  %v12645_v24 = vpack.c.bf16 %v1244_v23, %v1243_v22  ;;  %v1227_v25 = vld [vmem:[#allocation7 + $0x730] sm:$0xff] }
 0x580   :  { %v1213_v27 = vld [vmem:[#allocation7 + $0x6c0] sm:$0xff] }
 0x581   :  { %v868_v28 = vmax.f32 %v865_v26, 0.0  ;;  %v1228_v26 = vld [vmem:[#allocation7 + $0x738] sm:$0xff] }
 0x583   :  { %870 = vrot.lane.b32.xlu0 %v868_v28, %s14759_s5  ;;  %v1214_v28 = vld [vmem:[#allocation7 + $0x6c8] sm:$0xff] }
 0x59e   :  { %v10115_v31 = vpop.f32.mrb[8].mxu1 }
 0x59f   :  { %v10116_v32 = vpop.f32.mrb[9].mxu1 }
 0x5a0   :  { %v10117_v33 = vadd.f32 %v10116_v32, %v10115_v31  ;;  %v1246_v31 = vld [vmem:[#allocation7 + $0x7c8] sm:$0xff]  ;;  %v12647_v32 = vpack.c.bf16 %v1228_v26, %v1227_v25  ;;  %v1404_v26 = vld [vmem:[#allocation10 + $0x38] sm:$0xff] }
 0x5a1   :  { %v1403_v25 = vld [vmem:[#allocation10 + $0x30] sm:$0xff] }
 0x5f5   :  { %v871_v29 = vpop.permute.xlu0 %870 }
 0x5f6   :  { %874 = vst.msk [vmem:[#allocation2] sm:$0xff] %vm873_vm5, %v871_v29  ;;  %v12615_v29 = vpack.c.bf16 %v1196_v21, %v1195_v18  ;;  %v15011_v18 = vld [vmem:[#allocation2 + $0x8] sm:$0xff] }
 0x5fd   :  { %v875_v30 = vld [vmem:[#allocation2] sm:$0xff] }
 0x5fe   :  { %1017 = vmatmul.mubr.f32.vlgmr.msra.gmra.mrb[6].mxu0 %v875_v30  ;;  %v1245_v30 = vld [vmem:[#allocation7 + $0x7c0] sm:$0xff] }
 0x5ff   :  { %1395 = vmatprep.mubr.f32.mxu0 %v14756_v1  ;;  %12636 = vmatpush3.bf16.msra.mxu0 %v12635_v56  ;;  %v1201_v56 = vld [vmem:[#allocation7 + $0x660] sm:$0xff] }
 0x600   :  { %12638 = vmatprep.subr.bf16.mxu0 %v12637_v2  ;;  %v1219_v2 = vld [vmem:[#allocation7 + $0x6f0] sm:$0xff] }
 0x601   :  { %v12629_v5 = vpack.c.bf16 %v1220_v3, %v1219_v2  ;;  %v1551_v2 = vld [vmem:[#allocation7 + $0x9a8] sm:$0xff]  ;;  %v1534_v3 = vld [vmem:[#allocation7 + $0x920] sm:$0xff] }
 0x603   :  { %12640 = vmatpush3.bf16.msra.mxu0 %v12639_v6  ;;  %v1204_v6 = vld [vmem:[#allocation7 + $0x678] sm:$0xff] }
 0x604   :  { %12642 = vmatprep.subr.bf16.mxu0 %v12641_v15  ;;  %v12631_v9 = vpack.c.bf16 %v1204_v6, %v1203_v4  ;;  %v1535_v4 = vld [vmem:[#allocation7 + $0x928] sm:$0xff] }
 0x607   :  { %12644 = vmatpush3.bf16.msra.mxu0 %v12643_v19 }
 0x608   :  { %12646 = vmatprep.subr.bf16.mxu0 %v12645_v24 }
 0x60b   :  { %12648 = vmatpush3.bf16.msra.mxu0 %v12647_v32 }
 0x6d1   :  { %v10080_v37 = vpop.f32.mrb[6].mxu0 }
 0x6d2   :  { %v10081_v39 = vpop.f32.mrb[7].mxu0 }
 0x6d3   :  { %v10082_v40 = vadd.f32 %v10081_v39, %v10080_v37  ;;  %v12649_v37 = vpack.c.bf16 %v1246_v31, %v1245_v30  ;;  %v1215_v39 = vld [vmem:[#allocation7 + $0x6d0] sm:$0xff] }
 0x6d5   :  { %v1019_v41 = vadd.f32 %v10082_v40, %v9811_v38  ;;  %v1230_v38 = vld [vmem:[#allocation7 + $0x748] sm:$0xff]  ;;  %v1216_v40 = vld [vmem:[#allocation7 + $0x6d8] sm:$0xff]  ;;  %12650 = vmatprep.subr.bf16.mxu0 %v12649_v37  ;;  %v1498_v37 = vld [vmem:[#allocation7 + $0x800] sm:$0xff] }
 0x6d6   :  { %v12651_v44 = vpack.c.bf16 %v1230_v38, %v1229_v36  ;;  %v12621_v45 = vpack.c.bf16 %v1216_v40, %v1215_v39  ;;  %v1515_v36 = vld [vmem:[#allocation7 + $0x888] sm:$0xff]  ;;  %v1546_v40 = vld [vmem:[#allocation7 + $0x980] sm:$0xff] }
 0x6d7   :  { %v1089_v42 = vadd.f32 %v10117_v33, %v1019_v41  ;;  %v12617_v33 = vpack.c.bf16 %v1214_v28, %v1213_v27  ;;  %v1247_v41 = vld [vmem:[#allocation7 + $0x7d0] sm:$0xff]  ;;  %v12666_v27 = vpack.c.bf16 %v1404_v26, %v1403_v25  ;;  %v1499_v39 = vld [vmem:[#allocation7 + $0x808] sm:$0xff]  ;;  %v1506_v26 = vld [vmem:[#allocation7 + $0x840] sm:$0xff] }
 0x6d8   :  { %12652 = vmatpush3.bf16.msra.mxu0 %v12651_v44  ;;  %v1530_v44 = vld [vmem:[#allocation7 + $0x900] sm:$0xff] }
 0x6d9   :  { %v1092_v43 = vmax.f32 %v1089_v42, 0.0  ;;  %v1248_v42 = vld [vmem:[#allocation7 + $0x7d8] sm:$0xff] }
 0x6da   :  { %v12653_v48 = vpack.c.bf16 %v1248_v42, %v1247_v41  ;;  %v1547_v41 = vld [vmem:[#allocation7 + $0x988] sm:$0xff]  ;;  %v12670_v42 = vpack.c.bf16 %v1499_v39, %v1498_v37  ;;  %v1509_v39 = vld [vmem:[#allocation7 + $0x858] sm:$0xff] }
 0x6db   :  { %12195 = vmatmul.mubr.msk.f32.vlgmr.msra.gmra.mrb[10].mxu1 %vm485_vm3, %v1092_v43  ;;  %v12619_v43 = vpack.c.bf16 %v1198_v35, %v1197_v34  ;;  %v1514_v35 = vld [vmem:[#allocation7 + $0x880] sm:$0xff] }
 0x6dc   :  { %1325 = vmatprep.mubr.f32.mxu1 %v14756_v1  ;;  %12604 = vmatpush3.bf16.msra.mxu1 %v12603_v51  ;;  %v12605_v1 = vpack.c.bf16 %v1208_v57, %v1207_v55  ;;  %v12623_v51 = vpack.c.bf16 %v1200_v47, %v1199_v46  ;;  %v12625_v55 = vpack.c.bf16 %v1218_v54, %v1217_v53  ;;  %v1202_v57 = vld [vmem:[#allocation7 + $0x668] sm:$0xff]  ;;  %v1516_v46 = vld [vmem:[#allocation7 + $0x890] sm:$0xff]  ;;  %v1549_v54 = vld [vmem:[#allocation7 + $0x998] sm:$0xff] }
 0x6dd   :  { %12654 = vmatprep.subr.bf16.mxu0 %v12653_v48  ;;  %v12627_v59 = vpack.c.bf16 %v1202_v57, %v1201_v56  ;;  %v12668_v38 = vpack.c.bf16 %v1515_v36, %v1514_v35  ;;  %v1517_v48 = vld [vmem:[#allocation7 + $0x898] sm:$0xff]  ;;  %v1548_v53 = vld [vmem:[#allocation7 + $0x990] sm:$0xff] }
 0x6de   :  { %12606 = vmatprep.subr.bf16.mxu1 %v12605_v1  ;;  %12656 = vmatpush3.bf16.msra.mxu0 %v12655_v52  ;;  %v1250_v1 = vld [vmem:[#allocation7 + $0x7e8] sm:$0xff]  ;;  %v12674_v52 = vpack.c.bf16 %v1501_v50, %v1500_v49  ;;  %v12704_v56 = vpack.c.bf16 %v1549_v54, %v1548_v53  ;;  %v1533_v57 = vld [vmem:[#allocation7 + $0x918] sm:$0xff]  ;;  %v1558_v50 = vld [vmem:[#allocation7 + $0x9e0] sm:$0xff] }
 0x6df   :  { %v12657_v62 = vpack.c.bf16 %v1250_v1, %v1249_v58  ;;  %v1518_v58 = vld [vmem:[#allocation7 + $0x8a0] sm:$0xff]  ;;  %v1511_v49 = vld [vmem:[#allocation7 + $0x868] sm:$0xff] }
 0x6e0   :  { %12608 = vmatpush3.bf16.msra.mxu1 %v12607_v60  ;;  %v1233_v60 = vld [vmem:[#allocation7 + $0x760] sm:$0xff]  ;;  %v1543_v54 = vld [vmem:[#allocation7 + $0x968] sm:$0xff] }
 0x6e1   :  { %12610 = vmatprep.subr.bf16.mxu1 %v12609_v7  ;;  %v12659_v63 = vpack.c.bf16 %v1234_v61, %v1233_v60  ;;  %v1251_v7 = vld [vmem:[#allocation7 + $0x7f0] sm:$0xff]  ;;  %12658 = vmatprep.subr.bf16.mxu0 %v12657_v62  ;;  %v1502_v61 = vld [vmem:[#allocation7 + $0x820] sm:$0xff]  ;;  %v1503_v62 = vld [vmem:[#allocation7 + $0x828] sm:$0xff] }
 0x6e2   :  { %v12661_v10 = vpack.c.bf16 %v1252_v8, %v1251_v7  ;;  %v1520_v7 = vld [vmem:[#allocation7 + $0x8b0] sm:$0xff]  ;;  %v1521_v8 = vld [vmem:[#allocation7 + $0x8b8] sm:$0xff]  ;;  %v1542_v53 = vld [vmem:[#allocation7 + $0x960] sm:$0xff] }
 0x6e3   :  { %12660 = vmatpush3.bf16.msra.mxu0 %v12659_v63  ;;  %v1550_v63 = vld [vmem:[#allocation7 + $0x9a0] sm:$0xff]  ;;  %v12680_v11 = vpack.c.bf16 %v1521_v8, %v1520_v7 }
 0x6e4   :  { %12612 = vmatpush3.bf16.msra.mxu1 %v12611_v14  ;;  %12662 = vmatprep.subr.bf16.mxu0 %v12661_v10  ;;  %v9812_v14 = vld [vmem:[#allocation11 + $0x2] ss:$0 sm:$0xff]  ;;  %v12708_v6 = vpack.c.bf16 %v1551_v2, %v1550_v63  ;;  %v12710_v10 = vpack.c.bf16 %v1535_v4, %v1534_v3  ;;  %v1544_v3 = vld [vmem:[#allocation7 + $0x970] sm:$0xff]  ;;  %v1545_v4 = vld [vmem:[#allocation7 + $0x978] sm:$0xff] }
 0x6e5   :  { %12614 = vmatprep.subr.bf16.mxu1 %v12613_v20 }
 0x6e7   :  { %12664 = vmatpush3.bf16.msra.mxu0 %v12663_v13  ;;  %v1552_v13 = vld [vmem:[#allocation7 + $0x9b0] sm:$0xff] }
 0x6e8   :  { %12616 = vmatpush3.bf16.msra.mxu1 %v12615_v29  ;;  %v9814_v29 = vld [vmem:[#allocation8 + $0x3] ss:$0 sm:$0xff]  ;;  %12669 = vmatprep.subr.bf16.mxu0 %v12668_v38  ;;  %v1508_v38 = vld [vmem:[#allocation7 + $0x850] sm:$0xff] }
 0x6e9   :  { %12618 = vmatprep.subr.bf16.mxu1 %v12617_v33 }
 0x6ea   :  { %1396 = vmatmul.mubr.f32.vlgmr.msra.gmra.mrb[8].mxu0 %v15011_v18 }
 0x6eb   :  { %1634 = vmatprep.mubr.f32.mxu0 %v15011_v18  ;;  %12671 = vmatpush3.bf16.msra.mxu0 %v12670_v42  ;;  %v1541_v42 = vld [vmem:[#allocation7 + $0x958] sm:$0xff] }
 0x6ec   :  { %12620 = vmatpush3.bf16.msra.mxu1 %v12619_v43  ;;  %v12700_v43 = vpack.c.bf16 %v1547_v41, %v1546_v40  ;;  %v1540_v41 = vld [vmem:[#allocation7 + $0x950] sm:$0xff] }
 0x6ed   :  { %12622 = vmatprep.subr.bf16.mxu1 %v12621_v45  ;;  %v1531_v45 = vld [vmem:[#allocation7 + $0x908] sm:$0xff] }
 0x6ee   :  { %v12702_v47 = vpack.c.bf16 %v1531_v45, %v1530_v44  ;;  %v12722_v44 = vpack.c.bf16 %v1541_v42, %v1540_v41  ;;  %v1526_v45 = vld [vmem:[#allocation7 + $0x8e0] sm:$0xff]  ;;  %v1809_v41 = vld [vmem:[#allocation7 + $0xa10] sm:$0xff]  ;;  %v1810_v42 = vld [vmem:[#allocation7 + $0xa18] sm:$0xff] }
 0x6f0   :  { %12624 = vmatpush3.bf16.msra.mxu1 %v12623_v51  ;;  %v12672_v51 = vpack.c.bf16 %v1517_v48, %v1516_v46  ;;  %v1527_v46 = vld [vmem:[#allocation7 + $0x8e8] sm:$0xff]  ;;  %v1510_v48 = vld [vmem:[#allocation7 + $0x860] sm:$0xff] }
 0x6f1   :  { %12626 = vmatprep.subr.bf16.mxu1 %v12625_v55  ;;  %v1532_v55 = vld [vmem:[#allocation7 + $0x910] sm:$0xff] }
 0x6f2   :  { %12673 = vmatprep.subr.bf16.mxu0 %v12672_v51  ;;  %v12706_v1 = vpack.c.bf16 %v1533_v57, %v1532_v55  ;;  %v12694_v51 = vpack.c.bf16 %v1511_v49, %v1510_v48  ;;  %v1528_v57 = vld [vmem:[#allocation7 + $0x8f0] sm:$0xff]  ;;  %v1842_v49 = vld [vmem:[#allocation7 + $0xb18] sm:$0xff] }
 0x6f3   :  { %12675 = vmatpush3.bf16.msra.mxu0 %v12674_v52  ;;  %v1559_v52 = vld [vmem:[#allocation7 + $0x9e8] sm:$0xff] }
 0x6f4   :  { %12628 = vmatpush3.bf16.msra.mxu1 %v12627_v59  ;;  %v1519_v59 = vld [vmem:[#allocation7 + $0x8a8] sm:$0xff]  ;;  %v12724_v55 = vpack.c.bf16 %v1559_v52, %v1558_v50  ;;  %v1827_v50 = vld [vmem:[#allocation7 + $0xaa0] sm:$0xff] }
 0x6f5   :  { %12630 = vmatprep.subr.bf16.mxu1 %v12629_v5  ;;  %v12676_v60 = vpack.c.bf16 %v1519_v59, %v1518_v58  ;;  %v12678_v5 = vpack.c.bf16 %v1503_v62, %v1502_v61  ;;  %v1529_v58 = vld [vmem:[#allocation7 + $0x8f8] sm:$0xff]  ;;  %v1512_v59 = vld [vmem:[#allocation7 + $0x870] sm:$0xff] }
 0x6f6   :  { %v1560_v61 = vld [vmem:[#allocation7 + $0x9f0] sm:$0xff]  ;;  %v1561_v62 = vld [vmem:[#allocation7 + $0x9f8] sm:$0xff] }
 0x6f7   :  { %12677 = vmatprep.subr.bf16.mxu0 %v12676_v60  ;;  %v1513_v60 = vld [vmem:[#allocation7 + $0x878] sm:$0xff]  ;;  %v12728_v2 = vpack.c.bf16 %v1561_v62, %v1560_v61  ;;  %v1829_v61 = vld [vmem:[#allocation7 + $0xab0] sm:$0xff] }
 0x6f8   :  { %12632 = vmatpush3.bf16.msra.mxu1 %v12631_v9  ;;  %v1504_v9 = vld [vmem:[#allocation7 + $0x830] sm:$0xff]  ;;  %12679 = vmatpush3.bf16.msra.mxu0 %v12678_v5  ;;  %v12698_v63 = vpack.c.bf16 %v1513_v60, %v1512_v59  ;;  %v12730_v5 = vpack.c.bf16 %v1545_v4, %v1544_v3  ;;  %v1844_v59 = vld [vmem:[#allocation7 + $0xb28] sm:$0xff]  ;;  %v1830_v62 = vld [vmem:[#allocation7 + $0xab8] sm:$0xff] }
 0x6f9   :  { %12665 = vmatprep.subr.bf16.mxu1 %v14755_v0  ;;  %12681 = vmatprep.subr.bf16.mxu0 %v12680_v11  ;;  %v12747_v3 = vpack.c.bf16 %v1830_v62, %v1829_v61  ;;  %v1814_v4 = vld [vmem:[#allocation7 + $0xa38] sm:$0xff] }
 0x7ae   :  { %v1173_v15 = vpop.f32.mrb[10].mxu1 }
 0x7af   :  { %v1174_v16 = vadd.f32 %v9812_v14, %v1173_v15  ;;  %v12196_v17 = vpop.f32.mrb[11].mxu1  ;;  %v1553_v14 = vld [vmem:[#allocation7 + $0x9b8] sm:$0xff] }
 0x7b0   :  { %v12712_v15 = vpack.c.bf16 %v1553_v14, %v1552_v13  ;;  %v1537_v17 = vld [vmem:[#allocation7 + $0x938] sm:$0xff] }
 0x7b1   :  { %v1177_v19 = vmax.f32 %v1174_v16, 0.0  ;;  %v1536_v16 = vld [vmem:[#allocation7 + $0x930] sm:$0xff] }
 0x7b3   :  { %1179 = vrot.lane.b32.xlu1 %v1177_v19, %s14760_s27  ;;  %v1522_v19 = vld [vmem:[#allocation7 + $0x8c0] sm:$0xff] }
 0x7bd   :  { %v10188_v22 = vpop.f32.mrb[8].mxu0 }
 0x7be   :  { %v10189_v23 = vpop.f32.mrb[9].mxu0 }
 0x7bf   :  { %v10190_v24 = vadd.f32 %v10189_v23, %v10188_v22  ;;  %v1554_v22 = vld [vmem:[#allocation7 + $0x9c0] sm:$0xff]  ;;  %v1555_v23 = vld [vmem:[#allocation7 + $0x9c8] sm:$0xff] }
 0x825   :  { %v1180_v20 = vpop.permute.xlu1 %1179 }
 0x826   :  { %1183 = vst.msk [vmem:[#allocation2] sm:$0xff] %vm1182_vm6, %v1180_v20  ;;  %v1523_v20 = vld [vmem:[#allocation7 + $0x8c8] sm:$0xff] }
 0x827   :  { %v12684_v25 = vpack.c.bf16 %v1523_v20, %v1522_v19 }
 0x82d   :  { %v1184_v21 = vld [vmem:[#allocation2] sm:$0xff] }
 0x82e   :  { %1326 = vmatmul.mubr.f32.vlgmr.msra.gmra.mrb[12].mxu1 %v1184_v21  ;;  %v12682_v21 = vpack.c.bf16 %v1505_v12, %v1504_v9 }
 0x82f   :  { %12201 = vmatprep.mubr.msk.f32.mxu1 %vm14757_vm0, %v15011_v18  ;;  %12667 = vmatpush3.bf16.msra.mxu1 %v12666_v27  ;;  %v1507_v27 = vld [vmem:[#allocation7 + $0x848] sm:$0xff] }
 0x830   :  { %12701 = vmatprep.subr.bf16.mxu1 %v12700_v43  ;;  %12683 = vmatpush3.bf16.msra.mxu0 %v12682_v21  ;;  %v12686_v35 = vpack.c.bf16 %v1507_v27, %v1506_v26  ;;  %v12690_v43 = vpack.c.bf16 %v1509_v39, %v1508_v38  ;;  %v9817_v21 = vld [vmem:[#allocation8 + $0x4] ss:$0 sm:$0xff]  ;;  %v1825_v38 = vld [vmem:[#allocation7 + $0xa90] sm:$0xff] }
 0x831   :  { %12685 = vmatprep.subr.bf16.mxu0 %v12684_v25  ;;  %v1823_v27 = vld [vmem:[#allocation7 + $0xa80] sm:$0xff] }
 0x834   :  { %12687 = vmatpush3.bf16.msra.mxu0 %v12686_v35 }
 0x901   :  { %v10153_v28 = vpop.f32.mrb[12].mxu1 }
 0x902   :  { %v10154_v30 = vpop.f32.mrb[13].mxu1 }
 0x903   :  { %v10155_v31 = vadd.f32 %v10154_v30, %v10153_v28  ;;  %v1538_v28 = vld [vmem:[#allocation7 + $0x940] sm:$0xff]  ;;  %v1539_v30 = vld [vmem:[#allocation7 + $0x948] sm:$0xff] }
 0x904   :  { %v12718_v36 = vpack.c.bf16 %v1539_v30, %v1538_v28  ;;  %v1824_v28 = vld [vmem:[#allocation7 + $0xa88] sm:$0xff] }
 0x905   :  { %v1328_v32 = vadd.f32 %v10155_v31, %v9814_v29  ;;  %v12716_v29 = vpack.c.bf16 %v1555_v23, %v1554_v22  ;;  %v1524_v31 = vld [vmem:[#allocation7 + $0x8d0] sm:$0xff]  ;;  %v12735_v30 = vpack.c.bf16 %v1824_v28, %v1823_v27 }
 0x907   :  { %v1398_v33 = vadd.f32 %v10190_v24, %v1328_v32  ;;  %v12714_v24 = vpack.c.bf16 %v1537_v17, %v1536_v16  ;;  %v1525_v32 = vld [vmem:[#allocation7 + $0x8d8] sm:$0xff]  ;;  %v1713_v17 = vld [vmem:[#allocation10 + $0x48] sm:$0xff] }
 0x908   :  { %v12688_v37 = vpack.c.bf16 %v1525_v32, %v1524_v31  ;;  %v1712_v16 = vld [vmem:[#allocation10 + $0x40] sm:$0xff]  ;;  %v1808_v31 = vld [vmem:[#allocation7 + $0xa08] sm:$0xff] }
 0x909   :  { %v1401_v34 = vmax.f32 %v1398_v33, 0.0  ;;  %v1556_v33 = vld [vmem:[#allocation7 + $0x9d0] sm:$0xff]  ;;  %v12733_v19 = vpack.c.bf16 %v1713_v17, %v1712_v16  ;;  %v1855_v32 = vld [vmem:[#allocation7 + $0xb80] sm:$0xff] }
 0x90a   :  { %12689 = vmatprep.subr.bf16.mxu0 %v12688_v37  ;;  %v1840_v37 = vld [vmem:[#allocation7 + $0xb08] sm:$0xff]  ;;  %v1815_v17 = vld [vmem:[#allocation7 + $0xa40] sm:$0xff] }
 0x90b   :  { %12202 = vmatmul.mubr.msk.f32.vlgmr.msra.gmra.mrb[14].mxu1 %vm485_vm3, %v1401_v34  ;;  %v1557_v34 = vld [vmem:[#allocation7 + $0x9d8] sm:$0xff]  ;;  %12691 = vmatpush3.bf16.msra.mxu0 %v12690_v43 }
 0x90c   :  { %1704 = vmatprep.mubr.f32.mxu1 %v15011_v18  ;;  %12703 = vmatpush3.bf16.msra.mxu1 %v12702_v47  ;;  %v12720_v40 = vpack.c.bf16 %v1557_v34, %v1556_v33  ;;  %v12692_v47 = vpack.c.bf16 %v1527_v46, %v1526_v45  ;;  %v1856_v33 = vld [vmem:[#allocation7 + $0xb88] sm:$0xff]  ;;  %v1857_v45 = vld [vmem:[#allocation7 + $0xb90] sm:$0xff]  ;;  %v1858_v46 = vld [vmem:[#allocation7 + $0xb98] sm:$0xff] }
 0x90d   :  { %12705 = vmatprep.subr.bf16.mxu1 %v12704_v56  ;;  %v12726_v56 = vpack.c.bf16 %v1543_v54, %v1542_v53  ;;  %v12767_v35 = vpack.c.bf16 %v1856_v33, %v1855_v32  ;;  %v12771_v48 = vpack.c.bf16 %v1858_v46, %v1857_v45  ;;  %v1811_v54 = vld [vmem:[#allocation7 + $0xa20] sm:$0xff]  ;;  %v1849_v33 = vld [vmem:[#allocation7 + $0xb50] sm:$0xff]  ;;  %v1852_v46 = vld [vmem:[#allocation7 + $0xb68] sm:$0xff] }
 0x90e   :  { %12693 = vmatprep.subr.bf16.mxu0 %v12692_v47  ;;  %v1841_v47 = vld [vmem:[#allocation7 + $0xb10] sm:$0xff]  ;;  %v1851_v45 = vld [vmem:[#allocation7 + $0xb60] sm:$0xff] }
 0x90f   :  { %12695 = vmatpush3.bf16.msra.mxu0 %v12694_v51  ;;  %v1828_v51 = vld [vmem:[#allocation7 + $0xaa8] sm:$0xff]  ;;  %v12773_v52 = vpack.c.bf16 %v1842_v49, %v1841_v47  ;;  %v1837_v49 = vld [vmem:[#allocation7 + $0xaf0] sm:$0xff] }
 0x910   :  { %12707 = vmatpush3.bf16.msra.mxu1 %v12706_v1  ;;  %v12696_v1 = vpack.c.bf16 %v1529_v58, %v1528_v57  ;;  %v12743_v53 = vpack.c.bf16 %v1828_v51, %v1827_v50  ;;  %v1860_v57 = vld [vmem:[#allocation7 + $0xba8] sm:$0xff]  ;;  %v1843_v58 = vld [vmem:[#allocation7 + $0xb20] sm:$0xff]  ;;  %v1838_v50 = vld [vmem:[#allocation7 + $0xaf8] sm:$0xff] }
 0x911   :  { %12709 = vmatprep.subr.bf16.mxu1 %v12708_v6  ;;  %v9815_v6 = vld [vmem:[#allocation11 + $0x3] ss:$0 sm:$0xff]  ;;  %v1821_v51 = vld [vmem:[#allocation7 + $0xa70] sm:$0xff] }
 0x912   :  { %12697 = vmatprep.subr.bf16.mxu0 %v12696_v1 }
 0x913   :  { %12699 = vmatpush3.bf16.msra.mxu0 %v12698_v63  ;;  %v1813_v63 = vld [vmem:[#allocation7 + $0xa30] sm:$0xff] }
 0x914   :  { %12711 = vmatpush3.bf16.msra.mxu1 %v12710_v10  ;;  %12732 = vmatprep.subr.bf16.mxu0 %v14755_v0 }
 0x915   :  { %12713 = vmatprep.subr.bf16.mxu1 %v12712_v15 }
 0x918   :  { %12715 = vmatpush3.bf16.msra.mxu1 %v12714_v24 }
 0x919   :  { %12717 = vmatprep.subr.bf16.mxu1 %v12716_v29  ;;  %v1807_v29 = vld [vmem:[#allocation7 + $0xa00] sm:$0xff] }
 0x91a   :  { %v12737_v34 = vpack.c.bf16 %v1808_v31, %v1807_v29  ;;  %v1818_v31 = vld [vmem:[#allocation7 + $0xa58] sm:$0xff] }
 0x91c   :  { %12719 = vmatpush3.bf16.msra.mxu1 %v12718_v36  ;;  %v1839_v36 = vld [vmem:[#allocation7 + $0xb00] sm:$0xff] }
 0x91d   :  { %12721 = vmatprep.subr.bf16.mxu1 %v12720_v40  ;;  %v12769_v39 = vpack.c.bf16 %v1840_v37, %v1839_v36  ;;  %v1826_v40 = vld [vmem:[#allocation7 + $0xa98] sm:$0xff]  ;;  %v1835_v37 = vld [vmem:[#allocation7 + $0xae0] sm:$0xff] }
 0x91e   :  { %v12739_v43 = vpack.c.bf16 %v1826_v40, %v1825_v38  ;;  %v1836_v38 = vld [vmem:[#allocation7 + $0xae8] sm:$0xff]  ;;  %v1819_v40 = vld [vmem:[#allocation7 + $0xa60] sm:$0xff] }
 0x920   :  { %12723 = vmatpush3.bf16.msra.mxu1 %v12722_v44  ;;  %v12741_v44 = vpack.c.bf16 %v1810_v42, %v1809_v41  ;;  %v1820_v41 = vld [vmem:[#allocation7 + $0xa68] sm:$0xff]  ;;  %v1867_v42 = vld [vmem:[#allocation7 + $0xbe0] sm:$0xff] }
 0x921   :  { %12725 = vmatprep.subr.bf16.mxu1 %v12724_v55  ;;  %v1812_v55 = vld [vmem:[#allocation7 + $0xa28] sm:$0xff] }
 0x922   :  { %v12745_v1 = vpack.c.bf16 %v1812_v55, %v1811_v54  ;;  %v1869_v54 = vld [vmem:[#allocation7 + $0xbf0] sm:$0xff]  ;;  %v1870_v55 = vld [vmem:[#allocation7 + $0xbf8] sm:$0xff] }
 0x924   :  { %12727 = vmatpush3.bf16.msra.mxu1 %v12726_v56  ;;  %v1859_v56 = vld [vmem:[#allocation7 + $0xba0] sm:$0xff] }
 0x925   :  { %12729 = vmatprep.subr.bf16.mxu1 %v12728_v2  ;;  %v12775_v60 = vpack.c.bf16 %v1860_v57, %v1859_v56  ;;  %v12777_v2 = vpack.c.bf16 %v1844_v59, %v1843_v58  ;;  %v12795_v57 = vpack.c.bf16 %v1870_v55, %v1869_v54  ;;  %v1853_v58 = vld [vmem:[#allocation7 + $0xb70] sm:$0xff]  ;;  %v1854_v59 = vld [vmem:[#allocation7 + $0xb78] sm:$0xff] }
 0x926   :  { %v2138_v54 = vld [vmem:[#allocation7 + $0xcb0] sm:$0xff]  ;;  %v2139_v55 = vld [vmem:[#allocation7 + $0xcb8] sm:$0xff] }
 0x928   :  { %12731 = vmatpush3.bf16.msra.mxu1 %v12730_v5  ;;  %v1861_v5 = vld [vmem:[#allocation7 + $0xbb0] sm:$0xff] }
 0x929   :  { %12736 = vmatprep.subr.bf16.mxu1 %v12735_v30  ;;  %v1817_v30 = vld [vmem:[#allocation7 + $0xa50] sm:$0xff] }
 0x92b   :  { %1705 = vmatmul.mubr.f32.vlgmr.msra.gmra.mrb[16].mxu1 %v15011_v18 }
 0x92c   :  { %1943 = vmatprep.mubr.f32.mxu1 %v15011_v18  ;;  %12738 = vmatpush3.bf16.msra.mxu1 %v12737_v34  ;;  %v1850_v34 = vld [vmem:[#allocation7 + $0xb58] sm:$0xff] }
 0x92d   :  { %12740 = vmatprep.subr.bf16.mxu1 %v12739_v43  ;;  %v12789_v36 = vpack.c.bf16 %v1850_v34, %v1849_v33  ;;  %v12761_v43 = vpack.c.bf16 %v1820_v41, %v1819_v40  ;;  %v2118_v33 = vld [vmem:[#allocation7 + $0xc10] sm:$0xff]  ;;  %v2119_v34 = vld [vmem:[#allocation7 + $0xc18] sm:$0xff] }
 0x92e   :  { %v2151_v41 = vld [vmem:[#allocation7 + $0xd18] sm:$0xff] }
 0x930   :  { %12742 = vmatpush3.bf16.msra.mxu1 %v12741_v44  ;;  %v1868_v44 = vld [vmem:[#allocation7 + $0xbe8] sm:$0xff] }
 0x931   :  { %12744 = vmatprep.subr.bf16.mxu1 %v12743_v53  ;;  %v12791_v47 = vpack.c.bf16 %v1868_v44, %v1867_v42  ;;  %v1822_v53 = vld [vmem:[#allocation7 + $0xa78] sm:$0xff]  ;;  %v2136_v42 = vld [vmem:[#allocation7 + $0xca0] sm:$0xff] }
 0x932   :  { %v12765_v56 = vpack.c.bf16 %v1822_v53, %v1821_v51  ;;  %v2153_v51 = vld [vmem:[#allocation7 + $0xd28] sm:$0xff] }
 0x934   :  { %12746 = vmatpush3.bf16.msra.mxu1 %v12745_v1  ;;  %v12797_v1 = vpack.c.bf16 %v1854_v59, %v1853_v58  ;;  %v12814_v58 = vpack.c.bf16 %v2139_v55, %v2138_v54  ;;  %v2123_v59 = vld [vmem:[#allocation7 + $0xc38] sm:$0xff] }
 0x935   :  { %12748 = vmatprep.subr.bf16.mxu1 %v12747_v3 }
 0x9de   :  { %v1482_v7 = vpop.f32.mrb[14].mxu1 }
 0x9df   :  { %v1483_v8 = vadd.f32 %v9815_v6, %v1482_v7  ;;  %v12203_v9 = vpop.f32.mrb[15].mxu1  ;;  %v1862_v6 = vld [vmem:[#allocation7 + $0xbb8] sm:$0xff] }
 0x9e0   :  { %v12779_v7 = vpack.c.bf16 %v1862_v6, %v1861_v5  ;;  %v1846_v9 = vld [vmem:[#allocation7 + $0xb38] sm:$0xff] }
 0x9e1   :  { %v1486_v10 = vmax.f32 %v1483_v8, 0.0  ;;  %v1845_v8 = vld [vmem:[#allocation7 + $0xb30] sm:$0xff] }
 0x9e3   :  { %1488 = vrot.lane.b32.xlu1 %v1486_v10, %s14761_s16  ;;  %v1831_v10 = vld [vmem:[#allocation7 + $0xac0] sm:$0xff] }
 0x9fe   :  { %v10261_v13 = vpop.f32.mrb[16].mxu1 }
 0x9ff   :  { %v10262_v14 = vpop.f32.mrb[17].mxu1 }
 0xa00   :  { %v10263_v15 = vadd.f32 %v10262_v14, %v10261_v13  ;;  %v1863_v13 = vld [vmem:[#allocation7 + $0xbc0] sm:$0xff]  ;;  %v1864_v14 = vld [vmem:[#allocation7 + $0xbc8] sm:$0xff] }
 0xa55   :  { %v1489_v11 = vpop.permute.xlu1 %1488 }
 0xa56   :  { %1492 = vst.msk [vmem:[#allocation2] sm:$0xff] %vm1491_vm7, %v1489_v11  ;;  %v1832_v11 = vld [vmem:[#allocation7 + $0xac8] sm:$0xff] }
 0xa57   :  { %v12751_v16 = vpack.c.bf16 %v1832_v11, %v1831_v10 }
 0xa5d   :  { %v1493_v12 = vld [vmem:[#allocation2] sm:$0xff] }
 0xa5e   :  { %1635 = vmatmul.mubr.f32.vlgmr.msra.gmra.mrb[10].mxu0 %v1493_v12  ;;  %v12749_v12 = vpack.c.bf16 %v1814_v4, %v1813_v63 }
 0xa5f   :  { %12208 = vmatprep.mubr.msk.f32.mxu0 %vm14757_vm0, %v15011_v18  ;;  %12734 = vmatpush3.bf16.msra.mxu0 %v12733_v19  ;;  %v1816_v19 = vld [vmem:[#allocation7 + $0xa48] sm:$0xff] }
 0xa60   :  { %12768 = vmatprep.subr.bf16.mxu0 %v12767_v35  ;;  %12750 = vmatpush3.bf16.msra.mxu1 %v12749_v12  ;;  %v12753_v27 = vpack.c.bf16 %v1816_v19, %v1815_v17  ;;  %v12757_v35 = vpack.c.bf16 %v1818_v31, %v1817_v30  ;;  %v9820_v12 = vld [vmem:[#allocation8 + $0x5] ss:$0 sm:$0xff]  ;;  %v2134_v30 = vld [vmem:[#allocation7 + $0xc90] sm:$0xff] }
 0xa61   :  { %12752 = vmatprep.subr.bf16.mxu1 %v12751_v16  ;;  %v2132_v19 = vld [vmem:[#allocation7 + $0xc80] sm:$0xff] }
 0xa64   :  { %12754 = vmatpush3.bf16.msra.mxu1 %v12753_v27 }
 0xb31   :  { %v10226_v20 = vpop.f32.mrb[10].mxu0 }
 0xb32   :  { %v10227_v22 = vpop.f32.mrb[11].mxu0 }
 0xb33   :  { %v10228_v23 = vadd.f32 %v10227_v22, %v10226_v20  ;;  %v1847_v20 = vld [vmem:[#allocation7 + $0xb40] sm:$0xff]  ;;  %v1848_v22 = vld [vmem:[#allocation7 + $0xb48] sm:$0xff] }
 0xb34   :  { %v12785_v28 = vpack.c.bf16 %v1848_v22, %v1847_v20  ;;  %v2133_v20 = vld [vmem:[#allocation7 + $0xc88] sm:$0xff] }
 0xb35   :  { %v1637_v24 = vadd.f32 %v10228_v23, %v9817_v21  ;;  %v12783_v21 = vpack.c.bf16 %v1864_v14, %v1863_v13  ;;  %v1833_v23 = vld [vmem:[#allocation7 + $0xad0] sm:$0xff]  ;;  %v12802_v22 = vpack.c.bf16 %v2133_v20, %v2132_v19 }
 0xb37   :  { %v1707_v25 = vadd.f32 %v10263_v15, %v1637_v24  ;;  %v12781_v15 = vpack.c.bf16 %v1846_v9, %v1845_v8  ;;  %v1834_v24 = vld [vmem:[#allocation7 + $0xad8] sm:$0xff]  ;;  %v2021_v8 = vld [vmem:[#allocation10 + $0x50] sm:$0xff] }
 0xb38   :  { %v12755_v29 = vpack.c.bf16 %v1834_v24, %v1833_v23  ;;  %v2022_v9 = vld [vmem:[#allocation10 + $0x58] sm:$0xff]  ;;  %v2117_v23 = vld [vmem:[#allocation7 + $0xc08] sm:$0xff]  ;;  %v2164_v24 = vld [vmem:[#allocation7 + $0xd80] sm:$0xff] }
 0xb39   :  { %v1710_v26 = vmax.f32 %v1707_v25, 0.0  ;;  %v1865_v25 = vld [vmem:[#allocation7 + $0xbd0] sm:$0xff]  ;;  %v12800_v10 = vpack.c.bf16 %v2022_v9, %v2021_v8  ;;  %v2124_v9 = vld [vmem:[#allocation7 + $0xc40] sm:$0xff] }
 0xb3a   :  { %12756 = vmatprep.subr.bf16.mxu1 %v12755_v29  ;;  %v2149_v29 = vld [vmem:[#allocation7 + $0xd08] sm:$0xff] }
 0xb3b   :  { %12209 = vmatmul.mubr.msk.f32.vlgmr.msra.gmra.mrb[12].mxu0 %vm485_vm3, %v1710_v26  ;;  %v1866_v26 = vld [vmem:[#allocation7 + $0xbd8] sm:$0xff]  ;;  %12758 = vmatpush3.bf16.msra.mxu1 %v12757_v35 }
 0xb3c   :  { %2013 = vmatprep.mubr.f32.mxu0 %v15011_v18  ;;  %12770 = vmatpush3.bf16.msra.mxu0 %v12769_v39  ;;  %v12787_v32 = vpack.c.bf16 %v1866_v26, %v1865_v25  ;;  %v12759_v39 = vpack.c.bf16 %v1836_v38, %v1835_v37  ;;  %v2165_v25 = vld [vmem:[#allocation7 + $0xd88] sm:$0xff]  ;;  %v2166_v37 = vld [vmem:[#allocation7 + $0xd90] sm:$0xff]  ;;  %v2167_v38 = vld [vmem:[#allocation7 + $0xd98] sm:$0xff] }
 0xb3d   :  { %12772 = vmatprep.subr.bf16.mxu0 %v12771_v48  ;;  %v12793_v48 = vpack.c.bf16 %v1852_v46, %v1851_v45  ;;  %v12834_v27 = vpack.c.bf16 %v2165_v25, %v2164_v24  ;;  %v12838_v40 = vpack.c.bf16 %v2167_v38, %v2166_v37  ;;  %v2120_v46 = vld [vmem:[#allocation7 + $0xc20] sm:$0xff]  ;;  %v2158_v25 = vld [vmem:[#allocation7 + $0xd50] sm:$0xff]  ;;  %v2161_v38 = vld [vmem:[#allocation7 + $0xd68] sm:$0xff] }
 0xb3e   :  { %12760 = vmatprep.subr.bf16.mxu1 %v12759_v39  ;;  %v2150_v39 = vld [vmem:[#allocation7 + $0xd10] sm:$0xff]  ;;  %v2160_v37 = vld [vmem:[#allocation7 + $0xd60] sm:$0xff] }
 0xb3f   :  { %12762 = vmatpush3.bf16.msra.mxu1 %v12761_v43  ;;  %v2137_v43 = vld [vmem:[#allocation7 + $0xca8] sm:$0xff]  ;;  %v12840_v44 = vpack.c.bf16 %v2151_v41, %v2150_v39  ;;  %v2146_v41 = vld [vmem:[#allocation7 + $0xcf0] sm:$0xff] }
 0xb40   :  { %12774 = vmatpush3.bf16.msra.mxu0 %v12773_v52  ;;  %v12763_v52 = vpack.c.bf16 %v1838_v50, %v1837_v49  ;;  %v12810_v45 = vpack.c.bf16 %v2137_v43, %v2136_v42  ;;  %v2169_v49 = vld [vmem:[#allocation7 + $0xda8] sm:$0xff]  ;;  %v2152_v50 = vld [vmem:[#allocation7 + $0xd20] sm:$0xff]  ;;  %v2147_v42 = vld [vmem:[#allocation7 + $0xcf8] sm:$0xff] }
 0xb41   :  { %12776 = vmatprep.subr.bf16.mxu0 %v12775_v60  ;;  %v9818_v60 = vld [vmem:[#allocation11 + $0x4] ss:$0 sm:$0xff]  ;;  %v2130_v43 = vld [vmem:[#allocation7 + $0xc70] sm:$0xff] }
 0xb42   :  { %12764 = vmatprep.subr.bf16.mxu1 %v12763_v52 }
 0xb43   :  { %12766 = vmatpush3.bf16.msra.mxu1 %v12765_v56  ;;  %v2122_v56 = vld [vmem:[#allocation7 + $0xc30] sm:$0xff] }
 0xb44   :  { %12778 = vmatpush3.bf16.msra.mxu0 %v12777_v2  ;;  %12799 = vmatprep.subr.bf16.mxu1 %v14755_v0 }
 0xb45   :  { %12780 = vmatprep.subr.bf16.mxu0 %v12779_v7 }
 0xb48   :  { %12782 = vmatpush3.bf16.msra.mxu0 %v12781_v15 }
 0xb49   :  { %12784 = vmatprep.subr.bf16.mxu0 %v12783_v21  ;;  %v2116_v21 = vld [vmem:[#allocation7 + $0xc00] sm:$0xff] }
 0xb4a   :  { %v12804_v26 = vpack.c.bf16 %v2117_v23, %v2116_v21  ;;  %v2127_v23 = vld [vmem:[#allocation7 + $0xc58] sm:$0xff] }
 0xb4c   :  { %12786 = vmatpush3.bf16.msra.mxu0 %v12785_v28  ;;  %v2148_v28 = vld [vmem:[#allocation7 + $0xd00] sm:$0xff] }
 0xb4d   :  { %12788 = vmatprep.subr.bf16.mxu0 %v12787_v32  ;;  %v12836_v31 = vpack.c.bf16 %v2149_v29, %v2148_v28  ;;  %v2135_v32 = vld [vmem:[#allocation7 + $0xc98] sm:$0xff]  ;;  %v2144_v29 = vld [vmem:[#allocation7 + $0xce0] sm:$0xff] }
 0xb4e   :  { %v12806_v35 = vpack.c.bf16 %v2135_v32, %v2134_v30  ;;  %v2145_v30 = vld [vmem:[#allocation7 + $0xce8] sm:$0xff]  ;;  %v2128_v32 = vld [vmem:[#allocation7 + $0xc60] sm:$0xff] }
 0xb50   :  { %12790 = vmatpush3.bf16.msra.mxu0 %v12789_v36  ;;  %v12808_v36 = vpack.c.bf16 %v2119_v34, %v2118_v33  ;;  %v2129_v33 = vld [vmem:[#allocation7 + $0xc68] sm:$0xff]  ;;  %v2176_v34 = vld [vmem:[#allocation7 + $0xde0] sm:$0xff] }
 0xb51   :  { %12792 = vmatprep.subr.bf16.mxu0 %v12791_v47  ;;  %v2121_v47 = vld [vmem:[#allocation7 + $0xc28] sm:$0xff] }
 0xb52   :  { %v12812_v52 = vpack.c.bf16 %v2121_v47, %v2120_v46  ;;  %v2178_v46 = vld [vmem:[#allocation7 + $0xdf0] sm:$0xff]  ;;  %v2179_v47 = vld [vmem:[#allocation7 + $0xdf8] sm:$0xff] }
 0xb54   :  { %12794 = vmatpush3.bf16.msra.mxu0 %v12793_v48  ;;  %v2168_v48 = vld [vmem:[#allocation7 + $0xda0] sm:$0xff] }
 0xb55   :  { %12796 = vmatprep.subr.bf16.mxu0 %v12795_v57  ;;  %v12842_v53 = vpack.c.bf16 %v2169_v49, %v2168_v48  ;;  %v12844_v57 = vpack.c.bf16 %v2153_v51, %v2152_v50  ;;  %v12862_v49 = vpack.c.bf16 %v2179_v47, %v2178_v46  ;;  %v2162_v50 = vld [vmem:[#allocation7 + $0xd70] sm:$0xff]  ;;  %v2163_v51 = vld [vmem:[#allocation7 + $0xd78] sm:$0xff] }
 0xb58   :  { %12798 = vmatpush3.bf16.msra.mxu0 %v12797_v1  ;;  %v2170_v1 = vld [vmem:[#allocation7 + $0xdb0] sm:$0xff] }
 0xb59   :  { %12803 = vmatprep.subr.bf16.mxu0 %v12802_v22  ;;  %v2126_v22 = vld [vmem:[#allocation7 + $0xc50] sm:$0xff] }
 0xb5b   :  { %2014 = vmatmul.mubr.f32.vlgmr.msra.gmra.mrb[14].mxu0 %v15011_v18 }
 0xb5c   :  { %2252 = vmatprep.mubr.f32.mxu0 %v15011_v18  ;;  %12805 = vmatpush3.bf16.msra.mxu0 %v12804_v26  ;;  %v2159_v26 = vld [vmem:[#allocation7 + $0xd58] sm:$0xff] }
 0xb5d   :  { %12807 = vmatprep.subr.bf16.mxu0 %v12806_v35  ;;  %v12856_v28 = vpack.c.bf16 %v2159_v26, %v2158_v25  ;;  %v12828_v35 = vpack.c.bf16 %v2129_v33, %v2128_v32  ;;  %v2443_v25 = vld [vmem:[#allocation7 + $0xeb8] sm:$0xff]  ;;  %v2426_v26 = vld [vmem:[#allocation7 + $0xe30] sm:$0xff]  ;;  %v2428_v32 = vld [vmem:[#allocation7 + $0xe40] sm:$0xff] }
 0xb60   :  { %12809 = vmatpush3.bf16.msra.mxu0 %v12808_v36  ;;  %v2177_v36 = vld [vmem:[#allocation7 + $0xde8] sm:$0xff] }
 0xb61   :  { %12811 = vmatprep.subr.bf16.mxu0 %v12810_v45  ;;  %v12858_v39 = vpack.c.bf16 %v2177_v36, %v2176_v34  ;;  %v2131_v45 = vld [vmem:[#allocation7 + $0xc78] sm:$0xff]  ;;  %v2429_v34 = vld [vmem:[#allocation7 + $0xe48] sm:$0xff] }
 0xb62   :  { %v12832_v48 = vpack.c.bf16 %v2131_v45, %v2130_v43  ;;  %v2470_v43 = vld [vmem:[#allocation7 + $0xf90] sm:$0xff] }
 0xb64   :  { %12813 = vmatpush3.bf16.msra.mxu0 %v12812_v52  ;;  %v12864_v52 = vpack.c.bf16 %v2163_v51, %v2162_v50  ;;  %v2455_v50 = vld [vmem:[#allocation7 + $0xf18] sm:$0xff]  ;;  %v2472_v51 = vld [vmem:[#allocation7 + $0xfa0] sm:$0xff] }
 0xb65   :  { %12815 = vmatprep.subr.bf16.mxu0 %v12814_v58 }
 0xc0e   :  { %v1791_v61 = vpop.f32.mrb[12].mxu0 }
 0xc0f   :  { %v1792_v62 = vadd.f32 %v9818_v60, %v1791_v61  ;;  %v12210_v63 = vpop.f32.mrb[13].mxu0  ;;  %v2171_v60 = vld [vmem:[#allocation7 + $0xdb8] sm:$0xff] }
 0xc10   :  { %v12846_v61 = vpack.c.bf16 %v2171_v60, %v2170_v1  ;;  %v2155_v63 = vld [vmem:[#allocation7 + $0xd38] sm:$0xff] }
 0xc11   :  { %v1795_v2 = vmax.f32 %v1792_v62, 0.0  ;;  %v2154_v62 = vld [vmem:[#allocation7 + $0xd30] sm:$0xff] }
 0xc13   :  { %1797 = vrot.lane.b32.xlu0 %v1795_v2, %s14762_s4  ;;  %v2140_v2 = vld [vmem:[#allocation7 + $0xcc0] sm:$0xff] }
 0xc2e   :  { %v10334_v5 = vpop.f32.mrb[14].mxu0 }
 0xc2f   :  { %v10335_v6 = vpop.f32.mrb[15].mxu0 }
 0xc30   :  { %v10336_v7 = vadd.f32 %v10335_v6, %v10334_v5  ;;  %v2172_v5 = vld [vmem:[#allocation7 + $0xdc0] sm:$0xff]  ;;  %v2173_v6 = vld [vmem:[#allocation7 + $0xdc8] sm:$0xff] }
 0xc85   :  { %v1798_v3 = vpop.permute.xlu0 %1797 }
 0xc86   :  { %1801 = vst.msk [vmem:[#allocation2] sm:$0xff] %vm1800_vm8, %v1798_v3  ;;  %v2141_v3 = vld [vmem:[#allocation7 + $0xcc8] sm:$0xff] }
 0xc87   :  { %v12818_v8 = vpack.c.bf16 %v2141_v3, %v2140_v2  ;;  %v2436_v3 = vld [vmem:[#allocation7 + $0xe80] sm:$0xff] }
 0xc8d   :  { %v1802_v4 = vld [vmem:[#allocation2] sm:$0xff] }
 0xc8e   :  { %1944 = vmatmul.mubr.f32.vlgmr.msra.gmra.mrb[18].mxu1 %v1802_v4  ;;  %v12816_v4 = vpack.c.bf16 %v2123_v59, %v2122_v56 }
 0xc8f   :  { %12215 = vmatprep.mubr.msk.f32.mxu1 %vm14757_vm0, %v15011_v18  ;;  %12801 = vmatpush3.bf16.msra.mxu1 %v12800_v10  ;;  %v2125_v10 = vld [vmem:[#allocation7 + $0xc48] sm:$0xff] }
 0xc90   :  { %12835 = vmatprep.subr.bf16.mxu1 %v12834_v27  ;;  %12817 = vmatpush3.bf16.msra.mxu0 %v12816_v4  ;;  %v12820_v19 = vpack.c.bf16 %v2125_v10, %v2124_v9  ;;  %v12824_v27 = vpack.c.bf16 %v2127_v23, %v2126_v22  ;;  %v2437_v4 = vld [vmem:[#allocation7 + $0xe88] sm:$0xff] }
 0xc91   :  { %12819 = vmatprep.subr.bf16.mxu0 %v12818_v8  ;;  %v2468_v8 = vld [vmem:[#allocation7 + $0xf80] sm:$0xff]  ;;  %v2469_v9 = vld [vmem:[#allocation7 + $0xf88] sm:$0xff] }
 0xc92   :  { %v2425_v22 = vld [vmem:[#allocation7 + $0xe28] sm:$0xff] }
 0xc94   :  { %12821 = vmatpush3.bf16.msra.mxu0 %v12820_v19  ;;  %v2441_v19 = vld [vmem:[#allocation7 + $0xea8] sm:$0xff] }
 0xd61   :  { %v10299_v11 = vpop.f32.mrb[18].mxu1 }
 0xd62   :  { %v10300_v13 = vpop.f32.mrb[19].mxu1 }
 0xd63   :  { %v10301_v14 = vadd.f32 %v10300_v13, %v10299_v11  ;;  %v2156_v11 = vld [vmem:[#allocation7 + $0xd40] sm:$0xff]  ;;  %v2157_v13 = vld [vmem:[#allocation7 + $0xd48] sm:$0xff] }
 0xd64   :  { %v12852_v20 = vpack.c.bf16 %v2157_v13, %v2156_v11  ;;  %v12901_v11 = vpack.c.bf16 %v2469_v9, %v2468_v8  ;;  %v2439_v13 = vld [vmem:[#allocation7 + $0xe98] sm:$0xff]  ;;  %v2446_v9 = vld [vmem:[#allocation7 + $0xed0] sm:$0xff] }
 0xd65   :  { %v1946_v15 = vadd.f32 %v10301_v14, %v9820_v12  ;;  %v12850_v12 = vpack.c.bf16 %v2173_v6, %v2172_v5  ;;  %v2142_v14 = vld [vmem:[#allocation7 + $0xcd0] sm:$0xff]  ;;  %v2420_v5 = vld [vmem:[#allocation7 + $0xe00] sm:$0xff]  ;;  %v12869_v6 = vpack.c.bf16 %v2437_v4, %v2436_v3  ;;  %v2477_v3 = vld [vmem:[#allocation7 + $0xfc8] sm:$0xff] }
 0xd67   :  { %v2016_v16 = vadd.f32 %v10336_v7, %v1946_v15  ;;  %v12848_v7 = vpack.c.bf16 %v2155_v63, %v2154_v62  ;;  %v2143_v15 = vld [vmem:[#allocation7 + $0xcd8] sm:$0xff]  ;;  %v2331_v63 = vld [vmem:[#allocation10 + $0x68] sm:$0xff] }
 0xd68   :  { %v12822_v21 = vpack.c.bf16 %v2143_v15, %v2142_v14  ;;  %v2330_v62 = vld [vmem:[#allocation10 + $0x60] sm:$0xff] }
 0xd69   :  { %v2019_v17 = vmax.f32 %v2016_v16, 0.0  ;;  %v2174_v16 = vld [vmem:[#allocation7 + $0xdd0] sm:$0xff]  ;;  %v12867_v2 = vpack.c.bf16 %v2331_v63, %v2330_v62  ;;  %v2423_v14 = vld [vmem:[#allocation7 + $0xe18] sm:$0xff] }
 0xd6a   :  { %12823 = vmatprep.subr.bf16.mxu0 %v12822_v21  ;;  %v2424_v21 = vld [vmem:[#allocation7 + $0xe20] sm:$0xff]  ;;  %v2458_v62 = vld [vmem:[#allocation7 + $0xf30] sm:$0xff]  ;;  %v2459_v63 = vld [vmem:[#allocation7 + $0xf38] sm:$0xff] }
 0xd6b   :  { %12216 = vmatmul.mubr.msk.f32.vlgmr.msra.gmra.mrb[20].mxu1 %vm485_vm3, %v2019_v17  ;;  %v2175_v17 = vld [vmem:[#allocation7 + $0xdd8] sm:$0xff]  ;;  %12825 = vmatpush3.bf16.msra.mxu0 %v12824_v27  ;;  %v12879_v23 = vpack.c.bf16 %v2425_v22, %v2424_v21  ;;  %v12915_v4 = vpack.c.bf16 %v2459_v63, %v2458_v62  ;;  %v2448_v21 = vld [vmem:[#allocation7 + $0xee0] sm:$0xff]  ;;  %v2449_v22 = vld [vmem:[#allocation7 + $0xee8] sm:$0xff] }
 0xd6c   :  { %2322 = vmatprep.mubr.f32.mxu1 %v15011_v18  ;;  %12837 = vmatpush3.bf16.msra.mxu1 %v12836_v31  ;;  %v12854_v24 = vpack.c.bf16 %v2175_v17, %v2174_v16  ;;  %v12826_v31 = vpack.c.bf16 %v2145_v30, %v2144_v29  ;;  %v2440_v17 = vld [vmem:[#allocation7 + $0xea0] sm:$0xff] }
 0xd6d   :  { %12839 = vmatprep.subr.bf16.mxu1 %v12838_v40  ;;  %v12860_v40 = vpack.c.bf16 %v2161_v38, %v2160_v37  ;;  %v2444_v30 = vld [vmem:[#allocation7 + $0xec0] sm:$0xff] }
 0xd6e   :  { %12827 = vmatprep.subr.bf16.mxu0 %v12826_v31  ;;  %v2445_v31 = vld [vmem:[#allocation7 + $0xec8] sm:$0xff]  ;;  %v9823_v37 = vld [vmem:[#allocation8 + $0x6] ss:$0 sm:$0xff] }
 0xd6f   :  { %12829 = vmatpush3.bf16.msra.mxu0 %v12828_v35  ;;  %v12885_v33 = vpack.c.bf16 %v2445_v31, %v2444_v30  ;;  %v12887_v35 = vpack.c.bf16 %v2429_v34, %v2428_v32  ;;  %v2465_v30 = vld [vmem:[#allocation7 + $0xf68] sm:$0xff]  ;;  %v2451_v34 = vld [vmem:[#allocation7 + $0xef8] sm:$0xff] }
 0xd70   :  { %12841 = vmatpush3.bf16.msra.mxu1 %v12840_v44  ;;  %v12830_v44 = vpack.c.bf16 %v2147_v42, %v2146_v41  ;;  %v2452_v41 = vld [vmem:[#allocation7 + $0xf00] sm:$0xff]  ;;  %v2453_v42 = vld [vmem:[#allocation7 + $0xf08] sm:$0xff] }
 0xd71   :  { %12843 = vmatprep.subr.bf16.mxu1 %v12842_v53  ;;  %v9821_v53 = vld [vmem:[#allocation11 + $0x5] ss:$0 sm:$0xff]  ;;  %v12903_v46 = vpack.c.bf16 %v2453_v42, %v2452_v41  ;;  %v2466_v42 = vld [vmem:[#allocation7 + $0xf70] sm:$0xff] }
 0xd72   :  { %12831 = vmatprep.subr.bf16.mxu0 %v12830_v44  ;;  %v2471_v44 = vld [vmem:[#allocation7 + $0xf98] sm:$0xff] }
 0xd73   :  { %12833 = vmatpush3.bf16.msra.mxu0 %v12832_v48  ;;  %v12905_v48 = vpack.c.bf16 %v2471_v44, %v2470_v43  ;;  %v2467_v43 = vld [vmem:[#allocation7 + $0xf78] sm:$0xff] }
 0xd74   :  { %12845 = vmatpush3.bf16.msra.mxu1 %v12844_v57  ;;  %12866 = vmatprep.subr.bf16.mxu0 %v14755_v0  ;;  %v12931_v44 = vpack.c.bf16 %v2467_v43, %v2466_v42  ;;  %v2736_v43 = vld [vmem:[#allocation7 + $0x1038] sm:$0xff] }
 0xd75   :  { %12847 = vmatprep.subr.bf16.mxu1 %v12846_v61 }
 0xd78   :  { %12849 = vmatpush3.bf16.msra.mxu1 %v12848_v7  ;;  %v2421_v7 = vld [vmem:[#allocation7 + $0xe08] sm:$0xff] }
 0xd79   :  { %12851 = vmatprep.subr.bf16.mxu1 %v12850_v12  ;;  %v12871_v10 = vpack.c.bf16 %v2421_v7, %v2420_v5  ;;  %v2438_v12 = vld [vmem:[#allocation7 + $0xe90] sm:$0xff]  ;;  %v2461_v7 = vld [vmem:[#allocation7 + $0xf48] sm:$0xff] }
 0xd7a   :  { %v12873_v15 = vpack.c.bf16 %v2439_v13, %v2438_v12  ;;  %v2430_v12 = vld [vmem:[#allocation7 + $0xe50] sm:$0xff]  ;;  %v2431_v13 = vld [vmem:[#allocation7 + $0xe58] sm:$0xff] }
 0xd7c   :  { %12853 = vmatpush3.bf16.msra.mxu1 %v12852_v20  ;;  %v12877_v20 = vpack.c.bf16 %v2441_v19, %v2440_v17  ;;  %v2463_v17 = vld [vmem:[#allocation7 + $0xf58] sm:$0xff] }
 0xd7d   :  { %12855 = vmatprep.subr.bf16.mxu1 %v12854_v24  ;;  %v2442_v24 = vld [vmem:[#allocation7 + $0xeb0] sm:$0xff] }
 0xd7e   :  { %v12881_v27 = vpack.c.bf16 %v2443_v25, %v2442_v24  ;;  %v2432_v24 = vld [vmem:[#allocation7 + $0xe60] sm:$0xff]  ;;  %v2433_v25 = vld [vmem:[#allocation7 + $0xe68] sm:$0xff] }
 0xd80   :  { %12857 = vmatpush3.bf16.msra.mxu1 %v12856_v28  ;;  %v2427_v28 = vld [vmem:[#allocation7 + $0xe38] sm:$0xff] }
 0xd81   :  { %12859 = vmatprep.subr.bf16.mxu1 %v12858_v39  ;;  %v12883_v29 = vpack.c.bf16 %v2427_v28, %v2426_v26  ;;  %v2480_v26 = vld [vmem:[#allocation7 + $0xfe0] sm:$0xff]  ;;  %v2481_v28 = vld [vmem:[#allocation7 + $0xfe8] sm:$0xff] }
 0xd82   :  { %v12925_v31 = vpack.c.bf16 %v2481_v28, %v2480_v26  ;;  %v2749_v26 = vld [vmem:[#allocation7 + $0x10a0] sm:$0xff] }
 0xd84   :  { %12861 = vmatpush3.bf16.msra.mxu1 %v12860_v40 }
 0xd85   :  { %12863 = vmatprep.subr.bf16.mxu1 %v12862_v49  ;;  %v2454_v49 = vld [vmem:[#allocation7 + $0xf10] sm:$0xff] }
 0xd88   :  { %12865 = vmatpush3.bf16.msra.mxu1 %v12864_v52  ;;  %v2473_v52 = vld [vmem:[#allocation7 + $0xfa8] sm:$0xff] }
 0xd89   :  { %12870 = vmatprep.subr.bf16.mxu1 %v12869_v6  ;;  %v2460_v6 = vld [vmem:[#allocation7 + $0xf40] sm:$0xff] }
 0xd8a   :  { %v12919_v8 = vpack.c.bf16 %v2461_v7, %v2460_v6  ;;  %v2730_v7 = vld [vmem:[#allocation7 + $0x1008] sm:$0xff] }
 0xd8b   :  { %2323 = vmatmul.mubr.f32.vlgmr.msra.gmra.mrb[22].mxu1 %v15011_v18 }
 0xd8c   :  { %12872 = vmatpush3.bf16.msra.mxu1 %v12871_v10  ;;  %v2447_v10 = vld [vmem:[#allocation7 + $0xed8] sm:$0xff] }
 0xd8d   :  { %12874 = vmatprep.subr.bf16.mxu1 %v12873_v15  ;;  %v2479_v15 = vld [vmem:[#allocation7 + $0xfd8] sm:$0xff] }
 0xe3e   :  { %v2100_v54 = vpop.f32.mrb[20].mxu1 }
 0xe3f   :  { %v2101_v55 = vadd.f32 %v9821_v53, %v2100_v54  ;;  %v12217_v56 = vpop.f32.mrb[21].mxu1  ;;  %v12907_v53 = vpack.c.bf16 %v2455_v50, %v2454_v49  ;;  %v15049_v54 = vld [vmem:[#allocation2 + $0x8] sm:$0xff] }
 0xe40   :  { %v2456_v56 = vld [vmem:[#allocation7 + $0xf20] sm:$0xff] }
 0xe41   :  { %v2104_v57 = vmax.f32 %v2101_v55, 0.0  ;;  %v12909_v55 = vpack.c.bf16 %v2473_v52, %v2472_v51 }
 0xe43   :  { %2106 = vrot.lane.b32.xlu1 %v2104_v57, %s14763_s20  ;;  %v2457_v57 = vld [vmem:[#allocation7 + $0xf28] sm:$0xff] }
 0xe5e   :  { %v10407_v1 = vpop.f32.mrb[22].mxu1 }
 0xe5f   :  { %v10408_v60 = vpop.f32.mrb[23].mxu1 }
 0xe60   :  { %v10409_v61 = vadd.f32 %v10408_v60, %v10407_v1  ;;  %v2475_v1 = vld [vmem:[#allocation7 + $0xfb8] sm:$0xff]  ;;  %v12911_v60 = vpack.c.bf16 %v2457_v57, %v2456_v56 }
 0xe61   :  { %v2635_v56 = vld [vmem:[#allocation10 + $0x78] sm:$0xff] }
 0xeb5   :  { %v2107_v58 = vpop.permute.xlu1 %2106 }
 0xeb6   :  { %2110 = vst.msk [vmem:[#allocation2] sm:$0xff] %vm2109_vm9, %v2107_v58  ;;  %v2474_v58 = vld [vmem:[#allocation7 + $0xfb0] sm:$0xff] }
 0xebd   :  { %v15043_v59 = vld [vmem:[#allocation2] sm:$0xff] }
 0xebe   :  { %2253 = vmatmul.mubr.f32.vlgmr.msra.gmra.mrb[16].mxu0 %v15043_v59 }
 0xebf   :  { %12222 = vmatprep.mubr.msk.f32.mxu0 %vm14757_vm0, %v15011_v18  ;;  %12868 = vmatpush3.bf16.msra.mxu0 %v12867_v2  ;;  %v2422_v18 = vld [vmem:[#allocation7 + $0xe10] sm:$0xff]  ;;  %v2476_v2 = vld [vmem:[#allocation7 + $0xfc0] sm:$0xff] }
 0xec0   :  { %12902 = vmatprep.subr.bf16.mxu0 %v12901_v11  ;;  %v12875_v16 = vpack.c.bf16 %v2423_v14, %v2422_v18  ;;  %v12917_v5 = vpack.c.bf16 %v2477_v3, %v2476_v2  ;;  %v12889_v11 = vpack.c.bf16 %v2447_v10, %v2446_v9  ;;  %v2478_v18 = vld [vmem:[#allocation7 + $0xfd0] sm:$0xff]  ;;  %v12891_v14 = vpack.c.bf16 %v2431_v13, %v2430_v12  ;;  %v2745_v3 = vld [vmem:[#allocation7 + $0x1080] sm:$0xff]  ;;  %v2778_v9 = vld [vmem:[#allocation7 + $0x1188] sm:$0xff] }
 0xec1   :  { %v12921_v19 = vpack.c.bf16 %v2479_v15, %v2478_v18  ;;  %v2761_v12 = vld [vmem:[#allocation7 + $0x1100] sm:$0xff]  ;;  %v2762_v13 = vld [vmem:[#allocation7 + $0x1108] sm:$0xff]  ;;  %v2747_v18 = vld [vmem:[#allocation7 + $0x1090] sm:$0xff] }
 0xec2   :  { %12876 = vmatpush3.bf16.msra.mxu1 %v12875_v16  ;;  %v2462_v16 = vld [vmem:[#allocation7 + $0xf50] sm:$0xff]  ;;  %v2748_v15 = vld [vmem:[#allocation7 + $0x1098] sm:$0xff] }
 0xec3   :  { %12878 = vmatprep.subr.bf16.mxu1 %v12877_v20  ;;  %v12923_v20 = vpack.c.bf16 %v2463_v17, %v2462_v16  ;;  %v2731_v16 = vld [vmem:[#allocation7 + $0x1010] sm:$0xff]  ;;  %v2732_v17 = vld [vmem:[#allocation7 + $0x1018] sm:$0xff] }
 0xec6   :  { %12880 = vmatpush3.bf16.msra.mxu1 %v12879_v23  ;;  %v12893_v23 = vpack.c.bf16 %v2449_v22, %v2448_v21  ;;  %v2779_v21 = vld [vmem:[#allocation7 + $0x1190] sm:$0xff]  ;;  %v2780_v22 = vld [vmem:[#allocation7 + $0x1198] sm:$0xff] }
 0xec7   :  { %12882 = vmatprep.subr.bf16.mxu1 %v12881_v27  ;;  %v12895_v27 = vpack.c.bf16 %v2433_v25, %v2432_v24  ;;  %v12972_v24 = vpack.c.bf16 %v2780_v22, %v2779_v21  ;;  %v2764_v25 = vld [vmem:[#allocation7 + $0x1118] sm:$0xff]  ;;  %v2790_v21 = vld [vmem:[#allocation7 + $0x11e8] sm:$0xff]  ;;  %v2773_v22 = vld [vmem:[#allocation7 + $0x1160] sm:$0xff] }
 0xeca   :  { %12884 = vmatpush3.bf16.msra.mxu1 %v12883_v29  ;;  %v2464_v29 = vld [vmem:[#allocation7 + $0xf60] sm:$0xff] }
 0xecb   :  { %12886 = vmatprep.subr.bf16.mxu1 %v12885_v33  ;;  %v12927_v32 = vpack.c.bf16 %v2465_v30, %v2464_v29  ;;  %v2450_v33 = vld [vmem:[#allocation7 + $0xef0] sm:$0xff]  ;;  %v2733_v30 = vld [vmem:[#allocation7 + $0x1020] sm:$0xff] }
 0xece   :  { %12888 = vmatpush3.bf16.msra.mxu1 %v12887_v35  ;;  %v2434_v35 = vld [vmem:[#allocation7 + $0xe70] sm:$0xff] }
 0xecf   :  { %12890 = vmatprep.subr.bf16.mxu1 %v12889_v11 }
 0xed2   :  { %12892 = vmatpush3.bf16.msra.mxu1 %v12891_v14  ;;  %v12970_v14 = vpack.c.bf16 %v2762_v13, %v2761_v12 }
 0xed3   :  { %12894 = vmatprep.subr.bf16.mxu1 %v12893_v23  ;;  %v2763_v23 = vld [vmem:[#allocation7 + $0x1110] sm:$0xff] }
 0xed4   :  { %v12974_v28 = vpack.c.bf16 %v2764_v25, %v2763_v23  ;;  %v2774_v23 = vld [vmem:[#allocation7 + $0x1168] sm:$0xff] }
 0xed5   :  { %v12994_v25 = vpack.c.bf16 %v2774_v23, %v2773_v22 }
 0xed6   :  { %12896 = vmatpush3.bf16.msra.mxu1 %v12895_v27  ;;  %v2750_v27 = vld [vmem:[#allocation7 + $0x10a8] sm:$0xff] }
 0xed7   :  { %v12944_v29 = vpack.c.bf16 %v2750_v27, %v2749_v26  ;;  %v2759_v26 = vld [vmem:[#allocation7 + $0x10f0] sm:$0xff]  ;;  %v2760_v27 = vld [vmem:[#allocation7 + $0x10f8] sm:$0xff] }
 0xf91   :  { %v10372_v36 = vpop.f32.mrb[16].mxu0 }
 0xf92   :  { %v10373_v38 = vpop.f32.mrb[17].mxu0 }
 0xf93   :  { %v10374_v39 = vadd.f32 %v10373_v38, %v10372_v36  ;;  %v12897_v36 = vpack.c.bf16 %v2451_v34, %v2450_v33  ;;  %v2482_v38 = vld [vmem:[#allocation7 + $0xff0] sm:$0xff]  ;;  %v2782_v33 = vld [vmem:[#allocation7 + $0x11a8] sm:$0xff]  ;;  %v2765_v34 = vld [vmem:[#allocation7 + $0x1120] sm:$0xff] }
 0xf95   :  { %v2255_v40 = vadd.f32 %v10374_v39, %v9823_v37  ;;  %v2435_v37 = vld [vmem:[#allocation7 + $0xe78] sm:$0xff]  ;;  %12898 = vmatprep.subr.bf16.mxu1 %v12897_v36 }
 0xf96   :  { %v2483_v39 = vld [vmem:[#allocation7 + $0xff8] sm:$0xff] }
 0xf97   :  { %v2325_v45 = vadd.f32 %v10409_v61, %v2255_v40  ;;  %v12913_v61 = vpack.c.bf16 %v2475_v1, %v2474_v58  ;;  %v12899_v40 = vpack.c.bf16 %v2435_v37, %v2434_v35  ;;  %v12929_v41 = vpack.c.bf16 %v2483_v39, %v2482_v38  ;;  %v9826_v1 = vld [vmem:[#allocation8 + $0x7] ss:$0 sm:$0xff]  ;;  %v2766_v35 = vld [vmem:[#allocation7 + $0x1128] sm:$0xff]  ;;  %v2751_v38 = vld [vmem:[#allocation7 + $0x10b0] sm:$0xff] }
 0xf98   :  { %v2752_v39 = vld [vmem:[#allocation7 + $0x10b8] sm:$0xff] }
 0xf99   :  { %v2328_v47 = vmax.f32 %v2325_v45, 0.0  ;;  %12900 = vmatpush3.bf16.msra.mxu1 %v12899_v40  ;;  %v9824_v45 = vld [vmem:[#allocation11 + $0x6] ss:$0 sm:$0xff]  ;;  %v2735_v40 = vld [vmem:[#allocation7 + $0x1030] sm:$0xff]  ;;  %v12948_v42 = vpack.c.bf16 %v2752_v39, %v2751_v38  ;;  %v9827_v38 = vld [vmem:[#allocation11 + $0x7] ss:$0 sm:$0xff] }
 0xf9a   :  { %12933 = vmatprep.subr.bf16.mxu1 %v14755_v0 }
 0xf9b   :  { %12223 = vmatmul.mubr.msk.f32.vlgmr.msra.gmra.mrb[18].mxu0 %vm485_vm3, %v2328_v47 }
 0xf9c   :  { %12904 = vmatpush3.bf16.msra.mxu0 %v12903_v46  ;;  %2626 = vmatprep.mubr.f32.mxu0 %v15049_v54 }
 0xf9d   :  { %12906 = vmatprep.subr.bf16.mxu0 %v12905_v48 }
 0xfa0   :  { %12908 = vmatpush3.bf16.msra.mxu0 %v12907_v53 }
 0xfa1   :  { %12910 = vmatprep.subr.bf16.mxu0 %v12909_v55  ;;  %v2634_v55 = vld [vmem:[#allocation10 + $0x70] sm:$0xff] }
 0xfa2   :  { %v12934_v57 = vpack.c.bf16 %v2635_v56, %v2634_v55 }
 0xfa4   :  { %12912 = vmatpush3.bf16.msra.mxu0 %v12911_v60 }
 0xfa5   :  { %12914 = vmatprep.subr.bf16.mxu0 %v12913_v61 }
 0xfa8   :  { %12916 = vmatpush3.bf16.msra.mxu0 %v12915_v4  ;;  %v2746_v4 = vld [vmem:[#allocation7 + $0x1088] sm:$0xff] }
 0xfa9   :  { %12918 = vmatprep.subr.bf16.mxu0 %v12917_v5  ;;  %v2729_v5 = vld [vmem:[#allocation7 + $0x1000] sm:$0xff]  ;;  %v12936_v6 = vpack.c.bf16 %v2746_v4, %v2745_v3  ;;  %v2788_v3 = vld [vmem:[#allocation7 + $0x11d8] sm:$0xff] }
 0xfaa   :  { %v12938_v10 = vpack.c.bf16 %v2730_v7, %v2729_v5  ;;  %v2739_v7 = vld [vmem:[#allocation7 + $0x1050] sm:$0xff] }
 0xfac   :  { %12920 = vmatpush3.bf16.msra.mxu0 %v12919_v8  ;;  %v2777_v8 = vld [vmem:[#allocation7 + $0x1180] sm:$0xff] }
 0xfad   :  { %12922 = vmatprep.subr.bf16.mxu0 %v12921_v19  ;;  %v12968_v11 = vpack.c.bf16 %v2778_v9, %v2777_v8  ;;  %v12940_v19 = vpack.c.bf16 %v2748_v15, %v2747_v18  ;;  %v2740_v8 = vld [vmem:[#allocation7 + $0x1058] sm:$0xff]  ;;  %v2757_v18 = vld [vmem:[#allocation7 + $0x10e0] sm:$0xff] }
 0xfae   :  { %v12958_v12 = vpack.c.bf16 %v2740_v8, %v2739_v7  ;;  %v3070_v7 = vld [vmem:[#allocation7 + $0x1308] sm:$0xff]  ;;  %v3055_v8 = vld [vmem:[#allocation7 + $0x1290] sm:$0xff] }
 0xfb0   :  { %12924 = vmatpush3.bf16.msra.mxu0 %v12923_v20  ;;  %v12942_v20 = vpack.c.bf16 %v2732_v17, %v2731_v16  ;;  %v2741_v16 = vld [vmem:[#allocation7 + $0x1060] sm:$0xff]  ;;  %v2742_v17 = vld [vmem:[#allocation7 + $0x1068] sm:$0xff] }
 0xfb1   :  { %12926 = vmatprep.subr.bf16.mxu0 %v12925_v31  ;;  %v2734_v31 = vld [vmem:[#allocation7 + $0x1028] sm:$0xff] }
 0xfb2   :  { %v12946_v36 = vpack.c.bf16 %v2734_v31, %v2733_v30  ;;  %v2744_v30 = vld [vmem:[#allocation7 + $0x1078] sm:$0xff]  ;;  %v2791_v31 = vld [vmem:[#allocation7 + $0x11f0] sm:$0xff] }
 0xfb4   :  { %12928 = vmatpush3.bf16.msra.mxu0 %v12927_v32  ;;  %v2781_v32 = vld [vmem:[#allocation7 + $0x11a0] sm:$0xff] }
 0xfb5   :  { %12930 = vmatprep.subr.bf16.mxu0 %v12929_v41  ;;  %v12976_v37 = vpack.c.bf16 %v2782_v33, %v2781_v32  ;;  %v12978_v41 = vpack.c.bf16 %v2766_v35, %v2765_v34  ;;  %v2792_v32 = vld [vmem:[#allocation7 + $0x11f8] sm:$0xff]  ;;  %v2775_v35 = vld [vmem:[#allocation7 + $0x1170] sm:$0xff] }
 0xfb6   :  { %v12996_v34 = vpack.c.bf16 %v2792_v32, %v2791_v31  ;;  %v3059_v32 = vld [vmem:[#allocation7 + $0x12b0] sm:$0xff] }
 0xfb8   :  { %12932 = vmatpush3.bf16.msra.mxu0 %v12931_v44  ;;  %v2783_v44 = vld [vmem:[#allocation7 + $0x11b0] sm:$0xff] }
 0xfb9   :  { %12937 = vmatprep.subr.bf16.mxu0 %v12936_v6 }
 0xfbb   :  { %2627 = vmatmul.mubr.f32.vlgmr.msra.gmra.mrb[20].mxu0 %v15049_v54 }
 0xfbc   :  { %12939 = vmatpush3.bf16.msra.mxu0 %v12938_v10  ;;  %v2771_v10 = vld [vmem:[#allocation7 + $0x1150] sm:$0xff] }
 0xfbd   :  { %12941 = vmatprep.subr.bf16.mxu0 %v12940_v19  ;;  %v2789_v19 = vld [vmem:[#allocation7 + $0x11e0] sm:$0xff] }
 0xfc0   :  { %12943 = vmatpush3.bf16.msra.mxu0 %v12942_v20  ;;  %v12962_v20 = vpack.c.bf16 %v2742_v17, %v2741_v16  ;;  %v3071_v16 = vld [vmem:[#allocation7 + $0x1310] sm:$0xff] }
 0xfc1   :  { %12945 = vmatprep.subr.bf16.mxu0 %v12944_v29  ;;  %v12964_v29 = vpack.c.bf16 %v2760_v27, %v2759_v26  ;;  %v3089_v26 = vld [vmem:[#allocation7 + $0x13a0] sm:$0xff]  ;;  %v3090_v27 = vld [vmem:[#allocation7 + $0x13a8] sm:$0xff] }
 0xfc2   :  { %v13043_v31 = vpack.c.bf16 %v3090_v27, %v3089_v26  ;;  %v3100_v26 = vld [vmem:[#allocation7 + $0x13f8] sm:$0xff] }
 0xfc4   :  { %12947 = vmatpush3.bf16.msra.mxu0 %v12946_v36  ;;  %v2776_v36 = vld [vmem:[#allocation7 + $0x1178] sm:$0xff] }
 0xfc5   :  { %12949 = vmatprep.subr.bf16.mxu0 %v12948_v42 }
0x106e   :  { %v2409_v46 = vpop.f32.mrb[18].mxu0 }
0x106f   :  { %v2410_v47 = vadd.f32 %v9824_v45, %v2409_v46  ;;  %v12224_v48 = vpop.f32.mrb[19].mxu0  ;;  %v2784_v45 = vld [vmem:[#allocation7 + $0x11b8] sm:$0xff] }
0x1070   :  { %v12980_v46 = vpack.c.bf16 %v2784_v45, %v2783_v44  ;;  %v2768_v48 = vld [vmem:[#allocation7 + $0x1138] sm:$0xff] }
0x1071   :  { %v2413_v49 = vmax.f32 %v2410_v47, 0.0  ;;  %v2767_v47 = vld [vmem:[#allocation7 + $0x1130] sm:$0xff] }
0x1072   :  { %v12982_v55 = vpack.c.bf16 %v2768_v48, %v2767_v47  ;;  %v2943_v48 = vld [vmem:[#allocation10 + $0x80] sm:$0xff] }
0x1073   :  { %2414 = vst.msk [vmem:[#allocation2 + $0x8] sm:$0xff] %vm485_vm3, %v2413_v49  ;;  %v2753_v49 = vld [vmem:[#allocation7 + $0x10c0] sm:$0xff] }
0x107a   :  { %v2416_v50 = vld [vmem:[#allocation2 + $0x8] sm:$0xff] }
0x107b   :  { %2556 = vmatprep.mubr.f32.mxu1 %v2416_v50  ;;  %v2754_v50 = vld [vmem:[#allocation7 + $0x10c8] sm:$0xff] }
0x107c   :  { %2557 = vmatmul.mubr.f32.vlgmr.msra.gmra.mrb[24].mxu1 %v15043_v59  ;;  %v12952_v56 = vpack.c.bf16 %v2754_v50, %v2753_v49  ;;  %v2944_v49 = vld [vmem:[#allocation10 + $0x88] sm:$0xff] }
0x107d   :  { %12229 = vmatprep.mubr.msk.f32.mxu1 %vm14757_vm0, %v15049_v54  ;;  %12935 = vmatpush3.bf16.msra.mxu1 %v12934_v57  ;;  %v2737_v57 = vld [vmem:[#allocation7 + $0x1040] sm:$0xff]  ;;  %v13001_v50 = vpack.c.bf16 %v2944_v49, %v2943_v48 }
0x107e   :  { %12969 = vmatprep.subr.bf16.mxu1 %v12968_v11  ;;  %v2772_v11 = vld [vmem:[#allocation7 + $0x1158] sm:$0xff] }
0x107f   :  { %v12990_v13 = vpack.c.bf16 %v2772_v11, %v2771_v10  ;;  %v3056_v10 = vld [vmem:[#allocation7 + $0x1298] sm:$0xff]  ;;  %v3039_v11 = vld [vmem:[#allocation7 + $0x1210] sm:$0xff] }
0x108e   :  { %v10480_v51 = vpop.f32.mrb[20].mxu0 }
0x108f   :  { %v10481_v52 = vpop.f32.mrb[21].mxu0 }
0x1090   :  { %v10482_v53 = vadd.f32 %v10481_v52, %v10480_v51  ;;  %v12950_v51 = vpack.c.bf16 %v2736_v43, %v2735_v40  ;;  %v2785_v52 = vld [vmem:[#allocation7 + $0x11c0] sm:$0xff] }
0x1092   :  { %12951 = vmatpush3.bf16.msra.mxu0 %v12950_v51 }
0x1093   :  { %12953 = vmatprep.subr.bf16.mxu0 %v12952_v56 }
0x114f   :  { %v10445_v58 = vpop.f32.mrb[24].mxu1 }
0x1150   :  { %v10446_v60 = vpop.f32.mrb[25].mxu1 }
0x1151   :  { %v10447_v61 = vadd.f32 %v10446_v60, %v10445_v58  ;;  %v2738_v58 = vld [vmem:[#allocation7 + $0x1048] sm:$0xff] }
0x1152   :  { %v12954_v4 = vpack.c.bf16 %v2738_v58, %v2737_v57 }
0x1153   :  { %v2559_v62 = vadd.f32 %v10447_v61, %v9826_v1  ;;  %v2769_v1 = vld [vmem:[#allocation7 + $0x1140] sm:$0xff]  ;;  %v2770_v61 = vld [vmem:[#allocation7 + $0x1148] sm:$0xff] }
0x1154   :  { %v12986_v5 = vpack.c.bf16 %v2770_v61, %v2769_v1  ;;  %12955 = vmatpush3.bf16.msra.mxu0 %v12954_v4  ;;  %v3053_v1 = vld [vmem:[#allocation7 + $0x1280] sm:$0xff] }
0x1155   :  { %v2629_v63 = vadd.f32 %v10482_v53, %v2559_v62  ;;  %v2786_v53 = vld [vmem:[#allocation7 + $0x11c8] sm:$0xff]  ;;  %v2755_v62 = vld [vmem:[#allocation7 + $0x10d0] sm:$0xff]  ;;  %v3037_v61 = vld [vmem:[#allocation7 + $0x1200] sm:$0xff] }
0x1156   :  { %v12984_v60 = vpack.c.bf16 %v2786_v53, %v2785_v52  ;;  %v9829_v52 = vld [vmem:[#allocation8 + $0x8] ss:$0 sm:$0xff] }
0x1157   :  { %v2632_v2 = vmax.f32 %v2629_v63, 0.0  ;;  %v2756_v63 = vld [vmem:[#allocation7 + $0x10d8] sm:$0xff] }
0x1158   :  { %v12956_v6 = vpack.c.bf16 %v2756_v63, %v2755_v62  ;;  %v3038_v63 = vld [vmem:[#allocation7 + $0x1208] sm:$0xff] }
0x1159   :  { %12230 = vmatmul.mubr.msk.f32.vlgmr.msra.gmra.mrb[26].mxu1 %vm485_vm3, %v2632_v2  ;;  %v2787_v2 = vld [vmem:[#allocation7 + $0x11d0] sm:$0xff]  ;;  %v13005_v4 = vpack.c.bf16 %v3038_v63, %v3037_v61 }
0x115a   :  { %2935 = vmatprep.mubr.f32.mxu1 %v15049_v54  ;;  %12971 = vmatpush3.bf16.msra.mxu1 %v12970_v14  ;;  %v12988_v9 = vpack.c.bf16 %v2788_v3, %v2787_v2  ;;  %v2758_v14 = vld [vmem:[#allocation7 + $0x10e8] sm:$0xff]  ;;  %v3085_v2 = vld [vmem:[#allocation7 + $0x1380] sm:$0xff]  ;;  %v3047_v63 = vld [vmem:[#allocation7 + $0x1250] sm:$0xff] }
0x115b   :  { %12973 = vmatprep.subr.bf16.mxu1 %v12972_v24  ;;  %12957 = vmatprep.subr.bf16.mxu0 %v12956_v6  ;;  %v12960_v15 = vpack.c.bf16 %v2758_v14, %v2757_v18  ;;  %v12992_v24 = vpack.c.bf16 %v2790_v21, %v2789_v19  ;;  %v3086_v3 = vld [vmem:[#allocation7 + $0x1388] sm:$0xff]  ;;  %v3069_v6 = vld [vmem:[#allocation7 + $0x1300] sm:$0xff]  ;;  %v3087_v14 = vld [vmem:[#allocation7 + $0x1390] sm:$0xff] }
0x115c   :  { %12959 = vmatpush3.bf16.msra.mxu0 %v12958_v12  ;;  %v3040_v12 = vld [vmem:[#allocation7 + $0x1218] sm:$0xff]  ;;  %v3058_v21 = vld [vmem:[#allocation7 + $0x12a8] sm:$0xff] }
0x115d   :  { %12961 = vmatprep.subr.bf16.mxu0 %v12960_v15  ;;  %v13009_v18 = vpack.c.bf16 %v3040_v12, %v3039_v11  ;;  %v3088_v15 = vld [vmem:[#allocation7 + $0x1398] sm:$0xff]  ;;  %v3049_v11 = vld [vmem:[#allocation7 + $0x1260] sm:$0xff]  ;;  %v3050_v12 = vld [vmem:[#allocation7 + $0x1268] sm:$0xff] }
0x115e   :  { %12975 = vmatpush3.bf16.msra.mxu1 %v12974_v28  ;;  %v2743_v28 = vld [vmem:[#allocation7 + $0x1070] sm:$0xff]  ;;  %v13039_v17 = vpack.c.bf16 %v3088_v15, %v3087_v14  ;;  %v3072_v19 = vld [vmem:[#allocation7 + $0x1318] sm:$0xff]  ;;  %v3098_v14 = vld [vmem:[#allocation7 + $0x13e8] sm:$0xff] }
0x115f   :  { %12977 = vmatprep.subr.bf16.mxu1 %v12976_v37  ;;  %v12966_v33 = vpack.c.bf16 %v2744_v30, %v2743_v28  ;;  %v12998_v37 = vpack.c.bf16 %v2776_v36, %v2775_v35  ;;  %v13041_v22 = vpack.c.bf16 %v3072_v19, %v3071_v16  ;;  %v3073_v28 = vld [vmem:[#allocation7 + $0x1320] sm:$0xff]  ;;  %v3082_v16 = vld [vmem:[#allocation7 + $0x1368] sm:$0xff] }
0x1160   :  { %12963 = vmatpush3.bf16.msra.mxu0 %v12962_v20  ;;  %v3057_v20 = vld [vmem:[#allocation7 + $0x12a0] sm:$0xff] }
0x1161   :  { %12965 = vmatprep.subr.bf16.mxu0 %v12964_v29  ;;  %v13011_v23 = vpack.c.bf16 %v3058_v21, %v3057_v20  ;;  %v3074_v29 = vld [vmem:[#allocation7 + $0x1328] sm:$0xff]  ;;  %v3081_v15 = vld [vmem:[#allocation7 + $0x1360] sm:$0xff]  ;;  %v3067_v20 = vld [vmem:[#allocation7 + $0x12f0] sm:$0xff] }
0x1162   :  { %12979 = vmatpush3.bf16.msra.mxu1 %v12978_v41  ;;  %v13045_v35 = vpack.c.bf16 %v3074_v29, %v3073_v28  ;;  %v13061_v19 = vpack.c.bf16 %v3082_v16, %v3081_v15  ;;  %v3068_v21 = vld [vmem:[#allocation7 + $0x12f8] sm:$0xff]  ;;  %v3083_v29 = vld [vmem:[#allocation7 + $0x1370] sm:$0xff]  ;;  %v3349_v15 = vld [vmem:[#allocation7 + $0x1420] sm:$0xff] }
0x1163   :  { %12981 = vmatprep.subr.bf16.mxu1 %v12980_v46  ;;  %v3350_v16 = vld [vmem:[#allocation7 + $0x1428] sm:$0xff] }
0x1164   :  { %12967 = vmatpush3.bf16.msra.mxu0 %v12966_v33  ;;  %v3060_v33 = vld [vmem:[#allocation7 + $0x12b8] sm:$0xff] }
0x1165   :  { %13000 = vmatprep.subr.bf16.mxu0 %v14755_v0  ;;  %v13015_v36 = vpack.c.bf16 %v3060_v33, %v3059_v32  ;;  %v9830_v32 = vld [vmem:[#allocation11 + $0x8] ss:$0 sm:$0xff] }
0x1166   :  { %12983 = vmatpush3.bf16.msra.mxu1 %v12982_v55 }
0x1167   :  { %12985 = vmatprep.subr.bf16.mxu1 %v12984_v60  ;;  %v3054_v60 = vld [vmem:[#allocation7 + $0x1288] sm:$0xff] }
0x1168   :  { %v13003_v62 = vpack.c.bf16 %v3054_v60, %v3053_v1  ;;  %v3096_v1 = vld [vmem:[#allocation7 + $0x13d8] sm:$0xff] }
0x116a   :  { %12987 = vmatpush3.bf16.msra.mxu1 %v12986_v5  ;;  %v13035_v5 = vpack.c.bf16 %v3086_v3, %v3085_v2  ;;  %v3048_v2 = vld [vmem:[#allocation7 + $0x1258] sm:$0xff] }
0x116b   :  { %12989 = vmatprep.subr.bf16.mxu1 %v12988_v9  ;;  %v13037_v9 = vpack.c.bf16 %v3070_v7, %v3069_v6  ;;  %v13025_v6 = vpack.c.bf16 %v3048_v2, %v3047_v63  ;;  %v3363_v63 = vld [vmem:[#allocation7 + $0x1490] sm:$0xff] }
0x116e   :  { %12991 = vmatpush3.bf16.msra.mxu1 %v12990_v13  ;;  %v13007_v13 = vpack.c.bf16 %v3056_v10, %v3055_v8  ;;  %v3065_v8 = vld [vmem:[#allocation7 + $0x12e0] sm:$0xff] }
0x116f   :  { %12993 = vmatprep.subr.bf16.mxu1 %v12992_v24  ;;  %v3041_v24 = vld [vmem:[#allocation7 + $0x1220] sm:$0xff] }
0x1172   :  { %12995 = vmatpush3.bf16.msra.mxu1 %v12994_v25  ;;  %v3042_v25 = vld [vmem:[#allocation7 + $0x1228] sm:$0xff] }
0x1173   :  { %12997 = vmatprep.subr.bf16.mxu1 %v12996_v34  ;;  %v13013_v30 = vpack.c.bf16 %v3042_v25, %v3041_v24  ;;  %v3043_v34 = vld [vmem:[#allocation7 + $0x1230] sm:$0xff]  ;;  %v3052_v24 = vld [vmem:[#allocation7 + $0x1278] sm:$0xff] }
0x1174   :  { %v3099_v25 = vld [vmem:[#allocation7 + $0x13f0] sm:$0xff] }
0x1175   :  { %v13063_v28 = vpack.c.bf16 %v3100_v26, %v3099_v25  ;;  %v3368_v25 = vld [vmem:[#allocation7 + $0x14b8] sm:$0xff]  ;;  %v3351_v26 = vld [vmem:[#allocation7 + $0x1430] sm:$0xff] }
0x1176   :  { %12999 = vmatpush3.bf16.msra.mxu1 %v12998_v37  ;;  %v3044_v37 = vld [vmem:[#allocation7 + $0x1238] sm:$0xff] }
0x1177   :  { %13004 = vmatprep.subr.bf16.mxu1 %v13003_v62 }
0x1179   :  { %2936 = vmatmul.mubr.f32.vlgmr.msra.gmra.mrb[28].mxu1 %v15049_v54 }
0x117a   :  { %13006 = vmatpush3.bf16.msra.mxu1 %v13005_v4  ;;  %v3079_v4 = vld [vmem:[#allocation7 + $0x1350] sm:$0xff] }
0x117b   :  { %13008 = vmatprep.subr.bf16.mxu1 %v13007_v13  ;;  %v3097_v13 = vld [vmem:[#allocation7 + $0x13e0] sm:$0xff] }
0x117e   :  { %13010 = vmatpush3.bf16.msra.mxu1 %v13009_v18  ;;  %v13029_v18 = vpack.c.bf16 %v3050_v12, %v3049_v11  ;;  %v3380_v11 = vld [vmem:[#allocation7 + $0x1518] sm:$0xff]  ;;  %v3365_v12 = vld [vmem:[#allocation7 + $0x14a0] sm:$0xff] }
0x117f   :  { %13012 = vmatprep.subr.bf16.mxu1 %v13011_v23  ;;  %v13031_v23 = vpack.c.bf16 %v3068_v21, %v3067_v20  ;;  %v3381_v20 = vld [vmem:[#allocation7 + $0x1520] sm:$0xff]  ;;  %v3382_v21 = vld [vmem:[#allocation7 + $0x1528] sm:$0xff] }
0x1182   :  { %13014 = vmatpush3.bf16.msra.mxu1 %v13013_v30  ;;  %v3084_v30 = vld [vmem:[#allocation7 + $0x1378] sm:$0xff] }
0x1183   :  { %13016 = vmatprep.subr.bf16.mxu1 %v13015_v36 }
0x122c   :  { %v2713_v39 = vpop.f32.mrb[26].mxu1 }
0x122d   :  { %v2714_v40 = vadd.f32 %v9827_v38, %v2713_v39  ;;  %v12231_v41 = vpop.f32.mrb[27].mxu1  ;;  %v3091_v38 = vld [vmem:[#allocation7 + $0x13b0] sm:$0xff]  ;;  %v3092_v39 = vld [vmem:[#allocation7 + $0x13b8] sm:$0xff] }
0x122e   :  { %v3075_v41 = vld [vmem:[#allocation7 + $0x1330] sm:$0xff] }
0x122f   :  { %v2717_v42 = vmax.f32 %v2714_v40, 0.0  ;;  %v13047_v40 = vpack.c.bf16 %v3092_v39, %v3091_v38 }
0x1231   :  { %2719 = vrot.lane.b32.xlu0 %v2717_v42, %s14743_s2  ;;  %v3076_v42 = vld [vmem:[#allocation7 + $0x1338] sm:$0xff] }
0x1232   :  { %v13049_v48 = vpack.c.bf16 %v3076_v42, %v3075_v41  ;;  %v3251_v42 = vld [vmem:[#allocation10 + $0x90] sm:$0xff] }
0x124c   :  { %v10553_v45 = vpop.f32.mrb[28].mxu1 }
0x124d   :  { %v10554_v46 = vpop.f32.mrb[29].mxu1 }
0x124e   :  { %v10555_v47 = vadd.f32 %v10554_v46, %v10553_v45  ;;  %v13017_v45 = vpack.c.bf16 %v3044_v37, %v3043_v34  ;;  %v3093_v46 = vld [vmem:[#allocation7 + $0x13c0] sm:$0xff] }
0x1250   :  { %13018 = vmatpush3.bf16.msra.mxu1 %v13017_v45 }
0x12a3   :  { %v2720_v43 = vpop.permute.xlu0 %2719 }
0x12a4   :  { %2723 = vst.msk [vmem:[#allocation2 + $0x8] sm:$0xff] %vm2722_vm10, %v2720_v43  ;;  %v3061_v43 = vld [vmem:[#allocation7 + $0x12c0] sm:$0xff] }
0x12ab   :  { %v2725_v44 = vld [vmem:[#allocation2 + $0x8] sm:$0xff] }
0x12ac   :  { %2865 = vmatprep.mubr.f32.mxu0 %v2725_v44  ;;  %v3062_v44 = vld [vmem:[#allocation7 + $0x12c8] sm:$0xff] }
0x12ad   :  { %2866 = vmatmul.mubr.f32.vlgmr.msra.gmra.mrb[22].mxu0 %v15043_v59  ;;  %v13019_v49 = vpack.c.bf16 %v3062_v44, %v3061_v43  ;;  %v3252_v43 = vld [vmem:[#allocation10 + $0x98] sm:$0xff] }
0x12ae   :  { %12236 = vmatprep.mubr.msk.f32.mxu0 %vm14757_vm0, %v15049_v54  ;;  %13002 = vmatpush3.bf16.msra.mxu0 %v13001_v50  ;;  %v3045_v50 = vld [vmem:[#allocation7 + $0x1240] sm:$0xff]  ;;  %v13068_v44 = vpack.c.bf16 %v3252_v43, %v3251_v42  ;;  %v3354_v43 = vld [vmem:[#allocation7 + $0x1448] sm:$0xff] }
0x12af   :  { %13036 = vmatprep.subr.bf16.mxu0 %v13035_v5  ;;  %13020 = vmatprep.subr.bf16.mxu1 %v13019_v49  ;;  %v3080_v5 = vld [vmem:[#allocation7 + $0x1358] sm:$0xff]  ;;  %v3353_v42 = vld [vmem:[#allocation7 + $0x1440] sm:$0xff] }
0x12b0   :  { %v13057_v7 = vpack.c.bf16 %v3080_v5, %v3079_v4  ;;  %v3347_v4 = vld [vmem:[#allocation7 + $0x1410] sm:$0xff]  ;;  %v3348_v5 = vld [vmem:[#allocation7 + $0x1418] sm:$0xff] }
0x1380   :  { %v10518_v51 = vpop.f32.mrb[22].mxu0 }
0x1381   :  { %v10519_v53 = vpop.f32.mrb[23].mxu0 }
0x1382   :  { %v10520_v55 = vadd.f32 %v10519_v53, %v10518_v51  ;;  %v3046_v51 = vld [vmem:[#allocation7 + $0x1248] sm:$0xff] }
0x1383   :  { %v13021_v60 = vpack.c.bf16 %v3046_v51, %v3045_v50 }
0x1384   :  { %v2868_v56 = vadd.f32 %v10520_v55, %v9829_v52  ;;  %v3077_v52 = vld [vmem:[#allocation7 + $0x1340] sm:$0xff]  ;;  %v3078_v55 = vld [vmem:[#allocation7 + $0x1348] sm:$0xff] }
0x1385   :  { %v13053_v61 = vpack.c.bf16 %v3078_v55, %v3077_v52  ;;  %13022 = vmatpush3.bf16.msra.mxu1 %v13021_v60  ;;  %v3362_v52 = vld [vmem:[#allocation7 + $0x1488] sm:$0xff] }
0x1386   :  { %v2938_v57 = vadd.f32 %v10555_v47, %v2868_v56  ;;  %v3094_v47 = vld [vmem:[#allocation7 + $0x13c8] sm:$0xff]  ;;  %v3063_v56 = vld [vmem:[#allocation7 + $0x12d0] sm:$0xff] }
0x1387   :  { %v13051_v53 = vpack.c.bf16 %v3094_v47, %v3093_v46  ;;  %v9832_v46 = vld [vmem:[#allocation8 + $0x9] ss:$0 sm:$0xff] }
0x1388   :  { %v2941_v58 = vmax.f32 %v2938_v57, 0.0  ;;  %v3064_v57 = vld [vmem:[#allocation7 + $0x12d8] sm:$0xff] }
0x1389   :  { %v13023_v62 = vpack.c.bf16 %v3064_v57, %v3063_v56  ;;  %v3346_v56 = vld [vmem:[#allocation7 + $0x1408] sm:$0xff]  ;;  %v3393_v57 = vld [vmem:[#allocation7 + $0x1580] sm:$0xff] }
0x138a   :  { %12237 = vmatmul.mubr.msk.f32.vlgmr.msra.gmra.mrb[24].mxu0 %vm485_vm3, %v2941_v58  ;;  %v3095_v58 = vld [vmem:[#allocation7 + $0x13d0] sm:$0xff] }
0x138b   :  { %3243 = vmatprep.mubr.f32.mxu0 %v15049_v54  ;;  %13038 = vmatpush3.bf16.msra.mxu0 %v13037_v9  ;;  %v13055_v3 = vpack.c.bf16 %v3096_v1, %v3095_v58  ;;  %v3066_v9 = vld [vmem:[#allocation7 + $0x12e8] sm:$0xff] }
0x138c   :  { %13040 = vmatprep.subr.bf16.mxu0 %v13039_v17  ;;  %13024 = vmatprep.subr.bf16.mxu1 %v13023_v62  ;;  %v13027_v10 = vpack.c.bf16 %v3066_v9, %v3065_v8  ;;  %v13059_v17 = vpack.c.bf16 %v3098_v14, %v3097_v13  ;;  %v3394_v58 = vld [vmem:[#allocation7 + $0x1588] sm:$0xff]  ;;  %v3396_v8 = vld [vmem:[#allocation7 + $0x1598] sm:$0xff]  ;;  %v3379_v9 = vld [vmem:[#allocation7 + $0x1510] sm:$0xff] }
0x138d   :  { %13026 = vmatpush3.bf16.msra.mxu1 %v13025_v6  ;;  %v13102_v60 = vpack.c.bf16 %v3394_v58, %v3393_v57  ;;  %v3378_v62 = vld [vmem:[#allocation7 + $0x1508] sm:$0xff]  ;;  %v13076_v6 = vpack.c.bf16 %v3348_v5, %v3347_v4  ;;  %v3387_v57 = vld [vmem:[#allocation7 + $0x1550] sm:$0xff]  ;;  %v3388_v58 = vld [vmem:[#allocation7 + $0x1558] sm:$0xff] }
0x138e   :  { %13028 = vmatprep.subr.bf16.mxu1 %v13027_v10  ;;  %v3366_v13 = vld [vmem:[#allocation7 + $0x14a8] sm:$0xff]  ;;  %v3405_v4 = vld [vmem:[#allocation7 + $0x15e0] sm:$0xff] }
0x138f   :  { %13042 = vmatpush3.bf16.msra.mxu0 %v13041_v22  ;;  %v3051_v22 = vld [vmem:[#allocation7 + $0x1270] sm:$0xff]  ;;  %v13078_v14 = vpack.c.bf16 %v3366_v13, %v3365_v12 }
0x1390   :  { %13044 = vmatprep.subr.bf16.mxu0 %v13043_v31  ;;  %v13033_v27 = vpack.c.bf16 %v3052_v24, %v3051_v22  ;;  %v13065_v31 = vpack.c.bf16 %v3084_v30, %v3083_v29  ;;  %v13080_v22 = vpack.c.bf16 %v3350_v16, %v3349_v15  ;;  %v3367_v24 = vld [vmem:[#allocation7 + $0x14b0] sm:$0xff]  ;;  %v3352_v29 = vld [vmem:[#allocation7 + $0x1438] sm:$0xff] }
0x1391   :  { %13030 = vmatpush3.bf16.msra.mxu1 %v13029_v18  ;;  %v13108_v18 = vpack.c.bf16 %v3380_v11, %v3379_v9  ;;  %v3399_v30 = vld [vmem:[#allocation7 + $0x15b0] sm:$0xff]  ;;  %v3376_v11 = vld [vmem:[#allocation7 + $0x14f8] sm:$0xff] }
0x1392   :  { %13032 = vmatprep.subr.bf16.mxu1 %v13031_v23  ;;  %v3359_v12 = vld [vmem:[#allocation7 + $0x1470] sm:$0xff]  ;;  %v3408_v15 = vld [vmem:[#allocation7 + $0x15f8] sm:$0xff] }
0x1393   :  { %13046 = vmatpush3.bf16.msra.mxu0 %v13045_v35 }
0x1394   :  { %13048 = vmatprep.subr.bf16.mxu0 %v13047_v40 }
0x1395   :  { %13034 = vmatpush3.bf16.msra.mxu1 %v13033_v27  ;;  %v13112_v27 = vpack.c.bf16 %v3382_v21, %v3381_v20  ;;  %v3392_v20 = vld [vmem:[#allocation7 + $0x1578] sm:$0xff] }
0x1396   :  { %13067 = vmatprep.subr.bf16.mxu1 %v14755_v0 }
0x1397   :  { %13050 = vmatpush3.bf16.msra.mxu0 %v13049_v48 }
0x1398   :  { %13052 = vmatprep.subr.bf16.mxu0 %v13051_v53  ;;  %v3345_v53 = vld [vmem:[#allocation7 + $0x1400] sm:$0xff] }
0x1399   :  { %v13072_v1 = vpack.c.bf16 %v3346_v56, %v3345_v53  ;;  %v3355_v53 = vld [vmem:[#allocation7 + $0x1450] sm:$0xff] }
0x139b   :  { %13054 = vmatpush3.bf16.msra.mxu0 %v13053_v61  ;;  %v3377_v61 = vld [vmem:[#allocation7 + $0x1500] sm:$0xff] }
0x139c   :  { %13056 = vmatprep.subr.bf16.mxu0 %v13055_v3  ;;  %v13104_v2 = vpack.c.bf16 %v3378_v62, %v3377_v61  ;;  %v3364_v3 = vld [vmem:[#allocation7 + $0x1498] sm:$0xff]  ;;  %v3373_v61 = vld [vmem:[#allocation7 + $0x14e0] sm:$0xff]  ;;  %v3374_v62 = vld [vmem:[#allocation7 + $0x14e8] sm:$0xff] }
0x139f   :  { %13058 = vmatpush3.bf16.msra.mxu0 %v13057_v7  ;;  %v3395_v7 = vld [vmem:[#allocation7 + $0x1590] sm:$0xff] }
0x13a0   :  { %13060 = vmatprep.subr.bf16.mxu0 %v13059_v17  ;;  %v13106_v10 = vpack.c.bf16 %v3396_v8, %v3395_v7  ;;  %v3397_v17 = vld [vmem:[#allocation7 + $0x15a0] sm:$0xff]  ;;  %v3390_v7 = vld [vmem:[#allocation7 + $0x1568] sm:$0xff] }
0x13a3   :  { %13062 = vmatpush3.bf16.msra.mxu0 %v13061_v19  ;;  %v3398_v19 = vld [vmem:[#allocation7 + $0x15a8] sm:$0xff] }
0x13a4   :  { %13064 = vmatprep.subr.bf16.mxu0 %v13063_v28  ;;  %v13110_v23 = vpack.c.bf16 %v3398_v19, %v3397_v17  ;;  %v13082_v28 = vpack.c.bf16 %v3368_v25, %v3367_v24  ;;  %v3391_v19 = vld [vmem:[#allocation7 + $0x1570] sm:$0xff] }
0x13a5   :  { %v13132_v21 = vpack.c.bf16 %v3392_v20, %v3391_v19 }
0x13a7   :  { %13066 = vmatpush3.bf16.msra.mxu0 %v13065_v31  ;;  %v3400_v31 = vld [vmem:[#allocation7 + $0x15b8] sm:$0xff] }
0x13aa   :  { %3244 = vmatmul.mubr.f32.vlgmr.msra.gmra.mrb[26].mxu0 %v15049_v54 }
0x145d   :  { %v3022_v33 = vpop.f32.mrb[24].mxu0 }
0x145e   :  { %v3023_v34 = vadd.f32 %v9830_v32, %v3022_v33  ;;  %v12238_v35 = vpop.f32.mrb[25].mxu0  ;;  %v13114_v32 = vpack.c.bf16 %v3400_v31, %v3399_v30  ;;  %v3383_v33 = vld [vmem:[#allocation7 + $0x1530] sm:$0xff]  ;;  %v15084_v30 = vld [vmem:[#allocation2] sm:$0xff] }
0x145f   :  { %v3369_v35 = vld [vmem:[#allocation7 + $0x14c0] sm:$0xff] }
0x1460   :  { %v3026_v36 = vmax.f32 %v3023_v34, 0.0  ;;  %v3384_v34 = vld [vmem:[#allocation7 + $0x1538] sm:$0xff] }
0x1462   :  { %3028 = vrot.lane.b32.xlu1 %v3026_v36, %s14758_s0  ;;  %v3370_v36 = vld [vmem:[#allocation7 + $0x14c8] sm:$0xff] }
0x147d   :  { %v10626_v39 = vpop.f32.mrb[26].mxu0 }
0x147e   :  { %v10627_v40 = vpop.f32.mrb[27].mxu0 }
0x147f   :  { %v10628_v41 = vadd.f32 %v10627_v40, %v10626_v39  ;;  %v3402_v39 = vld [vmem:[#allocation7 + $0x15c8] sm:$0xff]  ;;  %v13116_v40 = vpack.c.bf16 %v3384_v34, %v3383_v33  ;;  %v3559_v34 = vld [vmem:[#allocation10 + $0xa0] sm:$0xff] }
0x14d4   :  { %v3029_v37 = vpop.permute.xlu1 %3028 }
0x14d5   :  { %3031 = vst.msk [vmem:[#allocation2 + $0x8] sm:$0xff] %vm564_vm4, %v3029_v37  ;;  %v13084_v37 = vpack.c.bf16 %v3352_v29, %v3351_v26 }
0x14dc   :  { %v3033_v38 = vld [vmem:[#allocation2 + $0x8] sm:$0xff] }
0x14dd   :  { %3173 = vmatprep.mubr.f32.mxu1 %v3033_v38  ;;  %v3401_v38 = vld [vmem:[#allocation7 + $0x15c0] sm:$0xff] }
0x14de   :  { %3174 = vmatmul.mubr.f32.vlgmr.msra.gmra.mrb[30].mxu1 %v15043_v59  ;;  %v3361_v59 = vld [vmem:[#allocation7 + $0x1480] sm:$0xff] }
0x14df   :  { %12243 = vmatprep.mubr.msk.f32.mxu1 %vm14757_vm0, %v15049_v54  ;;  %13069 = vmatpush3.bf16.msra.mxu1 %v13068_v44  ;;  %v13070_v55 = vpack.c.bf16 %v3362_v52, %v3361_v59  ;;  %v3385_v44 = vld [vmem:[#allocation7 + $0x1540] sm:$0xff] }
0x14e0   :  { %13103 = vmatprep.subr.bf16.mxu1 %v13102_v60  ;;  %v13124_v60 = vpack.c.bf16 %v3388_v58, %v3387_v57  ;;  %v3672_v57 = vld [vmem:[#allocation7 + $0x1698] sm:$0xff]  ;;  %v3655_v58 = vld [vmem:[#allocation7 + $0x1610] sm:$0xff] }
0x14e1   :  { %13071 = vmatprep.subr.bf16.mxu0 %v13070_v55  ;;  %v3356_v55 = vld [vmem:[#allocation7 + $0x1458] sm:$0xff] }
0x14e2   :  { %13073 = vmatpush3.bf16.msra.mxu0 %v13072_v1  ;;  %v13092_v1 = vpack.c.bf16 %v3356_v55, %v3355_v53  ;;  %v3686_v53 = vld [vmem:[#allocation7 + $0x1708] sm:$0xff]  ;;  %v3671_v55 = vld [vmem:[#allocation7 + $0x1690] sm:$0xff] }
0x15b1   :  { %v10591_v45 = vpop.f32.mrb[30].mxu1 }
0x15b2   :  { %v10592_v47 = vpop.f32.mrb[31].mxu1 }
0x15b3   :  { %v10593_v48 = vadd.f32 %v10592_v47, %v10591_v45  ;;  %v13118_v45 = vpack.c.bf16 %v3402_v39, %v3401_v38  ;;  %v3371_v47 = vld [vmem:[#allocation7 + $0x14d0] sm:$0xff]  ;;  %v9835_v38 = vld [vmem:[#allocation8 + $0xa] ss:$0 sm:$0xff] }
0x15b5   :  { %v3176_v49 = vadd.f32 %v10593_v48, %v9832_v46  ;;  %v3386_v46 = vld [vmem:[#allocation7 + $0x1548] sm:$0xff]  ;;  %v3372_v48 = vld [vmem:[#allocation7 + $0x14d8] sm:$0xff] }
0x15b6   :  { %v13120_v59 = vpack.c.bf16 %v3386_v46, %v3385_v44  ;;  %v13090_v52 = vpack.c.bf16 %v3372_v48, %v3371_v47  ;;  %v3669_v44 = vld [vmem:[#allocation7 + $0x1680] sm:$0xff]  ;;  %v3654_v48 = vld [vmem:[#allocation7 + $0x1608] sm:$0xff] }
0x15b7   :  { %v3246_v50 = vadd.f32 %v10628_v41, %v3176_v49  ;;  %v13086_v41 = vpack.c.bf16 %v3370_v36, %v3369_v35  ;;  %v3403_v49 = vld [vmem:[#allocation7 + $0x15d0] sm:$0xff]  ;;  %v3560_v35 = vld [vmem:[#allocation10 + $0xa8] sm:$0xff] }
0x15b8   :  { %v13135_v36 = vpack.c.bf16 %v3560_v35, %v3559_v34  ;;  %v3653_v46 = vld [vmem:[#allocation7 + $0x1600] sm:$0xff] }
0x15b9   :  { %v3249_v51 = vmax.f32 %v3246_v50, 0.0  ;;  %v3404_v50 = vld [vmem:[#allocation7 + $0x15d8] sm:$0xff] }
0x15ba   :  { %v13122_v56 = vpack.c.bf16 %v3404_v50, %v3403_v49  ;;  %v3701_v49 = vld [vmem:[#allocation7 + $0x1780] sm:$0xff]  ;;  %v3702_v50 = vld [vmem:[#allocation7 + $0x1788] sm:$0xff] }
0x15bb   :  { %12244 = vmatmul.mubr.msk.f32.vlgmr.msra.gmra.mrb[32].mxu1 %vm485_vm3, %v3249_v51  ;;  %v13088_v51 = vpack.c.bf16 %v3354_v43, %v3353_v42 }
0x15bc   :  { %3551 = vmatprep.mubr.f32.mxu1 %v15049_v54  ;;  %v13074_v54 = vpack.c.bf16 %v3364_v3, %v3363_v63  ;;  %13105 = vmatpush3.bf16.msra.mxu1 %v13104_v2  ;;  %v13094_v63 = vpack.c.bf16 %v3374_v62, %v3373_v61  ;;  %v3357_v2 = vld [vmem:[#allocation7 + $0x1460] sm:$0xff]  ;;  %v3358_v3 = vld [vmem:[#allocation7 + $0x1468] sm:$0xff]  ;;  %v3703_v62 = vld [vmem:[#allocation7 + $0x1790] sm:$0xff] }
0x15bd   :  { %13107 = vmatprep.subr.bf16.mxu1 %v13106_v10  ;;  %v13096_v5 = vpack.c.bf16 %v3358_v3, %v3357_v2  ;;  %v3375_v10 = vld [vmem:[#allocation7 + $0x14f0] sm:$0xff] }
0x15be   :  { %13075 = vmatprep.subr.bf16.mxu0 %v13074_v54  ;;  %v3406_v54 = vld [vmem:[#allocation7 + $0x15e8] sm:$0xff]  ;;  %v13098_v13 = vpack.c.bf16 %v3376_v11, %v3375_v10  ;;  %v3687_v2 = vld [vmem:[#allocation7 + $0x1710] sm:$0xff]  ;;  %v3705_v10 = vld [vmem:[#allocation7 + $0x17a0] sm:$0xff] }
0x15bf   :  { %13077 = vmatpush3.bf16.msra.mxu0 %v13076_v6  ;;  %v3389_v6 = vld [vmem:[#allocation7 + $0x1560] sm:$0xff]  ;;  %v13126_v8 = vpack.c.bf16 %v3406_v54, %v3405_v4  ;;  %v3688_v4 = vld [vmem:[#allocation7 + $0x1718] sm:$0xff]  ;;  %v3674_v54 = vld [vmem:[#allocation7 + $0x16a8] sm:$0xff] }
0x15c0   :  { %13109 = vmatpush3.bf16.msra.mxu1 %v13108_v18  ;;  %13079 = vmatprep.subr.bf16.mxu0 %v13078_v14  ;;  %v13128_v9 = vpack.c.bf16 %v3390_v7, %v3389_v6  ;;  %v3360_v18 = vld [vmem:[#allocation7 + $0x1478] sm:$0xff]  ;;  %v3407_v14 = vld [vmem:[#allocation7 + $0x15f0] sm:$0xff]  ;;  %v13175_v6 = vpack.c.bf16 %v3688_v4, %v3687_v2  ;;  %v3706_v11 = vld [vmem:[#allocation7 + $0x17a8] sm:$0xff] }
0x15c1   :  { %13111 = vmatprep.subr.bf16.mxu1 %v13110_v23  ;;  %v13100_v16 = vpack.c.bf16 %v3360_v18, %v3359_v12  ;;  %v13130_v17 = vpack.c.bf16 %v3408_v15, %v3407_v14  ;;  %v3689_v12 = vld [vmem:[#allocation7 + $0x1720] sm:$0xff]  ;;  %v13177_v14 = vpack.c.bf16 %v3706_v11, %v3705_v10  ;;  %v3675_v15 = vld [vmem:[#allocation7 + $0x16b0] sm:$0xff]  ;;  %v3698_v2 = vld [vmem:[#allocation7 + $0x1768] sm:$0xff] }
0x15c2   :  { %v3716_v10 = vld [vmem:[#allocation7 + $0x17f8] sm:$0xff] }
0x15c3   :  { %13081 = vmatpush3.bf16.msra.mxu0 %v13080_v22  ;;  %v9833_v22 = vld [vmem:[#allocation11 + $0x9] ss:$0 sm:$0xff] }
0x15c4   :  { %13113 = vmatpush3.bf16.msra.mxu1 %v13112_v27  ;;  %13083 = vmatprep.subr.bf16.mxu0 %v13082_v28  ;;  %v15079_v27 = vld [vmem:[#allocation2 + $0x10] sm:$0xff] }
0x15c5   :  { %13115 = vmatprep.subr.bf16.mxu1 %v13114_v32 }
0x15c7   :  { %13085 = vmatpush3.bf16.msra.mxu0 %v13084_v37 }
0x15c8   :  { %13117 = vmatpush3.bf16.msra.mxu1 %v13116_v40  ;;  %13087 = vmatprep.subr.bf16.mxu0 %v13086_v41 }
0x15c9   :  { %13119 = vmatprep.subr.bf16.mxu1 %v13118_v45  ;;  %v3670_v45 = vld [vmem:[#allocation7 + $0x1688] sm:$0xff] }
0x15ca   :  { %v13137_v47 = vpack.c.bf16 %v3670_v45, %v3669_v44  ;;  %v3712_v44 = vld [vmem:[#allocation7 + $0x17d8] sm:$0xff] }
0x15cb   :  { %13089 = vmatpush3.bf16.msra.mxu0 %v13088_v51  ;;  %v13139_v51 = vpack.c.bf16 %v3654_v48, %v3653_v46  ;;  %v3663_v48 = vld [vmem:[#allocation7 + $0x1650] sm:$0xff] }
0x15cc   :  { %13121 = vmatpush3.bf16.msra.mxu1 %v13120_v59  ;;  %13091 = vmatprep.subr.bf16.mxu0 %v13090_v52  ;;  %v13169_v59 = vpack.c.bf16 %v3702_v50, %v3701_v49  ;;  %v3685_v52 = vld [vmem:[#allocation7 + $0x1700] sm:$0xff]  ;;  %v3664_v49 = vld [vmem:[#allocation7 + $0x1658] sm:$0xff] }
0x15cd   :  { %13123 = vmatprep.subr.bf16.mxu1 %v13122_v56  ;;  %v13171_v56 = vpack.c.bf16 %v3686_v53, %v3685_v52  ;;  %v13159_v52 = vpack.c.bf16 %v3664_v49, %v3663_v48  ;;  %v3994_v48 = vld [vmem:[#allocation7 + $0x1908] sm:$0xff]  ;;  %v3979_v49 = vld [vmem:[#allocation7 + $0x1890] sm:$0xff] }
0x15cf   :  { %13093 = vmatpush3.bf16.msra.mxu0 %v13092_v1  ;;  %v3656_v1 = vld [vmem:[#allocation7 + $0x1618] sm:$0xff] }
0x15d0   :  { %13125 = vmatpush3.bf16.msra.mxu1 %v13124_v60  ;;  %13095 = vmatprep.subr.bf16.mxu0 %v13094_v63  ;;  %v13141_v60 = vpack.c.bf16 %v3672_v57, %v3671_v55  ;;  %v13143_v61 = vpack.c.bf16 %v3656_v1, %v3655_v58  ;;  %v3704_v63 = vld [vmem:[#allocation7 + $0x1798] sm:$0xff]  ;;  %v3681_v55 = vld [vmem:[#allocation7 + $0x16e0] sm:$0xff]  ;;  %v3666_v1 = vld [vmem:[#allocation7 + $0x1668] sm:$0xff] }
0x15d1   :  { %13127 = vmatprep.subr.bf16.mxu1 %v13126_v8  ;;  %v13173_v3 = vpack.c.bf16 %v3704_v63, %v3703_v62  ;;  %v3657_v8 = vld [vmem:[#allocation7 + $0x1620] sm:$0xff]  ;;  %v3714_v62 = vld [vmem:[#allocation7 + $0x17e8] sm:$0xff] }
0x15d2   :  { %v3665_v58 = vld [vmem:[#allocation7 + $0x1660] sm:$0xff] }
0x15d3   :  { %13097 = vmatpush3.bf16.msra.mxu0 %v13096_v5  ;;  %v3673_v5 = vld [vmem:[#allocation7 + $0x16a0] sm:$0xff] }
0x15d4   :  { %13129 = vmatpush3.bf16.msra.mxu1 %v13128_v9  ;;  %13099 = vmatprep.subr.bf16.mxu0 %v13098_v13  ;;  %v13145_v7 = vpack.c.bf16 %v3674_v54, %v3673_v5  ;;  %v3658_v9 = vld [vmem:[#allocation7 + $0x1628] sm:$0xff]  ;;  %v3697_v63 = vld [vmem:[#allocation7 + $0x1760] sm:$0xff]  ;;  %v3683_v5 = vld [vmem:[#allocation7 + $0x16f0] sm:$0xff] }
0x15d5   :  { %13131 = vmatprep.subr.bf16.mxu1 %v13130_v17  ;;  %v3690_v13 = vld [vmem:[#allocation7 + $0x1728] sm:$0xff]  ;;  %v13147_v18 = vpack.c.bf16 %v3658_v9, %v3657_v8  ;;  %v3659_v17 = vld [vmem:[#allocation7 + $0x1630] sm:$0xff]  ;;  %v13195_v4 = vpack.c.bf16 %v3698_v2, %v3697_v63  ;;  %v3684_v54 = vld [vmem:[#allocation7 + $0x16f8] sm:$0xff] }
0x15d6   :  { %v13179_v19 = vpack.c.bf16 %v3690_v13, %v3689_v12  ;;  %v3668_v8 = vld [vmem:[#allocation7 + $0x1678] sm:$0xff]  ;;  %v3715_v9 = vld [vmem:[#allocation7 + $0x17f0] sm:$0xff] }
0x15d7   :  { %13101 = vmatpush3.bf16.msra.mxu0 %v13100_v16  ;;  %v3676_v16 = vld [vmem:[#allocation7 + $0x16b8] sm:$0xff]  ;;  %v13197_v12 = vpack.c.bf16 %v3716_v10, %v3715_v9  ;;  %v3699_v13 = vld [vmem:[#allocation7 + $0x1770] sm:$0xff] }
0x15d8   :  { %13134 = vmatprep.subr.bf16.mxu0 %v14755_v0  ;;  %13133 = vmatpush3.bf16.msra.mxu1 %v13132_v21  ;;  %v13149_v20 = vpack.c.bf16 %v3676_v16, %v3675_v15  ;;  %v3660_v21 = vld [vmem:[#allocation7 + $0x1638] sm:$0xff]  ;;  %v9836_v15 = vld [vmem:[#allocation11 + $0xa] ss:$0 sm:$0xff]  ;;  %v3983_v10 = vld [vmem:[#allocation7 + $0x18b0] sm:$0xff] }
0x15d9   :  { %13138 = vmatprep.subr.bf16.mxu1 %v13137_v47 }
0x15db   :  { %3552 = vmatmul.mubr.f32.vlgmr.msra.gmra.mrb[34].mxu1 %v15079_v27 }
0x15dc   :  { %13140 = vmatpush3.bf16.msra.mxu1 %v13139_v51  ;;  %v3695_v51 = vld [vmem:[#allocation7 + $0x1750] sm:$0xff] }
0x15dd   :  { %13142 = vmatprep.subr.bf16.mxu1 %v13141_v60  ;;  %v3713_v60 = vld [vmem:[#allocation7 + $0x17e0] sm:$0xff] }
0x15e0   :  { %13144 = vmatpush3.bf16.msra.mxu1 %v13143_v61  ;;  %v13163_v61 = vpack.c.bf16 %v3666_v1, %v3665_v58  ;;  %v3995_v58 = vld [vmem:[#allocation7 + $0x1910] sm:$0xff] }
0x15e1   :  { %13146 = vmatprep.subr.bf16.mxu1 %v13145_v7  ;;  %v13165_v7 = vpack.c.bf16 %v3684_v54, %v3683_v5  ;;  %v4013_v5 = vld [vmem:[#allocation7 + $0x19a0] sm:$0xff]  ;;  %v4014_v54 = vld [vmem:[#allocation7 + $0x19a8] sm:$0xff] }
0x15e2   :  { %v13244_v9 = vpack.c.bf16 %v4014_v54, %v4013_v5  ;;  %v4024_v5 = vld [vmem:[#allocation7 + $0x19f8] sm:$0xff] }
0x15e4   :  { %13148 = vmatpush3.bf16.msra.mxu1 %v13147_v18  ;;  %v3700_v18 = vld [vmem:[#allocation7 + $0x1778] sm:$0xff] }
0x15e5   :  { %13150 = vmatprep.subr.bf16.mxu1 %v13149_v20 }
0x168e   :  { %v3330_v23 = vpop.f32.mrb[32].mxu1 }
0x168f   :  { %v3331_v24 = vadd.f32 %v9833_v22, %v3330_v23  ;;  %v12245_v25 = vpop.f32.mrb[33].mxu1  ;;  %v3707_v22 = vld [vmem:[#allocation7 + $0x17b0] sm:$0xff]  ;;  %v3708_v23 = vld [vmem:[#allocation7 + $0x17b8] sm:$0xff] }
0x1690   :  { %v3691_v25 = vld [vmem:[#allocation7 + $0x1730] sm:$0xff] }
0x1691   :  { %v3334_v26 = vmax.f32 %v3331_v24, 0.0  ;;  %v13181_v24 = vpack.c.bf16 %v3708_v23, %v3707_v22 }
0x1693   :  { %3336 = vrot.lane.b32.xlu0 %v3334_v26, %s14759_s5  ;;  %v3692_v26 = vld [vmem:[#allocation7 + $0x1738] sm:$0xff] }
0x1694   :  { %v13183_v34 = vpack.c.bf16 %v3692_v26, %v3691_v25  ;;  %v3867_v26 = vld [vmem:[#allocation10 + $0xb0] sm:$0xff] }
0x16ae   :  { %v10699_v31 = vpop.f32.mrb[34].mxu1 }
0x16af   :  { %v10700_v32 = vpop.f32.mrb[35].mxu1 }
0x16b0   :  { %v10701_v33 = vadd.f32 %v10700_v32, %v10699_v31  ;;  %v13151_v31 = vpack.c.bf16 %v3660_v21, %v3659_v17  ;;  %v3709_v32 = vld [vmem:[#allocation7 + $0x17c0] sm:$0xff] }
0x16b2   :  { %13152 = vmatpush3.bf16.msra.mxu1 %v13151_v31 }
0x1705   :  { %v3337_v28 = vpop.permute.xlu0 %3336 }
0x1706   :  { %3339 = vst.msk [vmem:[#allocation2 + $0x8] sm:$0xff] %vm873_vm5, %v3337_v28  ;;  %v3677_v28 = vld [vmem:[#allocation7 + $0x16c0] sm:$0xff] }
0x170d   :  { %v3341_v29 = vld [vmem:[#allocation2 + $0x8] sm:$0xff] }
0x170e   :  { %3481 = vmatprep.mubr.f32.mxu0 %v3341_v29  ;;  %v3678_v29 = vld [vmem:[#allocation7 + $0x16c8] sm:$0xff] }
0x170f   :  { %3482 = vmatmul.mubr.f32.vlgmr.msra.gmra.mrb[28].mxu0 %v15084_v30  ;;  %v13153_v35 = vpack.c.bf16 %v3678_v29, %v3677_v28  ;;  %v3868_v28 = vld [vmem:[#allocation10 + $0xb8] sm:$0xff] }
0x1710   :  { %12250 = vmatprep.mubr.msk.f32.mxu0 %vm14757_vm0, %v15079_v27  ;;  %13136 = vmatpush3.bf16.msra.mxu0 %v13135_v36  ;;  %v3661_v36 = vld [vmem:[#allocation7 + $0x1640] sm:$0xff]  ;;  %v13202_v29 = vpack.c.bf16 %v3868_v28, %v3867_v26 }
0x1711   :  { %13170 = vmatprep.subr.bf16.mxu0 %v13169_v59  ;;  %13154 = vmatprep.subr.bf16.mxu1 %v13153_v35  ;;  %v3696_v59 = vld [vmem:[#allocation7 + $0x1758] sm:$0xff] }
0x1712   :  { %v13191_v53 = vpack.c.bf16 %v3696_v59, %v3695_v51  ;;  %v3980_v51 = vld [vmem:[#allocation7 + $0x1898] sm:$0xff]  ;;  %v3963_v59 = vld [vmem:[#allocation7 + $0x1810] sm:$0xff] }
0x17e2   :  { %v10664_v37 = vpop.f32.mrb[28].mxu0 }
0x17e3   :  { %v10665_v39 = vpop.f32.mrb[29].mxu0 }
0x17e4   :  { %v10666_v40 = vadd.f32 %v10665_v39, %v10664_v37  ;;  %v3662_v37 = vld [vmem:[#allocation7 + $0x1648] sm:$0xff] }
0x17e5   :  { %v13155_v45 = vpack.c.bf16 %v3662_v37, %v3661_v36 }
0x17e6   :  { %v3484_v41 = vadd.f32 %v10666_v40, %v9835_v38  ;;  %v3693_v38 = vld [vmem:[#allocation7 + $0x1740] sm:$0xff]  ;;  %v3694_v40 = vld [vmem:[#allocation7 + $0x1748] sm:$0xff] }
0x17e7   :  { %v13187_v46 = vpack.c.bf16 %v3694_v40, %v3693_v38  ;;  %13156 = vmatpush3.bf16.msra.mxu1 %v13155_v45  ;;  %v3977_v38 = vld [vmem:[#allocation7 + $0x1880] sm:$0xff] }
0x17e8   :  { %v3554_v42 = vadd.f32 %v10701_v33, %v3484_v41  ;;  %v3710_v33 = vld [vmem:[#allocation7 + $0x17c8] sm:$0xff]  ;;  %v3679_v41 = vld [vmem:[#allocation7 + $0x16d0] sm:$0xff]  ;;  %v3961_v40 = vld [vmem:[#allocation7 + $0x1800] sm:$0xff] }
0x17e9   :  { %v13185_v39 = vpack.c.bf16 %v3710_v33, %v3709_v32  ;;  %v9838_v32 = vld [vmem:[#allocation8 + $0xb] ss:$0 sm:$0xff] }
0x17ea   :  { %v3557_v43 = vmax.f32 %v3554_v42, 0.0  ;;  %v3680_v42 = vld [vmem:[#allocation7 + $0x16d8] sm:$0xff] }
0x17eb   :  { %v13157_v47 = vpack.c.bf16 %v3680_v42, %v3679_v41  ;;  %v3962_v42 = vld [vmem:[#allocation7 + $0x1808] sm:$0xff] }
0x17ec   :  { %12251 = vmatmul.mubr.msk.f32.vlgmr.msra.gmra.mrb[30].mxu0 %vm485_vm3, %v3557_v43  ;;  %v3711_v43 = vld [vmem:[#allocation7 + $0x17d0] sm:$0xff]  ;;  %v13206_v45 = vpack.c.bf16 %v3962_v42, %v3961_v40 }
0x17ed   :  { %3859 = vmatprep.mubr.f32.mxu0 %v15079_v27  ;;  %13172 = vmatpush3.bf16.msra.mxu0 %v13171_v56  ;;  %v13189_v50 = vpack.c.bf16 %v3712_v44, %v3711_v43  ;;  %v3682_v56 = vld [vmem:[#allocation7 + $0x16e8] sm:$0xff]  ;;  %v4009_v43 = vld [vmem:[#allocation7 + $0x1980] sm:$0xff]  ;;  %v3971_v42 = vld [vmem:[#allocation7 + $0x1850] sm:$0xff] }
0x17ee   :  { %13174 = vmatprep.subr.bf16.mxu0 %v13173_v3  ;;  %13158 = vmatprep.subr.bf16.mxu1 %v13157_v47  ;;  %v13161_v57 = vpack.c.bf16 %v3682_v56, %v3681_v55  ;;  %v13193_v3 = vpack.c.bf16 %v3714_v62, %v3713_v60  ;;  %v4010_v44 = vld [vmem:[#allocation7 + $0x1988] sm:$0xff]  ;;  %v3993_v47 = vld [vmem:[#allocation7 + $0x1900] sm:$0xff]  ;;  %v4011_v56 = vld [vmem:[#allocation7 + $0x1990] sm:$0xff] }
0x17ef   :  { %13160 = vmatpush3.bf16.msra.mxu1 %v13159_v52  ;;  %v3964_v52 = vld [vmem:[#allocation7 + $0x1818] sm:$0xff]  ;;  %v3982_v62 = vld [vmem:[#allocation7 + $0x18a8] sm:$0xff] }
0x17f0   :  { %13162 = vmatprep.subr.bf16.mxu1 %v13161_v57  ;;  %v13210_v55 = vpack.c.bf16 %v3964_v52, %v3963_v59  ;;  %v4012_v57 = vld [vmem:[#allocation7 + $0x1998] sm:$0xff]  ;;  %v3973_v59 = vld [vmem:[#allocation7 + $0x1860] sm:$0xff]  ;;  %v3974_v52 = vld [vmem:[#allocation7 + $0x1868] sm:$0xff] }
0x17f1   :  { %13176 = vmatpush3.bf16.msra.mxu0 %v13175_v6  ;;  %v3667_v6 = vld [vmem:[#allocation7 + $0x1670] sm:$0xff]  ;;  %v13240_v1 = vpack.c.bf16 %v4012_v57, %v4011_v56  ;;  %v3996_v60 = vld [vmem:[#allocation7 + $0x1918] sm:$0xff]  ;;  %v4022_v56 = vld [vmem:[#allocation7 + $0x19e8] sm:$0xff] }
0x17f2   :  { %13178 = vmatprep.subr.bf16.mxu0 %v13177_v14  ;;  %v13167_v11 = vpack.c.bf16 %v3668_v8, %v3667_v6  ;;  %v13199_v14 = vpack.c.bf16 %v3700_v18, %v3699_v13  ;;  %v13242_v63 = vpack.c.bf16 %v3996_v60, %v3995_v58  ;;  %v3997_v6 = vld [vmem:[#allocation7 + $0x1920] sm:$0xff]  ;;  %v4006_v58 = vld [vmem:[#allocation7 + $0x1968] sm:$0xff] }
0x17f3   :  { %13164 = vmatpush3.bf16.msra.mxu1 %v13163_v61  ;;  %v3981_v61 = vld [vmem:[#allocation7 + $0x18a0] sm:$0xff] }
0x17f4   :  { %13166 = vmatprep.subr.bf16.mxu1 %v13165_v7  ;;  %v13212_v2 = vpack.c.bf16 %v3982_v62, %v3981_v61  ;;  %v3998_v7 = vld [vmem:[#allocation7 + $0x1928] sm:$0xff]  ;;  %v4005_v57 = vld [vmem:[#allocation7 + $0x1960] sm:$0xff]  ;;  %v3991_v61 = vld [vmem:[#allocation7 + $0x18f0] sm:$0xff] }
0x17f5   :  { %13180 = vmatpush3.bf16.msra.mxu0 %v13179_v19  ;;  %v13246_v13 = vpack.c.bf16 %v3998_v7, %v3997_v6  ;;  %v13262_v60 = vpack.c.bf16 %v4006_v58, %v4005_v57  ;;  %v3992_v62 = vld [vmem:[#allocation7 + $0x18f8] sm:$0xff]  ;;  %v4007_v7 = vld [vmem:[#allocation7 + $0x1970] sm:$0xff] }
0x17f6   :  { %13182 = vmatprep.subr.bf16.mxu0 %v13181_v24 }
0x17f7   :  { %13168 = vmatpush3.bf16.msra.mxu1 %v13167_v11  ;;  %v3984_v11 = vld [vmem:[#allocation7 + $0x18b8] sm:$0xff] }
0x17f8   :  { %13201 = vmatprep.subr.bf16.mxu1 %v14755_v0  ;;  %v13216_v18 = vpack.c.bf16 %v3984_v11, %v3983_v10  ;;  %v9839_v10 = vld [vmem:[#allocation11 + $0xb] ss:$0 sm:$0xff] }
0x17f9   :  { %13184 = vmatpush3.bf16.msra.mxu0 %v13183_v34 }
0x17fa   :  { %13186 = vmatprep.subr.bf16.mxu0 %v13185_v39  ;;  %v3978_v39 = vld [vmem:[#allocation7 + $0x1888] sm:$0xff] }
0x17fb   :  { %v13204_v41 = vpack.c.bf16 %v3978_v39, %v3977_v38  ;;  %v4020_v38 = vld [vmem:[#allocation7 + $0x19d8] sm:$0xff] }
0x17fd   :  { %13188 = vmatpush3.bf16.msra.mxu0 %v13187_v46  ;;  %v13236_v46 = vpack.c.bf16 %v4010_v44, %v4009_v43  ;;  %v3972_v43 = vld [vmem:[#allocation7 + $0x1858] sm:$0xff] }
0x17fe   :  { %13190 = vmatprep.subr.bf16.mxu0 %v13189_v50  ;;  %v13238_v50 = vpack.c.bf16 %v3994_v48, %v3993_v47  ;;  %v13226_v47 = vpack.c.bf16 %v3972_v43, %v3971_v42  ;;  %v4302_v42 = vld [vmem:[#allocation7 + $0x1b08] sm:$0xff]  ;;  %v4287_v43 = vld [vmem:[#allocation7 + $0x1a90] sm:$0xff] }
0x1801   :  { %13192 = vmatpush3.bf16.msra.mxu0 %v13191_v53  ;;  %v13208_v53 = vpack.c.bf16 %v3980_v51, %v3979_v49  ;;  %v3989_v49 = vld [vmem:[#allocation7 + $0x18e0] sm:$0xff] }
0x1802   :  { %13194 = vmatprep.subr.bf16.mxu0 %v13193_v3  ;;  %v3965_v3 = vld [vmem:[#allocation7 + $0x1820] sm:$0xff] }
0x1805   :  { %13196 = vmatpush3.bf16.msra.mxu0 %v13195_v4  ;;  %v3966_v4 = vld [vmem:[#allocation7 + $0x1828] sm:$0xff] }
0x1806   :  { %13198 = vmatprep.subr.bf16.mxu0 %v13197_v12  ;;  %v13214_v8 = vpack.c.bf16 %v3966_v4, %v3965_v3  ;;  %v3967_v12 = vld [vmem:[#allocation7 + $0x1830] sm:$0xff]  ;;  %v3976_v3 = vld [vmem:[#allocation7 + $0x1878] sm:$0xff] }
0x1807   :  { %v4023_v4 = vld [vmem:[#allocation7 + $0x19f0] sm:$0xff] }
0x1808   :  { %v13264_v6 = vpack.c.bf16 %v4024_v5, %v4023_v4  ;;  %v4291_v5 = vld [vmem:[#allocation7 + $0x1ab0] sm:$0xff] }
0x1809   :  { %13200 = vmatpush3.bf16.msra.mxu0 %v13199_v14  ;;  %v3968_v14 = vld [vmem:[#allocation7 + $0x1838] sm:$0xff] }
0x180a   :  { %13205 = vmatprep.subr.bf16.mxu0 %v13204_v41 }
0x180c   :  { %3860 = vmatmul.mubr.f32.vlgmr.msra.gmra.mrb[32].mxu0 %v15079_v27 }
0x180d   :  { %13207 = vmatpush3.bf16.msra.mxu0 %v13206_v45  ;;  %v4003_v45 = vld [vmem:[#allocation7 + $0x1950] sm:$0xff] }
0x180e   :  { %13209 = vmatprep.subr.bf16.mxu0 %v13208_v53  ;;  %v4021_v53 = vld [vmem:[#allocation7 + $0x19e0] sm:$0xff] }
0x1811   :  { %13211 = vmatpush3.bf16.msra.mxu0 %v13210_v55  ;;  %v13230_v55 = vpack.c.bf16 %v3974_v52, %v3973_v59  ;;  %v4303_v59 = vld [vmem:[#allocation7 + $0x1b10] sm:$0xff] }
0x1812   :  { %13213 = vmatprep.subr.bf16.mxu0 %v13212_v2  ;;  %v13232_v2 = vpack.c.bf16 %v3992_v62, %v3991_v61  ;;  %v4321_v61 = vld [vmem:[#allocation7 + $0x1ba0] sm:$0xff]  ;;  %v4322_v62 = vld [vmem:[#allocation7 + $0x1ba8] sm:$0xff] }
0x1813   :  { %v13311_v4 = vpack.c.bf16 %v4322_v62, %v4321_v61  ;;  %v4332_v61 = vld [vmem:[#allocation7 + $0x1bf8] sm:$0xff] }
0x1815   :  { %13215 = vmatpush3.bf16.msra.mxu0 %v13214_v8  ;;  %v4008_v8 = vld [vmem:[#allocation7 + $0x1978] sm:$0xff] }
0x1816   :  { %13217 = vmatprep.subr.bf16.mxu0 %v13216_v18 }
0x18bf   :  { %v3638_v16 = vpop.f32.mrb[30].mxu0 }
0x18c0   :  { %v3639_v17 = vadd.f32 %v9836_v15, %v3638_v16  ;;  %v12252_v19 = vpop.f32.mrb[31].mxu0  ;;  %v4015_v15 = vld [vmem:[#allocation7 + $0x19b0] sm:$0xff]  ;;  %v4016_v16 = vld [vmem:[#allocation7 + $0x19b8] sm:$0xff] }
0x18c1   :  { %v3999_v19 = vld [vmem:[#allocation7 + $0x1930] sm:$0xff] }
0x18c2   :  { %v3642_v20 = vmax.f32 %v3639_v17, 0.0  ;;  %v13248_v17 = vpack.c.bf16 %v4016_v16, %v4015_v15 }
0x18c4   :  { %3644 = vrot.lane.b32.xlu1 %v3642_v20, %s14760_s27  ;;  %v4000_v20 = vld [vmem:[#allocation7 + $0x1938] sm:$0xff] }
0x18c5   :  { %v13250_v26 = vpack.c.bf16 %v4000_v20, %v3999_v19  ;;  %v4175_v20 = vld [vmem:[#allocation10 + $0xc0] sm:$0xff] }
0x18df   :  { %v10772_v23 = vpop.f32.mrb[32].mxu0 }
0x18e0   :  { %v10773_v24 = vpop.f32.mrb[33].mxu0 }
0x18e1   :  { %v10774_v25 = vadd.f32 %v10773_v24, %v10772_v23  ;;  %v13218_v23 = vpack.c.bf16 %v3968_v14, %v3967_v12  ;;  %v4017_v24 = vld [vmem:[#allocation7 + $0x19c0] sm:$0xff] }
0x18e3   :  { %13219 = vmatpush3.bf16.msra.mxu0 %v13218_v23 }
0x1936   :  { %v3645_v21 = vpop.permute.xlu1 %3644 }
0x1937   :  { %3647 = vst.msk [vmem:[#allocation2 + $0x8] sm:$0xff] %vm1182_vm6, %v3645_v21  ;;  %v3985_v21 = vld [vmem:[#allocation7 + $0x18c0] sm:$0xff] }
0x193e   :  { %v3649_v22 = vld [vmem:[#allocation2 + $0x8] sm:$0xff] }
0x193f   :  { %3789 = vmatprep.mubr.f32.mxu1 %v3649_v22  ;;  %v3986_v22 = vld [vmem:[#allocation7 + $0x18c8] sm:$0xff] }
0x1940   :  { %3790 = vmatmul.mubr.f32.vlgmr.msra.gmra.mrb[36].mxu1 %v15084_v30  ;;  %v13220_v28 = vpack.c.bf16 %v3986_v22, %v3985_v21  ;;  %v4176_v21 = vld [vmem:[#allocation10 + $0xc8] sm:$0xff] }
0x1941   :  { %12257 = vmatprep.mubr.msk.f32.mxu1 %vm14757_vm0, %v15079_v27  ;;  %13203 = vmatpush3.bf16.msra.mxu1 %v13202_v29  ;;  %v3969_v29 = vld [vmem:[#allocation7 + $0x1840] sm:$0xff]  ;;  %v13269_v22 = vpack.c.bf16 %v4176_v21, %v4175_v20 }
0x1942   :  { %13237 = vmatprep.subr.bf16.mxu1 %v13236_v46  ;;  %13221 = vmatprep.subr.bf16.mxu0 %v13220_v28  ;;  %v4004_v46 = vld [vmem:[#allocation7 + $0x1958] sm:$0xff] }
0x1943   :  { %v13258_v48 = vpack.c.bf16 %v4004_v46, %v4003_v45  ;;  %v4288_v45 = vld [vmem:[#allocation7 + $0x1a98] sm:$0xff]  ;;  %v4271_v46 = vld [vmem:[#allocation7 + $0x1a10] sm:$0xff] }
0x1a13   :  { %v10737_v31 = vpop.f32.mrb[36].mxu1 }
0x1a14   :  { %v10738_v33 = vpop.f32.mrb[37].mxu1 }
0x1a15   :  { %v10739_v34 = vadd.f32 %v10738_v33, %v10737_v31  ;;  %v3970_v31 = vld [vmem:[#allocation7 + $0x1848] sm:$0xff] }
0x1a16   :  { %v13222_v39 = vpack.c.bf16 %v3970_v31, %v3969_v29 }
0x1a17   :  { %v3792_v35 = vadd.f32 %v10739_v34, %v9838_v32  ;;  %v4001_v32 = vld [vmem:[#allocation7 + $0x1940] sm:$0xff]  ;;  %v4002_v34 = vld [vmem:[#allocation7 + $0x1948] sm:$0xff] }
0x1a18   :  { %v13254_v40 = vpack.c.bf16 %v4002_v34, %v4001_v32  ;;  %13223 = vmatpush3.bf16.msra.mxu0 %v13222_v39  ;;  %v4285_v32 = vld [vmem:[#allocation7 + $0x1a80] sm:$0xff] }
0x1a19   :  { %v3862_v36 = vadd.f32 %v10774_v25, %v3792_v35  ;;  %v4018_v25 = vld [vmem:[#allocation7 + $0x19c8] sm:$0xff]  ;;  %v3987_v35 = vld [vmem:[#allocation7 + $0x18d0] sm:$0xff]  ;;  %v4269_v34 = vld [vmem:[#allocation7 + $0x1a00] sm:$0xff] }
0x1a1a   :  { %v13252_v33 = vpack.c.bf16 %v4018_v25, %v4017_v24  ;;  %v9841_v24 = vld [vmem:[#allocation8 + $0xc] ss:$0 sm:$0xff] }
0x1a1b   :  { %v3865_v37 = vmax.f32 %v3862_v36, 0.0  ;;  %v3988_v36 = vld [vmem:[#allocation7 + $0x18d8] sm:$0xff] }
0x1a1c   :  { %v13224_v41 = vpack.c.bf16 %v3988_v36, %v3987_v35  ;;  %v4270_v36 = vld [vmem:[#allocation7 + $0x1a08] sm:$0xff] }
0x1a1d   :  { %12258 = vmatmul.mubr.msk.f32.vlgmr.msra.gmra.mrb[38].mxu1 %vm485_vm3, %v3865_v37  ;;  %v4019_v37 = vld [vmem:[#allocation7 + $0x19d0] sm:$0xff]  ;;  %v13273_v39 = vpack.c.bf16 %v4270_v36, %v4269_v34 }
0x1a1e   :  { %4167 = vmatprep.mubr.f32.mxu1 %v15079_v27  ;;  %13239 = vmatpush3.bf16.msra.mxu1 %v13238_v50  ;;  %v13256_v44 = vpack.c.bf16 %v4020_v38, %v4019_v37  ;;  %v3990_v50 = vld [vmem:[#allocation7 + $0x18e8] sm:$0xff]  ;;  %v4317_v37 = vld [vmem:[#allocation7 + $0x1b80] sm:$0xff]  ;;  %v4279_v36 = vld [vmem:[#allocation7 + $0x1a50] sm:$0xff] }
0x1a1f   :  { %13241 = vmatprep.subr.bf16.mxu1 %v13240_v1  ;;  %13225 = vmatprep.subr.bf16.mxu0 %v13224_v41  ;;  %v13228_v51 = vpack.c.bf16 %v3990_v50, %v3989_v49  ;;  %v13260_v1 = vpack.c.bf16 %v4022_v56, %v4021_v53  ;;  %v4318_v38 = vld [vmem:[#allocation7 + $0x1b88] sm:$0xff]  ;;  %v4301_v41 = vld [vmem:[#allocation7 + $0x1b00] sm:$0xff]  ;;  %v4319_v50 = vld [vmem:[#allocation7 + $0x1b90] sm:$0xff] }
0x1a20   :  { %13227 = vmatpush3.bf16.msra.mxu0 %v13226_v47  ;;  %v4272_v47 = vld [vmem:[#allocation7 + $0x1a18] sm:$0xff]  ;;  %v4290_v56 = vld [vmem:[#allocation7 + $0x1aa8] sm:$0xff] }
0x1a21   :  { %13229 = vmatprep.subr.bf16.mxu0 %v13228_v51  ;;  %v13277_v49 = vpack.c.bf16 %v4272_v47, %v4271_v46  ;;  %v4320_v51 = vld [vmem:[#allocation7 + $0x1b98] sm:$0xff]  ;;  %v4281_v46 = vld [vmem:[#allocation7 + $0x1a60] sm:$0xff]  ;;  %v4282_v47 = vld [vmem:[#allocation7 + $0x1a68] sm:$0xff] }
0x1a22   :  { %13243 = vmatpush3.bf16.msra.mxu1 %v13242_v63  ;;  %v3975_v63 = vld [vmem:[#allocation7 + $0x1870] sm:$0xff]  ;;  %v13307_v52 = vpack.c.bf16 %v4320_v51, %v4319_v50  ;;  %v4304_v53 = vld [vmem:[#allocation7 + $0x1b18] sm:$0xff]  ;;  %v4330_v50 = vld [vmem:[#allocation7 + $0x1be8] sm:$0xff] }
0x1a23   :  { %13245 = vmatprep.subr.bf16.mxu1 %v13244_v9  ;;  %v13234_v54 = vpack.c.bf16 %v3976_v3, %v3975_v63  ;;  %v13266_v9 = vpack.c.bf16 %v4008_v8, %v4007_v7  ;;  %v13309_v57 = vpack.c.bf16 %v4304_v53, %v4303_v59  ;;  %v4305_v63 = vld [vmem:[#allocation7 + $0x1b20] sm:$0xff]  ;;  %v4314_v59 = vld [vmem:[#allocation7 + $0x1b68] sm:$0xff] }
0x1a24   :  { %13231 = vmatpush3.bf16.msra.mxu0 %v13230_v55  ;;  %v4289_v55 = vld [vmem:[#allocation7 + $0x1aa0] sm:$0xff] }
0x1a25   :  { %13233 = vmatprep.subr.bf16.mxu0 %v13232_v2  ;;  %v13279_v58 = vpack.c.bf16 %v4290_v56, %v4289_v55  ;;  %v4306_v2 = vld [vmem:[#allocation7 + $0x1b28] sm:$0xff]  ;;  %v4313_v51 = vld [vmem:[#allocation7 + $0x1b60] sm:$0xff]  ;;  %v4299_v55 = vld [vmem:[#allocation7 + $0x1af0] sm:$0xff] }
0x1a26   :  { %13247 = vmatpush3.bf16.msra.mxu1 %v13246_v13  ;;  %v13313_v7 = vpack.c.bf16 %v4306_v2, %v4305_v63  ;;  %v13329_v53 = vpack.c.bf16 %v4314_v59, %v4313_v51  ;;  %v4300_v56 = vld [vmem:[#allocation7 + $0x1af8] sm:$0xff]  ;;  %v4315_v2 = vld [vmem:[#allocation7 + $0x1b70] sm:$0xff]  ;;  %v4617_v59 = vld [vmem:[#allocation7 + $0x1d40] sm:$0xff] }
0x1a27   :  { %13249 = vmatprep.subr.bf16.mxu1 %v13248_v17 }
0x1a28   :  { %13235 = vmatpush3.bf16.msra.mxu0 %v13234_v54  ;;  %v4292_v54 = vld [vmem:[#allocation7 + $0x1ab8] sm:$0xff] }
0x1a29   :  { %13268 = vmatprep.subr.bf16.mxu0 %v14755_v0  ;;  %v13283_v8 = vpack.c.bf16 %v4292_v54, %v4291_v5  ;;  %v9842_v5 = vld [vmem:[#allocation11 + $0xc] ss:$0 sm:$0xff] }
0x1a2a   :  { %13251 = vmatpush3.bf16.msra.mxu1 %v13250_v26 }
0x1a2b   :  { %13253 = vmatprep.subr.bf16.mxu1 %v13252_v33  ;;  %v4286_v33 = vld [vmem:[#allocation7 + $0x1a88] sm:$0xff] }
0x1a2c   :  { %v13271_v35 = vpack.c.bf16 %v4286_v33, %v4285_v32  ;;  %v4328_v32 = vld [vmem:[#allocation7 + $0x1bd8] sm:$0xff] }
0x1a2e   :  { %13255 = vmatpush3.bf16.msra.mxu1 %v13254_v40  ;;  %v13303_v40 = vpack.c.bf16 %v4318_v38, %v4317_v37  ;;  %v4280_v37 = vld [vmem:[#allocation7 + $0x1a58] sm:$0xff] }
0x1a2f   :  { %13257 = vmatprep.subr.bf16.mxu1 %v13256_v44  ;;  %v13305_v44 = vpack.c.bf16 %v4302_v42, %v4301_v41  ;;  %v13293_v41 = vpack.c.bf16 %v4280_v37, %v4279_v36  ;;  %v4629_v36 = vld [vmem:[#allocation7 + $0x1da0] sm:$0xff]  ;;  %v4630_v37 = vld [vmem:[#allocation7 + $0x1da8] sm:$0xff] }
0x1a32   :  { %13259 = vmatpush3.bf16.msra.mxu1 %v13258_v48  ;;  %v13275_v48 = vpack.c.bf16 %v4288_v45, %v4287_v43  ;;  %v4297_v43 = vld [vmem:[#allocation7 + $0x1ae0] sm:$0xff] }
0x1a33   :  { %13261 = vmatprep.subr.bf16.mxu1 %v13260_v1  ;;  %v4273_v1 = vld [vmem:[#allocation7 + $0x1a20] sm:$0xff] }
0x1a36   :  { %13263 = vmatpush3.bf16.msra.mxu1 %v13262_v60  ;;  %v4274_v60 = vld [vmem:[#allocation7 + $0x1a28] sm:$0xff] }
0x1a37   :  { %13265 = vmatprep.subr.bf16.mxu1 %v13264_v6  ;;  %v13281_v3 = vpack.c.bf16 %v4274_v60, %v4273_v1  ;;  %v4275_v6 = vld [vmem:[#allocation7 + $0x1a30] sm:$0xff]  ;;  %v4284_v1 = vld [vmem:[#allocation7 + $0x1a78] sm:$0xff] }
0x1a38   :  { %v4331_v60 = vld [vmem:[#allocation7 + $0x1bf0] sm:$0xff] }
0x1a39   :  { %v13331_v63 = vpack.c.bf16 %v4332_v61, %v4331_v60  ;;  %v4596_v60 = vld [vmem:[#allocation7 + $0x1c98] sm:$0xff]  ;;  %v4635_v61 = vld [vmem:[#allocation7 + $0x1dd0] sm:$0xff] }
0x1a3a   :  { %13267 = vmatpush3.bf16.msra.mxu1 %v13266_v9  ;;  %v4276_v9 = vld [vmem:[#allocation7 + $0x1a38] sm:$0xff] }
0x1a3b   :  { %13272 = vmatprep.subr.bf16.mxu1 %v13271_v35 }
0x1a3d   :  { %4168 = vmatmul.mubr.f32.vlgmr.msra.gmra.mrb[40].mxu1 %v15079_v27 }
0x1a3e   :  { %13274 = vmatpush3.bf16.msra.mxu1 %v13273_v39  ;;  %v4311_v39 = vld [vmem:[#allocation7 + $0x1b50] sm:$0xff] }
0x1a3f   :  { %13276 = vmatprep.subr.bf16.mxu1 %v13275_v48  ;;  %v4329_v48 = vld [vmem:[#allocation7 + $0x1be0] sm:$0xff] }
0x1a42   :  { %13278 = vmatpush3.bf16.msra.mxu1 %v13277_v49  ;;  %v13297_v49 = vpack.c.bf16 %v4282_v47, %v4281_v46  ;;  %v4616_v46 = vld [vmem:[#allocation7 + $0x1d38] sm:$0xff]  ;;  %v4633_v47 = vld [vmem:[#allocation7 + $0x1dc0] sm:$0xff] }
0x1a43   :  { %13280 = vmatprep.subr.bf16.mxu1 %v13279_v58  ;;  %v13299_v58 = vpack.c.bf16 %v4300_v56, %v4299_v55  ;;  %v4578_v55 = vld [vmem:[#allocation7 + $0x1c08] sm:$0xff] }
0x1a46   :  { %13282 = vmatpush3.bf16.msra.mxu1 %v13281_v3  ;;  %v4316_v3 = vld [vmem:[#allocation7 + $0x1b78] sm:$0xff] }
0x1a47   :  { %13284 = vmatprep.subr.bf16.mxu1 %v13283_v8 }
0x1af0   :  { %v3946_v11 = vpop.f32.mrb[38].mxu1 }
0x1af1   :  { %v3947_v12 = vadd.f32 %v9839_v10, %v3946_v11  ;;  %v12259_v13 = vpop.f32.mrb[39].mxu1  ;;  %v4323_v10 = vld [vmem:[#allocation7 + $0x1bb0] sm:$0xff]  ;;  %v4324_v11 = vld [vmem:[#allocation7 + $0x1bb8] sm:$0xff] }
0x1af2   :  { %v4307_v13 = vld [vmem:[#allocation7 + $0x1b30] sm:$0xff] }
0x1af3   :  { %v3950_v18 = vmax.f32 %v3947_v12, 0.0  ;;  %v13315_v12 = vpack.c.bf16 %v4324_v11, %v4323_v10 }
0x1af5   :  { %3952 = vrot.lane.b32.xlu0 %v3950_v18, %s14761_s16  ;;  %v4308_v18 = vld [vmem:[#allocation7 + $0x1b38] sm:$0xff] }
0x1af6   :  { %v13317_v20 = vpack.c.bf16 %v4308_v18, %v4307_v13  ;;  %v4483_v18 = vld [vmem:[#allocation10 + $0xd0] sm:$0xff] }
0x1b10   :  { %v10845_v16 = vpop.f32.mrb[40].mxu1 }
0x1b11   :  { %v10846_v17 = vpop.f32.mrb[41].mxu1 }
0x1b12   :  { %v10847_v19 = vadd.f32 %v10846_v17, %v10845_v16  ;;  %v13285_v16 = vpack.c.bf16 %v4276_v9, %v4275_v6  ;;  %v4325_v17 = vld [vmem:[#allocation7 + $0x1bc0] sm:$0xff] }
0x1b14   :  { %13286 = vmatpush3.bf16.msra.mxu1 %v13285_v16 }
0x1b67   :  { %v3953_v14 = vpop.permute.xlu0 %3952 }
0x1b68   :  { %3955 = vst.msk [vmem:[#allocation2 + $0x8] sm:$0xff] %vm1491_vm7, %v3953_v14  ;;  %v4293_v14 = vld [vmem:[#allocation7 + $0x1ac0] sm:$0xff] }
0x1b6f   :  { %v3957_v15 = vld [vmem:[#allocation2 + $0x8] sm:$0xff] }
0x1b70   :  { %4097 = vmatprep.mubr.f32.mxu0 %v3957_v15  ;;  %v4294_v15 = vld [vmem:[#allocation7 + $0x1ac8] sm:$0xff] }
0x1b71   :  { %4098 = vmatmul.mubr.f32.vlgmr.msra.gmra.mrb[34].mxu0 %v15084_v30  ;;  %v13287_v21 = vpack.c.bf16 %v4294_v15, %v4293_v14  ;;  %v4484_v14 = vld [vmem:[#allocation10 + $0xd8] sm:$0xff] }
0x1b72   :  { %12264 = vmatprep.mubr.msk.f32.mxu0 %vm14757_vm0, %v15079_v27  ;;  %13270 = vmatpush3.bf16.msra.mxu0 %v13269_v22  ;;  %v4277_v22 = vld [vmem:[#allocation7 + $0x1a40] sm:$0xff]  ;;  %v13336_v15 = vpack.c.bf16 %v4484_v14, %v4483_v18  ;;  %v4638_v18 = vld [vmem:[#allocation7 + $0x1de8] sm:$0xff]  ;;  %v4599_v14 = vld [vmem:[#allocation7 + $0x1cb0] sm:$0xff] }
0x1b73   :  { %13304 = vmatprep.subr.bf16.mxu0 %v13303_v40  ;;  %13288 = vmatprep.subr.bf16.mxu1 %v13287_v21  ;;  %v4312_v40 = vld [vmem:[#allocation7 + $0x1b58] sm:$0xff] }
0x1b74   :  { %v13325_v42 = vpack.c.bf16 %v4312_v40, %v4311_v39  ;;  %v13378_v39 = vpack.c.bf16 %v4630_v37, %v4629_v36  ;;  %v4613_v40 = vld [vmem:[#allocation7 + $0x1d20] sm:$0xff]  ;;  %v4624_v37 = vld [vmem:[#allocation7 + $0x1d78] sm:$0xff] }
0x1c44   :  { %v10810_v23 = vpop.f32.mrb[34].mxu0 }
0x1c45   :  { %v10811_v25 = vpop.f32.mrb[35].mxu0 }
0x1c46   :  { %v10812_v26 = vadd.f32 %v10811_v25, %v10810_v23  ;;  %v4278_v23 = vld [vmem:[#allocation7 + $0x1a48] sm:$0xff] }
0x1c47   :  { %v13289_v33 = vpack.c.bf16 %v4278_v23, %v4277_v22 }
0x1c48   :  { %v4100_v28 = vadd.f32 %v10812_v26, %v9841_v24  ;;  %v4309_v24 = vld [vmem:[#allocation7 + $0x1b40] sm:$0xff]  ;;  %v4310_v26 = vld [vmem:[#allocation7 + $0x1b48] sm:$0xff] }
0x1c49   :  { %v13321_v34 = vpack.c.bf16 %v4310_v26, %v4309_v24  ;;  %13290 = vmatpush3.bf16.msra.mxu1 %v13289_v33  ;;  %v4626_v24 = vld [vmem:[#allocation7 + $0x1d88] sm:$0xff] }
0x1c4a   :  { %v4170_v29 = vadd.f32 %v10847_v19, %v4100_v28  ;;  %v4326_v19 = vld [vmem:[#allocation7 + $0x1bc8] sm:$0xff]  ;;  %v4295_v28 = vld [vmem:[#allocation7 + $0x1ad0] sm:$0xff] }
0x1c4b   :  { %v13319_v25 = vpack.c.bf16 %v4326_v19, %v4325_v17  ;;  %v9844_v17 = vld [vmem:[#allocation8 + $0xd] ss:$0 sm:$0xff] }
0x1c4c   :  { %v4173_v31 = vmax.f32 %v4170_v29, 0.0  ;;  %v4296_v29 = vld [vmem:[#allocation7 + $0x1ad8] sm:$0xff] }
0x1c4d   :  { %v13291_v35 = vpack.c.bf16 %v4296_v29, %v4295_v28  ;;  %v4610_v28 = vld [vmem:[#allocation7 + $0x1d08] sm:$0xff]  ;;  %v4627_v29 = vld [vmem:[#allocation7 + $0x1d90] sm:$0xff] }
0x1c4e   :  { %12265 = vmatmul.mubr.msk.f32.vlgmr.msra.gmra.mrb[36].mxu0 %vm485_vm3, %v4173_v31  ;;  %v4327_v31 = vld [vmem:[#allocation7 + $0x1bd0] sm:$0xff] }
0x1c4f   :  { %4475 = vmatprep.mubr.f32.mxu0 %v15079_v27  ;;  %13306 = vmatpush3.bf16.msra.mxu0 %v13305_v44  ;;  %v13323_v38 = vpack.c.bf16 %v4328_v32, %v4327_v31  ;;  %v4298_v44 = vld [vmem:[#allocation7 + $0x1ae8] sm:$0xff]  ;;  %v4628_v31 = vld [vmem:[#allocation7 + $0x1d98] sm:$0xff] }
0x1c50   :  { %13308 = vmatprep.subr.bf16.mxu0 %v13307_v52  ;;  %13292 = vmatprep.subr.bf16.mxu1 %v13291_v35  ;;  %v13295_v45 = vpack.c.bf16 %v4298_v44, %v4297_v43  ;;  %v13327_v52 = vpack.c.bf16 %v4330_v50, %v4329_v48  ;;  %v13374_v33 = vpack.c.bf16 %v4628_v31, %v4627_v29  ;;  %v4612_v35 = vld [vmem:[#allocation7 + $0x1d18] sm:$0xff]  ;;  %v4634_v48 = vld [vmem:[#allocation7 + $0x1dc8] sm:$0xff] }
0x1c51   :  { %13294 = vmatpush3.bf16.msra.mxu1 %v13293_v41  ;;  %v4631_v41 = vld [vmem:[#allocation7 + $0x1db0] sm:$0xff]  ;;  %v4594_v50 = vld [vmem:[#allocation7 + $0x1c88] sm:$0xff]  ;;  %v13386_v56 = vpack.c.bf16 %v4634_v48, %v4633_v47  ;;  %v4881_v47 = vld [vmem:[#allocation7 + $0x1e00] sm:$0xff] }
0x1c52   :  { %13296 = vmatprep.subr.bf16.mxu1 %v13295_v45  ;;  %v4615_v45 = vld [vmem:[#allocation7 + $0x1d30] sm:$0xff]  ;;  %v4882_v48 = vld [vmem:[#allocation7 + $0x1e08] sm:$0xff] }
0x1c53   :  { %13310 = vmatpush3.bf16.msra.mxu0 %v13309_v57  ;;  %v4283_v57 = vld [vmem:[#allocation7 + $0x1a70] sm:$0xff]  ;;  %v13384_v51 = vpack.c.bf16 %v4616_v46, %v4615_v45  ;;  %v4588_v45 = vld [vmem:[#allocation7 + $0x1c58] sm:$0xff] }
0x1c54   :  { %13312 = vmatprep.subr.bf16.mxu0 %v13311_v4  ;;  %v13301_v62 = vpack.c.bf16 %v4284_v1, %v4283_v57  ;;  %v13333_v4 = vpack.c.bf16 %v4316_v3, %v4315_v2  ;;  %v4618_v57 = vld [vmem:[#allocation7 + $0x1d48] sm:$0xff]  ;;  %v4595_v1 = vld [vmem:[#allocation7 + $0x1c90] sm:$0xff]  ;;  %v4580_v3 = vld [vmem:[#allocation7 + $0x1c18] sm:$0xff] }
0x1c55   :  { %13298 = vmatpush3.bf16.msra.mxu1 %v13297_v49  ;;  %v4593_v49 = vld [vmem:[#allocation7 + $0x1c80] sm:$0xff]  ;;  %v4579_v2 = vld [vmem:[#allocation7 + $0x1c10] sm:$0xff] }
0x1c56   :  { %13300 = vmatprep.subr.bf16.mxu1 %v13299_v58 }
0x1c57   :  { %13314 = vmatpush3.bf16.msra.mxu0 %v13313_v7 }
0x1c58   :  { %13316 = vmatprep.subr.bf16.mxu0 %v13315_v12 }
0x1c59   :  { %13302 = vmatpush3.bf16.msra.mxu1 %v13301_v62  ;;  %v4636_v62 = vld [vmem:[#allocation7 + $0x1dd8] sm:$0xff] }
0x1c5a   :  { %13335 = vmatprep.subr.bf16.mxu1 %v14755_v0 }
0x1c5b   :  { %13318 = vmatpush3.bf16.msra.mxu0 %v13317_v20 }
0x1c5c   :  { %13320 = vmatprep.subr.bf16.mxu0 %v13319_v25  ;;  %v4609_v25 = vld [vmem:[#allocation7 + $0x1d00] sm:$0xff] }
0x1c5d   :  { %v13372_v32 = vpack.c.bf16 %v4610_v28, %v4609_v25  ;;  %v4602_v25 = vld [vmem:[#allocation7 + $0x1cc8] sm:$0xff]  ;;  %v4640_v28 = vld [vmem:[#allocation7 + $0x1df8] sm:$0xff] }
0x1c5f   :  { %13322 = vmatpush3.bf16.msra.mxu0 %v13321_v34  ;;  %v4611_v34 = vld [vmem:[#allocation7 + $0x1d10] sm:$0xff] }
0x1c60   :  { %13324 = vmatprep.subr.bf16.mxu0 %v13323_v38  ;;  %v13376_v38 = vpack.c.bf16 %v4612_v35, %v4611_v34  ;;  %v4585_v34 = vld [vmem:[#allocation7 + $0x1c40] sm:$0xff]  ;;  %v4586_v35 = vld [vmem:[#allocation7 + $0x1c48] sm:$0xff] }
0x1c63   :  { %13326 = vmatpush3.bf16.msra.mxu0 %v13325_v42  ;;  %v4632_v42 = vld [vmem:[#allocation7 + $0x1db8] sm:$0xff] }
0x1c64   :  { %13328 = vmatprep.subr.bf16.mxu0 %v13327_v52  ;;  %v13382_v44 = vpack.c.bf16 %v4632_v42, %v4631_v41  ;;  %v13338_v52 = vpack.c.bf16 %v4594_v50, %v4593_v49  ;;  %v13356_v41 = vpack.c.bf16 %v4586_v35, %v4585_v34  ;;  %v4899_v49 = vld [vmem:[#allocation7 + $0x1e90] sm:$0xff]  ;;  %v4900_v50 = vld [vmem:[#allocation7 + $0x1e98] sm:$0xff] }
0x1c65   :  { %v4911_v34 = vld [vmem:[#allocation7 + $0x1ef0] sm:$0xff]  ;;  %v4912_v35 = vld [vmem:[#allocation7 + $0x1ef8] sm:$0xff] }
0x1c67   :  { %13330 = vmatpush3.bf16.msra.mxu0 %v13329_v53  ;;  %v4577_v53 = vld [vmem:[#allocation7 + $0x1c00] sm:$0xff] }
0x1c68   :  { %13332 = vmatprep.subr.bf16.mxu0 %v13331_v63  ;;  %v13340_v58 = vpack.c.bf16 %v4578_v55, %v4577_v53  ;;  %v13342_v63 = vpack.c.bf16 %v4596_v60, %v4595_v1  ;;  %v4883_v53 = vld [vmem:[#allocation7 + $0x1e10] sm:$0xff]  ;;  %v4884_v55 = vld [vmem:[#allocation7 + $0x1e18] sm:$0xff] }
0x1c69   :  { %v13411_v1 = vpack.c.bf16 %v4884_v55, %v4883_v53  ;;  %v4791_v53 = vld [vmem:[#allocation10 + $0xe0] sm:$0xff]  ;;  %v4792_v55 = vld [vmem:[#allocation10 + $0xe8] sm:$0xff] }
0x1c6b   :  { %13334 = vmatpush3.bf16.msra.mxu0 %v13333_v4  ;;  %v13388_v4 = vpack.c.bf16 %v4618_v57, %v4617_v59  ;;  %v13407_v59 = vpack.c.bf16 %v4882_v48, %v4881_v47  ;;  %v4902_v57 = vld [vmem:[#allocation7 + $0x1ea8] sm:$0xff] }
0x1c6c   :  { %13339 = vmatprep.subr.bf16.mxu0 %v13338_v52  ;;  %v13409_v52 = vpack.c.bf16 %v4900_v50, %v4899_v49 }
0x1c6e   :  { %4476 = vmatmul.mubr.f32.vlgmr.msra.gmra.mrb[38].mxu0 %v15079_v27 }
0x1c6f   :  { %13341 = vmatpush3.bf16.msra.mxu0 %v13340_v58  ;;  %v15118_v58 = vld [vmem:[#allocation2 + $0x10] sm:$0xff] }
0x1c70   :  { %13343 = vmatprep.subr.bf16.mxu0 %v13342_v63  ;;  %v4903_v63 = vld [vmem:[#allocation7 + $0x1eb0] sm:$0xff] }
0x1d21   :  { %v4254_v54 = vpop.f32.mrb[36].mxu0 }
0x1d22   :  { %v4255_v6 = vadd.f32 %v9842_v5, %v4254_v54  ;;  %v12266_v7 = vpop.f32.mrb[37].mxu0  ;;  %v4619_v5 = vld [vmem:[#allocation7 + $0x1d50] sm:$0xff]  ;;  %v13344_v54 = vpack.c.bf16 %v4580_v3, %v4579_v2  ;;  %v4904_v2 = vld [vmem:[#allocation7 + $0x1eb8] sm:$0xff] }
0x1d23   :  { %v4598_v7 = vld [vmem:[#allocation7 + $0x1ca8] sm:$0xff] }
0x1d24   :  { %v4258_v8 = vmax.f32 %v4255_v6, 0.0  ;;  %v4597_v6 = vld [vmem:[#allocation7 + $0x1ca0] sm:$0xff]  ;;  %13345 = vmatpush3.bf16.msra.mxu0 %v13344_v54  ;;  %v4888_v54 = vld [vmem:[#allocation7 + $0x1e38] sm:$0xff] }
0x1d26   :  { %4260 = vrot.lane.b32.xlu1 %v4258_v8, %s14762_s4  ;;  %v13390_v8 = vpack.c.bf16 %v4636_v62, %v4635_v61  ;;  %v4885_v61 = vld [vmem:[#allocation7 + $0x1e20] sm:$0xff]  ;;  %v4886_v62 = vld [vmem:[#allocation7 + $0x1e28] sm:$0xff] }
0x1d27   :  { %v13415_v3 = vpack.c.bf16 %v4886_v62, %v4885_v61 }
0x1d41   :  { %v10918_v11 = vpop.f32.mrb[38].mxu0 }
0x1d42   :  { %v10919_v12 = vpop.f32.mrb[39].mxu0 }
0x1d43   :  { %v10920_v13 = vadd.f32 %v10919_v12, %v10918_v11  ;;  %v4581_v11 = vld [vmem:[#allocation7 + $0x1c20] sm:$0xff]  ;;  %v4582_v12 = vld [vmem:[#allocation7 + $0x1c28] sm:$0xff] }
0x1d98   :  { %v4261_v9 = vpop.permute.xlu1 %4260 }
0x1d99   :  { %4263 = vst.msk [vmem:[#allocation2 + $0x8] sm:$0xff] %vm1800_vm8, %v4261_v9  ;;  %v4620_v9 = vld [vmem:[#allocation7 + $0x1d58] sm:$0xff] }
0x1da0   :  { %v4265_v10 = vld [vmem:[#allocation2 + $0x8] sm:$0xff] }
0x1da1   :  { %4405 = vmatprep.mubr.f32.mxu1 %v4265_v10  ;;  %v13346_v10 = vpack.c.bf16 %v4598_v7, %v4597_v6  ;;  %v4905_v6 = vld [vmem:[#allocation7 + $0x1ec0] sm:$0xff]  ;;  %v4906_v7 = vld [vmem:[#allocation7 + $0x1ec8] sm:$0xff] }
0x1da2   :  { %4406 = vmatmul.mubr.f32.vlgmr.msra.gmra.mrb[42].mxu1 %v15084_v30  ;;  %v4625_v30 = vld [vmem:[#allocation7 + $0x1d80] sm:$0xff] }
0x1da3   :  { %12271 = vmatprep.mubr.msk.f32.mxu1 %vm14757_vm0, %v15079_v27  ;;  %13337 = vmatpush3.bf16.msra.mxu1 %v13336_v15  ;;  %v13370_v26 = vpack.c.bf16 %v4626_v24, %v4625_v30  ;;  %v13348_v15 = vpack.c.bf16 %v4582_v12, %v4581_v11  ;;  %v4622_v30 = vld [vmem:[#allocation7 + $0x1d68] sm:$0xff]  ;;  %v4601_v24 = vld [vmem:[#allocation7 + $0x1cc0] sm:$0xff]  ;;  %v4907_v12 = vld [vmem:[#allocation7 + $0x1ed0] sm:$0xff] }
0x1da4   :  { %13347 = vmatprep.subr.bf16.mxu0 %v13346_v10  ;;  %v4889_v10 = vld [vmem:[#allocation7 + $0x1e40] sm:$0xff]  ;;  %v4890_v11 = vld [vmem:[#allocation7 + $0x1e48] sm:$0xff] }
0x1da5   :  { %13371 = vmatprep.subr.bf16.mxu1 %v13370_v26  ;;  %v4639_v26 = vld [vmem:[#allocation7 + $0x1df0] sm:$0xff]  ;;  %13349 = vmatpush3.bf16.msra.mxu0 %v13348_v15 }
0x1da6   :  { %v13398_v36 = vpack.c.bf16 %v4640_v28, %v4639_v26  ;;  %v4891_v15 = vld [vmem:[#allocation7 + $0x1e50] sm:$0xff]  ;;  %v4893_v28 = vld [vmem:[#allocation7 + $0x1e60] sm:$0xff] }
0x1e75   :  { %v10883_v16 = vpop.f32.mrb[42].mxu1 }
0x1e76   :  { %v10884_v19 = vpop.f32.mrb[43].mxu1 }
0x1e77   :  { %v10885_v20 = vadd.f32 %v10884_v19, %v10883_v16  ;;  %v4600_v16 = vld [vmem:[#allocation7 + $0x1cb8] sm:$0xff]  ;;  %v4621_v19 = vld [vmem:[#allocation7 + $0x1d60] sm:$0xff] }
0x1e78   :  { %v13396_v31 = vpack.c.bf16 %v4622_v30, %v4621_v19  ;;  %v4605_v19 = vld [vmem:[#allocation7 + $0x1ce0] sm:$0xff] }
0x1e79   :  { %v4408_v21 = vadd.f32 %v10885_v20, %v9844_v17  ;;  %v13392_v17 = vpack.c.bf16 %v4620_v9, %v4619_v5  ;;  %v13350_v20 = vpack.c.bf16 %v4600_v16, %v4599_v14  ;;  %v4887_v5 = vld [vmem:[#allocation7 + $0x1e30] sm:$0xff]  ;;  %v13421_v9 = vpack.c.bf16 %v4906_v7, %v4905_v6  ;;  %v4892_v16 = vld [vmem:[#allocation7 + $0x1e58] sm:$0xff]  ;;  %v4589_v30 = vld [vmem:[#allocation7 + $0x1c60] sm:$0xff] }
0x1e7a   :  { %v4913_v6 = vld [vmem:[#allocation7 + $0x1f00] sm:$0xff]  ;;  %v4914_v7 = vld [vmem:[#allocation7 + $0x1f08] sm:$0xff] }
0x1e7b   :  { %v4478_v22 = vadd.f32 %v10920_v13, %v4408_v21  ;;  %v4637_v13 = vld [vmem:[#allocation7 + $0x1de0] sm:$0xff]  ;;  %v4583_v21 = vld [vmem:[#allocation7 + $0x1c30] sm:$0xff]  ;;  %13351 = vmatprep.subr.bf16.mxu0 %v13350_v20  ;;  %v4606_v20 = vld [vmem:[#allocation7 + $0x1ce8] sm:$0xff] }
0x1e7d   :  { %v4481_v23 = vmax.f32 %v4478_v22, 0.0  ;;  %v4584_v22 = vld [vmem:[#allocation7 + $0x1c38] sm:$0xff] }
0x1e7e   :  { %v13352_v29 = vpack.c.bf16 %v4584_v22, %v4583_v21  ;;  %v4909_v21 = vld [vmem:[#allocation7 + $0x1ee0] sm:$0xff]  ;;  %v13362_v22 = vpack.c.bf16 %v4606_v20, %v4605_v19 }
0x1e7f   :  { %12272 = vmatmul.mubr.msk.f32.vlgmr.msra.gmra.mrb[44].mxu1 %vm485_vm3, %v4481_v23  ;;  %v13394_v23 = vpack.c.bf16 %v4638_v18, %v4637_v13  ;;  %v4908_v13 = vld [vmem:[#allocation7 + $0x1ed8] sm:$0xff]  ;;  %v13423_v18 = vpack.c.bf16 %v4890_v11, %v4889_v10  ;;  %v13439_v11 = vpack.c.bf16 %v4914_v7, %v4913_v6  ;;  %v4917_v20 = vld [vmem:[#allocation7 + $0x1f20] sm:$0xff] }
0x1e80   :  { %4783 = vmatprep.mubr.f32.mxu1 %v15079_v27  ;;  %13373 = vmatpush3.bf16.msra.mxu1 %v13372_v32  ;;  %v4614_v27 = vld [vmem:[#allocation7 + $0x1d28] sm:$0xff]  ;;  %v4623_v32 = vld [vmem:[#allocation7 + $0x1d70] sm:$0xff]  ;;  %v13425_v14 = vpack.c.bf16 %v4908_v13, %v4907_v12 }
0x1e81   :  { %13375 = vmatprep.subr.bf16.mxu1 %v13374_v33  ;;  %v13380_v43 = vpack.c.bf16 %v4614_v27, %v4613_v40  ;;  %v13354_v33 = vpack.c.bf16 %v4602_v25, %v4601_v24  ;;  %v4897_v40 = vld [vmem:[#allocation7 + $0x1e80] sm:$0xff]  ;;  %v4898_v27 = vld [vmem:[#allocation7 + $0x1e88] sm:$0xff]  ;;  %13353 = vmatpush3.bf16.msra.mxu0 %v13352_v29  ;;  %v13400_v42 = vpack.c.bf16 %v4624_v37, %v4623_v32 }
0x1e82   :  { %v13405_v46 = vpack.c.bf16 %v4898_v27, %v4897_v40  ;;  %v4590_v24 = vld [vmem:[#allocation7 + $0x1c68] sm:$0xff]  ;;  %v13433_v37 = vpack.c.bf16 %v4912_v35, %v4911_v34  ;;  %v4895_v40 = vld [vmem:[#allocation7 + $0x1e70] sm:$0xff] }
0x1e83   :  { %13355 = vmatprep.subr.bf16.mxu0 %v13354_v33  ;;  %v13364_v26 = vpack.c.bf16 %v4590_v24, %v4589_v30  ;;  %v4894_v29 = vld [vmem:[#allocation7 + $0x1e68] sm:$0xff]  ;;  %v4608_v33 = vld [vmem:[#allocation7 + $0x1cf8] sm:$0xff] }
0x1e84   :  { %13377 = vmatpush3.bf16.msra.mxu1 %v13376_v38  ;;  %v4603_v38 = vld [vmem:[#allocation7 + $0x1cd0] sm:$0xff]  ;;  %v13431_v32 = vpack.c.bf16 %v4894_v29, %v4893_v28  ;;  %v4937_v28 = vld [vmem:[#allocation7 + $0x1fc0] sm:$0xff]  ;;  %v4938_v29 = vld [vmem:[#allocation7 + $0x1fc8] sm:$0xff] }
0x1e85   :  { %13379 = vmatprep.subr.bf16.mxu1 %v13378_v39  ;;  %v4604_v39 = vld [vmem:[#allocation7 + $0x1cd8] sm:$0xff]  ;;  %13357 = vmatpush3.bf16.msra.mxu0 %v13356_v41  ;;  %v4922_v34 = vld [vmem:[#allocation7 + $0x1f48] sm:$0xff] }
0x1e86   :  { %v4896_v41 = vld [vmem:[#allocation7 + $0x1e78] sm:$0xff] }
0x1e88   :  { %13381 = vmatpush3.bf16.msra.mxu1 %v13380_v43  ;;  %v13358_v43 = vpack.c.bf16 %v4604_v39, %v4603_v38  ;;  %v4591_v38 = vld [vmem:[#allocation7 + $0x1c70] sm:$0xff]  ;;  %v4592_v39 = vld [vmem:[#allocation7 + $0x1c78] sm:$0xff] }
0x1e89   :  { %13383 = vmatprep.subr.bf16.mxu1 %v13382_v44  ;;  %v4587_v44 = vld [vmem:[#allocation7 + $0x1c50] sm:$0xff]  ;;  %v13368_v27 = vpack.c.bf16 %v4592_v39, %v4591_v38 }
0x1e8a   :  { %13359 = vmatprep.subr.bf16.mxu0 %v13358_v43  ;;  %v9845_v43 = vld [vmem:[#allocation11 + $0xd] ss:$0 sm:$0xff]  ;;  %v4923_v39 = vld [vmem:[#allocation7 + $0x1f50] sm:$0xff] }
0x1e8c   :  { %13385 = vmatpush3.bf16.msra.mxu1 %v13384_v51  ;;  %v13360_v51 = vpack.c.bf16 %v4588_v45, %v4587_v44 }
0x1e8d   :  { %13387 = vmatprep.subr.bf16.mxu1 %v13386_v56  ;;  %v4901_v56 = vld [vmem:[#allocation7 + $0x1ea0] sm:$0xff] }
0x1e8e   :  { %13361 = vmatpush3.bf16.msra.mxu0 %v13360_v51  ;;  %v13413_v60 = vpack.c.bf16 %v4902_v57, %v4901_v56  ;;  %v13403_v56 = vpack.c.bf16 %v4792_v55, %v4791_v53  ;;  %v4929_v57 = vld [vmem:[#allocation7 + $0x1f80] sm:$0xff]  ;;  %v5206_v55 = vld [vmem:[#allocation7 + $0x2088] sm:$0xff] }
0x1e8f   :  { %13363 = vmatprep.subr.bf16.mxu0 %v13362_v22  ;;  %v4935_v22 = vld [vmem:[#allocation7 + $0x1fb0] sm:$0xff]  ;;  %v5205_v53 = vld [vmem:[#allocation7 + $0x2080] sm:$0xff] }
0x1e90   :  { %13389 = vmatpush3.bf16.msra.mxu1 %v13388_v4  ;;  %v13417_v4 = vpack.c.bf16 %v4904_v2, %v4903_v63  ;;  %v9847_v63 = vld [vmem:[#allocation8 + $0xe] ss:$0 sm:$0xff] }
0x1e91   :  { %13391 = vmatprep.subr.bf16.mxu1 %v13390_v8  ;;  %v13419_v8 = vpack.c.bf16 %v4888_v54, %v4887_v5 }
0x1e92   :  { %13365 = vmatpush3.bf16.msra.mxu0 %v13364_v26  ;;  %v4920_v26 = vld [vmem:[#allocation7 + $0x1f38] sm:$0xff] }
0x1e94   :  { %13393 = vmatpush3.bf16.msra.mxu1 %v13392_v17  ;;  %v13427_v17 = vpack.c.bf16 %v4892_v16, %v4891_v15  ;;  %v4933_v15 = vld [vmem:[#allocation7 + $0x1fa0] sm:$0xff]  ;;  %v4934_v16 = vld [vmem:[#allocation7 + $0x1fa8] sm:$0xff] }
0x1e95   :  { %13395 = vmatprep.subr.bf16.mxu1 %v13394_v23  ;;  %v4910_v23 = vld [vmem:[#allocation7 + $0x1ee8] sm:$0xff]  ;;  %v13445_v19 = vpack.c.bf16 %v4934_v16, %v4933_v15  ;;  %v5211_v16 = vld [vmem:[#allocation7 + $0x20b0] sm:$0xff] }
0x1e96   :  { %v13429_v25 = vpack.c.bf16 %v4910_v23, %v4909_v21  ;;  %v4918_v21 = vld [vmem:[#allocation7 + $0x1f28] sm:$0xff]  ;;  %v4936_v23 = vld [vmem:[#allocation7 + $0x1fb8] sm:$0xff] }
0x1e97   :  { %v13447_v30 = vpack.c.bf16 %v4918_v21, %v4917_v20  ;;  %v13449_v24 = vpack.c.bf16 %v4936_v23, %v4935_v22  ;;  %v5194_v15 = vld [vmem:[#allocation7 + $0x2028] sm:$0xff]  ;;  %v5195_v21 = vld [vmem:[#allocation7 + $0x2030] sm:$0xff]  ;;  %v5196_v22 = vld [vmem:[#allocation7 + $0x2038] sm:$0xff] }
0x1e98   :  { %13397 = vmatpush3.bf16.msra.mxu1 %v13396_v31  ;;  %v4607_v31 = vld [vmem:[#allocation7 + $0x1cf0] sm:$0xff]  ;;  %v5213_v23 = vld [vmem:[#allocation7 + $0x20c0] sm:$0xff] }
0x1e99   :  { %13399 = vmatprep.subr.bf16.mxu1 %v13398_v36  ;;  %v13366_v36 = vpack.c.bf16 %v4608_v33, %v4607_v31  ;;  %v4921_v33 = vld [vmem:[#allocation7 + $0x1f40] sm:$0xff] }
0x1e9a   :  { %v13455_v35 = vpack.c.bf16 %v4922_v34, %v4921_v33  ;;  %v5199_v34 = vld [vmem:[#allocation7 + $0x2050] sm:$0xff] }
0x1e9b   :  { %13367 = vmatprep.subr.bf16.mxu0 %v13366_v36  ;;  %v4939_v36 = vld [vmem:[#allocation7 + $0x1fd0] sm:$0xff] }
0x1e9c   :  { %13401 = vmatpush3.bf16.msra.mxu1 %v13400_v42  ;;  %v13435_v42 = vpack.c.bf16 %v4896_v41, %v4895_v40  ;;  %13369 = vmatpush3.bf16.msra.mxu0 %v13368_v27  ;;  %v4924_v40 = vld [vmem:[#allocation7 + $0x1f58] sm:$0xff]  ;;  %v4941_v41 = vld [vmem:[#allocation7 + $0x1fe0] sm:$0xff] }
0x1e9d   :  { %13406 = vmatprep.subr.bf16.mxu1 %v13405_v46  ;;  %13402 = vmatprep.subr.bf16.mxu0 %v14755_v0  ;;  %v13459_v27 = vpack.c.bf16 %v4924_v40, %v4923_v39  ;;  %v5201_v40 = vld [vmem:[#allocation7 + $0x2060] sm:$0xff] }
0x1e9f   :  { %4784 = vmatmul.mubr.f32.vlgmr.msra.gmra.mrb[46].mxu1 %v15118_v58 }
0x1ea0   :  { %13408 = vmatpush3.bf16.msra.mxu1 %v13407_v59 }
0x1ea1   :  { %13410 = vmatprep.subr.bf16.mxu1 %v13409_v52  ;;  %v15129_v52 = vld [vmem:[#allocation2] sm:$0xff] }
0x1ea4   :  { %13412 = vmatpush3.bf16.msra.mxu1 %v13411_v1  ;;  %v4930_v1 = vld [vmem:[#allocation7 + $0x1f88] sm:$0xff] }
0x1ea5   :  { %13414 = vmatprep.subr.bf16.mxu1 %v13413_v60  ;;  %v13437_v60 = vpack.c.bf16 %v4930_v1, %v4929_v57  ;;  %v13472_v57 = vpack.c.bf16 %v5206_v55, %v5205_v53  ;;  %v9848_v1 = vld [vmem:[#allocation11 + $0xe] ss:$0 sm:$0xff] }
0x1ea8   :  { %13416 = vmatpush3.bf16.msra.mxu1 %v13415_v3 }
0x1ea9   :  { %13418 = vmatprep.subr.bf16.mxu1 %v13417_v4 }
0x1eac   :  { %13420 = vmatpush3.bf16.msra.mxu1 %v13419_v8  ;;  %v4931_v8 = vld [vmem:[#allocation7 + $0x1f90] sm:$0xff] }
0x1ead   :  { %13422 = vmatprep.subr.bf16.mxu1 %v13421_v9  ;;  %v4932_v9 = vld [vmem:[#allocation7 + $0x1f98] sm:$0xff] }
0x1eae   :  { %v13441_v13 = vpack.c.bf16 %v4932_v9, %v4931_v8  ;;  %v5191_v8 = vld [vmem:[#allocation7 + $0x2010] sm:$0xff]  ;;  %v5192_v9 = vld [vmem:[#allocation7 + $0x2018] sm:$0xff] }
0x1eb0   :  { %13424 = vmatpush3.bf16.msra.mxu1 %v13423_v18  ;;  %v4915_v18 = vld [vmem:[#allocation7 + $0x1f10] sm:$0xff] }
0x1eb1   :  { %13426 = vmatprep.subr.bf16.mxu1 %v13425_v14  ;;  %v4916_v14 = vld [vmem:[#allocation7 + $0x1f18] sm:$0xff] }
0x1eb4   :  { %13428 = vmatpush3.bf16.msra.mxu1 %v13427_v17  ;;  %v13443_v17 = vpack.c.bf16 %v4916_v14, %v4915_v18  ;;  %v5193_v14 = vld [vmem:[#allocation7 + $0x2020] sm:$0xff] }
0x1eb5   :  { %13430 = vmatprep.subr.bf16.mxu1 %v13429_v25  ;;  %v4919_v25 = vld [vmem:[#allocation7 + $0x1f30] sm:$0xff] }
0x1eb6   :  { %v13451_v31 = vpack.c.bf16 %v4920_v26, %v4919_v25  ;;  %v5197_v26 = vld [vmem:[#allocation7 + $0x2040] sm:$0xff] }
0x1eb8   :  { %13432 = vmatpush3.bf16.msra.mxu1 %v13431_v32  ;;  %v13453_v32 = vpack.c.bf16 %v4938_v29, %v4937_v28  ;;  %v5198_v28 = vld [vmem:[#allocation7 + $0x2048] sm:$0xff]  ;;  %v5215_v29 = vld [vmem:[#allocation7 + $0x20d0] sm:$0xff] }
0x1eb9   :  { %13434 = vmatprep.subr.bf16.mxu1 %v13433_v37  ;;  %v4940_v37 = vld [vmem:[#allocation7 + $0x1fd8] sm:$0xff] }
0x1eba   :  { %v13457_v38 = vpack.c.bf16 %v4940_v37, %v4939_v36  ;;  %v5217_v36 = vld [vmem:[#allocation7 + $0x20e0] sm:$0xff]  ;;  %v5218_v37 = vld [vmem:[#allocation7 + $0x20e8] sm:$0xff] }
0x1ebb   :  { %v13496_v39 = vpack.c.bf16 %v5218_v37, %v5217_v36  ;;  %v5232_v36 = vld [vmem:[#allocation7 + $0x2158] sm:$0xff]  ;;  %v5249_v37 = vld [vmem:[#allocation7 + $0x21e0] sm:$0xff] }
0x1ebc   :  { %13436 = vmatpush3.bf16.msra.mxu1 %v13435_v42  ;;  %v4942_v42 = vld [vmem:[#allocation7 + $0x1fe8] sm:$0xff] }
0x1ebd   :  { %13469 = vmatprep.subr.bf16.mxu1 %v14755_v0 }
0x1f52   :  { %v4562_v44 = vpop.f32.mrb[44].mxu1 }
0x1f53   :  { %v4563_v45 = vadd.f32 %v9845_v43, %v4562_v44  ;;  %v12273_v46 = vpop.f32.mrb[45].mxu1  ;;  %v13461_v43 = vpack.c.bf16 %v4942_v42, %v4941_v41  ;;  %v4925_v44 = vld [vmem:[#allocation7 + $0x1f60] sm:$0xff]  ;;  %v5219_v41 = vld [vmem:[#allocation7 + $0x20f0] sm:$0xff]  ;;  %v5220_v42 = vld [vmem:[#allocation7 + $0x20f8] sm:$0xff] }
0x1f55   :  { %v4566_v47 = vmax.f32 %v4563_v45, 0.0  ;;  %v4926_v45 = vld [vmem:[#allocation7 + $0x1f68] sm:$0xff] }
0x1f56   :  { %v13463_v46 = vpack.c.bf16 %v4926_v45, %v4925_v44  ;;  %v13500_v44 = vpack.c.bf16 %v5220_v42, %v5219_v41  ;;  %v5203_v45 = vld [vmem:[#allocation7 + $0x2070] sm:$0xff]  ;;  %v5234_v41 = vld [vmem:[#allocation7 + $0x2168] sm:$0xff] }
0x1f57   :  { %4568 = vrot.lane.b32.xlu0 %v4566_v47, %s14763_s20  ;;  %v4943_v47 = vld [vmem:[#allocation7 + $0x1ff0] sm:$0xff] }
0x1f72   :  { %v10991_v49 = vpop.f32.mrb[46].mxu1 }
0x1f73   :  { %v10992_v50 = vpop.f32.mrb[47].mxu1 }
0x1f74   :  { %v10993_v51 = vadd.f32 %v10992_v50, %v10991_v49  ;;  %v4927_v49 = vld [vmem:[#allocation7 + $0x1f70] sm:$0xff] }
0x1fc9   :  { %v4569_v48 = vpop.permute.xlu0 %4568 }
0x1fca   :  { %4571 = vst.msk [vmem:[#allocation2 + $0x8] sm:$0xff] %vm2109_vm9, %v4569_v48  ;;  %v4944_v48 = vld [vmem:[#allocation7 + $0x1ff8] sm:$0xff] }
0x1fcb   :  { %v13465_v50 = vpack.c.bf16 %v4944_v48, %v4943_v47  ;;  %v5095_v48 = vld [vmem:[#allocation10 + $0xf0] sm:$0xff] }
0x1fd1   :  { %v15125_v59 = vld [vmem:[#allocation2 + $0x8] sm:$0xff] }
0x1fd2   :  { %4713 = vmatprep.mubr.f32.mxu0 %v15125_v59  ;;  %5017 = vmatprep.mubr.f32.mxu1 %v15125_v59 }
0x1fd3   :  { %4714 = vmatmul.mubr.f32.vlgmr.msra.gmra.mrb[40].mxu0 %v15129_v52  ;;  %5018 = vmatmul.mubr.f32.vlgmr.msra.gmra.mrb[48].mxu1 %v15129_v52 }
0x1fd4   :  { %12278 = vmatprep.mubr.msk.f32.mxu0 %vm14757_vm0, %v15118_v58  ;;  %12285 = vmatprep.mubr.msk.f32.mxu1 %vm14757_vm0, %v15118_v58 }
0x1fd5   :  { %13404 = vmatpush3.bf16.msra.mxu0 %v13403_v56 }
0x1fd6   :  { %13438 = vmatprep.subr.bf16.mxu0 %v13437_v60 }
0x20a6   :  { %v10956_v61 = vpop.f32.mrb[40].mxu0  ;;  %v11029_v62 = vpop.f32.mrb[48].mxu1 }
0x20a7   :  { %v10957_v2 = vpop.f32.mrb[41].mxu0  ;;  %v11030_v3 = vpop.f32.mrb[49].mxu1 }
0x20a8   :  { %v10958_v4 = vadd.f32 %v10957_v2, %v10956_v61  ;;  %v15137_v5 = vadd.f32 %v11030_v3, %v11029_v62  ;;  %v5189_v2 = vld [vmem:[#allocation7 + $0x2000] sm:$0xff]  ;;  %v5190_v3 = vld [vmem:[#allocation7 + $0x2008] sm:$0xff] }
0x20a9   :  { %v13474_v6 = vpack.c.bf16 %v5190_v3, %v5189_v2  ;;  %v5237_v2 = vld [vmem:[#allocation7 + $0x2180] sm:$0xff]  ;;  %v5238_v3 = vld [vmem:[#allocation7 + $0x2188] sm:$0xff] }
0x20aa   :  { %v4716_v54 = vadd.f32 %v10958_v4, %v9847_v63  ;;  %v5207_v4 = vld [vmem:[#allocation7 + $0x2090] sm:$0xff] }
0x20ac   :  { %v4786_v10 = vadd.f32 %v10993_v51, %v4716_v54  ;;  %v4928_v51 = vld [vmem:[#allocation7 + $0x1f78] sm:$0xff] }
0x20ad   :  { %v13467_v56 = vpack.c.bf16 %v4928_v51, %v4927_v49  ;;  %v5208_v54 = vld [vmem:[#allocation7 + $0x2098] sm:$0xff]  ;;  %v9850_v51 = vld [vmem:[#allocation8 + $0xf] ss:$0 sm:$0xff] }
0x20ae   :  { %v4789_v12 = vmax.f32 %v4786_v10, 0.0  ;;  %v13476_v7 = vpack.c.bf16 %v5208_v54, %v5207_v4  ;;  %v5096_v49 = vld [vmem:[#allocation10 + $0xf8] sm:$0xff]  ;;  %v5221_v4 = vld [vmem:[#allocation7 + $0x2100] sm:$0xff]  ;;  %v13504_v54 = vpack.c.bf16 %v5238_v3, %v5237_v2 }
0x20af   :  { %v5515_v2 = vld [vmem:[#allocation7 + $0x2290] sm:$0xff]  ;;  %v5516_v3 = vld [vmem:[#allocation7 + $0x2298] sm:$0xff] }
0x20b0   :  { %12279 = vmatmul.mubr.msk.f32.vlgmr.msra.gmra.mrb[42].mxu0 %vm485_vm3, %v4789_v12  ;;  %v5210_v12 = vld [vmem:[#allocation7 + $0x20a8] sm:$0xff] }
0x20b1   :  { %13440 = vmatpush3.bf16.msra.mxu0 %v13439_v11  ;;  %5087 = vmatprep.mubr.f32.mxu0 %v15118_v58  ;;  %v5209_v11 = vld [vmem:[#allocation7 + $0x20a0] sm:$0xff] }
0x20b2   :  { %13442 = vmatprep.subr.bf16.mxu0 %v13441_v13  ;;  %v13478_v13 = vpack.c.bf16 %v5192_v9, %v5191_v8  ;;  %v13480_v18 = vpack.c.bf16 %v5210_v12, %v5209_v11  ;;  %v5240_v8 = vld [vmem:[#allocation7 + $0x2198] sm:$0xff]  ;;  %v5241_v12 = vld [vmem:[#allocation7 + $0x21a0] sm:$0xff] }
0x20b3   :  { %v5224_v11 = vld [vmem:[#allocation7 + $0x2118] sm:$0xff] }
0x20b5   :  { %13444 = vmatpush3.bf16.msra.mxu0 %v13443_v17  ;;  %v5212_v17 = vld [vmem:[#allocation7 + $0x20b8] sm:$0xff] }
0x20b6   :  { %13446 = vmatprep.subr.bf16.mxu0 %v13445_v19  ;;  %v13482_v19 = vpack.c.bf16 %v5194_v15, %v5193_v14  ;;  %v13484_v20 = vpack.c.bf16 %v5212_v17, %v5211_v16  ;;  %v5225_v15 = vld [vmem:[#allocation7 + $0x2120] sm:$0xff]  ;;  %v5226_v16 = vld [vmem:[#allocation7 + $0x2128] sm:$0xff]  ;;  %v5243_v17 = vld [vmem:[#allocation7 + $0x21b0] sm:$0xff] }
0x20b9   :  { %13448 = vmatpush3.bf16.msra.mxu0 %v13447_v30  ;;  %v5214_v30 = vld [vmem:[#allocation7 + $0x20c8] sm:$0xff] }
0x20ba   :  { %13450 = vmatprep.subr.bf16.mxu0 %v13449_v24  ;;  %v13486_v24 = vpack.c.bf16 %v5196_v22, %v5195_v21  ;;  %v13488_v25 = vpack.c.bf16 %v5214_v30, %v5213_v23  ;;  %v5227_v22 = vld [vmem:[#allocation7 + $0x2130] sm:$0xff]  ;;  %v5228_v23 = vld [vmem:[#allocation7 + $0x2138] sm:$0xff]  ;;  %v5245_v30 = vld [vmem:[#allocation7 + $0x21c0] sm:$0xff] }
0x20bd   :  { %13452 = vmatpush3.bf16.msra.mxu0 %v13451_v31  ;;  %v5216_v31 = vld [vmem:[#allocation7 + $0x20d8] sm:$0xff] }
0x20be   :  { %13454 = vmatprep.subr.bf16.mxu0 %v13453_v32  ;;  %v13490_v32 = vpack.c.bf16 %v5198_v28, %v5197_v26  ;;  %v13492_v33 = vpack.c.bf16 %v5216_v31, %v5215_v29  ;;  %v5229_v28 = vld [vmem:[#allocation7 + $0x2140] sm:$0xff]  ;;  %v5230_v29 = vld [vmem:[#allocation7 + $0x2148] sm:$0xff]  ;;  %v5247_v31 = vld [vmem:[#allocation7 + $0x21d0] sm:$0xff] }
0x20c1   :  { %13456 = vmatpush3.bf16.msra.mxu0 %v13455_v35  ;;  %v5200_v35 = vld [vmem:[#allocation7 + $0x2058] sm:$0xff] }
0x20c2   :  { %13458 = vmatprep.subr.bf16.mxu0 %v13457_v38  ;;  %v13494_v38 = vpack.c.bf16 %v5200_v35, %v5199_v34  ;;  %v5231_v35 = vld [vmem:[#allocation7 + $0x2150] sm:$0xff] }
0x20c5   :  { %13460 = vmatpush3.bf16.msra.mxu0 %v13459_v27  ;;  %v5202_v27 = vld [vmem:[#allocation7 + $0x2068] sm:$0xff] }
0x20c6   :  { %13462 = vmatprep.subr.bf16.mxu0 %v13461_v43  ;;  %v13498_v43 = vpack.c.bf16 %v5202_v27, %v5201_v40  ;;  %v5233_v27 = vld [vmem:[#allocation7 + $0x2160] sm:$0xff] }
0x20c7   :  { %v13530_v42 = vpack.c.bf16 %v5234_v41, %v5233_v27 }
0x20c9   :  { %13464 = vmatpush3.bf16.msra.mxu0 %v13463_v46  ;;  %v5204_v46 = vld [vmem:[#allocation7 + $0x2078] sm:$0xff] }
0x20ca   :  { %13466 = vmatprep.subr.bf16.mxu0 %v13465_v50  ;;  %v13502_v47 = vpack.c.bf16 %v5204_v46, %v5203_v45  ;;  %v13470_v50 = vpack.c.bf16 %v5096_v49, %v5095_v48  ;;  %v5235_v45 = vld [vmem:[#allocation7 + $0x2170] sm:$0xff]  ;;  %v5513_v48 = vld [vmem:[#allocation7 + $0x2280] sm:$0xff]  ;;  %v5514_v49 = vld [vmem:[#allocation7 + $0x2288] sm:$0xff] }
0x20cc   :  { %13471 = vmatpush3.bf16.msra.mxu1 %v13470_v50 }
0x20cd   :  { %13468 = vmatpush3.bf16.msra.mxu0 %v13467_v56  ;;  %v5020_v56 = vadd.f32 %v15137_v5, %v9850_v51  ;;  %13505 = vmatprep.subr.bf16.mxu1 %v13504_v54  ;;  %v13539_v51 = vpack.c.bf16 %v5514_v49, %v5513_v48  ;;  %v13543_v54 = vpack.c.bf16 %v5516_v3, %v5515_v2  ;;  %v9853_v48 = vld [vmem:[#allocation8 + $0x10] ss:$0 sm:$0xff]  ;;  %v5529_v2 = vld [vmem:[#allocation7 + $0x2300] sm:$0xff] }
0x20ce   :  { %13473 = vmatprep.subr.bf16.mxu0 %v13472_v57 }
0x2183   :  { %v4870_v60 = vpop.f32.mrb[42].mxu0 }
0x2184   :  { %v4871_v61 = vadd.f32 %v9848_v1, %v4870_v60  ;;  %v12280_v62 = vpop.f32.mrb[43].mxu0 }
0x2186   :  { %v4874_v63 = vmax.f32 %v4871_v61, 0.0 }
0x2188   :  { %4875 = vst.msk [vmem:[#allocation2 + $0x10] sm:$0xff] %vm485_vm3, %v4874_v63 }
0x218f   :  { %v4878_v10 = vld [vmem:[#allocation2 + $0x10] sm:$0xff] }
0x2190   :  { %5088 = vmatmul.mubr.f32.vlgmr.msra.gmra.mrb[44].mxu0 %v4878_v10  ;;  %v5223_v10 = vld [vmem:[#allocation7 + $0x2110] sm:$0xff] }
0x2191   :  { %13475 = vmatpush3.bf16.msra.mxu0 %v13474_v6  ;;  %5325 = vmatprep.mubr.f32.mxu0 %v15125_v59  ;;  %v5222_v6 = vld [vmem:[#allocation7 + $0x2108] sm:$0xff] }
0x2192   :  { %13477 = vmatprep.subr.bf16.mxu0 %v13476_v7  ;;  %v5239_v7 = vld [vmem:[#allocation7 + $0x2190] sm:$0xff]  ;;  %v13506_v9 = vpack.c.bf16 %v5222_v6, %v5221_v4 }
0x2193   :  { %v13508_v5 = vpack.c.bf16 %v5240_v8, %v5239_v7  ;;  %v5499_v6 = vld [vmem:[#allocation7 + $0x2210] sm:$0xff]  ;;  %v5500_v7 = vld [vmem:[#allocation7 + $0x2218] sm:$0xff] }
0x2195   :  { %13479 = vmatpush3.bf16.msra.mxu0 %v13478_v13  ;;  %v5242_v13 = vld [vmem:[#allocation7 + $0x21a8] sm:$0xff] }
0x2196   :  { %13481 = vmatprep.subr.bf16.mxu0 %v13480_v18  ;;  %v13510_v18 = vpack.c.bf16 %v5224_v11, %v5223_v10  ;;  %v13512_v14 = vpack.c.bf16 %v5242_v13, %v5241_v12  ;;  %v13545_v10 = vpack.c.bf16 %v5500_v7, %v5499_v6  ;;  %v5501_v12 = vld [vmem:[#allocation7 + $0x2220] sm:$0xff]  ;;  %v5502_v13 = vld [vmem:[#allocation7 + $0x2228] sm:$0xff]  ;;  %v5548_v6 = vld [vmem:[#allocation7 + $0x2398] sm:$0xff] }
0x2199   :  { %13483 = vmatpush3.bf16.msra.mxu0 %v13482_v19  ;;  %v5244_v19 = vld [vmem:[#allocation7 + $0x21b8] sm:$0xff] }
0x219a   :  { %13485 = vmatprep.subr.bf16.mxu0 %v13484_v20  ;;  %v13514_v20 = vpack.c.bf16 %v5226_v16, %v5225_v15  ;;  %v13516_v21 = vpack.c.bf16 %v5244_v19, %v5243_v17  ;;  %v13549_v15 = vpack.c.bf16 %v5502_v13, %v5501_v12  ;;  %v5503_v17 = vld [vmem:[#allocation7 + $0x2230] sm:$0xff]  ;;  %v5504_v19 = vld [vmem:[#allocation7 + $0x2238] sm:$0xff]  ;;  %v5533_v12 = vld [vmem:[#allocation7 + $0x2320] sm:$0xff] }
0x219b   :  { %v5534_v13 = vld [vmem:[#allocation7 + $0x2328] sm:$0xff] }
0x219d   :  { %13487 = vmatpush3.bf16.msra.mxu0 %v13486_v24  ;;  %v5246_v24 = vld [vmem:[#allocation7 + $0x21c8] sm:$0xff] }
0x219e   :  { %13489 = vmatprep.subr.bf16.mxu0 %v13488_v25  ;;  %v13518_v25 = vpack.c.bf16 %v5228_v23, %v5227_v22  ;;  %v13520_v26 = vpack.c.bf16 %v5246_v24, %v5245_v30  ;;  %v13553_v22 = vpack.c.bf16 %v5504_v19, %v5503_v17  ;;  %v5505_v30 = vld [vmem:[#allocation7 + $0x2240] sm:$0xff]  ;;  %v5506_v24 = vld [vmem:[#allocation7 + $0x2248] sm:$0xff]  ;;  %v5535_v17 = vld [vmem:[#allocation7 + $0x2330] sm:$0xff] }
0x219f   :  { %v5536_v19 = vld [vmem:[#allocation7 + $0x2338] sm:$0xff] }
0x21a1   :  { %13491 = vmatpush3.bf16.msra.mxu0 %v13490_v32  ;;  %v5248_v32 = vld [vmem:[#allocation7 + $0x21d8] sm:$0xff] }
0x21a2   :  { %13493 = vmatprep.subr.bf16.mxu0 %v13492_v33  ;;  %v13522_v33 = vpack.c.bf16 %v5230_v29, %v5229_v28  ;;  %v13524_v34 = vpack.c.bf16 %v5248_v32, %v5247_v31  ;;  %v13557_v28 = vpack.c.bf16 %v5506_v24, %v5505_v30  ;;  %v5507_v31 = vld [vmem:[#allocation7 + $0x2250] sm:$0xff]  ;;  %v5508_v32 = vld [vmem:[#allocation7 + $0x2258] sm:$0xff]  ;;  %v5537_v30 = vld [vmem:[#allocation7 + $0x2340] sm:$0xff] }
0x21a3   :  { %v5538_v24 = vld [vmem:[#allocation7 + $0x2348] sm:$0xff] }
0x21a5   :  { %13495 = vmatpush3.bf16.msra.mxu0 %v13494_v38  ;;  %v5250_v38 = vld [vmem:[#allocation7 + $0x21e8] sm:$0xff] }
0x21a6   :  { %13497 = vmatprep.subr.bf16.mxu0 %v13496_v39  ;;  %v13526_v39 = vpack.c.bf16 %v5232_v36, %v5231_v35  ;;  %v13528_v40 = vpack.c.bf16 %v5250_v38, %v5249_v37  ;;  %v13561_v35 = vpack.c.bf16 %v5508_v32, %v5507_v31  ;;  %v5509_v37 = vld [vmem:[#allocation7 + $0x2260] sm:$0xff]  ;;  %v5510_v38 = vld [vmem:[#allocation7 + $0x2268] sm:$0xff]  ;;  %v5539_v31 = vld [vmem:[#allocation7 + $0x2350] sm:$0xff] }
0x21a7   :  { %v13565_v27 = vpack.c.bf16 %v5510_v38, %v5509_v37  ;;  %v5540_v32 = vld [vmem:[#allocation7 + $0x2358] sm:$0xff]  ;;  %v5541_v37 = vld [vmem:[#allocation7 + $0x2360] sm:$0xff]  ;;  %v5542_v38 = vld [vmem:[#allocation7 + $0x2368] sm:$0xff] }
0x21a9   :  { %13499 = vmatpush3.bf16.msra.mxu0 %v13498_v43  ;;  %v5251_v43 = vld [vmem:[#allocation7 + $0x21f0] sm:$0xff] }
0x21aa   :  { %13501 = vmatprep.subr.bf16.mxu0 %v13500_v44  ;;  %v5252_v44 = vld [vmem:[#allocation7 + $0x21f8] sm:$0xff] }
0x21ab   :  { %v13532_v46 = vpack.c.bf16 %v5252_v44, %v5251_v43  ;;  %v5512_v43 = vld [vmem:[#allocation7 + $0x2278] sm:$0xff] }
0x21ad   :  { %13503 = vmatpush3.bf16.msra.mxu0 %v13502_v47  ;;  %v5236_v47 = vld [vmem:[#allocation7 + $0x2178] sm:$0xff] }
0x21ae   :  { %13536 = vmatprep.subr.bf16.mxu0 %v14755_v0  ;;  %v13534_v50 = vpack.c.bf16 %v5236_v47, %v5235_v45  ;;  %v5403_v45 = vld [vmem:[#allocation10 + $0x100] sm:$0xff] }
0x21b0   :  { %5326 = vmatmul.mubr.f32.vlgmr.msra.gmra.mrb[46].mxu0 %v15129_v52 }
0x21b1   :  { %12292 = vmatprep.mubr.msk.f32.mxu0 %vm14757_vm0, %v15118_v58 }
0x2263   :  { %v11064_v53 = vpop.f32.mrb[44].mxu0 }
0x2264   :  { %v11065_v55 = vpop.f32.mrb[45].mxu0 }
0x2265   :  { %v11066_v57 = vadd.f32 %v11065_v55, %v11064_v53  ;;  %v9851_v53 = vld [vmem:[#allocation11 + $0xf] ss:$0 sm:$0xff] }
0x2267   :  { %v5090_v1 = vadd.f32 %v11066_v57, %v5020_v56 }
0x2269   :  { %v5093_v60 = vmax.f32 %v5090_v1, 0.0 }
0x226b   :  { %12286 = vmatmul.mubr.msk.f32.vlgmr.msra.gmra.mrb[50].mxu1 %vm485_vm3, %v5093_v60 }
0x226c   :  { %5395 = vmatprep.mubr.f32.mxu1 %v15118_v58  ;;  %13507 = vmatpush3.bf16.msra.mxu1 %v13506_v9  ;;  %v5517_v9 = vld [vmem:[#allocation7 + $0x22a0] sm:$0xff] }
0x226d   :  { %13509 = vmatprep.subr.bf16.mxu1 %v13508_v5  ;;  %v5518_v5 = vld [vmem:[#allocation7 + $0x22a8] sm:$0xff] }
0x226e   :  { %v13547_v11 = vpack.c.bf16 %v5518_v5, %v5517_v9  ;;  %v5532_v9 = vld [vmem:[#allocation7 + $0x2318] sm:$0xff]  ;;  %v5549_v5 = vld [vmem:[#allocation7 + $0x23a0] sm:$0xff] }
0x2270   :  { %13511 = vmatpush3.bf16.msra.mxu1 %v13510_v18  ;;  %v5519_v18 = vld [vmem:[#allocation7 + $0x22b0] sm:$0xff] }
0x2271   :  { %13513 = vmatprep.subr.bf16.mxu1 %v13512_v14  ;;  %v5520_v14 = vld [vmem:[#allocation7 + $0x22b8] sm:$0xff] }
0x2272   :  { %v13551_v16 = vpack.c.bf16 %v5520_v14, %v5519_v18  ;;  %v5551_v18 = vld [vmem:[#allocation7 + $0x23b0] sm:$0xff]  ;;  %v5552_v14 = vld [vmem:[#allocation7 + $0x23b8] sm:$0xff] }
0x2274   :  { %13515 = vmatpush3.bf16.msra.mxu1 %v13514_v20  ;;  %v5521_v20 = vld [vmem:[#allocation7 + $0x22c0] sm:$0xff] }
0x2275   :  { %13517 = vmatprep.subr.bf16.mxu1 %v13516_v21  ;;  %v5522_v21 = vld [vmem:[#allocation7 + $0x22c8] sm:$0xff] }
0x2276   :  { %v13555_v23 = vpack.c.bf16 %v5522_v21, %v5521_v20  ;;  %v5553_v20 = vld [vmem:[#allocation7 + $0x23c0] sm:$0xff]  ;;  %v5554_v21 = vld [vmem:[#allocation7 + $0x23c8] sm:$0xff] }
0x2278   :  { %13519 = vmatpush3.bf16.msra.mxu1 %v13518_v25  ;;  %v5523_v25 = vld [vmem:[#allocation7 + $0x22d0] sm:$0xff] }
0x2279   :  { %13521 = vmatprep.subr.bf16.mxu1 %v13520_v26  ;;  %v5524_v26 = vld [vmem:[#allocation7 + $0x22d8] sm:$0xff] }
0x227a   :  { %v13559_v29 = vpack.c.bf16 %v5524_v26, %v5523_v25  ;;  %v5555_v25 = vld [vmem:[#allocation7 + $0x23d0] sm:$0xff]  ;;  %v5556_v26 = vld [vmem:[#allocation7 + $0x23d8] sm:$0xff] }
0x227c   :  { %13523 = vmatpush3.bf16.msra.mxu1 %v13522_v33  ;;  %v5525_v33 = vld [vmem:[#allocation7 + $0x22e0] sm:$0xff] }
0x227d   :  { %13525 = vmatprep.subr.bf16.mxu1 %v13524_v34  ;;  %v5526_v34 = vld [vmem:[#allocation7 + $0x22e8] sm:$0xff] }
0x227e   :  { %v13563_v36 = vpack.c.bf16 %v5526_v34, %v5525_v33  ;;  %v5557_v33 = vld [vmem:[#allocation7 + $0x23e0] sm:$0xff]  ;;  %v5558_v34 = vld [vmem:[#allocation7 + $0x23e8] sm:$0xff] }
0x2280   :  { %13527 = vmatpush3.bf16.msra.mxu1 %v13526_v39  ;;  %v5527_v39 = vld [vmem:[#allocation7 + $0x22f0] sm:$0xff] }
0x2281   :  { %13529 = vmatprep.subr.bf16.mxu1 %v13528_v40  ;;  %v5528_v40 = vld [vmem:[#allocation7 + $0x22f8] sm:$0xff] }
0x2282   :  { %v13567_v41 = vpack.c.bf16 %v5528_v40, %v5527_v39  ;;  %v13597_v39 = vpack.c.bf16 %v5542_v38, %v5541_v37  ;;  %v5559_v40 = vld [vmem:[#allocation7 + $0x23f0] sm:$0xff]  ;;  %v5820_v38 = vld [vmem:[#allocation7 + $0x2478] sm:$0xff] }
0x2283   :  { %v11102_v61 = vpop.f32.mrb[46].mxu0  ;;  %v5819_v37 = vld [vmem:[#allocation7 + $0x2470] sm:$0xff] }
0x2284   :  { %v11103_v62 = vpop.f32.mrb[47].mxu0  ;;  %13531 = vmatpush3.bf16.msra.mxu1 %v13530_v42  ;;  %v5511_v42 = vld [vmem:[#allocation7 + $0x2270] sm:$0xff] }
0x2285   :  { %v15150_v63 = vadd.f32 %v11103_v62, %v11102_v61  ;;  %13533 = vmatprep.subr.bf16.mxu1 %v13532_v46  ;;  %v5497_v61 = vld [vmem:[#allocation7 + $0x2200] sm:$0xff]  ;;  %v5498_v62 = vld [vmem:[#allocation7 + $0x2208] sm:$0xff]  ;;  %v13569_v44 = vpack.c.bf16 %v5512_v43, %v5511_v42  ;;  %v5544_v43 = vld [vmem:[#allocation7 + $0x2378] sm:$0xff] }
0x2286   :  { %v13541_v4 = vpack.c.bf16 %v5498_v62, %v5497_v61  ;;  %v5404_v46 = vld [vmem:[#allocation10 + $0x108] sm:$0xff] }
0x2287   :  { %v13537_v47 = vpack.c.bf16 %v5404_v46, %v5403_v45  ;;  %v5545_v61 = vld [vmem:[#allocation7 + $0x2380] sm:$0xff]  ;;  %v5546_v62 = vld [vmem:[#allocation7 + $0x2388] sm:$0xff] }
0x2288   :  { %13535 = vmatpush3.bf16.msra.mxu1 %v13534_v50  ;;  %v13571_v3 = vpack.c.bf16 %v5546_v62, %v5545_v61  ;;  %v5822_v45 = vld [vmem:[#allocation7 + $0x2488] sm:$0xff]  ;;  %v5824_v61 = vld [vmem:[#allocation7 + $0x2498] sm:$0xff] }
0x2289   :  { %13540 = vmatprep.subr.bf16.mxu1 %v13539_v51  ;;  %13538 = vmatpush3.bf16.msra.mxu0 %v13537_v47  ;;  %v5328_v51 = vadd.f32 %v15150_v63, %v9853_v48  ;;  %v9854_v48 = vld [vmem:[#allocation11 + $0x10] ss:$0 sm:$0xff] }
0x228a   :  { %13572 = vmatprep.subr.bf16.mxu0 %v13571_v3  ;;  %v5807_v3 = vld [vmem:[#allocation7 + $0x2410] sm:$0xff] }
0x233e   :  { %v5174_v55 = vpop.f32.mrb[50].mxu1 }
0x233f   :  { %v5175_v56 = vadd.f32 %v9851_v53, %v5174_v55  ;;  %v12287_v57 = vpop.f32.mrb[51].mxu1 }
0x2341   :  { %v5178_v1 = vmax.f32 %v5175_v56, 0.0 }
0x2343   :  { %5180 = vrot.lane.b32.xlu1 %v5178_v1, %s14743_s2 }
0x23b5   :  { %v5181_v60 = vpop.permute.xlu1 %5180 }
0x23b6   :  { %5183 = vst.msk [vmem:[#allocation2 + $0x10] sm:$0xff] %vm2722_vm10, %v5181_v60 }
0x23bd   :  { %v5186_v8 = vld [vmem:[#allocation2 + $0x10] sm:$0xff] }
0x23be   :  { %5396 = vmatmul.mubr.f32.vlgmr.msra.gmra.mrb[52].mxu1 %v5186_v8  ;;  %v5531_v8 = vld [vmem:[#allocation7 + $0x2310] sm:$0xff] }
0x23bf   :  { %13542 = vmatpush3.bf16.msra.mxu1 %v13541_v4  ;;  %5633 = vmatprep.mubr.f32.mxu1 %v15125_v59  ;;  %v5530_v4 = vld [vmem:[#allocation7 + $0x2308] sm:$0xff] }
0x23c0   :  { %13544 = vmatprep.subr.bf16.mxu1 %v13543_v54  ;;  %v5547_v54 = vld [vmem:[#allocation7 + $0x2390] sm:$0xff]  ;;  %v13573_v7 = vpack.c.bf16 %v5530_v4, %v5529_v2  ;;  %v5808_v4 = vld [vmem:[#allocation7 + $0x2418] sm:$0xff] }
0x23c1   :  { %v13575_v63 = vpack.c.bf16 %v5548_v6, %v5547_v54  ;;  %v5825_v6 = vld [vmem:[#allocation7 + $0x24a0] sm:$0xff] }
0x23c3   :  { %13546 = vmatpush3.bf16.msra.mxu1 %v13545_v10  ;;  %v5550_v10 = vld [vmem:[#allocation7 + $0x23a8] sm:$0xff] }
0x23c4   :  { %13548 = vmatprep.subr.bf16.mxu1 %v13547_v11  ;;  %v13579_v11 = vpack.c.bf16 %v5550_v10, %v5549_v5  ;;  %v5810_v5 = vld [vmem:[#allocation7 + $0x2428] sm:$0xff]  ;;  %v5827_v10 = vld [vmem:[#allocation7 + $0x24b0] sm:$0xff] }
0x23c7   :  { %13550 = vmatpush3.bf16.msra.mxu1 %v13549_v15  ;;  %v13581_v15 = vpack.c.bf16 %v5534_v13, %v5533_v12  ;;  %v5811_v13 = vld [vmem:[#allocation7 + $0x2430] sm:$0xff] }
0x23c8   :  { %13552 = vmatprep.subr.bf16.mxu1 %v13551_v16  ;;  %v13583_v16 = vpack.c.bf16 %v5552_v14, %v5551_v18  ;;  %v5812_v18 = vld [vmem:[#allocation7 + $0x2438] sm:$0xff]  ;;  %v5829_v14 = vld [vmem:[#allocation7 + $0x24c0] sm:$0xff] }
0x23cb   :  { %13554 = vmatpush3.bf16.msra.mxu1 %v13553_v22  ;;  %v13585_v22 = vpack.c.bf16 %v5536_v19, %v5535_v17  ;;  %v5814_v19 = vld [vmem:[#allocation7 + $0x2448] sm:$0xff] }
0x23cc   :  { %13556 = vmatprep.subr.bf16.mxu1 %v13555_v23  ;;  %v13587_v23 = vpack.c.bf16 %v5554_v21, %v5553_v20  ;;  %v5831_v20 = vld [vmem:[#allocation7 + $0x24d0] sm:$0xff]  ;;  %v5832_v21 = vld [vmem:[#allocation7 + $0x24d8] sm:$0xff] }
0x23cf   :  { %13558 = vmatpush3.bf16.msra.mxu1 %v13557_v28  ;;  %v13589_v28 = vpack.c.bf16 %v5538_v24, %v5537_v30  ;;  %v5815_v30 = vld [vmem:[#allocation7 + $0x2450] sm:$0xff]  ;;  %v5816_v24 = vld [vmem:[#allocation7 + $0x2458] sm:$0xff] }
0x23d0   :  { %13560 = vmatprep.subr.bf16.mxu1 %v13559_v29  ;;  %v13591_v29 = vpack.c.bf16 %v5556_v26, %v5555_v25  ;;  %v5833_v25 = vld [vmem:[#allocation7 + $0x24e0] sm:$0xff]  ;;  %v5834_v26 = vld [vmem:[#allocation7 + $0x24e8] sm:$0xff] }
0x23d3   :  { %13562 = vmatpush3.bf16.msra.mxu1 %v13561_v35  ;;  %v13593_v35 = vpack.c.bf16 %v5540_v32, %v5539_v31  ;;  %v5817_v31 = vld [vmem:[#allocation7 + $0x2460] sm:$0xff]  ;;  %v5818_v32 = vld [vmem:[#allocation7 + $0x2468] sm:$0xff] }
0x23d4   :  { %13564 = vmatprep.subr.bf16.mxu1 %v13563_v36  ;;  %v13595_v36 = vpack.c.bf16 %v5558_v34, %v5557_v33  ;;  %v5835_v33 = vld [vmem:[#allocation7 + $0x24f0] sm:$0xff]  ;;  %v5836_v34 = vld [vmem:[#allocation7 + $0x24f8] sm:$0xff] }
0x23d7   :  { %13566 = vmatpush3.bf16.msra.mxu1 %v13565_v27  ;;  %v5560_v27 = vld [vmem:[#allocation7 + $0x23f8] sm:$0xff] }
0x23d8   :  { %13568 = vmatprep.subr.bf16.mxu1 %v13567_v41  ;;  %v5543_v41 = vld [vmem:[#allocation7 + $0x2370] sm:$0xff]  ;;  %v13599_v42 = vpack.c.bf16 %v5560_v27, %v5559_v40  ;;  %v15169_v40 = vld [vmem:[#allocation2 + $0x18] sm:$0xff] }
0x23d9   :  { %v13601_v46 = vpack.c.bf16 %v5544_v43, %v5543_v41  ;;  %v5711_v27 = vld [vmem:[#allocation10 + $0x110] sm:$0xff]  ;;  %v5712_v41 = vld [vmem:[#allocation10 + $0x118] sm:$0xff] }
0x23da   :  { %v9856_v43 = vld [vmem:[#allocation8 + $0x11] ss:$0 sm:$0xff] }
0x23db   :  { %13570 = vmatpush3.bf16.msra.mxu1 %v13569_v44  ;;  %v5821_v44 = vld [vmem:[#allocation7 + $0x2480] sm:$0xff] }
0x23dc   :  { %13603 = vmatprep.subr.bf16.mxu1 %v14755_v0  ;;  %v13606_v47 = vpack.c.bf16 %v5822_v45, %v5821_v44 }
0x23de   :  { %5634 = vmatmul.mubr.f32.vlgmr.msra.gmra.mrb[54].mxu1 %v15129_v52 }
0x23df   :  { %12299 = vmatprep.mubr.msk.f32.mxu1 %vm14757_vm0, %v15118_v58 }
0x2491   :  { %v11137_v49 = vpop.f32.mrb[52].mxu1 }
0x2492   :  { %v11138_v50 = vpop.f32.mrb[53].mxu1 }
0x2493   :  { %v11139_v53 = vadd.f32 %v11138_v50, %v11137_v49 }
0x2495   :  { %v5398_v55 = vadd.f32 %v11139_v53, %v5328_v51 }
0x2497   :  { %v5401_v56 = vmax.f32 %v5398_v55, 0.0 }
0x2499   :  { %12293 = vmatmul.mubr.msk.f32.vlgmr.msra.gmra.mrb[48].mxu0 %vm485_vm3, %v5401_v56  ;;  %v5805_v56 = vld [vmem:[#allocation7 + $0x2400] sm:$0xff] }
0x249a   :  { %5703 = vmatprep.mubr.f32.mxu0 %v15118_v58  ;;  %13574 = vmatpush3.bf16.msra.mxu0 %v13573_v7  ;;  %v13577_v58 = vpack.c.bf16 %v5532_v9, %v5531_v8  ;;  %v5826_v7 = vld [vmem:[#allocation7 + $0x24a8] sm:$0xff]  ;;  %v5809_v9 = vld [vmem:[#allocation7 + $0x2420] sm:$0xff] }
0x249b   :  { %13576 = vmatprep.subr.bf16.mxu0 %v13575_v63  ;;  %v13612_v63 = vpack.c.bf16 %v5808_v4, %v5807_v3  ;;  %v13614_v8 = vpack.c.bf16 %v5826_v7, %v5825_v6  ;;  %v5839_v3 = vld [vmem:[#allocation7 + $0x2510] sm:$0xff]  ;;  %v5840_v4 = vld [vmem:[#allocation7 + $0x2518] sm:$0xff]  ;;  %v5858_v6 = vld [vmem:[#allocation7 + $0x25a8] sm:$0xff] }
0x249c   :  { %v13644_v7 = vpack.c.bf16 %v5840_v4, %v5839_v3  ;;  %v6117_v4 = vld [vmem:[#allocation7 + $0x2620] sm:$0xff] }
0x249e   :  { %13578 = vmatpush3.bf16.msra.mxu0 %v13577_v58  ;;  %v5828_v58 = vld [vmem:[#allocation7 + $0x24b8] sm:$0xff] }
0x249f   :  { %13580 = vmatprep.subr.bf16.mxu0 %v13579_v11  ;;  %v13616_v11 = vpack.c.bf16 %v5810_v5, %v5809_v9  ;;  %v13618_v12 = vpack.c.bf16 %v5828_v58, %v5827_v10  ;;  %v5842_v9 = vld [vmem:[#allocation7 + $0x2528] sm:$0xff]  ;;  %v5859_v5 = vld [vmem:[#allocation7 + $0x25b0] sm:$0xff]  ;;  %v5860_v10 = vld [vmem:[#allocation7 + $0x25b8] sm:$0xff] }
0x24a2   :  { %13582 = vmatpush3.bf16.msra.mxu0 %v13581_v15  ;;  %v5830_v15 = vld [vmem:[#allocation7 + $0x24c8] sm:$0xff] }
0x24a3   :  { %13584 = vmatprep.subr.bf16.mxu0 %v13583_v16  ;;  %v13620_v16 = vpack.c.bf16 %v5812_v18, %v5811_v13  ;;  %v13622_v17 = vpack.c.bf16 %v5830_v15, %v5829_v14  ;;  %v5844_v13 = vld [vmem:[#allocation7 + $0x2538] sm:$0xff]  ;;  %v5861_v18 = vld [vmem:[#allocation7 + $0x25c0] sm:$0xff]  ;;  %v5862_v14 = vld [vmem:[#allocation7 + $0x25c8] sm:$0xff] }
0x24a6   :  { %13586 = vmatpush3.bf16.msra.mxu0 %v13585_v22 }
0x24a7   :  { %13588 = vmatprep.subr.bf16.mxu0 %v13587_v23  ;;  %v13626_v23 = vpack.c.bf16 %v5832_v21, %v5831_v20  ;;  %v5864_v20 = vld [vmem:[#allocation7 + $0x25d8] sm:$0xff] }
0x24aa   :  { %13590 = vmatpush3.bf16.msra.mxu0 %v13589_v28  ;;  %v13628_v28 = vpack.c.bf16 %v5816_v24, %v5815_v30  ;;  %v5848_v30 = vld [vmem:[#allocation7 + $0x2558] sm:$0xff]  ;;  %v5865_v24 = vld [vmem:[#allocation7 + $0x25e0] sm:$0xff] }
0x24ab   :  { %13592 = vmatprep.subr.bf16.mxu0 %v13591_v29  ;;  %v13630_v29 = vpack.c.bf16 %v5834_v26, %v5833_v25  ;;  %v5866_v25 = vld [vmem:[#allocation7 + $0x25e8] sm:$0xff] }
0x24ae   :  { %13594 = vmatpush3.bf16.msra.mxu0 %v13593_v35  ;;  %v13632_v35 = vpack.c.bf16 %v5818_v32, %v5817_v31  ;;  %v5850_v31 = vld [vmem:[#allocation7 + $0x2568] sm:$0xff] }
0x24af   :  { %13596 = vmatprep.subr.bf16.mxu0 %v13595_v36  ;;  %v13634_v36 = vpack.c.bf16 %v5836_v34, %v5835_v33  ;;  %v5867_v33 = vld [vmem:[#allocation7 + $0x25f0] sm:$0xff]  ;;  %v5868_v34 = vld [vmem:[#allocation7 + $0x25f8] sm:$0xff] }
0x24b1   :  { %v11175_v57 = vpop.f32.mrb[54].mxu1 }
0x24b2   :  { %v11176_v1 = vpop.f32.mrb[55].mxu1  ;;  %13598 = vmatpush3.bf16.msra.mxu0 %v13597_v39  ;;  %v13636_v39 = vpack.c.bf16 %v5820_v38, %v5819_v37  ;;  %v5852_v37 = vld [vmem:[#allocation7 + $0x2578] sm:$0xff]  ;;  %v6129_v38 = vld [vmem:[#allocation7 + $0x2680] sm:$0xff] }
0x24b3   :  { %v15162_v60 = vadd.f32 %v11176_v1, %v11175_v57  ;;  %13600 = vmatprep.subr.bf16.mxu0 %v13599_v42  ;;  %v5806_v57 = vld [vmem:[#allocation7 + $0x2408] sm:$0xff]  ;;  %v5823_v1 = vld [vmem:[#allocation7 + $0x2490] sm:$0xff]  ;;  %v13604_v42 = vpack.c.bf16 %v5712_v41, %v5711_v27 }
0x24b4   :  { %v13608_v62 = vpack.c.bf16 %v5806_v57, %v5805_v56  ;;  %v13610_v2 = vpack.c.bf16 %v5824_v61, %v5823_v1  ;;  %v5837_v56 = vld [vmem:[#allocation7 + $0x2500] sm:$0xff]  ;;  %v5838_v1 = vld [vmem:[#allocation7 + $0x2508] sm:$0xff]  ;;  %v5855_v61 = vld [vmem:[#allocation7 + $0x2590] sm:$0xff] }
0x24b5   :  { %13605 = vmatpush3.bf16.msra.mxu1 %v13604_v42  ;;  %v9857_v42 = vld [vmem:[#allocation11 + $0x11] ss:$0 sm:$0xff] }
0x24b6   :  { %13602 = vmatpush3.bf16.msra.mxu0 %v13601_v46  ;;  %v5636_v46 = vadd.f32 %v15162_v60, %v9856_v43 }
0x24b7   :  { %13607 = vmatprep.subr.bf16.mxu0 %v13606_v47 }
0x256c   :  { %v5482_v49 = vpop.f32.mrb[48].mxu0 }
0x256d   :  { %v5483_v50 = vadd.f32 %v9854_v48, %v5482_v49  ;;  %v12294_v51 = vpop.f32.mrb[49].mxu0 }
0x256f   :  { %v5486_v53 = vmax.f32 %v5483_v50, 0.0 }
0x2571   :  { %5488 = vrot.lane.b32.xlu0 %v5486_v53, %s14758_s0  ;;  %v5853_v53 = vld [vmem:[#allocation7 + $0x2580] sm:$0xff] }
0x25e3   :  { %v5489_v55 = vpop.permute.xlu0 %5488 }
0x25e4   :  { %5491 = vst.msk [vmem:[#allocation2 + $0x10] sm:$0xff] %vm564_vm4, %v5489_v55  ;;  %v5854_v55 = vld [vmem:[#allocation7 + $0x2588] sm:$0xff] }
0x25e5   :  { %v13638_v57 = vpack.c.bf16 %v5854_v55, %v5853_v53 }
0x25e7   :  { %13639 = vmatprep.subr.bf16.mxu1 %v13638_v57  ;;  %v6116_v57 = vld [vmem:[#allocation7 + $0x2618] sm:$0xff] }
0x25eb   :  { %v5494_v54 = vld [vmem:[#allocation2 + $0x10] sm:$0xff] }
0x25ec   :  { %5704 = vmatmul.mubr.f32.vlgmr.msra.gmra.mrb[50].mxu0 %v5494_v54  ;;  %v5857_v54 = vld [vmem:[#allocation7 + $0x25a0] sm:$0xff] }
0x25ed   :  { %13609 = vmatpush3.bf16.msra.mxu0 %v13608_v62  ;;  %5941 = vmatprep.mubr.f32.mxu0 %v15125_v59  ;;  %v5813_v59 = vld [vmem:[#allocation7 + $0x2440] sm:$0xff]  ;;  %v5856_v62 = vld [vmem:[#allocation7 + $0x2598] sm:$0xff] }
0x25ee   :  { %13611 = vmatprep.subr.bf16.mxu0 %v13610_v2  ;;  %v13624_v22 = vpack.c.bf16 %v5814_v19, %v5813_v59  ;;  %v13640_v2 = vpack.c.bf16 %v5838_v1, %v5837_v56  ;;  %v13642_v60 = vpack.c.bf16 %v5856_v62, %v5855_v61  ;;  %v5846_v59 = vld [vmem:[#allocation7 + $0x2548] sm:$0xff]  ;;  %v5863_v19 = vld [vmem:[#allocation7 + $0x25d0] sm:$0xff]  ;;  %v6133_v61 = vld [vmem:[#allocation7 + $0x26a0] sm:$0xff] }
0x25ef   :  { %v6115_v56 = vld [vmem:[#allocation7 + $0x2610] sm:$0xff]  ;;  %v6134_v62 = vld [vmem:[#allocation7 + $0x26a8] sm:$0xff] }
0x25f0   :  { %v13681_v3 = vpack.c.bf16 %v6134_v62, %v6133_v61  ;;  %v6148_v61 = vld [vmem:[#allocation7 + $0x2718] sm:$0xff]  ;;  %v6165_v62 = vld [vmem:[#allocation7 + $0x27a0] sm:$0xff] }
0x25f1   :  { %13613 = vmatpush3.bf16.msra.mxu0 %v13612_v63  ;;  %v13646_v63 = vpack.c.bf16 %v5858_v6, %v5857_v54  ;;  %v6118_v54 = vld [vmem:[#allocation7 + $0x2628] sm:$0xff]  ;;  %v6135_v6 = vld [vmem:[#allocation7 + $0x26b0] sm:$0xff] }
0x25f2   :  { %13615 = vmatprep.subr.bf16.mxu0 %v13614_v8  ;;  %v5841_v8 = vld [vmem:[#allocation7 + $0x2520] sm:$0xff] }
0x25f3   :  { %v13648_v58 = vpack.c.bf16 %v5842_v9, %v5841_v8  ;;  %v6119_v9 = vld [vmem:[#allocation7 + $0x2630] sm:$0xff] }
0x25f5   :  { %13617 = vmatpush3.bf16.msra.mxu0 %v13616_v11  ;;  %v13650_v11 = vpack.c.bf16 %v5860_v10, %v5859_v5  ;;  %v6120_v5 = vld [vmem:[#allocation7 + $0x2638] sm:$0xff]  ;;  %v6137_v10 = vld [vmem:[#allocation7 + $0x26c0] sm:$0xff] }
0x25f6   :  { %13619 = vmatprep.subr.bf16.mxu0 %v13618_v12  ;;  %v5843_v12 = vld [vmem:[#allocation7 + $0x2530] sm:$0xff] }
0x25f7   :  { %v13652_v15 = vpack.c.bf16 %v5844_v13, %v5843_v12  ;;  %v6121_v13 = vld [vmem:[#allocation7 + $0x2640] sm:$0xff] }
0x25f9   :  { %13621 = vmatpush3.bf16.msra.mxu0 %v13620_v16  ;;  %v13654_v16 = vpack.c.bf16 %v5862_v14, %v5861_v18  ;;  %v6122_v18 = vld [vmem:[#allocation7 + $0x2648] sm:$0xff]  ;;  %v6139_v14 = vld [vmem:[#allocation7 + $0x26d0] sm:$0xff] }
0x25fa   :  { %13623 = vmatprep.subr.bf16.mxu0 %v13622_v17  ;;  %v5845_v17 = vld [vmem:[#allocation7 + $0x2540] sm:$0xff] }
0x25fb   :  { %v13656_v21 = vpack.c.bf16 %v5846_v59, %v5845_v17  ;;  %v6123_v59 = vld [vmem:[#allocation7 + $0x2650] sm:$0xff] }
0x25fd   :  { %13625 = vmatpush3.bf16.msra.mxu0 %v13624_v22  ;;  %v13658_v22 = vpack.c.bf16 %v5864_v20, %v5863_v19  ;;  %v6124_v19 = vld [vmem:[#allocation7 + $0x2658] sm:$0xff]  ;;  %v6141_v20 = vld [vmem:[#allocation7 + $0x26e0] sm:$0xff] }
0x25fe   :  { %13627 = vmatprep.subr.bf16.mxu0 %v13626_v23  ;;  %v5847_v23 = vld [vmem:[#allocation7 + $0x2550] sm:$0xff] }
0x25ff   :  { %v13660_v26 = vpack.c.bf16 %v5848_v30, %v5847_v23  ;;  %v6125_v30 = vld [vmem:[#allocation7 + $0x2660] sm:$0xff] }
0x2601   :  { %13629 = vmatpush3.bf16.msra.mxu0 %v13628_v28  ;;  %v13662_v28 = vpack.c.bf16 %v5866_v25, %v5865_v24  ;;  %v6126_v24 = vld [vmem:[#allocation7 + $0x2668] sm:$0xff]  ;;  %v6143_v25 = vld [vmem:[#allocation7 + $0x26f0] sm:$0xff] }
0x2602   :  { %13631 = vmatprep.subr.bf16.mxu0 %v13630_v29  ;;  %v5849_v29 = vld [vmem:[#allocation7 + $0x2560] sm:$0xff] }
0x2603   :  { %v13664_v32 = vpack.c.bf16 %v5850_v31, %v5849_v29  ;;  %v6127_v31 = vld [vmem:[#allocation7 + $0x2670] sm:$0xff] }
0x2605   :  { %13633 = vmatpush3.bf16.msra.mxu0 %v13632_v35  ;;  %v5851_v35 = vld [vmem:[#allocation7 + $0x2570] sm:$0xff] }
0x2606   :  { %13635 = vmatprep.subr.bf16.mxu0 %v13634_v36  ;;  %v13666_v36 = vpack.c.bf16 %v5868_v34, %v5867_v33  ;;  %v13668_v27 = vpack.c.bf16 %v5852_v37, %v5851_v35  ;;  %v15184_v34 = vld [vmem:[#allocation2] sm:$0xff]  ;;  %v6019_v35 = vld [vmem:[#allocation10 + $0x120] sm:$0xff] }
0x2609   :  { %13637 = vmatpush3.bf16.msra.mxu0 %v13636_v39  ;;  %v6130_v39 = vld [vmem:[#allocation7 + $0x2688] sm:$0xff] }
0x260a   :  { %13670 = vmatprep.subr.bf16.mxu0 %v14755_v0  ;;  %v13673_v41 = vpack.c.bf16 %v6130_v39, %v6129_v38  ;;  %v9859_v38 = vld [vmem:[#allocation8 + $0x12] ss:$0 sm:$0xff] }
0x260c   :  { %5942 = vmatmul.mubr.f32.vlgmr.msra.gmra.mrb[52].mxu0 %v15129_v52 }
0x260d   :  { %12306 = vmatprep.mubr.msk.f32.mxu0 %vm14757_vm0, %v15169_v40 }
0x26bf   :  { %v11210_v44 = vpop.f32.mrb[50].mxu0 }
0x26c0   :  { %v11211_v45 = vpop.f32.mrb[51].mxu0 }
0x26c1   :  { %v11212_v47 = vadd.f32 %v11211_v45, %v11210_v44 }
0x26c3   :  { %v5706_v48 = vadd.f32 %v11212_v47, %v5636_v46 }
0x26c5   :  { %v5709_v49 = vmax.f32 %v5706_v48, 0.0  ;;  %v6113_v48 = vld [vmem:[#allocation7 + $0x2600] sm:$0xff] }
0x26c7   :  { %12300 = vmatmul.mubr.msk.f32.vlgmr.msra.gmra.mrb[56].mxu1 %vm485_vm3, %v5709_v49  ;;  %v6114_v49 = vld [vmem:[#allocation7 + $0x2608] sm:$0xff] }
0x26c8   :  { %6011 = vmatprep.mubr.f32.mxu1 %v15169_v40  ;;  %13641 = vmatpush3.bf16.msra.mxu1 %v13640_v2  ;;  %v13675_v53 = vpack.c.bf16 %v6114_v49, %v6113_v48  ;;  %v15180_v2 = vld [vmem:[#allocation2 + $0x8] sm:$0xff]  ;;  %v6161_v48 = vld [vmem:[#allocation7 + $0x2780] sm:$0xff] }
0x26c9   :  { %13643 = vmatprep.subr.bf16.mxu1 %v13642_v60  ;;  %v13679_v60 = vpack.c.bf16 %v6116_v57, %v6115_v56  ;;  %v6162_v49 = vld [vmem:[#allocation7 + $0x2788] sm:$0xff]  ;;  %v6164_v56 = vld [vmem:[#allocation7 + $0x2798] sm:$0xff] }
0x26cc   :  { %13645 = vmatpush3.bf16.msra.mxu1 %v13644_v7  ;;  %v6136_v7 = vld [vmem:[#allocation7 + $0x26b8] sm:$0xff] }
0x26cd   :  { %13647 = vmatprep.subr.bf16.mxu1 %v13646_v63  ;;  %v13683_v63 = vpack.c.bf16 %v6118_v54, %v6117_v4  ;;  %v13685_v8 = vpack.c.bf16 %v6136_v7, %v6135_v6  ;;  %v6149_v54 = vld [vmem:[#allocation7 + $0x2720] sm:$0xff]  ;;  %v6150_v6 = vld [vmem:[#allocation7 + $0x2728] sm:$0xff]  ;;  %v6167_v7 = vld [vmem:[#allocation7 + $0x27b0] sm:$0xff] }
0x26d0   :  { %13649 = vmatpush3.bf16.msra.mxu1 %v13648_v58  ;;  %v6138_v58 = vld [vmem:[#allocation7 + $0x26c8] sm:$0xff] }
0x26d1   :  { %13651 = vmatprep.subr.bf16.mxu1 %v13650_v11  ;;  %v13687_v11 = vpack.c.bf16 %v6120_v5, %v6119_v9  ;;  %v13689_v12 = vpack.c.bf16 %v6138_v58, %v6137_v10  ;;  %v6151_v5 = vld [vmem:[#allocation7 + $0x2730] sm:$0xff]  ;;  %v6152_v10 = vld [vmem:[#allocation7 + $0x2738] sm:$0xff]  ;;  %v6169_v58 = vld [vmem:[#allocation7 + $0x27c0] sm:$0xff] }
0x26d4   :  { %13653 = vmatpush3.bf16.msra.mxu1 %v13652_v15  ;;  %v6140_v15 = vld [vmem:[#allocation7 + $0x26d8] sm:$0xff] }
0x26d5   :  { %13655 = vmatprep.subr.bf16.mxu1 %v13654_v16  ;;  %v13691_v16 = vpack.c.bf16 %v6122_v18, %v6121_v13  ;;  %v13693_v17 = vpack.c.bf16 %v6140_v15, %v6139_v14  ;;  %v6153_v18 = vld [vmem:[#allocation7 + $0x2740] sm:$0xff]  ;;  %v6154_v14 = vld [vmem:[#allocation7 + $0x2748] sm:$0xff]  ;;  %v6171_v15 = vld [vmem:[#allocation7 + $0x27d0] sm:$0xff] }
0x26d8   :  { %13657 = vmatpush3.bf16.msra.mxu1 %v13656_v21  ;;  %v6142_v21 = vld [vmem:[#allocation7 + $0x26e8] sm:$0xff] }
0x26d9   :  { %13659 = vmatprep.subr.bf16.mxu1 %v13658_v22  ;;  %v13695_v22 = vpack.c.bf16 %v6124_v19, %v6123_v59  ;;  %v13697_v23 = vpack.c.bf16 %v6142_v21, %v6141_v20  ;;  %v6155_v19 = vld [vmem:[#allocation7 + $0x2750] sm:$0xff]  ;;  %v6156_v20 = vld [vmem:[#allocation7 + $0x2758] sm:$0xff]  ;;  %v6173_v21 = vld [vmem:[#allocation7 + $0x27e0] sm:$0xff] }
0x26dc   :  { %13661 = vmatpush3.bf16.msra.mxu1 %v13660_v26  ;;  %v6144_v26 = vld [vmem:[#allocation7 + $0x26f8] sm:$0xff] }
0x26dd   :  { %13663 = vmatprep.subr.bf16.mxu1 %v13662_v28  ;;  %v13699_v28 = vpack.c.bf16 %v6126_v24, %v6125_v30  ;;  %v13701_v29 = vpack.c.bf16 %v6144_v26, %v6143_v25  ;;  %v6157_v24 = vld [vmem:[#allocation7 + $0x2760] sm:$0xff]  ;;  %v6158_v25 = vld [vmem:[#allocation7 + $0x2768] sm:$0xff] }
0x26de   :  { %v13731_v26 = vpack.c.bf16 %v6158_v25, %v6157_v24 }
0x26df   :  { %v11248_v52 = vpop.f32.mrb[52].mxu0 }
0x26e0   :  { %v11249_v50 = vpop.f32.mrb[53].mxu0  ;;  %13665 = vmatpush3.bf16.msra.mxu1 %v13664_v32  ;;  %v6128_v32 = vld [vmem:[#allocation7 + $0x2678] sm:$0xff] }
0x26e1   :  { %v15176_v51 = vadd.f32 %v11249_v50, %v11248_v52  ;;  %13667 = vmatprep.subr.bf16.mxu1 %v13666_v36  ;;  %v6131_v52 = vld [vmem:[#allocation7 + $0x2690] sm:$0xff]  ;;  %v6132_v50 = vld [vmem:[#allocation7 + $0x2698] sm:$0xff]  ;;  %v13703_v33 = vpack.c.bf16 %v6128_v32, %v6127_v31  ;;  %v6020_v36 = vld [vmem:[#allocation10 + $0x128] sm:$0xff] }
0x26e2   :  { %v13677_v55 = vpack.c.bf16 %v6132_v50, %v6131_v52  ;;  %v13671_v37 = vpack.c.bf16 %v6020_v36, %v6019_v35  ;;  %v6145_v52 = vld [vmem:[#allocation7 + $0x2700] sm:$0xff]  ;;  %v13705_v50 = vpack.c.bf16 %v6162_v49, %v6161_v48  ;;  %v6159_v31 = vld [vmem:[#allocation7 + $0x2770] sm:$0xff]  ;;  %v6438_v36 = vld [vmem:[#allocation7 + $0x2888] sm:$0xff] }
0x26e3   :  { %v6437_v35 = vld [vmem:[#allocation7 + $0x2880] sm:$0xff]  ;;  %v6439_v48 = vld [vmem:[#allocation7 + $0x2890] sm:$0xff]  ;;  %v6440_v49 = vld [vmem:[#allocation7 + $0x2898] sm:$0xff] }
0x26e4   :  { %13669 = vmatpush3.bf16.msra.mxu1 %v13668_v27  ;;  %13672 = vmatpush3.bf16.msra.mxu0 %v13671_v37 }
0x26e5   :  { %13674 = vmatprep.subr.bf16.mxu1 %v13673_v41  ;;  %v5944_v41 = vadd.f32 %v15176_v51, %v9859_v38  ;;  %13706 = vmatprep.subr.bf16.mxu0 %v13705_v50  ;;  %v13740_v38 = vpack.c.bf16 %v6438_v36, %v6437_v35  ;;  %v13744_v50 = vpack.c.bf16 %v6440_v49, %v6439_v48  ;;  %v9862_v35 = vld [vmem:[#allocation8 + $0x13] ss:$0 sm:$0xff]  ;;  %v6453_v48 = vld [vmem:[#allocation7 + $0x2900] sm:$0xff] }
0x279a   :  { %v5790_v43 = vpop.f32.mrb[56].mxu1 }
0x279b   :  { %v5791_v44 = vadd.f32 %v9857_v42, %v5790_v43  ;;  %v12301_v45 = vpop.f32.mrb[57].mxu1 }
0x279d   :  { %v5794_v46 = vmax.f32 %v5791_v44, 0.0 }
0x279f   :  { %5796 = vrot.lane.b32.xlu1 %v5794_v46, %s14759_s5 }
0x2811   :  { %v5797_v47 = vpop.permute.xlu1 %5796 }
0x2812   :  { %5799 = vst.msk [vmem:[#allocation2 + $0x10] sm:$0xff] %vm873_vm5, %v5797_v47 }
0x2819   :  { %v5802_v1 = vld [vmem:[#allocation2 + $0x10] sm:$0xff] }
0x281a   :  { %6012 = vmatmul.mubr.f32.vlgmr.msra.gmra.mrb[58].mxu1 %v5802_v1  ;;  %v6147_v1 = vld [vmem:[#allocation7 + $0x2710] sm:$0xff] }
0x281b   :  { %13676 = vmatpush3.bf16.msra.mxu1 %v13675_v53  ;;  %6249 = vmatprep.mubr.f32.mxu1 %v15180_v2  ;;  %v6146_v53 = vld [vmem:[#allocation7 + $0x2708] sm:$0xff] }
0x281c   :  { %13678 = vmatprep.subr.bf16.mxu1 %v13677_v55  ;;  %v6163_v55 = vld [vmem:[#allocation7 + $0x2790] sm:$0xff]  ;;  %v13707_v57 = vpack.c.bf16 %v6146_v53, %v6145_v52 }
0x281d   :  { %v13709_v51 = vpack.c.bf16 %v6164_v56, %v6163_v55  ;;  %v6423_v53 = vld [vmem:[#allocation7 + $0x2810] sm:$0xff]  ;;  %v6424_v55 = vld [vmem:[#allocation7 + $0x2818] sm:$0xff] }
0x281f   :  { %13680 = vmatpush3.bf16.msra.mxu1 %v13679_v60  ;;  %v6166_v60 = vld [vmem:[#allocation7 + $0x27a8] sm:$0xff] }
0x2820   :  { %13682 = vmatprep.subr.bf16.mxu1 %v13681_v3  ;;  %v13711_v3 = vpack.c.bf16 %v6148_v61, %v6147_v1  ;;  %v13713_v4 = vpack.c.bf16 %v6166_v60, %v6165_v62  ;;  %v13746_v1 = vpack.c.bf16 %v6424_v55, %v6423_v53  ;;  %v6425_v62 = vld [vmem:[#allocation7 + $0x2820] sm:$0xff]  ;;  %v6426_v60 = vld [vmem:[#allocation7 + $0x2828] sm:$0xff]  ;;  %v6472_v53 = vld [vmem:[#allocation7 + $0x2998] sm:$0xff] }
0x2823   :  { %13684 = vmatpush3.bf16.msra.mxu1 %v13683_v63  ;;  %v6168_v63 = vld [vmem:[#allocation7 + $0x27b8] sm:$0xff] }
0x2824   :  { %13686 = vmatprep.subr.bf16.mxu1 %v13685_v8  ;;  %v13715_v8 = vpack.c.bf16 %v6150_v6, %v6149_v54  ;;  %v13717_v9 = vpack.c.bf16 %v6168_v63, %v6167_v7  ;;  %v13750_v54 = vpack.c.bf16 %v6426_v60, %v6425_v62  ;;  %v6427_v7 = vld [vmem:[#allocation7 + $0x2830] sm:$0xff]  ;;  %v6428_v63 = vld [vmem:[#allocation7 + $0x2838] sm:$0xff]  ;;  %v6457_v60 = vld [vmem:[#allocation7 + $0x2920] sm:$0xff] }
0x2827   :  { %13688 = vmatpush3.bf16.msra.mxu1 %v13687_v11  ;;  %v6170_v11 = vld [vmem:[#allocation7 + $0x27c8] sm:$0xff] }
0x2828   :  { %13690 = vmatprep.subr.bf16.mxu1 %v13689_v12  ;;  %v13719_v12 = vpack.c.bf16 %v6152_v10, %v6151_v5  ;;  %v13721_v13 = vpack.c.bf16 %v6170_v11, %v6169_v58  ;;  %v13754_v5 = vpack.c.bf16 %v6428_v63, %v6427_v7  ;;  %v6429_v58 = vld [vmem:[#allocation7 + $0x2840] sm:$0xff]  ;;  %v6430_v11 = vld [vmem:[#allocation7 + $0x2848] sm:$0xff]  ;;  %v6459_v63 = vld [vmem:[#allocation7 + $0x2930] sm:$0xff] }
0x282b   :  { %13692 = vmatpush3.bf16.msra.mxu1 %v13691_v16  ;;  %v6172_v16 = vld [vmem:[#allocation7 + $0x27d8] sm:$0xff] }
0x282c   :  { %13694 = vmatprep.subr.bf16.mxu1 %v13693_v17  ;;  %v13723_v17 = vpack.c.bf16 %v6154_v14, %v6153_v18  ;;  %v13725_v59 = vpack.c.bf16 %v6172_v16, %v6171_v15  ;;  %v13758_v18 = vpack.c.bf16 %v6430_v11, %v6429_v58  ;;  %v6431_v15 = vld [vmem:[#allocation7 + $0x2850] sm:$0xff]  ;;  %v6432_v16 = vld [vmem:[#allocation7 + $0x2858] sm:$0xff]  ;;  %v6461_v11 = vld [vmem:[#allocation7 + $0x2940] sm:$0xff] }
0x282f   :  { %13696 = vmatpush3.bf16.msra.mxu1 %v13695_v22  ;;  %v6174_v22 = vld [vmem:[#allocation7 + $0x27e8] sm:$0xff] }
0x2830   :  { %13698 = vmatprep.subr.bf16.mxu1 %v13697_v23  ;;  %v13727_v23 = vpack.c.bf16 %v6156_v20, %v6155_v19  ;;  %v13729_v30 = vpack.c.bf16 %v6174_v22, %v6173_v21  ;;  %v13762_v19 = vpack.c.bf16 %v6432_v16, %v6431_v15  ;;  %v6433_v21 = vld [vmem:[#allocation7 + $0x2860] sm:$0xff]  ;;  %v6434_v22 = vld [vmem:[#allocation7 + $0x2868] sm:$0xff]  ;;  %v6463_v16 = vld [vmem:[#allocation7 + $0x2950] sm:$0xff] }
0x2831   :  { %v13766_v24 = vpack.c.bf16 %v6434_v22, %v6433_v21  ;;  %v6465_v22 = vld [vmem:[#allocation7 + $0x2960] sm:$0xff] }
0x2833   :  { %13700 = vmatpush3.bf16.msra.mxu1 %v13699_v28  ;;  %v6175_v28 = vld [vmem:[#allocation7 + $0x27f0] sm:$0xff] }
0x2834   :  { %13702 = vmatprep.subr.bf16.mxu1 %v13701_v29  ;;  %v6176_v29 = vld [vmem:[#allocation7 + $0x27f8] sm:$0xff] }
0x2835   :  { %v13733_v32 = vpack.c.bf16 %v6176_v29, %v6175_v28  ;;  %v6436_v28 = vld [vmem:[#allocation7 + $0x2878] sm:$0xff] }
0x2837   :  { %13704 = vmatpush3.bf16.msra.mxu1 %v13703_v33  ;;  %v6160_v33 = vld [vmem:[#allocation7 + $0x2778] sm:$0xff] }
0x2838   :  { %13737 = vmatprep.subr.bf16.mxu1 %v14755_v0  ;;  %v13735_v37 = vpack.c.bf16 %v6160_v33, %v6159_v31  ;;  %v6327_v31 = vld [vmem:[#allocation10 + $0x130] sm:$0xff] }
0x283a   :  { %6250 = vmatmul.mubr.f32.vlgmr.msra.gmra.mrb[60].mxu1 %v15184_v34 }
0x283b   :  { %12313 = vmatprep.mubr.msk.f32.mxu1 %vm14757_vm0, %v15169_v40 }
0x28ed   :  { %v11283_v39 = vpop.f32.mrb[58].mxu1 }
0x28ee   :  { %v11284_v27 = vpop.f32.mrb[59].mxu1 }
0x28ef   :  { %v11285_v42 = vadd.f32 %v11284_v27, %v11283_v39  ;;  %v9860_v39 = vld [vmem:[#allocation11 + $0x12] ss:$0 sm:$0xff] }
0x28f1   :  { %v6014_v43 = vadd.f32 %v11285_v42, %v5944_v41 }
0x28f3   :  { %v6017_v44 = vmax.f32 %v6014_v43, 0.0 }
0x28f5   :  { %12307 = vmatmul.mubr.msk.f32.vlgmr.msra.gmra.mrb[54].mxu0 %vm485_vm3, %v6017_v44 }
0x28f6   :  { %6319 = vmatprep.mubr.f32.mxu0 %v15169_v40  ;;  %13708 = vmatpush3.bf16.msra.mxu0 %v13707_v57  ;;  %v6441_v57 = vld [vmem:[#allocation7 + $0x28a0] sm:$0xff] }
0x28f7   :  { %13710 = vmatprep.subr.bf16.mxu0 %v13709_v51  ;;  %v6442_v51 = vld [vmem:[#allocation7 + $0x28a8] sm:$0xff] }
0x28f8   :  { %v13748_v61 = vpack.c.bf16 %v6442_v51, %v6441_v57  ;;  %v6456_v57 = vld [vmem:[#allocation7 + $0x2918] sm:$0xff]  ;;  %v6473_v51 = vld [vmem:[#allocation7 + $0x29a0] sm:$0xff] }
0x28fa   :  { %13712 = vmatpush3.bf16.msra.mxu0 %v13711_v3  ;;  %v6443_v3 = vld [vmem:[#allocation7 + $0x28b0] sm:$0xff] }
0x28fb   :  { %13714 = vmatprep.subr.bf16.mxu0 %v13713_v4  ;;  %v6444_v4 = vld [vmem:[#allocation7 + $0x28b8] sm:$0xff] }
0x28fc   :  { %v13752_v6 = vpack.c.bf16 %v6444_v4, %v6443_v3  ;;  %v6458_v3 = vld [vmem:[#allocation7 + $0x2928] sm:$0xff]  ;;  %v6475_v4 = vld [vmem:[#allocation7 + $0x29b0] sm:$0xff] }
0x28fe   :  { %13716 = vmatpush3.bf16.msra.mxu0 %v13715_v8  ;;  %v6445_v8 = vld [vmem:[#allocation7 + $0x28c0] sm:$0xff] }
0x28ff   :  { %13718 = vmatprep.subr.bf16.mxu0 %v13717_v9  ;;  %v6446_v9 = vld [vmem:[#allocation7 + $0x28c8] sm:$0xff] }
0x2900   :  { %v13756_v10 = vpack.c.bf16 %v6446_v9, %v6445_v8  ;;  %v6460_v8 = vld [vmem:[#allocation7 + $0x2938] sm:$0xff]  ;;  %v6477_v9 = vld [vmem:[#allocation7 + $0x29c0] sm:$0xff] }
0x2902   :  { %13720 = vmatpush3.bf16.msra.mxu0 %v13719_v12  ;;  %v6447_v12 = vld [vmem:[#allocation7 + $0x28d0] sm:$0xff] }
0x2903   :  { %13722 = vmatprep.subr.bf16.mxu0 %v13721_v13  ;;  %v6448_v13 = vld [vmem:[#allocation7 + $0x28d8] sm:$0xff] }
0x2904   :  { %v13760_v14 = vpack.c.bf16 %v6448_v13, %v6447_v12  ;;  %v6462_v12 = vld [vmem:[#allocation7 + $0x2948] sm:$0xff]  ;;  %v6479_v13 = vld [vmem:[#allocation7 + $0x29d0] sm:$0xff] }
0x2906   :  { %13724 = vmatpush3.bf16.msra.mxu0 %v13723_v17  ;;  %v6449_v17 = vld [vmem:[#allocation7 + $0x28e0] sm:$0xff] }
0x2907   :  { %13726 = vmatprep.subr.bf16.mxu0 %v13725_v59  ;;  %v6450_v59 = vld [vmem:[#allocation7 + $0x28e8] sm:$0xff] }
0x2908   :  { %v13764_v20 = vpack.c.bf16 %v6450_v59, %v6449_v17  ;;  %v6464_v17 = vld [vmem:[#allocation7 + $0x2958] sm:$0xff]  ;;  %v6481_v59 = vld [vmem:[#allocation7 + $0x29e0] sm:$0xff] }
0x290a   :  { %13728 = vmatpush3.bf16.msra.mxu0 %v13727_v23  ;;  %v6451_v23 = vld [vmem:[#allocation7 + $0x28f0] sm:$0xff] }
0x290b   :  { %13730 = vmatprep.subr.bf16.mxu0 %v13729_v30  ;;  %v6452_v30 = vld [vmem:[#allocation7 + $0x28f8] sm:$0xff] }
0x290c   :  { %v13768_v25 = vpack.c.bf16 %v6452_v30, %v6451_v23  ;;  %v6466_v23 = vld [vmem:[#allocation7 + $0x2968] sm:$0xff] }
0x290d   :  { %v11321_v45 = vpop.f32.mrb[60].mxu1  ;;  %v13798_v30 = vpack.c.bf16 %v6466_v23, %v6465_v22 }
0x290e   :  { %v11322_v46 = vpop.f32.mrb[61].mxu1  ;;  %13732 = vmatpush3.bf16.msra.mxu0 %v13731_v26  ;;  %v6435_v26 = vld [vmem:[#allocation7 + $0x2870] sm:$0xff] }
0x290f   :  { %v15192_v47 = vadd.f32 %v11322_v46, %v11321_v45  ;;  %13734 = vmatprep.subr.bf16.mxu0 %v13733_v32  ;;  %v6421_v45 = vld [vmem:[#allocation7 + $0x2800] sm:$0xff]  ;;  %v6422_v46 = vld [vmem:[#allocation7 + $0x2808] sm:$0xff]  ;;  %v13770_v29 = vpack.c.bf16 %v6436_v28, %v6435_v26  ;;  %v6328_v32 = vld [vmem:[#allocation10 + $0x138] sm:$0xff] }
0x2910   :  { %v13742_v52 = vpack.c.bf16 %v6422_v46, %v6421_v45  ;;  %v13738_v33 = vpack.c.bf16 %v6328_v32, %v6327_v31  ;;  %v6469_v45 = vld [vmem:[#allocation7 + $0x2980] sm:$0xff]  ;;  %v6470_v46 = vld [vmem:[#allocation7 + $0x2988] sm:$0xff]  ;;  %v6467_v26 = vld [vmem:[#allocation7 + $0x2970] sm:$0xff] }
0x2911   :  { %v13772_v49 = vpack.c.bf16 %v6470_v46, %v6469_v45  ;;  %v6745_v31 = vld [vmem:[#allocation7 + $0x2a80] sm:$0xff]  ;;  %v6746_v32 = vld [vmem:[#allocation7 + $0x2a88] sm:$0xff]  ;;  %v6747_v45 = vld [vmem:[#allocation7 + $0x2a90] sm:$0xff] }
0x2912   :  { %13736 = vmatpush3.bf16.msra.mxu0 %v13735_v37  ;;  %13739 = vmatpush3.bf16.msra.mxu1 %v13738_v33  ;;  %v6748_v46 = vld [vmem:[#allocation7 + $0x2a98] sm:$0xff] }
0x2913   :  { %13741 = vmatprep.subr.bf16.mxu0 %v13740_v38  ;;  %v6252_v38 = vadd.f32 %v15192_v47, %v9862_v35  ;;  %13773 = vmatprep.subr.bf16.mxu1 %v13772_v49  ;;  %v13807_v35 = vpack.c.bf16 %v6746_v32, %v6745_v31  ;;  %v13811_v49 = vpack.c.bf16 %v6748_v46, %v6747_v45  ;;  %v9865_v31 = vld [vmem:[#allocation8 + $0x14] ss:$0 sm:$0xff]  ;;  %v6761_v45 = vld [vmem:[#allocation7 + $0x2b00] sm:$0xff] }
0x29c8   :  { %v6098_v27 = vpop.f32.mrb[54].mxu0 }
0x29c9   :  { %v6099_v41 = vadd.f32 %v9860_v39, %v6098_v27  ;;  %v12308_v42 = vpop.f32.mrb[55].mxu0 }
0x29cb   :  { %v6102_v43 = vmax.f32 %v6099_v41, 0.0 }
0x29cd   :  { %6104 = vrot.lane.b32.xlu0 %v6102_v43, %s14760_s27 }
0x2a3f   :  { %v6105_v44 = vpop.permute.xlu0 %6104 }
0x2a40   :  { %6107 = vst.msk [vmem:[#allocation2 + $0x10] sm:$0xff] %vm1182_vm6, %v6105_v44 }
0x2a47   :  { %v6110_v56 = vld [vmem:[#allocation2 + $0x10] sm:$0xff] }
0x2a48   :  { %6320 = vmatmul.mubr.f32.vlgmr.msra.gmra.mrb[56].mxu0 %v6110_v56  ;;  %v6455_v56 = vld [vmem:[#allocation7 + $0x2910] sm:$0xff] }
0x2a49   :  { %13743 = vmatpush3.bf16.msra.mxu0 %v13742_v52  ;;  %6557 = vmatprep.mubr.f32.mxu0 %v15180_v2  ;;  %v6454_v52 = vld [vmem:[#allocation7 + $0x2908] sm:$0xff] }
0x2a4a   :  { %13745 = vmatprep.subr.bf16.mxu0 %v13744_v50  ;;  %v6471_v50 = vld [vmem:[#allocation7 + $0x2990] sm:$0xff]  ;;  %v13774_v55 = vpack.c.bf16 %v6454_v52, %v6453_v48 }
0x2a4b   :  { %v13776_v47 = vpack.c.bf16 %v6472_v53, %v6471_v50  ;;  %v6731_v52 = vld [vmem:[#allocation7 + $0x2a10] sm:$0xff]  ;;  %v6732_v50 = vld [vmem:[#allocation7 + $0x2a18] sm:$0xff] }
0x2a4d   :  { %13747 = vmatpush3.bf16.msra.mxu0 %v13746_v1  ;;  %v6474_v1 = vld [vmem:[#allocation7 + $0x29a8] sm:$0xff] }
0x2a4e   :  { %13749 = vmatprep.subr.bf16.mxu0 %v13748_v61  ;;  %v13778_v61 = vpack.c.bf16 %v6456_v57, %v6455_v56  ;;  %v13780_v62 = vpack.c.bf16 %v6474_v1, %v6473_v51  ;;  %v13813_v56 = vpack.c.bf16 %v6732_v50, %v6731_v52  ;;  %v6733_v51 = vld [vmem:[#allocation7 + $0x2a20] sm:$0xff]  ;;  %v6734_v1 = vld [vmem:[#allocation7 + $0x2a28] sm:$0xff]  ;;  %v6780_v52 = vld [vmem:[#allocation7 + $0x2b98] sm:$0xff] }
0x2a51   :  { %13751 = vmatpush3.bf16.msra.mxu0 %v13750_v54  ;;  %v6476_v54 = vld [vmem:[#allocation7 + $0x29b8] sm:$0xff] }
0x2a52   :  { %13753 = vmatprep.subr.bf16.mxu0 %v13752_v6  ;;  %v13782_v6 = vpack.c.bf16 %v6458_v3, %v6457_v60  ;;  %v13784_v7 = vpack.c.bf16 %v6476_v54, %v6475_v4  ;;  %v13817_v60 = vpack.c.bf16 %v6734_v1, %v6733_v51  ;;  %v6735_v4 = vld [vmem:[#allocation7 + $0x2a30] sm:$0xff]  ;;  %v6736_v54 = vld [vmem:[#allocation7 + $0x2a38] sm:$0xff]  ;;  %v6765_v51 = vld [vmem:[#allocation7 + $0x2b20] sm:$0xff] }
0x2a53   :  { %v6766_v1 = vld [vmem:[#allocation7 + $0x2b28] sm:$0xff] }
0x2a55   :  { %13755 = vmatpush3.bf16.msra.mxu0 %v13754_v5  ;;  %v6478_v5 = vld [vmem:[#allocation7 + $0x29c8] sm:$0xff] }
0x2a56   :  { %13757 = vmatprep.subr.bf16.mxu0 %v13756_v10  ;;  %v13786_v10 = vpack.c.bf16 %v6460_v8, %v6459_v63  ;;  %v13788_v58 = vpack.c.bf16 %v6478_v5, %v6477_v9  ;;  %v13821_v63 = vpack.c.bf16 %v6736_v54, %v6735_v4  ;;  %v6737_v9 = vld [vmem:[#allocation7 + $0x2a40] sm:$0xff]  ;;  %v6738_v5 = vld [vmem:[#allocation7 + $0x2a48] sm:$0xff]  ;;  %v6767_v4 = vld [vmem:[#allocation7 + $0x2b30] sm:$0xff] }
0x2a57   :  { %v6768_v54 = vld [vmem:[#allocation7 + $0x2b38] sm:$0xff] }
0x2a59   :  { %13759 = vmatpush3.bf16.msra.mxu0 %v13758_v18  ;;  %v6480_v18 = vld [vmem:[#allocation7 + $0x29d8] sm:$0xff] }
0x2a5a   :  { %13761 = vmatprep.subr.bf16.mxu0 %v13760_v14  ;;  %v13790_v14 = vpack.c.bf16 %v6462_v12, %v6461_v11  ;;  %v13792_v15 = vpack.c.bf16 %v6480_v18, %v6479_v13  ;;  %v13825_v11 = vpack.c.bf16 %v6738_v5, %v6737_v9  ;;  %v6739_v13 = vld [vmem:[#allocation7 + $0x2a50] sm:$0xff]  ;;  %v6740_v18 = vld [vmem:[#allocation7 + $0x2a58] sm:$0xff]  ;;  %v6769_v9 = vld [vmem:[#allocation7 + $0x2b40] sm:$0xff] }
0x2a5b   :  { %v6770_v5 = vld [vmem:[#allocation7 + $0x2b48] sm:$0xff] }
0x2a5d   :  { %13763 = vmatpush3.bf16.msra.mxu0 %v13762_v19  ;;  %v6482_v19 = vld [vmem:[#allocation7 + $0x29e8] sm:$0xff] }
0x2a5e   :  { %13765 = vmatprep.subr.bf16.mxu0 %v13764_v20  ;;  %v13794_v20 = vpack.c.bf16 %v6464_v17, %v6463_v16  ;;  %v13796_v21 = vpack.c.bf16 %v6482_v19, %v6481_v59  ;;  %v13829_v16 = vpack.c.bf16 %v6740_v18, %v6739_v13  ;;  %v6741_v59 = vld [vmem:[#allocation7 + $0x2a60] sm:$0xff]  ;;  %v6742_v19 = vld [vmem:[#allocation7 + $0x2a68] sm:$0xff]  ;;  %v6771_v13 = vld [vmem:[#allocation7 + $0x2b50] sm:$0xff] }
0x2a5f   :  { %v13833_v22 = vpack.c.bf16 %v6742_v19, %v6741_v59  ;;  %v6772_v18 = vld [vmem:[#allocation7 + $0x2b58] sm:$0xff]  ;;  %v6773_v59 = vld [vmem:[#allocation7 + $0x2b60] sm:$0xff]  ;;  %v6774_v19 = vld [vmem:[#allocation7 + $0x2b68] sm:$0xff] }
0x2a61   :  { %13767 = vmatpush3.bf16.msra.mxu0 %v13766_v24  ;;  %v6483_v24 = vld [vmem:[#allocation7 + $0x29f0] sm:$0xff] }
0x2a62   :  { %13769 = vmatprep.subr.bf16.mxu0 %v13768_v25  ;;  %v6484_v25 = vld [vmem:[#allocation7 + $0x29f8] sm:$0xff] }
0x2a63   :  { %v13800_v28 = vpack.c.bf16 %v6484_v25, %v6483_v24  ;;  %v6744_v24 = vld [vmem:[#allocation7 + $0x2a78] sm:$0xff] }
0x2a65   :  { %13771 = vmatpush3.bf16.msra.mxu0 %v13770_v29  ;;  %v6468_v29 = vld [vmem:[#allocation7 + $0x2978] sm:$0xff] }
0x2a66   :  { %13804 = vmatprep.subr.bf16.mxu0 %v14755_v0  ;;  %v13802_v33 = vpack.c.bf16 %v6468_v29, %v6467_v26  ;;  %v6635_v26 = vld [vmem:[#allocation10 + $0x140] sm:$0xff] }
0x2a68   :  { %6558 = vmatmul.mubr.f32.vlgmr.msra.gmra.mrb[58].mxu0 %v15184_v34 }
0x2a69   :  { %12320 = vmatprep.mubr.msk.f32.mxu0 %vm14757_vm0, %v15169_v40 }
0x2b1b   :  { %v11356_v36 = vpop.f32.mrb[56].mxu0 }
0x2b1c   :  { %v11357_v37 = vpop.f32.mrb[57].mxu0 }
0x2b1d   :  { %v11358_v39 = vadd.f32 %v11357_v37, %v11356_v36  ;;  %v9863_v36 = vld [vmem:[#allocation11 + $0x13] ss:$0 sm:$0xff] }
0x2b1f   :  { %v6322_v27 = vadd.f32 %v11358_v39, %v6252_v38 }
0x2b21   :  { %v6325_v41 = vmax.f32 %v6322_v27, 0.0 }
0x2b23   :  { %12314 = vmatmul.mubr.msk.f32.vlgmr.msra.gmra.mrb[62].mxu1 %vm485_vm3, %v6325_v41 }
0x2b24   :  { %6627 = vmatprep.mubr.f32.mxu1 %v15169_v40  ;;  %13775 = vmatpush3.bf16.msra.mxu1 %v13774_v55  ;;  %v6749_v55 = vld [vmem:[#allocation7 + $0x2aa0] sm:$0xff] }
0x2b25   :  { %13777 = vmatprep.subr.bf16.mxu1 %v13776_v47  ;;  %v6750_v47 = vld [vmem:[#allocation7 + $0x2aa8] sm:$0xff] }
0x2b26   :  { %v13815_v57 = vpack.c.bf16 %v6750_v47, %v6749_v55  ;;  %v6764_v55 = vld [vmem:[#allocation7 + $0x2b18] sm:$0xff]  ;;  %v6781_v47 = vld [vmem:[#allocation7 + $0x2ba0] sm:$0xff] }
0x2b28   :  { %13779 = vmatpush3.bf16.msra.mxu1 %v13778_v61  ;;  %v6751_v61 = vld [vmem:[#allocation7 + $0x2ab0] sm:$0xff] }
0x2b29   :  { %13781 = vmatprep.subr.bf16.mxu1 %v13780_v62  ;;  %v6752_v62 = vld [vmem:[#allocation7 + $0x2ab8] sm:$0xff] }
0x2b2a   :  { %v13819_v3 = vpack.c.bf16 %v6752_v62, %v6751_v61  ;;  %v6783_v61 = vld [vmem:[#allocation7 + $0x2bb0] sm:$0xff]  ;;  %v6784_v62 = vld [vmem:[#allocation7 + $0x2bb8] sm:$0xff] }
0x2b2c   :  { %13783 = vmatpush3.bf16.msra.mxu1 %v13782_v6  ;;  %v6753_v6 = vld [vmem:[#allocation7 + $0x2ac0] sm:$0xff] }
0x2b2d   :  { %13785 = vmatprep.subr.bf16.mxu1 %v13784_v7  ;;  %v6754_v7 = vld [vmem:[#allocation7 + $0x2ac8] sm:$0xff] }
0x2b2e   :  { %v13823_v8 = vpack.c.bf16 %v6754_v7, %v6753_v6  ;;  %v6785_v6 = vld [vmem:[#allocation7 + $0x2bc0] sm:$0xff]  ;;  %v6786_v7 = vld [vmem:[#allocation7 + $0x2bc8] sm:$0xff] }
0x2b30   :  { %13787 = vmatpush3.bf16.msra.mxu1 %v13786_v10  ;;  %v6755_v10 = vld [vmem:[#allocation7 + $0x2ad0] sm:$0xff] }
0x2b31   :  { %13789 = vmatprep.subr.bf16.mxu1 %v13788_v58  ;;  %v6756_v58 = vld [vmem:[#allocation7 + $0x2ad8] sm:$0xff] }
0x2b32   :  { %v13827_v12 = vpack.c.bf16 %v6756_v58, %v6755_v10  ;;  %v6787_v10 = vld [vmem:[#allocation7 + $0x2bd0] sm:$0xff]  ;;  %v6788_v58 = vld [vmem:[#allocation7 + $0x2bd8] sm:$0xff] }
0x2b34   :  { %13791 = vmatpush3.bf16.msra.mxu1 %v13790_v14  ;;  %v6757_v14 = vld [vmem:[#allocation7 + $0x2ae0] sm:$0xff] }
0x2b35   :  { %13793 = vmatprep.subr.bf16.mxu1 %v13792_v15  ;;  %v6758_v15 = vld [vmem:[#allocation7 + $0x2ae8] sm:$0xff] }
0x2b36   :  { %v13831_v17 = vpack.c.bf16 %v6758_v15, %v6757_v14  ;;  %v6789_v14 = vld [vmem:[#allocation7 + $0x2be0] sm:$0xff]  ;;  %v6790_v15 = vld [vmem:[#allocation7 + $0x2be8] sm:$0xff] }
0x2b38   :  { %13795 = vmatpush3.bf16.msra.mxu1 %v13794_v20  ;;  %v6759_v20 = vld [vmem:[#allocation7 + $0x2af0] sm:$0xff] }
0x2b39   :  { %13797 = vmatprep.subr.bf16.mxu1 %v13796_v21  ;;  %v6760_v21 = vld [vmem:[#allocation7 + $0x2af8] sm:$0xff] }
0x2b3a   :  { %v13835_v23 = vpack.c.bf16 %v6760_v21, %v6759_v20  ;;  %v13865_v20 = vpack.c.bf16 %v6774_v19, %v6773_v59  ;;  %v6791_v21 = vld [vmem:[#allocation7 + $0x2bf0] sm:$0xff]  ;;  %v7052_v19 = vld [vmem:[#allocation7 + $0x2c78] sm:$0xff] }
0x2b3b   :  { %v11394_v42 = vpop.f32.mrb[58].mxu0  ;;  %v7051_v59 = vld [vmem:[#allocation7 + $0x2c70] sm:$0xff] }
0x2b3c   :  { %v11395_v43 = vpop.f32.mrb[59].mxu0  ;;  %13799 = vmatpush3.bf16.msra.mxu1 %v13798_v30  ;;  %v6743_v30 = vld [vmem:[#allocation7 + $0x2a70] sm:$0xff] }
0x2b3d   :  { %v15204_v44 = vadd.f32 %v11395_v43, %v11394_v42  ;;  %13801 = vmatprep.subr.bf16.mxu1 %v13800_v28  ;;  %v6729_v42 = vld [vmem:[#allocation7 + $0x2a00] sm:$0xff]  ;;  %v6730_v43 = vld [vmem:[#allocation7 + $0x2a08] sm:$0xff]  ;;  %v13837_v25 = vpack.c.bf16 %v6744_v24, %v6743_v30  ;;  %v6776_v24 = vld [vmem:[#allocation7 + $0x2b78] sm:$0xff] }
0x2b3e   :  { %v13809_v48 = vpack.c.bf16 %v6730_v43, %v6729_v42  ;;  %v6636_v28 = vld [vmem:[#allocation10 + $0x148] sm:$0xff] }
0x2b3f   :  { %v13805_v29 = vpack.c.bf16 %v6636_v28, %v6635_v26  ;;  %v6777_v42 = vld [vmem:[#allocation7 + $0x2b80] sm:$0xff]  ;;  %v6778_v43 = vld [vmem:[#allocation7 + $0x2b88] sm:$0xff] }
0x2b40   :  { %13803 = vmatpush3.bf16.msra.mxu1 %v13802_v33  ;;  %v13839_v46 = vpack.c.bf16 %v6778_v43, %v6777_v42  ;;  %v7054_v26 = vld [vmem:[#allocation7 + $0x2c88] sm:$0xff]  ;;  %v7056_v42 = vld [vmem:[#allocation7 + $0x2c98] sm:$0xff] }
0x2b41   :  { %13808 = vmatprep.subr.bf16.mxu1 %v13807_v35  ;;  %13806 = vmatpush3.bf16.msra.mxu0 %v13805_v29  ;;  %v6560_v35 = vadd.f32 %v15204_v44, %v9865_v31  ;;  %v9866_v31 = vld [vmem:[#allocation11 + $0x14] ss:$0 sm:$0xff] }
0x2b42   :  { %13840 = vmatprep.subr.bf16.mxu0 %v13839_v46  ;;  %v7039_v46 = vld [vmem:[#allocation7 + $0x2c10] sm:$0xff] }
0x2bf6   :  { %v6406_v37 = vpop.f32.mrb[62].mxu1 }
0x2bf7   :  { %v6407_v38 = vadd.f32 %v9863_v36, %v6406_v37  ;;  %v12315_v39 = vpop.f32.mrb[63].mxu1 }
0x2bf9   :  { %v6410_v27 = vmax.f32 %v6407_v38, 0.0 }
0x2bfb   :  { %6412 = vrot.lane.b32.xlu1 %v6410_v27, %s14761_s16 }
0x2c6d   :  { %v6413_v41 = vpop.permute.xlu1 %6412 }
0x2c6e   :  { %6415 = vst.msk [vmem:[#allocation2 + $0x10] sm:$0xff] %vm1491_vm7, %v6413_v41 }
0x2c75   :  { %v6418_v53 = vld [vmem:[#allocation2 + $0x10] sm:$0xff] }
0x2c76   :  { %6628 = vmatmul.mubr.f32.vlgmr.msra.gmra.mrb[64].mxu1 %v6418_v53  ;;  %v6763_v53 = vld [vmem:[#allocation7 + $0x2b10] sm:$0xff] }
0x2c77   :  { %13810 = vmatpush3.bf16.msra.mxu1 %v13809_v48  ;;  %6865 = vmatprep.mubr.f32.mxu1 %v15180_v2  ;;  %v6762_v48 = vld [vmem:[#allocation7 + $0x2b08] sm:$0xff] }
0x2c78   :  { %13812 = vmatprep.subr.bf16.mxu1 %v13811_v49  ;;  %v6779_v49 = vld [vmem:[#allocation7 + $0x2b90] sm:$0xff]  ;;  %v13841_v50 = vpack.c.bf16 %v6762_v48, %v6761_v45  ;;  %v7040_v48 = vld [vmem:[#allocation7 + $0x2c18] sm:$0xff] }
0x2c79   :  { %v13843_v44 = vpack.c.bf16 %v6780_v52, %v6779_v49  ;;  %v7057_v52 = vld [vmem:[#allocation7 + $0x2ca0] sm:$0xff] }
0x2c7b   :  { %13814 = vmatpush3.bf16.msra.mxu1 %v13813_v56  ;;  %v6782_v56 = vld [vmem:[#allocation7 + $0x2ba8] sm:$0xff] }
0x2c7c   :  { %13816 = vmatprep.subr.bf16.mxu1 %v13815_v57  ;;  %v13847_v57 = vpack.c.bf16 %v6782_v56, %v6781_v47  ;;  %v7042_v47 = vld [vmem:[#allocation7 + $0x2c28] sm:$0xff]  ;;  %v7059_v56 = vld [vmem:[#allocation7 + $0x2cb0] sm:$0xff] }
0x2c7f   :  { %13818 = vmatpush3.bf16.msra.mxu1 %v13817_v60  ;;  %v13849_v60 = vpack.c.bf16 %v6766_v1, %v6765_v51  ;;  %v7043_v1 = vld [vmem:[#allocation7 + $0x2c30] sm:$0xff] }
0x2c80   :  { %13820 = vmatprep.subr.bf16.mxu1 %v13819_v3  ;;  %v13851_v3 = vpack.c.bf16 %v6784_v62, %v6783_v61  ;;  %v7044_v61 = vld [vmem:[#allocation7 + $0x2c38] sm:$0xff]  ;;  %v7061_v62 = vld [vmem:[#allocation7 + $0x2cc0] sm:$0xff] }
0x2c83   :  { %13822 = vmatpush3.bf16.msra.mxu1 %v13821_v63  ;;  %v13853_v63 = vpack.c.bf16 %v6768_v54, %v6767_v4  ;;  %v7046_v54 = vld [vmem:[#allocation7 + $0x2c48] sm:$0xff] }
0x2c84   :  { %13824 = vmatprep.subr.bf16.mxu1 %v13823_v8  ;;  %v13855_v8 = vpack.c.bf16 %v6786_v7, %v6785_v6  ;;  %v7063_v6 = vld [vmem:[#allocation7 + $0x2cd0] sm:$0xff]  ;;  %v7064_v7 = vld [vmem:[#allocation7 + $0x2cd8] sm:$0xff] }
0x2c87   :  { %13826 = vmatpush3.bf16.msra.mxu1 %v13825_v11  ;;  %v13857_v11 = vpack.c.bf16 %v6770_v5, %v6769_v9  ;;  %v7047_v9 = vld [vmem:[#allocation7 + $0x2c50] sm:$0xff]  ;;  %v7048_v5 = vld [vmem:[#allocation7 + $0x2c58] sm:$0xff] }
0x2c88   :  { %13828 = vmatprep.subr.bf16.mxu1 %v13827_v12  ;;  %v13859_v12 = vpack.c.bf16 %v6788_v58, %v6787_v10  ;;  %v7065_v10 = vld [vmem:[#allocation7 + $0x2ce0] sm:$0xff]  ;;  %v7066_v58 = vld [vmem:[#allocation7 + $0x2ce8] sm:$0xff] }
0x2c8b   :  { %13830 = vmatpush3.bf16.msra.mxu1 %v13829_v16  ;;  %v13861_v16 = vpack.c.bf16 %v6772_v18, %v6771_v13  ;;  %v7049_v13 = vld [vmem:[#allocation7 + $0x2c60] sm:$0xff]  ;;  %v7050_v18 = vld [vmem:[#allocation7 + $0x2c68] sm:$0xff] }
0x2c8c   :  { %13832 = vmatprep.subr.bf16.mxu1 %v13831_v17  ;;  %v13863_v17 = vpack.c.bf16 %v6790_v15, %v6789_v14  ;;  %v7067_v14 = vld [vmem:[#allocation7 + $0x2cf0] sm:$0xff]  ;;  %v7068_v15 = vld [vmem:[#allocation7 + $0x2cf8] sm:$0xff] }
0x2c8f   :  { %13834 = vmatpush3.bf16.msra.mxu1 %v13833_v22  ;;  %v6792_v22 = vld [vmem:[#allocation7 + $0x2bf8] sm:$0xff] }
0x2c90   :  { %13836 = vmatprep.subr.bf16.mxu1 %v13835_v23  ;;  %v6775_v23 = vld [vmem:[#allocation7 + $0x2b70] sm:$0xff]  ;;  %v13867_v30 = vpack.c.bf16 %v6792_v22, %v6791_v21  ;;  %v15223_v21 = vld [vmem:[#allocation2 + $0x18] sm:$0xff] }
0x2c91   :  { %v13869_v28 = vpack.c.bf16 %v6776_v24, %v6775_v23  ;;  %v6943_v22 = vld [vmem:[#allocation10 + $0x150] sm:$0xff]  ;;  %v6944_v23 = vld [vmem:[#allocation10 + $0x158] sm:$0xff] }
0x2c92   :  { %v9868_v24 = vld [vmem:[#allocation8 + $0x15] ss:$0 sm:$0xff] }
0x2c93   :  { %13838 = vmatpush3.bf16.msra.mxu1 %v13837_v25  ;;  %v7053_v25 = vld [vmem:[#allocation7 + $0x2c80] sm:$0xff] }
0x2c94   :  { %13871 = vmatprep.subr.bf16.mxu1 %v14755_v0  ;;  %v13874_v29 = vpack.c.bf16 %v7054_v26, %v7053_v25 }
0x2c96   :  { %6866 = vmatmul.mubr.f32.vlgmr.msra.gmra.mrb[66].mxu1 %v15184_v34 }
0x2c97   :  { %12327 = vmatprep.mubr.msk.f32.mxu1 %vm14757_vm0, %v15169_v40 }
0x2d49   :  { %v11429_v32 = vpop.f32.mrb[64].mxu1 }
0x2d4a   :  { %v11430_v33 = vpop.f32.mrb[65].mxu1 }
0x2d4b   :  { %v11431_v36 = vadd.f32 %v11430_v33, %v11429_v32 }
0x2d4d   :  { %v6630_v37 = vadd.f32 %v11431_v36, %v6560_v35 }
0x2d4f   :  { %v6633_v38 = vmax.f32 %v6630_v37, 0.0 }
0x2d51   :  { %12321 = vmatmul.mubr.msk.f32.vlgmr.msra.gmra.mrb[60].mxu0 %vm485_vm3, %v6633_v38  ;;  %v7037_v38 = vld [vmem:[#allocation7 + $0x2c00] sm:$0xff] }
0x2d52   :  { %6935 = vmatprep.mubr.f32.mxu0 %v15169_v40  ;;  %13842 = vmatpush3.bf16.msra.mxu0 %v13841_v50  ;;  %v13845_v40 = vpack.c.bf16 %v6764_v55, %v6763_v53  ;;  %v7058_v50 = vld [vmem:[#allocation7 + $0x2ca8] sm:$0xff]  ;;  %v7041_v55 = vld [vmem:[#allocation7 + $0x2c20] sm:$0xff] }
0x2d53   :  { %13844 = vmatprep.subr.bf16.mxu0 %v13843_v44  ;;  %v13880_v44 = vpack.c.bf16 %v7040_v48, %v7039_v46  ;;  %v13882_v53 = vpack.c.bf16 %v7058_v50, %v7057_v52  ;;  %v7071_v46 = vld [vmem:[#allocation7 + $0x2d10] sm:$0xff]  ;;  %v7072_v48 = vld [vmem:[#allocation7 + $0x2d18] sm:$0xff]  ;;  %v7090_v52 = vld [vmem:[#allocation7 + $0x2da8] sm:$0xff] }
0x2d54   :  { %v13912_v50 = vpack.c.bf16 %v7072_v48, %v7071_v46  ;;  %v7345_v48 = vld [vmem:[#allocation7 + $0x2e20] sm:$0xff] }
0x2d56   :  { %13846 = vmatpush3.bf16.msra.mxu0 %v13845_v40  ;;  %v7060_v40 = vld [vmem:[#allocation7 + $0x2cb8] sm:$0xff] }
0x2d57   :  { %13848 = vmatprep.subr.bf16.mxu0 %v13847_v57  ;;  %v13884_v57 = vpack.c.bf16 %v7042_v47, %v7041_v55  ;;  %v13886_v51 = vpack.c.bf16 %v7060_v40, %v7059_v56  ;;  %v7074_v55 = vld [vmem:[#allocation7 + $0x2d28] sm:$0xff]  ;;  %v7091_v47 = vld [vmem:[#allocation7 + $0x2db0] sm:$0xff]  ;;  %v7092_v56 = vld [vmem:[#allocation7 + $0x2db8] sm:$0xff] }
0x2d5a   :  { %13850 = vmatpush3.bf16.msra.mxu0 %v13849_v60  ;;  %v7062_v60 = vld [vmem:[#allocation7 + $0x2cc8] sm:$0xff] }
0x2d5b   :  { %13852 = vmatprep.subr.bf16.mxu0 %v13851_v3  ;;  %v13888_v3 = vpack.c.bf16 %v7044_v61, %v7043_v1  ;;  %v13890_v4 = vpack.c.bf16 %v7062_v60, %v7061_v62  ;;  %v7076_v1 = vld [vmem:[#allocation7 + $0x2d38] sm:$0xff]  ;;  %v7093_v61 = vld [vmem:[#allocation7 + $0x2dc0] sm:$0xff]  ;;  %v7094_v62 = vld [vmem:[#allocation7 + $0x2dc8] sm:$0xff] }
0x2d5e   :  { %13854 = vmatpush3.bf16.msra.mxu0 %v13853_v63 }
0x2d5f   :  { %13856 = vmatprep.subr.bf16.mxu0 %v13855_v8  ;;  %v13894_v8 = vpack.c.bf16 %v7064_v7, %v7063_v6  ;;  %v7096_v6 = vld [vmem:[#allocation7 + $0x2dd8] sm:$0xff] }
0x2d62   :  { %13858 = vmatpush3.bf16.msra.mxu0 %v13857_v11  ;;  %v13896_v11 = vpack.c.bf16 %v7048_v5, %v7047_v9  ;;  %v7080_v9 = vld [vmem:[#allocation7 + $0x2d58] sm:$0xff]  ;;  %v7097_v5 = vld [vmem:[#allocation7 + $0x2de0] sm:$0xff] }
0x2d63   :  { %13860 = vmatprep.subr.bf16.mxu0 %v13859_v12  ;;  %v13898_v12 = vpack.c.bf16 %v7066_v58, %v7065_v10  ;;  %v7098_v10 = vld [vmem:[#allocation7 + $0x2de8] sm:$0xff] }
0x2d66   :  { %13862 = vmatpush3.bf16.msra.mxu0 %v13861_v16  ;;  %v13900_v16 = vpack.c.bf16 %v7050_v18, %v7049_v13  ;;  %v7082_v13 = vld [vmem:[#allocation7 + $0x2d68] sm:$0xff] }
0x2d67   :  { %13864 = vmatprep.subr.bf16.mxu0 %v13863_v17  ;;  %v13902_v17 = vpack.c.bf16 %v7068_v15, %v7067_v14  ;;  %v7099_v14 = vld [vmem:[#allocation7 + $0x2df0] sm:$0xff]  ;;  %v7100_v15 = vld [vmem:[#allocation7 + $0x2df8] sm:$0xff] }
0x2d69   :  { %v11467_v39 = vpop.f32.mrb[66].mxu1 }
0x2d6a   :  { %v11468_v27 = vpop.f32.mrb[67].mxu1  ;;  %13866 = vmatpush3.bf16.msra.mxu0 %v13865_v20  ;;  %v13904_v20 = vpack.c.bf16 %v7052_v19, %v7051_v59  ;;  %v7084_v59 = vld [vmem:[#allocation7 + $0x2d78] sm:$0xff]  ;;  %v7357_v19 = vld [vmem:[#allocation7 + $0x2e80] sm:$0xff] }
0x2d6b   :  { %v15216_v41 = vadd.f32 %v11468_v27, %v11467_v39  ;;  %13868 = vmatprep.subr.bf16.mxu0 %v13867_v30  ;;  %v7038_v39 = vld [vmem:[#allocation7 + $0x2c08] sm:$0xff]  ;;  %v7055_v27 = vld [vmem:[#allocation7 + $0x2c90] sm:$0xff]  ;;  %v13872_v30 = vpack.c.bf16 %v6944_v23, %v6943_v22 }
0x2d6c   :  { %v13876_v43 = vpack.c.bf16 %v7038_v39, %v7037_v38  ;;  %v13878_v45 = vpack.c.bf16 %v7056_v42, %v7055_v27  ;;  %v7069_v38 = vld [vmem:[#allocation7 + $0x2d00] sm:$0xff]  ;;  %v7070_v27 = vld [vmem:[#allocation7 + $0x2d08] sm:$0xff]  ;;  %v7087_v42 = vld [vmem:[#allocation7 + $0x2d90] sm:$0xff] }
0x2d6d   :  { %13873 = vmatpush3.bf16.msra.mxu1 %v13872_v30  ;;  %v9869_v30 = vld [vmem:[#allocation11 + $0x15] ss:$0 sm:$0xff] }
0x2d6e   :  { %13870 = vmatpush3.bf16.msra.mxu0 %v13869_v28  ;;  %v6868_v28 = vadd.f32 %v15216_v41, %v9868_v24 }
0x2d6f   :  { %13875 = vmatprep.subr.bf16.mxu0 %v13874_v29 }
0x2e24   :  { %v6714_v32 = vpop.f32.mrb[60].mxu0 }
0x2e25   :  { %v6715_v33 = vadd.f32 %v9866_v31, %v6714_v32  ;;  %v12322_v35 = vpop.f32.mrb[61].mxu0 }
0x2e27   :  { %v6718_v36 = vmax.f32 %v6715_v33, 0.0 }
0x2e29   :  { %6720 = vrot.lane.b32.xlu0 %v6718_v36, %s14762_s4  ;;  %v7085_v36 = vld [vmem:[#allocation7 + $0x2d80] sm:$0xff] }
0x2e9b   :  { %v6721_v37 = vpop.permute.xlu0 %6720 }
0x2e9c   :  { %6723 = vst.msk [vmem:[#allocation2 + $0x10] sm:$0xff] %vm1800_vm8, %v6721_v37  ;;  %v7086_v37 = vld [vmem:[#allocation7 + $0x2d88] sm:$0xff] }
0x2e9d   :  { %v13906_v39 = vpack.c.bf16 %v7086_v37, %v7085_v36 }
0x2e9f   :  { %13907 = vmatprep.subr.bf16.mxu1 %v13906_v39  ;;  %v7344_v39 = vld [vmem:[#allocation7 + $0x2e18] sm:$0xff] }
0x2ea3   :  { %v6726_v49 = vld [vmem:[#allocation2 + $0x10] sm:$0xff] }
0x2ea4   :  { %6936 = vmatmul.mubr.f32.vlgmr.msra.gmra.mrb[62].mxu0 %v6726_v49  ;;  %v7089_v49 = vld [vmem:[#allocation7 + $0x2da0] sm:$0xff] }
0x2ea5   :  { %13877 = vmatpush3.bf16.msra.mxu0 %v13876_v43  ;;  %7173 = vmatprep.mubr.f32.mxu0 %v15180_v2  ;;  %v7045_v2 = vld [vmem:[#allocation7 + $0x2c40] sm:$0xff]  ;;  %v7088_v43 = vld [vmem:[#allocation7 + $0x2d98] sm:$0xff] }
0x2ea6   :  { %13879 = vmatprep.subr.bf16.mxu0 %v13878_v45  ;;  %v13892_v63 = vpack.c.bf16 %v7046_v54, %v7045_v2  ;;  %v13908_v45 = vpack.c.bf16 %v7070_v27, %v7069_v38  ;;  %v13910_v41 = vpack.c.bf16 %v7088_v43, %v7087_v42  ;;  %v7078_v2 = vld [vmem:[#allocation7 + $0x2d48] sm:$0xff]  ;;  %v7095_v54 = vld [vmem:[#allocation7 + $0x2dd0] sm:$0xff]  ;;  %v7361_v42 = vld [vmem:[#allocation7 + $0x2ea0] sm:$0xff] }
0x2ea7   :  { %v7343_v38 = vld [vmem:[#allocation7 + $0x2e10] sm:$0xff]  ;;  %v7362_v43 = vld [vmem:[#allocation7 + $0x2ea8] sm:$0xff] }
0x2ea8   :  { %v13949_v46 = vpack.c.bf16 %v7362_v43, %v7361_v42  ;;  %v7393_v42 = vld [vmem:[#allocation7 + $0x2fa0] sm:$0xff]  ;;  %v7394_v43 = vld [vmem:[#allocation7 + $0x2fa8] sm:$0xff] }
0x2ea9   :  { %13881 = vmatpush3.bf16.msra.mxu0 %v13880_v44  ;;  %v13914_v44 = vpack.c.bf16 %v7090_v52, %v7089_v49  ;;  %v7346_v49 = vld [vmem:[#allocation7 + $0x2e28] sm:$0xff]  ;;  %v7363_v52 = vld [vmem:[#allocation7 + $0x2eb0] sm:$0xff] }
0x2eaa   :  { %13883 = vmatprep.subr.bf16.mxu0 %v13882_v53  ;;  %v7073_v53 = vld [vmem:[#allocation7 + $0x2d20] sm:$0xff] }
0x2eab   :  { %v13916_v40 = vpack.c.bf16 %v7074_v55, %v7073_v53  ;;  %v7347_v55 = vld [vmem:[#allocation7 + $0x2e30] sm:$0xff] }
0x2ead   :  { %13885 = vmatpush3.bf16.msra.mxu0 %v13884_v57  ;;  %v13918_v57 = vpack.c.bf16 %v7092_v56, %v7091_v47  ;;  %v7348_v47 = vld [vmem:[#allocation7 + $0x2e38] sm:$0xff]  ;;  %v7365_v56 = vld [vmem:[#allocation7 + $0x2ec0] sm:$0xff] }
0x2eae   :  { %13887 = vmatprep.subr.bf16.mxu0 %v13886_v51  ;;  %v7075_v51 = vld [vmem:[#allocation7 + $0x2d30] sm:$0xff] }
0x2eaf   :  { %v13920_v60 = vpack.c.bf16 %v7076_v1, %v7075_v51  ;;  %v7349_v1 = vld [vmem:[#allocation7 + $0x2e40] sm:$0xff] }
0x2eb1   :  { %13889 = vmatpush3.bf16.msra.mxu0 %v13888_v3  ;;  %v13922_v3 = vpack.c.bf16 %v7094_v62, %v7093_v61  ;;  %v7350_v61 = vld [vmem:[#allocation7 + $0x2e48] sm:$0xff]  ;;  %v7367_v62 = vld [vmem:[#allocation7 + $0x2ed0] sm:$0xff] }
0x2eb2   :  { %13891 = vmatprep.subr.bf16.mxu0 %v13890_v4  ;;  %v7077_v4 = vld [vmem:[#allocation7 + $0x2d40] sm:$0xff] }
0x2eb3   :  { %v13924_v7 = vpack.c.bf16 %v7078_v2, %v7077_v4  ;;  %v7351_v2 = vld [vmem:[#allocation7 + $0x2e50] sm:$0xff] }
0x2eb5   :  { %13893 = vmatpush3.bf16.msra.mxu0 %v13892_v63  ;;  %v13926_v63 = vpack.c.bf16 %v7096_v6, %v7095_v54  ;;  %v7352_v54 = vld [vmem:[#allocation7 + $0x2e58] sm:$0xff]  ;;  %v7369_v6 = vld [vmem:[#allocation7 + $0x2ee0] sm:$0xff] }
0x2eb6   :  { %13895 = vmatprep.subr.bf16.mxu0 %v13894_v8  ;;  %v7079_v8 = vld [vmem:[#allocation7 + $0x2d50] sm:$0xff] }
0x2eb7   :  { %v13928_v58 = vpack.c.bf16 %v7080_v9, %v7079_v8  ;;  %v7353_v9 = vld [vmem:[#allocation7 + $0x2e60] sm:$0xff] }
0x2eb9   :  { %13897 = vmatpush3.bf16.msra.mxu0 %v13896_v11  ;;  %v13930_v11 = vpack.c.bf16 %v7098_v10, %v7097_v5  ;;  %v7354_v5 = vld [vmem:[#allocation7 + $0x2e68] sm:$0xff]  ;;  %v7371_v10 = vld [vmem:[#allocation7 + $0x2ef0] sm:$0xff] }
0x2eba   :  { %13899 = vmatprep.subr.bf16.mxu0 %v13898_v12  ;;  %v7081_v12 = vld [vmem:[#allocation7 + $0x2d60] sm:$0xff] }
0x2ebb   :  { %v13932_v18 = vpack.c.bf16 %v7082_v13, %v7081_v12  ;;  %v7355_v13 = vld [vmem:[#allocation7 + $0x2e70] sm:$0xff] }
0x2ebd   :  { %13901 = vmatpush3.bf16.msra.mxu0 %v13900_v16  ;;  %v7083_v16 = vld [vmem:[#allocation7 + $0x2d70] sm:$0xff] }
0x2ebe   :  { %13903 = vmatprep.subr.bf16.mxu0 %v13902_v17  ;;  %v13934_v17 = vpack.c.bf16 %v7100_v15, %v7099_v14  ;;  %v13936_v22 = vpack.c.bf16 %v7084_v59, %v7083_v16  ;;  %v15241_v15 = vld [vmem:[#allocation2] sm:$0xff]  ;;  %v7251_v16 = vld [vmem:[#allocation10 + $0x160] sm:$0xff] }
0x2ec1   :  { %13905 = vmatpush3.bf16.msra.mxu0 %v13904_v20  ;;  %v7358_v20 = vld [vmem:[#allocation7 + $0x2e88] sm:$0xff] }
0x2ec2   :  { %13938 = vmatprep.subr.bf16.mxu0 %v14755_v0  ;;  %v13941_v23 = vpack.c.bf16 %v7358_v20, %v7357_v19  ;;  %v7389_v19 = vld [vmem:[#allocation7 + $0x2f80] sm:$0xff]  ;;  %v7390_v20 = vld [vmem:[#allocation7 + $0x2f88] sm:$0xff] }
0x2ec4   :  { %7174 = vmatmul.mubr.f32.vlgmr.msra.gmra.mrb[64].mxu0 %v15184_v34 }
0x2ec5   :  { %12334 = vmatprep.mubr.msk.f32.mxu0 %vm14757_vm0, %v15223_v21 }
0x2f77   :  { %v11502_v25 = vpop.f32.mrb[62].mxu0 }
0x2f78   :  { %v11503_v26 = vpop.f32.mrb[63].mxu0 }
0x2f79   :  { %v11504_v29 = vadd.f32 %v11503_v26, %v11502_v25 }
0x2f7b   :  { %v6938_v31 = vadd.f32 %v11504_v29, %v6868_v28 }
0x2f7d   :  { %v6941_v32 = vmax.f32 %v6938_v31, 0.0  ;;  %v7341_v31 = vld [vmem:[#allocation7 + $0x2e00] sm:$0xff] }
0x2f7f   :  { %12328 = vmatmul.mubr.msk.f32.vlgmr.msra.gmra.mrb[68].mxu1 %vm485_vm3, %v6941_v32  ;;  %v7342_v32 = vld [vmem:[#allocation7 + $0x2e08] sm:$0xff] }
0x2f80   :  { %7243 = vmatprep.mubr.f32.mxu1 %v15223_v21  ;;  %13909 = vmatpush3.bf16.msra.mxu1 %v13908_v45  ;;  %v13943_v36 = vpack.c.bf16 %v7342_v32, %v7341_v31  ;;  %v15237_v45 = vld [vmem:[#allocation2 + $0x8] sm:$0xff]  ;;  %v7392_v32 = vld [vmem:[#allocation7 + $0x2f98] sm:$0xff] }
0x2f81   :  { %13911 = vmatprep.subr.bf16.mxu1 %v13910_v41  ;;  %v13947_v41 = vpack.c.bf16 %v7344_v39, %v7343_v38  ;;  %v7391_v31 = vld [vmem:[#allocation7 + $0x2f90] sm:$0xff]  ;;  %v7376_v39 = vld [vmem:[#allocation7 + $0x2f18] sm:$0xff] }
0x2f82   :  { %v7375_v38 = vld [vmem:[#allocation7 + $0x2f10] sm:$0xff] }
0x2f84   :  { %13913 = vmatpush3.bf16.msra.mxu1 %v13912_v50  ;;  %v7364_v50 = vld [vmem:[#allocation7 + $0x2eb8] sm:$0xff] }
0x2f85   :  { %13915 = vmatprep.subr.bf16.mxu1 %v13914_v44  ;;  %v13951_v44 = vpack.c.bf16 %v7346_v49, %v7345_v48  ;;  %v13953_v53 = vpack.c.bf16 %v7364_v50, %v7363_v52  ;;  %v7378_v48 = vld [vmem:[#allocation7 + $0x2f28] sm:$0xff]  ;;  %v7395_v49 = vld [vmem:[#allocation7 + $0x2fb0] sm:$0xff]  ;;  %v7396_v52 = vld [vmem:[#allocation7 + $0x2fb8] sm:$0xff] }
0x2f88   :  { %13917 = vmatpush3.bf16.msra.mxu1 %v13916_v40  ;;  %v7366_v40 = vld [vmem:[#allocation7 + $0x2ec8] sm:$0xff] }
0x2f89   :  { %13919 = vmatprep.subr.bf16.mxu1 %v13918_v57  ;;  %v13955_v57 = vpack.c.bf16 %v7348_v47, %v7347_v55  ;;  %v13957_v51 = vpack.c.bf16 %v7366_v40, %v7365_v56  ;;  %v7380_v55 = vld [vmem:[#allocation7 + $0x2f38] sm:$0xff]  ;;  %v7397_v47 = vld [vmem:[#allocation7 + $0x2fc0] sm:$0xff]  ;;  %v7398_v56 = vld [vmem:[#allocation7 + $0x2fc8] sm:$0xff] }
0x2f8c   :  { %13921 = vmatpush3.bf16.msra.mxu1 %v13920_v60  ;;  %v7368_v60 = vld [vmem:[#allocation7 + $0x2ed8] sm:$0xff] }
0x2f8d   :  { %13923 = vmatprep.subr.bf16.mxu1 %v13922_v3  ;;  %v13959_v3 = vpack.c.bf16 %v7350_v61, %v7349_v1  ;;  %v13961_v4 = vpack.c.bf16 %v7368_v60, %v7367_v62  ;;  %v7382_v1 = vld [vmem:[#allocation7 + $0x2f48] sm:$0xff] }
0x2f90   :  { %13925 = vmatpush3.bf16.msra.mxu1 %v13924_v7  ;;  %v7370_v7 = vld [vmem:[#allocation7 + $0x2ee8] sm:$0xff] }
0x2f91   :  { %13927 = vmatprep.subr.bf16.mxu1 %v13926_v63  ;;  %v13963_v63 = vpack.c.bf16 %v7352_v54, %v7351_v2  ;;  %v13965_v8 = vpack.c.bf16 %v7370_v7, %v7369_v6  ;;  %v7400_v2 = vld [vmem:[#allocation7 + $0x2fd8] sm:$0xff]  ;;  %v7383_v6 = vld [vmem:[#allocation7 + $0x2f50] sm:$0xff] }
0x2f92   :  { %v7384_v7 = vld [vmem:[#allocation7 + $0x2f58] sm:$0xff] }
0x2f94   :  { %13929 = vmatpush3.bf16.msra.mxu1 %v13928_v58  ;;  %v7372_v58 = vld [vmem:[#allocation7 + $0x2ef8] sm:$0xff] }
0x2f95   :  { %13931 = vmatprep.subr.bf16.mxu1 %v13930_v11  ;;  %v13967_v11 = vpack.c.bf16 %v7354_v5, %v7353_v9  ;;  %v13969_v12 = vpack.c.bf16 %v7372_v58, %v7371_v10  ;;  %v7402_v9 = vld [vmem:[#allocation7 + $0x2fe8] sm:$0xff]  ;;  %v7385_v10 = vld [vmem:[#allocation7 + $0x2f60] sm:$0xff] }
0x2f96   :  { %v7386_v58 = vld [vmem:[#allocation7 + $0x2f68] sm:$0xff] }
0x2f97   :  { %v11540_v34 = vpop.f32.mrb[64].mxu0 }
0x2f98   :  { %v11541_v33 = vpop.f32.mrb[65].mxu0  ;;  %13933 = vmatpush3.bf16.msra.mxu1 %v13932_v18  ;;  %v7356_v18 = vld [vmem:[#allocation7 + $0x2e78] sm:$0xff] }
0x2f99   :  { %v15230_v35 = vadd.f32 %v11541_v33, %v11540_v34  ;;  %13935 = vmatprep.subr.bf16.mxu1 %v13934_v17  ;;  %v7359_v34 = vld [vmem:[#allocation7 + $0x2e90] sm:$0xff]  ;;  %v7360_v33 = vld [vmem:[#allocation7 + $0x2e98] sm:$0xff]  ;;  %v13971_v14 = vpack.c.bf16 %v7356_v18, %v7355_v13  ;;  %v7252_v17 = vld [vmem:[#allocation10 + $0x168] sm:$0xff] }
0x2f9a   :  { %v13945_v37 = vpack.c.bf16 %v7360_v33, %v7359_v34  ;;  %v13939_v59 = vpack.c.bf16 %v7252_v17, %v7251_v16  ;;  %v7404_v13 = vld [vmem:[#allocation7 + $0x2ff8] sm:$0xff]  ;;  %v7387_v18 = vld [vmem:[#allocation7 + $0x2f70] sm:$0xff] }
0x2f9b   :  { %v7388_v16 = vld [vmem:[#allocation7 + $0x2f78] sm:$0xff] }
0x2f9c   :  { %13937 = vmatpush3.bf16.msra.mxu1 %v13936_v22  ;;  %13940 = vmatpush3.bf16.msra.mxu0 %v13939_v59  ;;  %v13973_v22 = vpack.c.bf16 %v7390_v20, %v7389_v19  ;;  %v14003_v17 = vpack.c.bf16 %v7388_v16, %v7387_v18  ;;  %v7665_v59 = vld [vmem:[#allocation7 + $0x3080] sm:$0xff]  ;;  %v7666_v19 = vld [vmem:[#allocation7 + $0x3088] sm:$0xff] }
0x2f9d   :  { %13942 = vmatprep.subr.bf16.mxu1 %v13941_v23  ;;  %v9871_v23 = vld [vmem:[#allocation8 + $0x16] ss:$0 sm:$0xff]  ;;  %v14008_v20 = vpack.c.bf16 %v7666_v19, %v7665_v59  ;;  %v7555_v18 = vld [vmem:[#allocation10 + $0x170] sm:$0xff] }
0x2f9e   :  { %13974 = vmatprep.subr.bf16.mxu0 %v13973_v22  ;;  %v9872_v22 = vld [vmem:[#allocation11 + $0x16] ss:$0 sm:$0xff] }
0x3052   :  { %v7022_v24 = vpop.f32.mrb[68].mxu1 }
0x3053   :  { %v7023_v25 = vadd.f32 %v9869_v30, %v7022_v24  ;;  %v12329_v26 = vpop.f32.mrb[69].mxu1 }
0x3055   :  { %v7026_v28 = vmax.f32 %v7023_v25, 0.0  ;;  %v7176_v25 = vadd.f32 %v15230_v35, %v9871_v23  ;;  %v7377_v35 = vld [vmem:[#allocation7 + $0x2f20] sm:$0xff] }
0x3056   :  { %v13983_v50 = vpack.c.bf16 %v7378_v48, %v7377_v35  ;;  %v7671_v35 = vld [vmem:[#allocation7 + $0x30b0] sm:$0xff]  ;;  %v7672_v48 = vld [vmem:[#allocation7 + $0x30b8] sm:$0xff] }
0x3057   :  { %7028 = vrot.lane.b32.xlu1 %v7026_v28, %s14763_s20  ;;  %v7373_v28 = vld [vmem:[#allocation7 + $0x2f00] sm:$0xff] }
0x30c9   :  { %v7029_v29 = vpop.permute.xlu1 %7028 }
0x30ca   :  { %7031 = vst.msk [vmem:[#allocation2 + $0x10] sm:$0xff] %vm2109_vm9, %v7029_v29  ;;  %v7374_v29 = vld [vmem:[#allocation7 + $0x2f08] sm:$0xff] }
0x30cb   :  { %v13975_v33 = vpack.c.bf16 %v7374_v29, %v7373_v28  ;;  %v7650_v28 = vld [vmem:[#allocation7 + $0x3008] sm:$0xff]  ;;  %v7667_v29 = vld [vmem:[#allocation7 + $0x3090] sm:$0xff] }
0x30d1   :  { %v15234_v27 = vld [vmem:[#allocation2 + $0x10] sm:$0xff] }
0x30d2   :  { %7244 = vmatmul.mubr.f32.vlgmr.msra.gmra.mrb[70].mxu1 %v15234_v27 }
0x30d3   :  { %13944 = vmatpush3.bf16.msra.mxu1 %v13943_v36  ;;  %7477 = vmatprep.mubr.f32.mxu1 %v15237_v45 }
0x30d4   :  { %13946 = vmatprep.subr.bf16.mxu1 %v13945_v37  ;;  %v13977_v37 = vpack.c.bf16 %v7392_v32, %v7391_v31  ;;  %v7668_v31 = vld [vmem:[#allocation7 + $0x3098] sm:$0xff] }
0x30d7   :  { %13948 = vmatpush3.bf16.msra.mxu1 %v13947_v41  ;;  %v13979_v41 = vpack.c.bf16 %v7376_v39, %v7375_v38  ;;  %v7669_v38 = vld [vmem:[#allocation7 + $0x30a0] sm:$0xff]  ;;  %v7670_v39 = vld [vmem:[#allocation7 + $0x30a8] sm:$0xff] }
0x30d8   :  { %13950 = vmatprep.subr.bf16.mxu1 %v13949_v46  ;;  %v13981_v46 = vpack.c.bf16 %v7394_v43, %v7393_v42  ;;  %v14016_v43 = vpack.c.bf16 %v7670_v39, %v7669_v38  ;;  %v7683_v39 = vld [vmem:[#allocation7 + $0x3110] sm:$0xff] }
0x30db   :  { %13952 = vmatpush3.bf16.msra.mxu1 %v13951_v44  ;;  %v13985_v44 = vpack.c.bf16 %v7396_v52, %v7395_v49  ;;  %v14020_v52 = vpack.c.bf16 %v7672_v48, %v7671_v35  ;;  %v7685_v35 = vld [vmem:[#allocation7 + $0x3120] sm:$0xff]  ;;  %v7686_v48 = vld [vmem:[#allocation7 + $0x3128] sm:$0xff] }
0x30dc   :  { %13954 = vmatprep.subr.bf16.mxu1 %v13953_v53  ;;  %v7379_v53 = vld [vmem:[#allocation7 + $0x2f30] sm:$0xff] }
0x30dd   :  { %v13987_v40 = vpack.c.bf16 %v7380_v55, %v7379_v53  ;;  %v7673_v53 = vld [vmem:[#allocation7 + $0x30c0] sm:$0xff]  ;;  %v7674_v55 = vld [vmem:[#allocation7 + $0x30c8] sm:$0xff] }
0x30df   :  { %13956 = vmatpush3.bf16.msra.mxu1 %v13955_v57  ;;  %v13989_v57 = vpack.c.bf16 %v7398_v56, %v7397_v47  ;;  %v14024_v56 = vpack.c.bf16 %v7674_v55, %v7673_v53  ;;  %v7687_v53 = vld [vmem:[#allocation7 + $0x3130] sm:$0xff]  ;;  %v7688_v55 = vld [vmem:[#allocation7 + $0x3138] sm:$0xff] }
0x30e0   :  { %13958 = vmatprep.subr.bf16.mxu1 %v13957_v51  ;;  %v7381_v51 = vld [vmem:[#allocation7 + $0x2f40] sm:$0xff] }
0x30e1   :  { %v13991_v61 = vpack.c.bf16 %v7382_v1, %v7381_v51  ;;  %v7675_v51 = vld [vmem:[#allocation7 + $0x30d0] sm:$0xff]  ;;  %v7676_v1 = vld [vmem:[#allocation7 + $0x30d8] sm:$0xff] }
0x30e3   :  { %13960 = vmatpush3.bf16.msra.mxu1 %v13959_v3 }
0x30e4   :  { %13962 = vmatprep.subr.bf16.mxu1 %v13961_v4  ;;  %v7399_v4 = vld [vmem:[#allocation7 + $0x2fd0] sm:$0xff] }
0x30e5   :  { %v13993_v54 = vpack.c.bf16 %v7400_v2, %v7399_v4  ;;  %v7660_v4 = vld [vmem:[#allocation7 + $0x3058] sm:$0xff]  ;;  %v7677_v2 = vld [vmem:[#allocation7 + $0x30e0] sm:$0xff] }
0x30e7   :  { %13964 = vmatpush3.bf16.msra.mxu1 %v13963_v63  ;;  %v13995_v63 = vpack.c.bf16 %v7384_v7, %v7383_v6 }
0x30e8   :  { %13966 = vmatprep.subr.bf16.mxu1 %v13965_v8  ;;  %v7401_v8 = vld [vmem:[#allocation7 + $0x2fe0] sm:$0xff] }
0x30e9   :  { %v13997_v5 = vpack.c.bf16 %v7402_v9, %v7401_v8  ;;  %v7662_v8 = vld [vmem:[#allocation7 + $0x3068] sm:$0xff]  ;;  %v7679_v9 = vld [vmem:[#allocation7 + $0x30f0] sm:$0xff] }
0x30eb   :  { %13968 = vmatpush3.bf16.msra.mxu1 %v13967_v11  ;;  %v13999_v11 = vpack.c.bf16 %v7386_v58, %v7385_v10 }
0x30ec   :  { %13970 = vmatprep.subr.bf16.mxu1 %v13969_v12  ;;  %v7403_v12 = vld [vmem:[#allocation7 + $0x2ff0] sm:$0xff] }
0x30ef   :  { %13972 = vmatpush3.bf16.msra.mxu1 %v13971_v14  ;;  %v14001_v14 = vpack.c.bf16 %v7404_v13, %v7403_v12  ;;  %v7664_v12 = vld [vmem:[#allocation7 + $0x3078] sm:$0xff] }
0x30f0   :  { %14005 = vmatprep.subr.bf16.mxu1 %v14755_v0 }
0x30f2   :  { %7478 = vmatmul.mubr.f32.vlgmr.msra.gmra.mrb[72].mxu1 %v15241_v15 }
0x30f3   :  { %12341 = vmatprep.mubr.msk.f32.mxu1 %vm14757_vm0, %v15223_v21 }
0x31a5   :  { %v11575_v30 = vpop.f32.mrb[70].mxu1 }
0x31a6   :  { %v11576_v24 = vpop.f32.mrb[71].mxu1 }
0x31a7   :  { %v11577_v26 = vadd.f32 %v11576_v24, %v11575_v30 }
0x31a9   :  { %v7246_v34 = vadd.f32 %v11577_v26, %v7176_v25  ;;  %v7649_v26 = vld [vmem:[#allocation7 + $0x3000] sm:$0xff] }
0x31aa   :  { %v14010_v32 = vpack.c.bf16 %v7650_v28, %v7649_v26  ;;  %v7697_v28 = vld [vmem:[#allocation7 + $0x3180] sm:$0xff] }
0x31ab   :  { %v7249_v36 = vmax.f32 %v7246_v34, 0.0 }
0x31ad   :  { %12335 = vmatmul.mubr.msk.f32.vlgmr.msra.gmra.mrb[66].mxu0 %vm485_vm3, %v7249_v36  ;;  %v7651_v36 = vld [vmem:[#allocation7 + $0x3010] sm:$0xff] }
0x31ae   :  { %13976 = vmatpush3.bf16.msra.mxu0 %v13975_v33  ;;  %v14012_v33 = vpack.c.bf16 %v7668_v31, %v7667_v29  ;;  %v7698_v29 = vld [vmem:[#allocation7 + $0x3188] sm:$0xff]  ;;  %v7681_v31 = vld [vmem:[#allocation7 + $0x3100] sm:$0xff] }
0x31af   :  { %13978 = vmatprep.subr.bf16.mxu0 %v13977_v37  ;;  %v7652_v37 = vld [vmem:[#allocation7 + $0x3018] sm:$0xff] }
0x31b0   :  { %v14014_v42 = vpack.c.bf16 %v7652_v37, %v7651_v36  ;;  %v7700_v36 = vld [vmem:[#allocation7 + $0x3198] sm:$0xff] }
0x31b2   :  { %13980 = vmatpush3.bf16.msra.mxu0 %v13979_v41  ;;  %v7653_v41 = vld [vmem:[#allocation7 + $0x3020] sm:$0xff] }
0x31b3   :  { %13982 = vmatprep.subr.bf16.mxu0 %v13981_v46  ;;  %v7654_v46 = vld [vmem:[#allocation7 + $0x3028] sm:$0xff] }
0x31b4   :  { %v14018_v49 = vpack.c.bf16 %v7654_v46, %v7653_v41 }
0x31b6   :  { %13984 = vmatpush3.bf16.msra.mxu0 %v13983_v50  ;;  %v7655_v50 = vld [vmem:[#allocation7 + $0x3030] sm:$0xff] }
0x31b7   :  { %13986 = vmatprep.subr.bf16.mxu0 %v13985_v44  ;;  %v7656_v44 = vld [vmem:[#allocation7 + $0x3038] sm:$0xff] }
0x31b8   :  { %v14022_v47 = vpack.c.bf16 %v7656_v44, %v7655_v50  ;;  %v14050_v50 = vpack.c.bf16 %v7686_v48, %v7685_v35  ;;  %v7980_v35 = vld [vmem:[#allocation7 + $0x32b8] sm:$0xff] }
0x31ba   :  { %13988 = vmatpush3.bf16.msra.mxu0 %v13987_v40  ;;  %v7657_v40 = vld [vmem:[#allocation7 + $0x3040] sm:$0xff] }
0x31bb   :  { %13990 = vmatprep.subr.bf16.mxu0 %v13989_v57  ;;  %v7658_v57 = vld [vmem:[#allocation7 + $0x3048] sm:$0xff] }
0x31be   :  { %13992 = vmatpush3.bf16.msra.mxu0 %v13991_v61  ;;  %v14026_v61 = vpack.c.bf16 %v7658_v57, %v7657_v40  ;;  %v14054_v40 = vpack.c.bf16 %v7688_v55, %v7687_v53  ;;  %v7982_v53 = vld [vmem:[#allocation7 + $0x32c8] sm:$0xff] }
0x31bf   :  { %13994 = vmatprep.subr.bf16.mxu0 %v13993_v54  ;;  %v7678_v54 = vld [vmem:[#allocation7 + $0x30e8] sm:$0xff] }
0x31c0   :  { %v14032_v7 = vpack.c.bf16 %v7678_v54, %v7677_v2  ;;  %v7691_v2 = vld [vmem:[#allocation7 + $0x3150] sm:$0xff]  ;;  %v7692_v54 = vld [vmem:[#allocation7 + $0x3158] sm:$0xff] }
0x31c2   :  { %13996 = vmatpush3.bf16.msra.mxu0 %v13995_v63  ;;  %v7661_v63 = vld [vmem:[#allocation7 + $0x3060] sm:$0xff] }
0x31c3   :  { %13998 = vmatprep.subr.bf16.mxu0 %v13997_v5  ;;  %v7680_v5 = vld [vmem:[#allocation7 + $0x30f8] sm:$0xff]  ;;  %v14034_v10 = vpack.c.bf16 %v7662_v8, %v7661_v63  ;;  %v7710_v63 = vld [vmem:[#allocation7 + $0x31e8] sm:$0xff] }
0x31c4   :  { %v14036_v58 = vpack.c.bf16 %v7680_v5, %v7679_v9  ;;  %v7693_v9 = vld [vmem:[#allocation7 + $0x3160] sm:$0xff]  ;;  %v7694_v5 = vld [vmem:[#allocation7 + $0x3168] sm:$0xff] }
0x31c5   :  { %v11613_v62 = vpop.f32.mrb[72].mxu1 }
0x31c6   :  { %v11614_v60 = vpop.f32.mrb[73].mxu1  ;;  %14000 = vmatpush3.bf16.msra.mxu0 %v13999_v11  ;;  %v7663_v11 = vld [vmem:[#allocation7 + $0x3070] sm:$0xff] }
0x31c7   :  { %v15248_v3 = vadd.f32 %v11614_v60, %v11613_v62  ;;  %14002 = vmatprep.subr.bf16.mxu0 %v14001_v14  ;;  %v14028_v62 = vpack.c.bf16 %v7676_v1, %v7675_v51  ;;  %v7659_v60 = vld [vmem:[#allocation7 + $0x3050] sm:$0xff]  ;;  %v14038_v13 = vpack.c.bf16 %v7664_v12, %v7663_v11  ;;  %v7689_v51 = vld [vmem:[#allocation7 + $0x3140] sm:$0xff]  ;;  %v7690_v1 = vld [vmem:[#allocation7 + $0x3148] sm:$0xff] }
0x31c8   :  { %v14030_v6 = vpack.c.bf16 %v7660_v4, %v7659_v60  ;;  %v7556_v14 = vld [vmem:[#allocation10 + $0x178] sm:$0xff]  ;;  %v14058_v60 = vpack.c.bf16 %v7690_v1, %v7689_v51 }
0x31c9   :  { %v14006_v16 = vpack.c.bf16 %v7556_v14, %v7555_v18  ;;  %v7712_v11 = vld [vmem:[#allocation7 + $0x31f8] sm:$0xff]  ;;  %v7695_v12 = vld [vmem:[#allocation7 + $0x3170] sm:$0xff] }
0x31ca   :  { %14004 = vmatpush3.bf16.msra.mxu0 %v14003_v17  ;;  %v9874_v17 = vld [vmem:[#allocation8 + $0x17] ss:$0 sm:$0xff]  ;;  %v7696_v18 = vld [vmem:[#allocation7 + $0x3178] sm:$0xff] }
0x31cb   :  { %14009 = vmatprep.subr.bf16.mxu0 %v14008_v20  ;;  %14007 = vmatpush3.bf16.msra.mxu1 %v14006_v16  ;;  %v7480_v20 = vadd.f32 %v15248_v3, %v9874_v17  ;;  %v7684_v3 = vld [vmem:[#allocation7 + $0x3118] sm:$0xff]  ;;  %v14070_v14 = vpack.c.bf16 %v7696_v18, %v7695_v12  ;;  %v9875_v16 = vld [vmem:[#allocation11 + $0x17] ss:$0 sm:$0xff]  ;;  %v7973_v17 = vld [vmem:[#allocation7 + $0x3280] sm:$0xff] }
0x31cc   :  { %v14046_v41 = vpack.c.bf16 %v7684_v3, %v7683_v39  ;;  %v7978_v39 = vld [vmem:[#allocation7 + $0x32a8] sm:$0xff]  ;;  %v7984_v51 = vld [vmem:[#allocation7 + $0x32d8] sm:$0xff] }
0x31cd   :  { %v7864_v18 = vld [vmem:[#allocation10 + $0x188] sm:$0xff] }
0x3280   :  { %v7330_v23 = vpop.f32.mrb[66].mxu0 }
0x3281   :  { %v7331_v30 = vadd.f32 %v9872_v22, %v7330_v23  ;;  %v12336_v24 = vpop.f32.mrb[67].mxu0 }
0x3283   :  { %v7334_v25 = vmax.f32 %v7331_v30, 0.0 }
0x3285   :  { %7335 = vst.msk [vmem:[#allocation2 + $0x18] sm:$0xff] %vm485_vm3, %v7334_v25 }
0x328c   :  { %v7339_v34 = vld [vmem:[#allocation2 + $0x18] sm:$0xff] }
0x328d   :  { %7547 = vmatprep.mubr.f32.mxu0 %v7339_v34  ;;  %v7682_v34 = vld [vmem:[#allocation7 + $0x3108] sm:$0xff] }
0x328e   :  { %7548 = vmatmul.mubr.f32.vlgmr.msra.gmra.mrb[68].mxu0 %v15234_v27  ;;  %v14042_v37 = vpack.c.bf16 %v7682_v34, %v7681_v31  ;;  %v7976_v31 = vld [vmem:[#allocation7 + $0x3298] sm:$0xff] }
0x328f   :  { %14011 = vmatpush3.bf16.msra.mxu0 %v14010_v32  ;;  %7785 = vmatprep.mubr.f32.mxu0 %v15237_v45  ;;  %v14040_v32 = vpack.c.bf16 %v7698_v29, %v7697_v28  ;;  %v7958_v28 = vld [vmem:[#allocation7 + $0x3208] sm:$0xff]  ;;  %v7975_v29 = vld [vmem:[#allocation7 + $0x3290] sm:$0xff] }
0x3290   :  { %14013 = vmatprep.subr.bf16.mxu0 %v14012_v33  ;;  %v7699_v33 = vld [vmem:[#allocation7 + $0x3190] sm:$0xff] }
0x3291   :  { %v14044_v38 = vpack.c.bf16 %v7700_v36, %v7699_v33  ;;  %14041 = vmatprep.subr.bf16.mxu1 %v14040_v32  ;;  %v14079_v33 = vpack.c.bf16 %v7976_v31, %v7975_v29  ;;  %v7959_v36 = vld [vmem:[#allocation7 + $0x3210] sm:$0xff]  ;;  %v8006_v29 = vld [vmem:[#allocation7 + $0x3388] sm:$0xff]  ;;  %v7989_v31 = vld [vmem:[#allocation7 + $0x3300] sm:$0xff] }
0x3293   :  { %14015 = vmatpush3.bf16.msra.mxu0 %v14014_v42  ;;  %v7701_v42 = vld [vmem:[#allocation7 + $0x31a0] sm:$0xff] }
0x3294   :  { %14017 = vmatprep.subr.bf16.mxu0 %v14016_v43  ;;  %v7702_v43 = vld [vmem:[#allocation7 + $0x31a8] sm:$0xff] }
0x3295   :  { %v14048_v46 = vpack.c.bf16 %v7702_v43, %v7701_v42  ;;  %v7961_v43 = vld [vmem:[#allocation7 + $0x3220] sm:$0xff] }
0x3297   :  { %14019 = vmatpush3.bf16.msra.mxu0 %v14018_v49  ;;  %v7703_v49 = vld [vmem:[#allocation7 + $0x31b0] sm:$0xff] }
0x3298   :  { %14021 = vmatprep.subr.bf16.mxu0 %v14020_v52  ;;  %v7704_v52 = vld [vmem:[#allocation7 + $0x31b8] sm:$0xff] }
0x3299   :  { %v14052_v44 = vpack.c.bf16 %v7704_v52, %v7703_v49  ;;  %v7963_v52 = vld [vmem:[#allocation7 + $0x3230] sm:$0xff] }
0x329b   :  { %14023 = vmatpush3.bf16.msra.mxu0 %v14022_v47  ;;  %v7705_v47 = vld [vmem:[#allocation7 + $0x31c0] sm:$0xff] }
0x329c   :  { %14025 = vmatprep.subr.bf16.mxu0 %v14024_v56  ;;  %v7706_v56 = vld [vmem:[#allocation7 + $0x31c8] sm:$0xff] }
0x329d   :  { %v14056_v57 = vpack.c.bf16 %v7706_v56, %v7705_v47  ;;  %v7965_v56 = vld [vmem:[#allocation7 + $0x3240] sm:$0xff] }
0x329f   :  { %14027 = vmatpush3.bf16.msra.mxu0 %v14026_v61  ;;  %v7707_v61 = vld [vmem:[#allocation7 + $0x31d0] sm:$0xff] }
0x32a0   :  { %14029 = vmatprep.subr.bf16.mxu0 %v14028_v62  ;;  %v7708_v62 = vld [vmem:[#allocation7 + $0x31d8] sm:$0xff] }
0x32a1   :  { %v14060_v4 = vpack.c.bf16 %v7708_v62, %v7707_v61  ;;  %v7967_v62 = vld [vmem:[#allocation7 + $0x3250] sm:$0xff] }
0x32a3   :  { %14031 = vmatpush3.bf16.msra.mxu0 %v14030_v6  ;;  %v14062_v6 = vpack.c.bf16 %v7692_v54, %v7691_v2  ;;  %v7986_v2 = vld [vmem:[#allocation7 + $0x32e8] sm:$0xff] }
0x32a4   :  { %14033 = vmatprep.subr.bf16.mxu0 %v14032_v7  ;;  %v7709_v7 = vld [vmem:[#allocation7 + $0x31e0] sm:$0xff] }
0x32a5   :  { %v14064_v8 = vpack.c.bf16 %v7710_v63, %v7709_v7  ;;  %v7969_v7 = vld [vmem:[#allocation7 + $0x3260] sm:$0xff]  ;;  %v7970_v63 = vld [vmem:[#allocation7 + $0x3268] sm:$0xff] }
0x32a7   :  { %14035 = vmatpush3.bf16.msra.mxu0 %v14034_v10  ;;  %v14066_v10 = vpack.c.bf16 %v7694_v5, %v7693_v9  ;;  %v7988_v9 = vld [vmem:[#allocation7 + $0x32f8] sm:$0xff]  ;;  %v14101_v5 = vpack.c.bf16 %v7970_v63, %v7969_v7  ;;  %v8018_v7 = vld [vmem:[#allocation7 + $0x33e8] sm:$0xff] }
0x32a8   :  { %14037 = vmatprep.subr.bf16.mxu0 %v14036_v58  ;;  %v7711_v58 = vld [vmem:[#allocation7 + $0x31f0] sm:$0xff] }
0x32ab   :  { %14039 = vmatpush3.bf16.msra.mxu0 %v14038_v13  ;;  %v14068_v13 = vpack.c.bf16 %v7712_v11, %v7711_v58  ;;  %v7971_v58 = vld [vmem:[#allocation7 + $0x3270] sm:$0xff]  ;;  %v7972_v11 = vld [vmem:[#allocation7 + $0x3278] sm:$0xff] }
0x32ac   :  { %14072 = vmatprep.subr.bf16.mxu0 %v14755_v0  ;;  %v14105_v12 = vpack.c.bf16 %v7972_v11, %v7971_v58  ;;  %v8020_v58 = vld [vmem:[#allocation7 + $0x33f8] sm:$0xff]  ;;  %v8003_v11 = vld [vmem:[#allocation7 + $0x3370] sm:$0xff] }
0x32ae   :  { %7786 = vmatmul.mubr.f32.vlgmr.msra.gmra.mrb[70].mxu0 %v15241_v15 }
0x32af   :  { %12348 = vmatprep.mubr.msk.f32.mxu0 %vm14757_vm0, %v15223_v21 }
0x3361   :  { %v11648_v59 = vpop.f32.mrb[68].mxu0 }
0x3362   :  { %v11649_v19 = vpop.f32.mrb[69].mxu0 }
0x3363   :  { %v11650_v22 = vadd.f32 %v11649_v19, %v11648_v59  ;;  %v7974_v59 = vld [vmem:[#allocation7 + $0x3288] sm:$0xff] }
0x3364   :  { %v14075_v19 = vpack.c.bf16 %v7974_v59, %v7973_v17 }
0x3365   :  { %v7550_v23 = vadd.f32 %v11650_v22, %v7480_v20 }
0x3367   :  { %v7553_v30 = vmax.f32 %v7550_v23, 0.0 }
0x3369   :  { %12342 = vmatmul.mubr.msk.f32.vlgmr.msra.gmra.mrb[74].mxu1 %vm485_vm3, %v7553_v30 }
0x336a   :  { %14043 = vmatpush3.bf16.msra.mxu1 %v14042_v37  ;;  %v7960_v37 = vld [vmem:[#allocation7 + $0x3218] sm:$0xff] }
0x336b   :  { %14045 = vmatprep.subr.bf16.mxu1 %v14044_v38  ;;  %v7977_v38 = vld [vmem:[#allocation7 + $0x32a0] sm:$0xff]  ;;  %v14081_v3 = vpack.c.bf16 %v7960_v37, %v7959_v36  ;;  %v8008_v36 = vld [vmem:[#allocation7 + $0x3398] sm:$0xff] }
0x336c   :  { %v14083_v42 = vpack.c.bf16 %v7978_v39, %v7977_v38  ;;  %v7991_v39 = vld [vmem:[#allocation7 + $0x3310] sm:$0xff] }
0x336e   :  { %14047 = vmatpush3.bf16.msra.mxu1 %v14046_v41  ;;  %v7962_v41 = vld [vmem:[#allocation7 + $0x3228] sm:$0xff] }
0x336f   :  { %14049 = vmatprep.subr.bf16.mxu1 %v14048_v46  ;;  %v7979_v46 = vld [vmem:[#allocation7 + $0x32b0] sm:$0xff]  ;;  %v14085_v48 = vpack.c.bf16 %v7962_v41, %v7961_v43 }
0x3370   :  { %v14087_v49 = vpack.c.bf16 %v7980_v35, %v7979_v46  ;;  %v7993_v46 = vld [vmem:[#allocation7 + $0x3320] sm:$0xff]  ;;  %v7994_v35 = vld [vmem:[#allocation7 + $0x3328] sm:$0xff] }
0x3372   :  { %14051 = vmatpush3.bf16.msra.mxu1 %v14050_v50  ;;  %v7964_v50 = vld [vmem:[#allocation7 + $0x3238] sm:$0xff] }
0x3373   :  { %14053 = vmatprep.subr.bf16.mxu1 %v14052_v44  ;;  %v7981_v44 = vld [vmem:[#allocation7 + $0x32c0] sm:$0xff]  ;;  %v14089_v55 = vpack.c.bf16 %v7964_v50, %v7963_v52  ;;  %v14117_v52 = vpack.c.bf16 %v7994_v35, %v7993_v46  ;;  %v8288_v46 = vld [vmem:[#allocation7 + $0x34b8] sm:$0xff] }
0x3374   :  { %v14091_v47 = vpack.c.bf16 %v7982_v53, %v7981_v44  ;;  %v7995_v44 = vld [vmem:[#allocation7 + $0x3330] sm:$0xff]  ;;  %v7996_v53 = vld [vmem:[#allocation7 + $0x3338] sm:$0xff] }
0x3376   :  { %14055 = vmatpush3.bf16.msra.mxu1 %v14054_v40  ;;  %v7966_v40 = vld [vmem:[#allocation7 + $0x3248] sm:$0xff] }
0x3377   :  { %14057 = vmatprep.subr.bf16.mxu1 %v14056_v57  ;;  %v7983_v57 = vld [vmem:[#allocation7 + $0x32d0] sm:$0xff]  ;;  %v14093_v1 = vpack.c.bf16 %v7966_v40, %v7965_v56  ;;  %v14121_v56 = vpack.c.bf16 %v7996_v53, %v7995_v44  ;;  %v8290_v44 = vld [vmem:[#allocation7 + $0x34c8] sm:$0xff] }
0x3378   :  { %v14095_v61 = vpack.c.bf16 %v7984_v51, %v7983_v57  ;;  %v7997_v57 = vld [vmem:[#allocation7 + $0x3340] sm:$0xff]  ;;  %v7998_v51 = vld [vmem:[#allocation7 + $0x3348] sm:$0xff] }
0x337a   :  { %14059 = vmatpush3.bf16.msra.mxu1 %v14058_v60  ;;  %v7968_v60 = vld [vmem:[#allocation7 + $0x3258] sm:$0xff] }
0x337b   :  { %14061 = vmatprep.subr.bf16.mxu1 %v14060_v4  ;;  %v7985_v4 = vld [vmem:[#allocation7 + $0x32e0] sm:$0xff]  ;;  %v14097_v54 = vpack.c.bf16 %v7968_v60, %v7967_v62  ;;  %v14125_v62 = vpack.c.bf16 %v7998_v51, %v7997_v57  ;;  %v8275_v51 = vld [vmem:[#allocation7 + $0x3450] sm:$0xff] }
0x337e   :  { %14063 = vmatpush3.bf16.msra.mxu1 %v14062_v6  ;;  %v14099_v6 = vpack.c.bf16 %v7986_v2, %v7985_v4  ;;  %v7999_v4 = vld [vmem:[#allocation7 + $0x3350] sm:$0xff]  ;;  %v8000_v2 = vld [vmem:[#allocation7 + $0x3358] sm:$0xff] }
0x337f   :  { %14065 = vmatprep.subr.bf16.mxu1 %v14064_v8  ;;  %v7987_v8 = vld [vmem:[#allocation7 + $0x32f0] sm:$0xff] }
0x3381   :  { %v11686_v24 = vpop.f32.mrb[70].mxu0 }
0x3382   :  { %v11687_v25 = vpop.f32.mrb[71].mxu0  ;;  %14067 = vmatpush3.bf16.msra.mxu1 %v14066_v10  ;;  %v14103_v10 = vpack.c.bf16 %v7988_v9, %v7987_v8  ;;  %v8001_v8 = vld [vmem:[#allocation7 + $0x3360] sm:$0xff]  ;;  %v8002_v9 = vld [vmem:[#allocation7 + $0x3368] sm:$0xff] }
0x3383   :  { %v15259_v26 = vadd.f32 %v11687_v25, %v11686_v24  ;;  %14069 = vmatprep.subr.bf16.mxu1 %v14068_v13  ;;  %v7957_v25 = vld [vmem:[#allocation7 + $0x3200] sm:$0xff] }
0x3384   :  { %v14077_v32 = vpack.c.bf16 %v7958_v28, %v7957_v25  ;;  %v7863_v13 = vld [vmem:[#allocation10 + $0x180] sm:$0xff] }
0x3385   :  { %v8005_v28 = vld [vmem:[#allocation7 + $0x3380] sm:$0xff] }
0x3386   :  { %14071 = vmatpush3.bf16.msra.mxu1 %v14070_v14  ;;  %v14073_v14 = vpack.c.bf16 %v7864_v18, %v7863_v13  ;;  %v8004_v13 = vld [vmem:[#allocation7 + $0x3378] sm:$0xff] }
0x3387   :  { %14076 = vmatprep.subr.bf16.mxu1 %v14075_v19  ;;  %v14137_v18 = vpack.c.bf16 %v8004_v13, %v8003_v11  ;;  %v8172_v11 = vld [vmem:[#allocation10 + $0x198] sm:$0xff] }
0x3388   :  { %14074 = vmatpush3.bf16.msra.mxu0 %v14073_v14  ;;  %v9878_v14 = vld [vmem:[#allocation11 + $0x18] ss:$0 sm:$0xff]  ;;  %v9880_v13 = vld [vmem:[#allocation8 + $0x19] ss:$0 sm:$0xff] }
0x343c   :  { %v7634_v20 = vpop.f32.mrb[74].mxu1 }
0x343d   :  { %v7635_v22 = vadd.f32 %v9875_v16, %v7634_v20  ;;  %v12343_v23 = vpop.f32.mrb[75].mxu1  ;;  %v9877_v16 = vld [vmem:[#allocation8 + $0x18] ss:$0 sm:$0xff] }
0x343e   :  { %v7788_v19 = vadd.f32 %v15259_v26, %v9877_v16  ;;  %v7992_v26 = vld [vmem:[#allocation7 + $0x3318] sm:$0xff]  ;;  %v8281_v16 = vld [vmem:[#allocation7 + $0x3480] sm:$0xff] }
0x343f   :  { %v7638_v30 = vmax.f32 %v7635_v22, 0.0  ;;  %v14113_v43 = vpack.c.bf16 %v7992_v26, %v7991_v39  ;;  %v8286_v39 = vld [vmem:[#allocation7 + $0x34a8] sm:$0xff] }
0x3441   :  { %7640 = vrot.lane.b32.xlu0 %v7638_v30, %s14743_s2 }
0x34b3   :  { %v7641_v24 = vpop.permute.xlu0 %7640 }
0x34b4   :  { %7643 = vst.msk [vmem:[#allocation2 + $0x18] sm:$0xff] %vm2722_vm10, %v7641_v24 }
0x34bb   :  { %v7647_v34 = vld [vmem:[#allocation2 + $0x18] sm:$0xff] }
0x34bc   :  { %7855 = vmatprep.mubr.f32.mxu1 %v7647_v34  ;;  %v7990_v34 = vld [vmem:[#allocation7 + $0x3308] sm:$0xff] }
0x34bd   :  { %7856 = vmatmul.mubr.f32.vlgmr.msra.gmra.mrb[76].mxu1 %v15234_v27  ;;  %v14109_v37 = vpack.c.bf16 %v7990_v34, %v7989_v31  ;;  %v8284_v31 = vld [vmem:[#allocation7 + $0x3498] sm:$0xff] }
0x34be   :  { %14078 = vmatpush3.bf16.msra.mxu1 %v14077_v32  ;;  %8093 = vmatprep.mubr.f32.mxu1 %v15237_v45  ;;  %v14107_v32 = vpack.c.bf16 %v8006_v29, %v8005_v28  ;;  %v8266_v28 = vld [vmem:[#allocation7 + $0x3408] sm:$0xff]  ;;  %v8283_v29 = vld [vmem:[#allocation7 + $0x3490] sm:$0xff] }
0x34bf   :  { %14080 = vmatprep.subr.bf16.mxu1 %v14079_v33  ;;  %v8007_v33 = vld [vmem:[#allocation7 + $0x3390] sm:$0xff] }
0x34c0   :  { %v14111_v38 = vpack.c.bf16 %v8008_v36, %v8007_v33  ;;  %14108 = vmatprep.subr.bf16.mxu0 %v14107_v32  ;;  %v14146_v33 = vpack.c.bf16 %v8284_v31, %v8283_v29  ;;  %v8267_v36 = vld [vmem:[#allocation7 + $0x3410] sm:$0xff]  ;;  %v8298_v29 = vld [vmem:[#allocation7 + $0x3508] sm:$0xff] }
0x34c1   :  { %v8315_v31 = vld [vmem:[#allocation7 + $0x3590] sm:$0xff] }
0x34c2   :  { %14082 = vmatpush3.bf16.msra.mxu1 %v14081_v3  ;;  %v8009_v3 = vld [vmem:[#allocation7 + $0x33a0] sm:$0xff] }
0x34c3   :  { %14084 = vmatprep.subr.bf16.mxu1 %v14083_v42  ;;  %v8010_v42 = vld [vmem:[#allocation7 + $0x33a8] sm:$0xff] }
0x34c4   :  { %v14115_v41 = vpack.c.bf16 %v8010_v42, %v8009_v3  ;;  %v8269_v42 = vld [vmem:[#allocation7 + $0x3420] sm:$0xff] }
0x34c6   :  { %14086 = vmatpush3.bf16.msra.mxu1 %v14085_v48  ;;  %v8011_v48 = vld [vmem:[#allocation7 + $0x33b0] sm:$0xff] }
0x34c7   :  { %14088 = vmatprep.subr.bf16.mxu1 %v14087_v49  ;;  %v8012_v49 = vld [vmem:[#allocation7 + $0x33b8] sm:$0xff] }
0x34c8   :  { %v14119_v50 = vpack.c.bf16 %v8012_v49, %v8011_v48  ;;  %v8271_v49 = vld [vmem:[#allocation7 + $0x3430] sm:$0xff] }
0x34ca   :  { %14090 = vmatpush3.bf16.msra.mxu1 %v14089_v55  ;;  %v8013_v55 = vld [vmem:[#allocation7 + $0x33c0] sm:$0xff] }
0x34cb   :  { %14092 = vmatprep.subr.bf16.mxu1 %v14091_v47  ;;  %v8014_v47 = vld [vmem:[#allocation7 + $0x33c8] sm:$0xff] }
0x34cc   :  { %v14123_v40 = vpack.c.bf16 %v8014_v47, %v8013_v55  ;;  %v8274_v55 = vld [vmem:[#allocation7 + $0x3448] sm:$0xff]  ;;  %v8291_v47 = vld [vmem:[#allocation7 + $0x34d0] sm:$0xff] }
0x34ce   :  { %14094 = vmatpush3.bf16.msra.mxu1 %v14093_v1  ;;  %v8015_v1 = vld [vmem:[#allocation7 + $0x33d0] sm:$0xff] }
0x34cf   :  { %14096 = vmatprep.subr.bf16.mxu1 %v14095_v61  ;;  %v8016_v61 = vld [vmem:[#allocation7 + $0x33d8] sm:$0xff] }
0x34d0   :  { %v14127_v60 = vpack.c.bf16 %v8016_v61, %v8015_v1  ;;  %v8276_v1 = vld [vmem:[#allocation7 + $0x3458] sm:$0xff]  ;;  %v8293_v61 = vld [vmem:[#allocation7 + $0x34e0] sm:$0xff] }
0x34d2   :  { %14098 = vmatpush3.bf16.msra.mxu1 %v14097_v54  ;;  %v14129_v54 = vpack.c.bf16 %v8000_v2, %v7999_v4  ;;  %v8277_v2 = vld [vmem:[#allocation7 + $0x3460] sm:$0xff] }
0x34d3   :  { %14100 = vmatprep.subr.bf16.mxu1 %v14099_v6  ;;  %v8017_v6 = vld [vmem:[#allocation7 + $0x33e0] sm:$0xff] }
0x34d4   :  { %v14131_v63 = vpack.c.bf16 %v8018_v7, %v8017_v6  ;;  %v8295_v6 = vld [vmem:[#allocation7 + $0x34f0] sm:$0xff]  ;;  %v8296_v7 = vld [vmem:[#allocation7 + $0x34f8] sm:$0xff] }
0x34d6   :  { %14102 = vmatpush3.bf16.msra.mxu1 %v14101_v5  ;;  %v14133_v5 = vpack.c.bf16 %v8002_v9, %v8001_v8  ;;  %v14170_v8 = vpack.c.bf16 %v8296_v7, %v8295_v6  ;;  %v8279_v9 = vld [vmem:[#allocation7 + $0x3470] sm:$0xff]  ;;  %v8328_v7 = vld [vmem:[#allocation7 + $0x35f8] sm:$0xff] }
0x34d7   :  { %14104 = vmatprep.subr.bf16.mxu1 %v14103_v10  ;;  %v8019_v10 = vld [vmem:[#allocation7 + $0x33f0] sm:$0xff] }
0x34d8   :  { %v8327_v6 = vld [vmem:[#allocation7 + $0x35f0] sm:$0xff] }
0x34da   :  { %14106 = vmatpush3.bf16.msra.mxu1 %v14105_v12  ;;  %v14135_v12 = vpack.c.bf16 %v8020_v58, %v8019_v10  ;;  %v8171_v58 = vld [vmem:[#allocation10 + $0x190] sm:$0xff] }
0x34db   :  { %14139 = vmatprep.subr.bf16.mxu1 %v14755_v0 }
0x34dd   :  { %8094 = vmatmul.mubr.f32.vlgmr.msra.gmra.mrb[78].mxu1 %v15241_v15 }
0x34de   :  { %12355 = vmatprep.mubr.msk.f32.mxu1 %vm14757_vm0, %v15223_v21 }
0x3590   :  { %v11721_v17 = vpop.f32.mrb[76].mxu1 }
0x3591   :  { %v11722_v59 = vpop.f32.mrb[77].mxu1 }
0x3592   :  { %v11723_v20 = vadd.f32 %v11722_v59, %v11721_v17  ;;  %v8282_v17 = vld [vmem:[#allocation7 + $0x3488] sm:$0xff] }
0x3593   :  { %v14142_v59 = vpack.c.bf16 %v8282_v17, %v8281_v16 }
0x3594   :  { %v7858_v22 = vadd.f32 %v11723_v20, %v7788_v19 }
0x3596   :  { %v7861_v23 = vmax.f32 %v7858_v22, 0.0 }
0x3598   :  { %12349 = vmatmul.mubr.msk.f32.vlgmr.msra.gmra.mrb[72].mxu0 %vm485_vm3, %v7861_v23 }
0x3599   :  { %14110 = vmatpush3.bf16.msra.mxu0 %v14109_v37  ;;  %v8268_v37 = vld [vmem:[#allocation7 + $0x3418] sm:$0xff] }
0x359a   :  { %14112 = vmatprep.subr.bf16.mxu0 %v14111_v38  ;;  %v8285_v38 = vld [vmem:[#allocation7 + $0x34a0] sm:$0xff]  ;;  %v14148_v26 = vpack.c.bf16 %v8268_v37, %v8267_v36  ;;  %v8299_v36 = vld [vmem:[#allocation7 + $0x3510] sm:$0xff] }
0x359b   :  { %v14150_v3 = vpack.c.bf16 %v8286_v39, %v8285_v38  ;;  %v8317_v37 = vld [vmem:[#allocation7 + $0x35a0] sm:$0xff]  ;;  %v8318_v38 = vld [vmem:[#allocation7 + $0x35a8] sm:$0xff] }
0x359d   :  { %14114 = vmatpush3.bf16.msra.mxu0 %v14113_v43  ;;  %v8270_v43 = vld [vmem:[#allocation7 + $0x3428] sm:$0xff] }
0x359e   :  { %14116 = vmatprep.subr.bf16.mxu0 %v14115_v41  ;;  %v8287_v41 = vld [vmem:[#allocation7 + $0x34b0] sm:$0xff]  ;;  %v14152_v35 = vpack.c.bf16 %v8270_v43, %v8269_v42  ;;  %v8302_v42 = vld [vmem:[#allocation7 + $0x3528] sm:$0xff] }
0x359f   :  { %v14154_v48 = vpack.c.bf16 %v8288_v46, %v8287_v41  ;;  %v8319_v43 = vld [vmem:[#allocation7 + $0x35b0] sm:$0xff]  ;;  %v8320_v41 = vld [vmem:[#allocation7 + $0x35b8] sm:$0xff] }
0x35a1   :  { %14118 = vmatpush3.bf16.msra.mxu0 %v14117_v52  ;;  %v8272_v52 = vld [vmem:[#allocation7 + $0x3438] sm:$0xff] }
0x35a2   :  { %14120 = vmatprep.subr.bf16.mxu0 %v14119_v50  ;;  %v8289_v50 = vld [vmem:[#allocation7 + $0x34c0] sm:$0xff] }
0x35a3   :  { %v14158_v53 = vpack.c.bf16 %v8290_v44, %v8289_v50  ;;  %v8322_v50 = vld [vmem:[#allocation7 + $0x35c8] sm:$0xff] }
0x35a5   :  { %14122 = vmatpush3.bf16.msra.mxu0 %v14121_v56  ;;  %v8292_v56 = vld [vmem:[#allocation7 + $0x34d8] sm:$0xff] }
0x35a6   :  { %14124 = vmatprep.subr.bf16.mxu0 %v14123_v40  ;;  %v14162_v57 = vpack.c.bf16 %v8292_v56, %v8291_v47  ;;  %v8324_v47 = vld [vmem:[#allocation7 + $0x35d8] sm:$0xff] }
0x35a9   :  { %14126 = vmatpush3.bf16.msra.mxu0 %v14125_v62  ;;  %v8294_v62 = vld [vmem:[#allocation7 + $0x34e8] sm:$0xff] }
0x35aa   :  { %14128 = vmatprep.subr.bf16.mxu0 %v14127_v60  ;;  %v14164_v60 = vpack.c.bf16 %v8276_v1, %v8275_v51  ;;  %v14166_v4 = vpack.c.bf16 %v8294_v62, %v8293_v61  ;;  %v8308_v51 = vld [vmem:[#allocation7 + $0x3558] sm:$0xff]  ;;  %v8325_v61 = vld [vmem:[#allocation7 + $0x35e0] sm:$0xff]  ;;  %v8326_v62 = vld [vmem:[#allocation7 + $0x35e8] sm:$0xff] }
0x35ad   :  { %14130 = vmatpush3.bf16.msra.mxu0 %v14129_v54  ;;  %v8278_v54 = vld [vmem:[#allocation7 + $0x3468] sm:$0xff] }
0x35ae   :  { %14132 = vmatprep.subr.bf16.mxu0 %v14131_v63  ;;  %v14168_v63 = vpack.c.bf16 %v8278_v54, %v8277_v2  ;;  %v8310_v2 = vld [vmem:[#allocation7 + $0x3568] sm:$0xff] }
0x35b0   :  { %v11759_v30 = vpop.f32.mrb[78].mxu1 }
0x35b1   :  { %v11760_v24 = vpop.f32.mrb[79].mxu1  ;;  %14134 = vmatpush3.bf16.msra.mxu0 %v14133_v5  ;;  %v8280_v5 = vld [vmem:[#allocation7 + $0x3478] sm:$0xff] }
0x35b2   :  { %v15271_v25 = vadd.f32 %v11760_v24, %v11759_v30  ;;  %14136 = vmatprep.subr.bf16.mxu0 %v14135_v12  ;;  %v8265_v24 = vld [vmem:[#allocation7 + $0x3400] sm:$0xff]  ;;  %v14172_v10 = vpack.c.bf16 %v8280_v5, %v8279_v9  ;;  %v14140_v12 = vpack.c.bf16 %v8172_v11, %v8171_v58  ;;  %v8312_v9 = vld [vmem:[#allocation7 + $0x3578] sm:$0xff]  ;;  %v8590_v11 = vld [vmem:[#allocation7 + $0x3688] sm:$0xff] }
0x35b3   :  { %v14144_v32 = vpack.c.bf16 %v8266_v28, %v8265_v24  ;;  %v8297_v24 = vld [vmem:[#allocation7 + $0x3500] sm:$0xff] }
0x35b4   :  { %14141 = vmatpush3.bf16.msra.mxu1 %v14140_v12  ;;  %v8096_v16 = vadd.f32 %v15271_v25, %v9880_v13  ;;  %v8300_v25 = vld [vmem:[#allocation7 + $0x3518] sm:$0xff]  ;;  %v8589_v58 = vld [vmem:[#allocation7 + $0x3680] sm:$0xff] }
0x35b5   :  { %14138 = vmatpush3.bf16.msra.mxu0 %v14137_v18  ;;  %v14180_v39 = vpack.c.bf16 %v8300_v25, %v8299_v36  ;;  %v14209_v12 = vpack.c.bf16 %v8590_v11, %v8589_v58 }
0x35b6   :  { %14143 = vmatprep.subr.bf16.mxu0 %v14142_v59 }
0x366b   :  { %v7942_v19 = vpop.f32.mrb[72].mxu0 }
0x366c   :  { %v7943_v20 = vadd.f32 %v9878_v14, %v7942_v19  ;;  %v12350_v22 = vpop.f32.mrb[73].mxu0 }
0x366e   :  { %v7946_v23 = vmax.f32 %v7943_v20, 0.0 }
0x3670   :  { %7948 = vrot.lane.b32.xlu1 %v7946_v23, %s14758_s0  ;;  %v8313_v23 = vld [vmem:[#allocation7 + $0x3580] sm:$0xff] }
0x36e2   :  { %v7949_v30 = vpop.permute.xlu1 %7948 }
0x36e3   :  { %7951 = vst.msk [vmem:[#allocation2 + $0x18] sm:$0xff] %vm564_vm4, %v7949_v30  ;;  %v8314_v30 = vld [vmem:[#allocation7 + $0x3588] sm:$0xff] }
0x36e4   :  { %v14174_v28 = vpack.c.bf16 %v8314_v30, %v8313_v23 }
0x36e6   :  { %14175 = vmatprep.subr.bf16.mxu1 %v14174_v28  ;;  %v8575_v28 = vld [vmem:[#allocation7 + $0x3610] sm:$0xff] }
0x36ea   :  { %v7955_v34 = vld [vmem:[#allocation2 + $0x18] sm:$0xff] }
0x36eb   :  { %8163 = vmatprep.mubr.f32.mxu0 %v7955_v34  ;;  %v14176_v34 = vpack.c.bf16 %v8298_v29, %v8297_v24  ;;  %v8576_v29 = vld [vmem:[#allocation7 + $0x3618] sm:$0xff] }
0x36ec   :  { %8164 = vmatmul.mubr.f32.vlgmr.msra.gmra.mrb[74].mxu0 %v15234_v27  ;;  %v14156_v27 = vpack.c.bf16 %v8272_v52, %v8271_v49  ;;  %v8304_v49 = vld [vmem:[#allocation7 + $0x3538] sm:$0xff]  ;;  %v8321_v52 = vld [vmem:[#allocation7 + $0x35c0] sm:$0xff]  ;;  %v14215_v36 = vpack.c.bf16 %v8576_v29, %v8575_v28 }
0x36ed   :  { %14145 = vmatpush3.bf16.msra.mxu0 %v14144_v32  ;;  %8401 = vmatprep.mubr.f32.mxu0 %v15237_v45  ;;  %v8273_v45 = vld [vmem:[#allocation7 + $0x3440] sm:$0xff]  ;;  %v8316_v32 = vld [vmem:[#allocation7 + $0x3598] sm:$0xff] }
0x36ee   :  { %14147 = vmatprep.subr.bf16.mxu0 %v14146_v33  ;;  %v14160_v40 = vpack.c.bf16 %v8274_v55, %v8273_v45  ;;  %v14178_v33 = vpack.c.bf16 %v8316_v32, %v8315_v31  ;;  %v8306_v45 = vld [vmem:[#allocation7 + $0x3548] sm:$0xff]  ;;  %v8323_v55 = vld [vmem:[#allocation7 + $0x35d0] sm:$0xff]  ;;  %v8593_v32 = vld [vmem:[#allocation7 + $0x36a0] sm:$0xff] }
0x36ef   :  { %v15287_v31 = vld [vmem:[#allocation2 + $0x10] sm:$0xff] }
0x36f0   :  { %v8624_v28 = vld [vmem:[#allocation7 + $0x3798] sm:$0xff] }
0x36f1   :  { %14149 = vmatpush3.bf16.msra.mxu0 %v14148_v26  ;;  %v14182_v26 = vpack.c.bf16 %v8318_v38, %v8317_v37  ;;  %v8577_v37 = vld [vmem:[#allocation7 + $0x3620] sm:$0xff]  ;;  %v8578_v38 = vld [vmem:[#allocation7 + $0x3628] sm:$0xff] }
0x36f2   :  { %14151 = vmatprep.subr.bf16.mxu0 %v14150_v3  ;;  %v8301_v3 = vld [vmem:[#allocation7 + $0x3520] sm:$0xff] }
0x36f3   :  { %v14184_v46 = vpack.c.bf16 %v8302_v42, %v8301_v3  ;;  %v14219_v3 = vpack.c.bf16 %v8578_v38, %v8577_v37 }
0x36f5   :  { %14153 = vmatpush3.bf16.msra.mxu0 %v14152_v35  ;;  %v14186_v35 = vpack.c.bf16 %v8320_v41, %v8319_v43  ;;  %v8579_v43 = vld [vmem:[#allocation7 + $0x3630] sm:$0xff]  ;;  %v8580_v41 = vld [vmem:[#allocation7 + $0x3638] sm:$0xff] }
0x36f6   :  { %14155 = vmatprep.subr.bf16.mxu0 %v14154_v48  ;;  %v8303_v48 = vld [vmem:[#allocation7 + $0x3530] sm:$0xff] }
0x36f7   :  { %v14188_v44 = vpack.c.bf16 %v8304_v49, %v8303_v48  ;;  %v14223_v48 = vpack.c.bf16 %v8580_v41, %v8579_v43 }
0x36f9   :  { %14157 = vmatpush3.bf16.msra.mxu0 %v14156_v27  ;;  %v14190_v27 = vpack.c.bf16 %v8322_v50, %v8321_v52  ;;  %v8581_v52 = vld [vmem:[#allocation7 + $0x3640] sm:$0xff]  ;;  %v8582_v50 = vld [vmem:[#allocation7 + $0x3648] sm:$0xff] }
0x36fa   :  { %14159 = vmatprep.subr.bf16.mxu0 %v14158_v53  ;;  %v8305_v53 = vld [vmem:[#allocation7 + $0x3540] sm:$0xff] }
0x36fb   :  { %v14192_v56 = vpack.c.bf16 %v8306_v45, %v8305_v53  ;;  %v14227_v53 = vpack.c.bf16 %v8582_v50, %v8581_v52 }
0x36fd   :  { %14161 = vmatpush3.bf16.msra.mxu0 %v14160_v40  ;;  %v14194_v40 = vpack.c.bf16 %v8324_v47, %v8323_v55  ;;  %v8583_v55 = vld [vmem:[#allocation7 + $0x3650] sm:$0xff]  ;;  %v8584_v47 = vld [vmem:[#allocation7 + $0x3658] sm:$0xff] }
0x36fe   :  { %14163 = vmatprep.subr.bf16.mxu0 %v14162_v57  ;;  %v8307_v57 = vld [vmem:[#allocation7 + $0x3550] sm:$0xff] }
0x36ff   :  { %v14196_v1 = vpack.c.bf16 %v8308_v51, %v8307_v57  ;;  %v14231_v57 = vpack.c.bf16 %v8584_v47, %v8583_v55 }
0x3701   :  { %14165 = vmatpush3.bf16.msra.mxu0 %v14164_v60  ;;  %v14198_v60 = vpack.c.bf16 %v8326_v62, %v8325_v61  ;;  %v8586_v61 = vld [vmem:[#allocation7 + $0x3668] sm:$0xff]  ;;  %v8603_v62 = vld [vmem:[#allocation7 + $0x36f0] sm:$0xff] }
0x3702   :  { %14167 = vmatprep.subr.bf16.mxu0 %v14166_v4  ;;  %v8309_v4 = vld [vmem:[#allocation7 + $0x3560] sm:$0xff] }
0x3703   :  { %v14200_v54 = vpack.c.bf16 %v8310_v2, %v8309_v4 }
0x3705   :  { %14169 = vmatpush3.bf16.msra.mxu0 %v14168_v63  ;;  %v8311_v63 = vld [vmem:[#allocation7 + $0x3570] sm:$0xff] }
0x3706   :  { %14171 = vmatprep.subr.bf16.mxu0 %v14170_v8  ;;  %v14202_v8 = vpack.c.bf16 %v8328_v7, %v8327_v6  ;;  %v14204_v5 = vpack.c.bf16 %v8312_v9, %v8311_v63  ;;  %v8588_v6 = vld [vmem:[#allocation7 + $0x3678] sm:$0xff]  ;;  %v15294_v63 = vld [vmem:[#allocation2] sm:$0xff] }
0x3707   :  { %v8480_v9 = vld [vmem:[#allocation10 + $0x1a8] sm:$0xff] }
0x3709   :  { %14173 = vmatpush3.bf16.msra.mxu0 %v14172_v10  ;;  %v9881_v10 = vld [vmem:[#allocation11 + $0x19] ss:$0 sm:$0xff] }
0x370a   :  { %14206 = vmatprep.subr.bf16.mxu0 %v14755_v0 }
0x370c   :  { %8402 = vmatmul.mubr.f32.vlgmr.msra.gmra.mrb[76].mxu0 %v15241_v15 }
0x370d   :  { %12362 = vmatprep.mubr.msk.f32.mxu0 %vm14757_vm0, %v15223_v21 }
0x37bf   :  { %v11794_v18 = vpop.f32.mrb[74].mxu0 }
0x37c0   :  { %v11795_v14 = vpop.f32.mrb[75].mxu0 }
0x37c1   :  { %v11796_v17 = vadd.f32 %v11795_v14, %v11794_v18 }
0x37c3   :  { %v8166_v59 = vadd.f32 %v11796_v17, %v8096_v16 }
0x37c5   :  { %v8169_v19 = vmax.f32 %v8166_v59, 0.0  ;;  %v8573_v59 = vld [vmem:[#allocation7 + $0x3600] sm:$0xff] }
0x37c7   :  { %12356 = vmatmul.mubr.msk.f32.vlgmr.msra.gmra.mrb[80].mxu1 %vm485_vm3, %v8169_v19  ;;  %v8574_v19 = vld [vmem:[#allocation7 + $0x3608] sm:$0xff] }
0x37c8   :  { %14177 = vmatpush3.bf16.msra.mxu1 %v14176_v34  ;;  %v14211_v23 = vpack.c.bf16 %v8574_v19, %v8573_v59  ;;  %v8594_v34 = vld [vmem:[#allocation7 + $0x36a8] sm:$0xff]  ;;  %v8621_v19 = vld [vmem:[#allocation7 + $0x3780] sm:$0xff] }
0x37c9   :  { %14179 = vmatprep.subr.bf16.mxu1 %v14178_v33  ;;  %v15290_v33 = vld [vmem:[#allocation2 + $0x8] sm:$0xff]  ;;  %v14217_v25 = vpack.c.bf16 %v8594_v34, %v8593_v32 }
0x37ca   :  { %v8607_v34 = vld [vmem:[#allocation7 + $0x3710] sm:$0xff] }
0x37cc   :  { %14181 = vmatpush3.bf16.msra.mxu1 %v14180_v39  ;;  %v8595_v39 = vld [vmem:[#allocation7 + $0x36b0] sm:$0xff] }
0x37cd   :  { %14183 = vmatprep.subr.bf16.mxu1 %v14182_v26  ;;  %v8596_v26 = vld [vmem:[#allocation7 + $0x36b8] sm:$0xff] }
0x37ce   :  { %v14221_v42 = vpack.c.bf16 %v8596_v26, %v8595_v39  ;;  %v8609_v39 = vld [vmem:[#allocation7 + $0x3720] sm:$0xff]  ;;  %v8610_v26 = vld [vmem:[#allocation7 + $0x3728] sm:$0xff] }
0x37cf   :  { %v14251_v43 = vpack.c.bf16 %v8610_v26, %v8609_v39  ;;  %v8904_v39 = vld [vmem:[#allocation7 + $0x38b8] sm:$0xff] }
0x37d0   :  { %14185 = vmatpush3.bf16.msra.mxu1 %v14184_v46  ;;  %v8597_v46 = vld [vmem:[#allocation7 + $0x36c0] sm:$0xff] }
0x37d1   :  { %14187 = vmatprep.subr.bf16.mxu1 %v14186_v35  ;;  %v8598_v35 = vld [vmem:[#allocation7 + $0x36c8] sm:$0xff] }
0x37d2   :  { %v14225_v49 = vpack.c.bf16 %v8598_v35, %v8597_v46  ;;  %v8611_v46 = vld [vmem:[#allocation7 + $0x3730] sm:$0xff]  ;;  %v8612_v35 = vld [vmem:[#allocation7 + $0x3738] sm:$0xff] }
0x37d3   :  { %v14255_v52 = vpack.c.bf16 %v8612_v35, %v8611_v46  ;;  %v8906_v46 = vld [vmem:[#allocation7 + $0x38c8] sm:$0xff] }
0x37d4   :  { %14189 = vmatpush3.bf16.msra.mxu1 %v14188_v44  ;;  %v8599_v44 = vld [vmem:[#allocation7 + $0x36d0] sm:$0xff] }
0x37d5   :  { %14191 = vmatprep.subr.bf16.mxu1 %v14190_v27  ;;  %v8600_v27 = vld [vmem:[#allocation7 + $0x36d8] sm:$0xff] }
0x37d6   :  { %v14229_v45 = vpack.c.bf16 %v8600_v27, %v8599_v44  ;;  %v8613_v44 = vld [vmem:[#allocation7 + $0x3740] sm:$0xff]  ;;  %v8614_v27 = vld [vmem:[#allocation7 + $0x3748] sm:$0xff] }
0x37d7   :  { %v14259_v55 = vpack.c.bf16 %v8614_v27, %v8613_v44  ;;  %v8908_v44 = vld [vmem:[#allocation7 + $0x38d8] sm:$0xff] }
0x37d8   :  { %14193 = vmatpush3.bf16.msra.mxu1 %v14192_v56  ;;  %v8601_v56 = vld [vmem:[#allocation7 + $0x36e0] sm:$0xff] }
0x37d9   :  { %14195 = vmatprep.subr.bf16.mxu1 %v14194_v40  ;;  %v8602_v40 = vld [vmem:[#allocation7 + $0x36e8] sm:$0xff] }
0x37da   :  { %v14233_v51 = vpack.c.bf16 %v8602_v40, %v8601_v56  ;;  %v8615_v56 = vld [vmem:[#allocation7 + $0x3750] sm:$0xff]  ;;  %v8616_v40 = vld [vmem:[#allocation7 + $0x3758] sm:$0xff] }
0x37dc   :  { %14197 = vmatpush3.bf16.msra.mxu1 %v14196_v1  ;;  %v8585_v1 = vld [vmem:[#allocation7 + $0x3660] sm:$0xff] }
0x37dd   :  { %14199 = vmatprep.subr.bf16.mxu1 %v14198_v60  ;;  %v8604_v60 = vld [vmem:[#allocation7 + $0x36f8] sm:$0xff]  ;;  %v14235_v4 = vpack.c.bf16 %v8586_v61, %v8585_v1  ;;  %v8634_v1 = vld [vmem:[#allocation7 + $0x37e8] sm:$0xff] }
0x37de   :  { %v14237_v2 = vpack.c.bf16 %v8604_v60, %v8603_v62  ;;  %v8617_v62 = vld [vmem:[#allocation7 + $0x3760] sm:$0xff]  ;;  %v8618_v60 = vld [vmem:[#allocation7 + $0x3768] sm:$0xff] }
0x37df   :  { %v11832_v20 = vpop.f32.mrb[76].mxu0 }
0x37e0   :  { %v11833_v22 = vpop.f32.mrb[77].mxu0  ;;  %14201 = vmatpush3.bf16.msra.mxu1 %v14200_v54  ;;  %v8587_v54 = vld [vmem:[#allocation7 + $0x3670] sm:$0xff] }
0x37e1   :  { %v15283_v15 = vadd.f32 %v11833_v22, %v11832_v20  ;;  %14203 = vmatprep.subr.bf16.mxu1 %v14202_v8  ;;  %v8591_v20 = vld [vmem:[#allocation7 + $0x3690] sm:$0xff]  ;;  %v8592_v22 = vld [vmem:[#allocation7 + $0x3698] sm:$0xff]  ;;  %v14239_v7 = vpack.c.bf16 %v8588_v6, %v8587_v54 }
0x37e2   :  { %v14213_v24 = vpack.c.bf16 %v8592_v22, %v8591_v20  ;;  %v8479_v8 = vld [vmem:[#allocation10 + $0x1a0] sm:$0xff]  ;;  %v8622_v20 = vld [vmem:[#allocation7 + $0x3788] sm:$0xff]  ;;  %v8619_v6 = vld [vmem:[#allocation7 + $0x3770] sm:$0xff] }
0x37e3   :  { %v8605_v22 = vld [vmem:[#allocation7 + $0x3700] sm:$0xff]  ;;  %v8636_v54 = vld [vmem:[#allocation7 + $0x37f8] sm:$0xff] }
0x37e4   :  { %14205 = vmatpush3.bf16.msra.mxu1 %v14204_v5  ;;  %v14207_v5 = vpack.c.bf16 %v8480_v9, %v8479_v8  ;;  %v8620_v8 = vld [vmem:[#allocation7 + $0x3778] sm:$0xff] }
0x37e5   :  { %14210 = vmatprep.subr.bf16.mxu1 %v14209_v12  ;;  %v14271_v9 = vpack.c.bf16 %v8620_v8, %v8619_v6  ;;  %v8788_v8 = vld [vmem:[#allocation10 + $0x1b8] sm:$0xff] }
0x37e6   :  { %14208 = vmatpush3.bf16.msra.mxu0 %v14207_v5  ;;  %v9884_v5 = vld [vmem:[#allocation11 + $0x1a] ss:$0 sm:$0xff] }
0x389a   :  { %v8250_v13 = vpop.f32.mrb[80].mxu1 }
0x389b   :  { %v8251_v18 = vadd.f32 %v9881_v10, %v8250_v13  ;;  %v12357_v14 = vpop.f32.mrb[81].mxu1  ;;  %v9883_v10 = vld [vmem:[#allocation8 + $0x1a] ss:$0 sm:$0xff] }
0x389c   :  { %v8404_v12 = vadd.f32 %v15283_v15, %v9883_v10  ;;  %v8608_v15 = vld [vmem:[#allocation7 + $0x3718] sm:$0xff]  ;;  %v8897_v10 = vld [vmem:[#allocation7 + $0x3880] sm:$0xff] }
0x389d   :  { %v8254_v16 = vmax.f32 %v8251_v18, 0.0  ;;  %v14247_v37 = vpack.c.bf16 %v8608_v15, %v8607_v34  ;;  %v8902_v34 = vld [vmem:[#allocation7 + $0x38a8] sm:$0xff] }
0x389f   :  { %8256 = vrot.lane.b32.xlu0 %v8254_v16, %s14759_s5 }
0x3911   :  { %v8257_v17 = vpop.permute.xlu0 %8256 }
0x3912   :  { %8259 = vst.msk [vmem:[#allocation2 + $0x18] sm:$0xff] %vm873_vm5, %v8257_v17 }
0x3919   :  { %v8263_v30 = vld [vmem:[#allocation2 + $0x18] sm:$0xff] }
0x391a   :  { %8471 = vmatprep.mubr.f32.mxu1 %v8263_v30  ;;  %v8606_v30 = vld [vmem:[#allocation7 + $0x3708] sm:$0xff] }
0x391b   :  { %8472 = vmatmul.mubr.f32.vlgmr.msra.gmra.mrb[82].mxu1 %v15287_v31  ;;  %v14243_v29 = vpack.c.bf16 %v8606_v30, %v8605_v22  ;;  %v8900_v22 = vld [vmem:[#allocation7 + $0x3898] sm:$0xff] }
0x391c   :  { %14212 = vmatpush3.bf16.msra.mxu1 %v14211_v23  ;;  %8709 = vmatprep.mubr.f32.mxu1 %v15290_v33  ;;  %v14241_v23 = vpack.c.bf16 %v8622_v20, %v8621_v19  ;;  %v8882_v19 = vld [vmem:[#allocation7 + $0x3808] sm:$0xff]  ;;  %v8899_v20 = vld [vmem:[#allocation7 + $0x3890] sm:$0xff] }
0x391d   :  { %14214 = vmatprep.subr.bf16.mxu1 %v14213_v24  ;;  %v8623_v24 = vld [vmem:[#allocation7 + $0x3790] sm:$0xff] }
0x391e   :  { %v14245_v32 = vpack.c.bf16 %v8624_v28, %v8623_v24  ;;  %14242 = vmatprep.subr.bf16.mxu0 %v14241_v23  ;;  %v14280_v24 = vpack.c.bf16 %v8900_v22, %v8899_v20  ;;  %v8883_v28 = vld [vmem:[#allocation7 + $0x3810] sm:$0xff]  ;;  %v8930_v20 = vld [vmem:[#allocation7 + $0x3988] sm:$0xff]  ;;  %v8913_v22 = vld [vmem:[#allocation7 + $0x3900] sm:$0xff] }
0x3920   :  { %14216 = vmatpush3.bf16.msra.mxu1 %v14215_v36  ;;  %v8625_v36 = vld [vmem:[#allocation7 + $0x37a0] sm:$0xff] }
0x3921   :  { %14218 = vmatprep.subr.bf16.mxu1 %v14217_v25  ;;  %v8626_v25 = vld [vmem:[#allocation7 + $0x37a8] sm:$0xff] }
0x3922   :  { %v14249_v38 = vpack.c.bf16 %v8626_v25, %v8625_v36  ;;  %v8885_v25 = vld [vmem:[#allocation7 + $0x3820] sm:$0xff] }
0x3924   :  { %14220 = vmatpush3.bf16.msra.mxu1 %v14219_v3  ;;  %v8627_v3 = vld [vmem:[#allocation7 + $0x37b0] sm:$0xff] }
0x3925   :  { %14222 = vmatprep.subr.bf16.mxu1 %v14221_v42  ;;  %v8628_v42 = vld [vmem:[#allocation7 + $0x37b8] sm:$0xff] }
0x3926   :  { %v14253_v41 = vpack.c.bf16 %v8628_v42, %v8627_v3  ;;  %v8887_v42 = vld [vmem:[#allocation7 + $0x3830] sm:$0xff] }
0x3928   :  { %14224 = vmatpush3.bf16.msra.mxu1 %v14223_v48  ;;  %v8629_v48 = vld [vmem:[#allocation7 + $0x37c0] sm:$0xff] }
0x3929   :  { %14226 = vmatprep.subr.bf16.mxu1 %v14225_v49  ;;  %v8630_v49 = vld [vmem:[#allocation7 + $0x37c8] sm:$0xff] }
0x392a   :  { %v14257_v50 = vpack.c.bf16 %v8630_v49, %v8629_v48  ;;  %v8889_v49 = vld [vmem:[#allocation7 + $0x3840] sm:$0xff] }
0x392c   :  { %14228 = vmatpush3.bf16.msra.mxu1 %v14227_v53  ;;  %v8631_v53 = vld [vmem:[#allocation7 + $0x37d0] sm:$0xff] }
0x392d   :  { %14230 = vmatprep.subr.bf16.mxu1 %v14229_v45  ;;  %v8632_v45 = vld [vmem:[#allocation7 + $0x37d8] sm:$0xff] }
0x392e   :  { %v14261_v47 = vpack.c.bf16 %v8632_v45, %v8631_v53  ;;  %v8891_v45 = vld [vmem:[#allocation7 + $0x3850] sm:$0xff] }
0x3930   :  { %14232 = vmatpush3.bf16.msra.mxu1 %v14231_v57  ;;  %v14263_v57 = vpack.c.bf16 %v8616_v40, %v8615_v56  ;;  %v8910_v56 = vld [vmem:[#allocation7 + $0x38e8] sm:$0xff] }
0x3931   :  { %14234 = vmatprep.subr.bf16.mxu1 %v14233_v51  ;;  %v8633_v51 = vld [vmem:[#allocation7 + $0x37e0] sm:$0xff] }
0x3932   :  { %v14265_v61 = vpack.c.bf16 %v8634_v1, %v8633_v51  ;;  %v8893_v51 = vld [vmem:[#allocation7 + $0x3860] sm:$0xff]  ;;  %v8894_v1 = vld [vmem:[#allocation7 + $0x3868] sm:$0xff] }
0x3934   :  { %14236 = vmatpush3.bf16.msra.mxu1 %v14235_v4  ;;  %v14267_v4 = vpack.c.bf16 %v8618_v60, %v8617_v62  ;;  %v8912_v62 = vld [vmem:[#allocation7 + $0x38f8] sm:$0xff]  ;;  %v14302_v60 = vpack.c.bf16 %v8894_v1, %v8893_v51  ;;  %v8942_v51 = vld [vmem:[#allocation7 + $0x39e8] sm:$0xff] }
0x3935   :  { %14238 = vmatprep.subr.bf16.mxu1 %v14237_v2  ;;  %v8635_v2 = vld [vmem:[#allocation7 + $0x37f0] sm:$0xff] }
0x3938   :  { %14240 = vmatpush3.bf16.msra.mxu1 %v14239_v7  ;;  %v14269_v7 = vpack.c.bf16 %v8636_v54, %v8635_v2  ;;  %v8895_v2 = vld [vmem:[#allocation7 + $0x3870] sm:$0xff]  ;;  %v8896_v54 = vld [vmem:[#allocation7 + $0x3878] sm:$0xff] }
0x3939   :  { %14273 = vmatprep.subr.bf16.mxu1 %v14755_v0  ;;  %v14306_v6 = vpack.c.bf16 %v8896_v54, %v8895_v2  ;;  %v8944_v2 = vld [vmem:[#allocation7 + $0x39f8] sm:$0xff]  ;;  %v8927_v54 = vld [vmem:[#allocation7 + $0x3970] sm:$0xff] }
0x393b   :  { %8710 = vmatmul.mubr.f32.vlgmr.msra.gmra.mrb[84].mxu1 %v15294_v63 }
0x393c   :  { %12369 = vmatprep.mubr.msk.f32.mxu1 %vm14757_vm0, %v15223_v21 }
0x39ee   :  { %v11867_v58 = vpop.f32.mrb[82].mxu1 }
0x39ef   :  { %v11868_v11 = vpop.f32.mrb[83].mxu1 }
0x39f0   :  { %v11869_v13 = vadd.f32 %v11868_v11, %v11867_v58  ;;  %v8898_v58 = vld [vmem:[#allocation7 + $0x3888] sm:$0xff] }
0x39f1   :  { %v14276_v11 = vpack.c.bf16 %v8898_v58, %v8897_v10 }
0x39f2   :  { %v8474_v18 = vadd.f32 %v11869_v13, %v8404_v12 }
0x39f4   :  { %v8477_v14 = vmax.f32 %v8474_v18, 0.0 }
0x39f6   :  { %12363 = vmatmul.mubr.msk.f32.vlgmr.msra.gmra.mrb[78].mxu0 %vm485_vm3, %v8477_v14 }
0x39f7   :  { %14244 = vmatpush3.bf16.msra.mxu0 %v14243_v29  ;;  %v8884_v29 = vld [vmem:[#allocation7 + $0x3818] sm:$0xff] }
0x39f8   :  { %14246 = vmatprep.subr.bf16.mxu0 %v14245_v32  ;;  %v8901_v32 = vld [vmem:[#allocation7 + $0x38a0] sm:$0xff]  ;;  %v14282_v15 = vpack.c.bf16 %v8884_v29, %v8883_v28  ;;  %v8932_v28 = vld [vmem:[#allocation7 + $0x3998] sm:$0xff] }
0x39f9   :  { %v14284_v36 = vpack.c.bf16 %v8902_v34, %v8901_v32  ;;  %v8915_v34 = vld [vmem:[#allocation7 + $0x3910] sm:$0xff] }
0x39fb   :  { %14248 = vmatpush3.bf16.msra.mxu0 %v14247_v37  ;;  %v8886_v37 = vld [vmem:[#allocation7 + $0x3828] sm:$0xff] }
0x39fc   :  { %14250 = vmatprep.subr.bf16.mxu0 %v14249_v38  ;;  %v8903_v38 = vld [vmem:[#allocation7 + $0x38b0] sm:$0xff]  ;;  %v14286_v26 = vpack.c.bf16 %v8886_v37, %v8885_v25 }
0x39fd   :  { %v14288_v3 = vpack.c.bf16 %v8904_v39, %v8903_v38  ;;  %v8917_v38 = vld [vmem:[#allocation7 + $0x3920] sm:$0xff]  ;;  %v8918_v39 = vld [vmem:[#allocation7 + $0x3928] sm:$0xff] }
0x39ff   :  { %14252 = vmatpush3.bf16.msra.mxu0 %v14251_v43  ;;  %v8888_v43 = vld [vmem:[#allocation7 + $0x3838] sm:$0xff] }
0x3a00   :  { %14254 = vmatprep.subr.bf16.mxu0 %v14253_v41  ;;  %v8905_v41 = vld [vmem:[#allocation7 + $0x38c0] sm:$0xff]  ;;  %v14290_v35 = vpack.c.bf16 %v8888_v43, %v8887_v42  ;;  %v14318_v42 = vpack.c.bf16 %v8918_v39, %v8917_v38  ;;  %v9212_v38 = vld [vmem:[#allocation7 + $0x3ab8] sm:$0xff] }
0x3a01   :  { %v14292_v48 = vpack.c.bf16 %v8906_v46, %v8905_v41  ;;  %v8919_v41 = vld [vmem:[#allocation7 + $0x3930] sm:$0xff]  ;;  %v8920_v46 = vld [vmem:[#allocation7 + $0x3938] sm:$0xff] }
0x3a03   :  { %14256 = vmatpush3.bf16.msra.mxu0 %v14255_v52  ;;  %v8890_v52 = vld [vmem:[#allocation7 + $0x3848] sm:$0xff] }
0x3a04   :  { %14258 = vmatprep.subr.bf16.mxu0 %v14257_v50  ;;  %v8907_v50 = vld [vmem:[#allocation7 + $0x38d0] sm:$0xff]  ;;  %v14294_v27 = vpack.c.bf16 %v8890_v52, %v8889_v49  ;;  %v14322_v49 = vpack.c.bf16 %v8920_v46, %v8919_v41  ;;  %v9214_v41 = vld [vmem:[#allocation7 + $0x3ac8] sm:$0xff] }
0x3a05   :  { %v14296_v53 = vpack.c.bf16 %v8908_v44, %v8907_v50  ;;  %v8921_v50 = vld [vmem:[#allocation7 + $0x3940] sm:$0xff]  ;;  %v8922_v44 = vld [vmem:[#allocation7 + $0x3948] sm:$0xff] }
0x3a07   :  { %14260 = vmatpush3.bf16.msra.mxu0 %v14259_v55  ;;  %v8892_v55 = vld [vmem:[#allocation7 + $0x3858] sm:$0xff] }
0x3a08   :  { %14262 = vmatprep.subr.bf16.mxu0 %v14261_v47  ;;  %v8909_v47 = vld [vmem:[#allocation7 + $0x38e0] sm:$0xff]  ;;  %v14298_v40 = vpack.c.bf16 %v8892_v55, %v8891_v45  ;;  %v14326_v45 = vpack.c.bf16 %v8922_v44, %v8921_v50  ;;  %v9216_v50 = vld [vmem:[#allocation7 + $0x3ad8] sm:$0xff] }
0x3a0b   :  { %14264 = vmatpush3.bf16.msra.mxu0 %v14263_v57  ;;  %v14300_v57 = vpack.c.bf16 %v8910_v56, %v8909_v47  ;;  %v8923_v47 = vld [vmem:[#allocation7 + $0x3950] sm:$0xff]  ;;  %v8924_v56 = vld [vmem:[#allocation7 + $0x3958] sm:$0xff] }
0x3a0c   :  { %14266 = vmatprep.subr.bf16.mxu0 %v14265_v61  ;;  %v8911_v61 = vld [vmem:[#allocation7 + $0x38f0] sm:$0xff] }
0x3a0e   :  { %v11905_v16 = vpop.f32.mrb[84].mxu1 }
0x3a0f   :  { %v11906_v17 = vpop.f32.mrb[85].mxu1  ;;  %14268 = vmatpush3.bf16.msra.mxu0 %v14267_v4  ;;  %v14304_v4 = vpack.c.bf16 %v8912_v62, %v8911_v61  ;;  %v8925_v61 = vld [vmem:[#allocation7 + $0x3960] sm:$0xff]  ;;  %v8926_v62 = vld [vmem:[#allocation7 + $0x3968] sm:$0xff] }
0x3a10   :  { %v15301_v59 = vadd.f32 %v11906_v17, %v11905_v16  ;;  %14270 = vmatprep.subr.bf16.mxu0 %v14269_v7  ;;  %v8881_v17 = vld [vmem:[#allocation7 + $0x3800] sm:$0xff]  ;;  %v8787_v7 = vld [vmem:[#allocation10 + $0x1b0] sm:$0xff] }
0x3a11   :  { %v14278_v23 = vpack.c.bf16 %v8882_v19, %v8881_v17  ;;  %v8929_v19 = vld [vmem:[#allocation7 + $0x3980] sm:$0xff] }
0x3a13   :  { %14272 = vmatpush3.bf16.msra.mxu0 %v14271_v9  ;;  %v14274_v9 = vpack.c.bf16 %v8788_v8, %v8787_v7  ;;  %v8928_v7 = vld [vmem:[#allocation7 + $0x3978] sm:$0xff] }
0x3a14   :  { %14277 = vmatprep.subr.bf16.mxu0 %v14276_v11  ;;  %v14338_v8 = vpack.c.bf16 %v8928_v7, %v8927_v54  ;;  %v9096_v7 = vld [vmem:[#allocation10 + $0x1c8] sm:$0xff] }
0x3a15   :  { %14275 = vmatpush3.bf16.msra.mxu1 %v14274_v9  ;;  %v9887_v9 = vld [vmem:[#allocation11 + $0x1b] ss:$0 sm:$0xff] }
0x3ac9   :  { %v8558_v12 = vpop.f32.mrb[78].mxu0 }
0x3aca   :  { %v8559_v13 = vadd.f32 %v9884_v5, %v8558_v12  ;;  %v12364_v18 = vpop.f32.mrb[79].mxu0  ;;  %v9886_v5 = vld [vmem:[#allocation8 + $0x1b] ss:$0 sm:$0xff] }
0x3acb   :  { %v8712_v11 = vadd.f32 %v15301_v59, %v9886_v5  ;;  %v8916_v59 = vld [vmem:[#allocation7 + $0x3918] sm:$0xff]  ;;  %v9205_v5 = vld [vmem:[#allocation7 + $0x3a80] sm:$0xff] }
0x3acc   :  { %v8562_v14 = vmax.f32 %v8559_v13, 0.0  ;;  %v14314_v25 = vpack.c.bf16 %v8916_v59, %v8915_v34  ;;  %v9210_v34 = vld [vmem:[#allocation7 + $0x3aa8] sm:$0xff] }
0x3ace   :  { %8564 = vrot.lane.b32.xlu1 %v8562_v14, %s14760_s27 }
0x3b40   :  { %v8565_v16 = vpop.permute.xlu1 %8564 }
0x3b41   :  { %8567 = vst.msk [vmem:[#allocation2 + $0x18] sm:$0xff] %vm1182_vm6, %v8565_v16 }
0x3b48   :  { %v8571_v30 = vld [vmem:[#allocation2 + $0x18] sm:$0xff] }
0x3b49   :  { %8779 = vmatprep.mubr.f32.mxu0 %v8571_v30  ;;  %v8914_v30 = vld [vmem:[#allocation7 + $0x3908] sm:$0xff] }
0x3b4a   :  { %8780 = vmatmul.mubr.f32.vlgmr.msra.gmra.mrb[80].mxu0 %v15287_v31  ;;  %v14310_v29 = vpack.c.bf16 %v8914_v30, %v8913_v22  ;;  %v9208_v22 = vld [vmem:[#allocation7 + $0x3a98] sm:$0xff] }
0x3b4b   :  { %14279 = vmatpush3.bf16.msra.mxu0 %v14278_v23  ;;  %9017 = vmatprep.mubr.f32.mxu0 %v15290_v33  ;;  %v14308_v23 = vpack.c.bf16 %v8930_v20, %v8929_v19  ;;  %v9190_v19 = vld [vmem:[#allocation7 + $0x3a08] sm:$0xff]  ;;  %v9207_v20 = vld [vmem:[#allocation7 + $0x3a90] sm:$0xff] }
0x3b4c   :  { %14281 = vmatprep.subr.bf16.mxu0 %v14280_v24  ;;  %v8931_v24 = vld [vmem:[#allocation7 + $0x3990] sm:$0xff] }
0x3b4d   :  { %v14312_v32 = vpack.c.bf16 %v8932_v28, %v8931_v24  ;;  %14309 = vmatprep.subr.bf16.mxu1 %v14308_v23  ;;  %v14347_v24 = vpack.c.bf16 %v9208_v22, %v9207_v20  ;;  %v9191_v28 = vld [vmem:[#allocation7 + $0x3a10] sm:$0xff]  ;;  %v9238_v20 = vld [vmem:[#allocation7 + $0x3b88] sm:$0xff]  ;;  %v9221_v22 = vld [vmem:[#allocation7 + $0x3b00] sm:$0xff] }
0x3b4f   :  { %14283 = vmatpush3.bf16.msra.mxu0 %v14282_v15  ;;  %v8933_v15 = vld [vmem:[#allocation7 + $0x39a0] sm:$0xff] }
0x3b50   :  { %14285 = vmatprep.subr.bf16.mxu0 %v14284_v36  ;;  %v8934_v36 = vld [vmem:[#allocation7 + $0x39a8] sm:$0xff] }
0x3b51   :  { %v14316_v37 = vpack.c.bf16 %v8934_v36, %v8933_v15  ;;  %v9193_v36 = vld [vmem:[#allocation7 + $0x3a20] sm:$0xff] }
0x3b53   :  { %14287 = vmatpush3.bf16.msra.mxu0 %v14286_v26  ;;  %v8935_v26 = vld [vmem:[#allocation7 + $0x39b0] sm:$0xff] }
0x3b54   :  { %14289 = vmatprep.subr.bf16.mxu0 %v14288_v3  ;;  %v8936_v3 = vld [vmem:[#allocation7 + $0x39b8] sm:$0xff] }
0x3b55   :  { %v14320_v43 = vpack.c.bf16 %v8936_v3, %v8935_v26  ;;  %v9195_v3 = vld [vmem:[#allocation7 + $0x3a30] sm:$0xff] }
0x3b57   :  { %14291 = vmatpush3.bf16.msra.mxu0 %v14290_v35  ;;  %v8937_v35 = vld [vmem:[#allocation7 + $0x39c0] sm:$0xff] }
0x3b58   :  { %14293 = vmatprep.subr.bf16.mxu0 %v14292_v48  ;;  %v8938_v48 = vld [vmem:[#allocation7 + $0x39c8] sm:$0xff] }
0x3b59   :  { %v14324_v52 = vpack.c.bf16 %v8938_v48, %v8937_v35  ;;  %v9197_v48 = vld [vmem:[#allocation7 + $0x3a40] sm:$0xff] }
0x3b5b   :  { %14295 = vmatpush3.bf16.msra.mxu0 %v14294_v27  ;;  %v8939_v27 = vld [vmem:[#allocation7 + $0x39d0] sm:$0xff] }
0x3b5c   :  { %14297 = vmatprep.subr.bf16.mxu0 %v14296_v53  ;;  %v8940_v53 = vld [vmem:[#allocation7 + $0x39d8] sm:$0xff] }
0x3b5d   :  { %v14328_v55 = vpack.c.bf16 %v8940_v53, %v8939_v27  ;;  %v9199_v53 = vld [vmem:[#allocation7 + $0x3a50] sm:$0xff] }
0x3b5f   :  { %14299 = vmatpush3.bf16.msra.mxu0 %v14298_v40  ;;  %v14330_v40 = vpack.c.bf16 %v8924_v56, %v8923_v47  ;;  %v9218_v47 = vld [vmem:[#allocation7 + $0x3ae8] sm:$0xff] }
0x3b60   :  { %14301 = vmatprep.subr.bf16.mxu0 %v14300_v57  ;;  %v8941_v57 = vld [vmem:[#allocation7 + $0x39e0] sm:$0xff] }
0x3b61   :  { %v14332_v1 = vpack.c.bf16 %v8942_v51, %v8941_v57  ;;  %v9201_v57 = vld [vmem:[#allocation7 + $0x3a60] sm:$0xff]  ;;  %v9202_v51 = vld [vmem:[#allocation7 + $0x3a68] sm:$0xff] }
0x3b63   :  { %14303 = vmatpush3.bf16.msra.mxu0 %v14302_v60  ;;  %v14334_v60 = vpack.c.bf16 %v8926_v62, %v8925_v61  ;;  %v9220_v61 = vld [vmem:[#allocation7 + $0x3af8] sm:$0xff]  ;;  %v14369_v62 = vpack.c.bf16 %v9202_v51, %v9201_v57  ;;  %v9250_v57 = vld [vmem:[#allocation7 + $0x3be8] sm:$0xff] }
0x3b64   :  { %14305 = vmatprep.subr.bf16.mxu0 %v14304_v4  ;;  %v8943_v4 = vld [vmem:[#allocation7 + $0x39f0] sm:$0xff] }
0x3b67   :  { %14307 = vmatpush3.bf16.msra.mxu0 %v14306_v6  ;;  %v14336_v6 = vpack.c.bf16 %v8944_v2, %v8943_v4  ;;  %v9203_v4 = vld [vmem:[#allocation7 + $0x3a70] sm:$0xff]  ;;  %v9204_v2 = vld [vmem:[#allocation7 + $0x3a78] sm:$0xff] }
0x3b68   :  { %14340 = vmatprep.subr.bf16.mxu0 %v14755_v0  ;;  %v14373_v54 = vpack.c.bf16 %v9204_v2, %v9203_v4  ;;  %v9252_v4 = vld [vmem:[#allocation7 + $0x3bf8] sm:$0xff]  ;;  %v9235_v2 = vld [vmem:[#allocation7 + $0x3b70] sm:$0xff] }
0x3b6a   :  { %9018 = vmatmul.mubr.f32.vlgmr.msra.gmra.mrb[82].mxu0 %v15294_v63 }
0x3b6b   :  { %12376 = vmatprep.mubr.msk.f32.mxu0 %vm14757_vm0, %v15223_v21 }
0x3c1d   :  { %v11940_v10 = vpop.f32.mrb[80].mxu0 }
0x3c1e   :  { %v11941_v58 = vpop.f32.mrb[81].mxu0 }
0x3c1f   :  { %v11942_v12 = vadd.f32 %v11941_v58, %v11940_v10  ;;  %v9206_v10 = vld [vmem:[#allocation7 + $0x3a88] sm:$0xff] }
0x3c20   :  { %v14343_v58 = vpack.c.bf16 %v9206_v10, %v9205_v5 }
0x3c21   :  { %v8782_v13 = vadd.f32 %v11942_v12, %v8712_v11 }
0x3c23   :  { %v8785_v18 = vmax.f32 %v8782_v13, 0.0 }
0x3c25   :  { %12370 = vmatmul.mubr.msk.f32.vlgmr.msra.gmra.mrb[86].mxu1 %vm485_vm3, %v8785_v18 }
0x3c26   :  { %14311 = vmatpush3.bf16.msra.mxu1 %v14310_v29  ;;  %v9192_v29 = vld [vmem:[#allocation7 + $0x3a18] sm:$0xff] }
0x3c27   :  { %14313 = vmatprep.subr.bf16.mxu1 %v14312_v32  ;;  %v9209_v32 = vld [vmem:[#allocation7 + $0x3aa0] sm:$0xff]  ;;  %v14349_v59 = vpack.c.bf16 %v9192_v29, %v9191_v28  ;;  %v9240_v28 = vld [vmem:[#allocation7 + $0x3b98] sm:$0xff] }
0x3c28   :  { %v14351_v15 = vpack.c.bf16 %v9210_v34, %v9209_v32  ;;  %v9223_v34 = vld [vmem:[#allocation7 + $0x3b10] sm:$0xff] }
0x3c2a   :  { %14315 = vmatpush3.bf16.msra.mxu1 %v14314_v25  ;;  %v9194_v25 = vld [vmem:[#allocation7 + $0x3a28] sm:$0xff] }
0x3c2b   :  { %14317 = vmatprep.subr.bf16.mxu1 %v14316_v37  ;;  %v9211_v37 = vld [vmem:[#allocation7 + $0x3ab0] sm:$0xff]  ;;  %v14353_v39 = vpack.c.bf16 %v9194_v25, %v9193_v36 }
0x3c2c   :  { %v14355_v26 = vpack.c.bf16 %v9212_v38, %v9211_v37  ;;  %v9225_v37 = vld [vmem:[#allocation7 + $0x3b20] sm:$0xff]  ;;  %v9226_v38 = vld [vmem:[#allocation7 + $0x3b28] sm:$0xff] }
0x3c2e   :  { %14319 = vmatpush3.bf16.msra.mxu1 %v14318_v42  ;;  %v9196_v42 = vld [vmem:[#allocation7 + $0x3a38] sm:$0xff] }
0x3c2f   :  { %14321 = vmatprep.subr.bf16.mxu1 %v14320_v43  ;;  %v9213_v43 = vld [vmem:[#allocation7 + $0x3ac0] sm:$0xff]  ;;  %v14357_v46 = vpack.c.bf16 %v9196_v42, %v9195_v3  ;;  %v14385_v3 = vpack.c.bf16 %v9226_v38, %v9225_v37  ;;  %v9519_v37 = vld [vmem:[#allocation13 + $0xb8] sm:$0xff] }
0x3c30   :  { %v14359_v35 = vpack.c.bf16 %v9214_v41, %v9213_v43  ;;  %v9227_v43 = vld [vmem:[#allocation7 + $0x3b30] sm:$0xff]  ;;  %v9228_v41 = vld [vmem:[#allocation7 + $0x3b38] sm:$0xff] }
0x3c32   :  { %14323 = vmatpush3.bf16.msra.mxu1 %v14322_v49  ;;  %v9198_v49 = vld [vmem:[#allocation7 + $0x3a48] sm:$0xff] }
0x3c33   :  { %14325 = vmatprep.subr.bf16.mxu1 %v14324_v52  ;;  %v9215_v52 = vld [vmem:[#allocation7 + $0x3ad0] sm:$0xff]  ;;  %v14361_v44 = vpack.c.bf16 %v9198_v49, %v9197_v48  ;;  %v14389_v48 = vpack.c.bf16 %v9228_v41, %v9227_v43  ;;  %v9521_v43 = vld [vmem:[#allocation13 + $0xc8] sm:$0xff] }
0x3c34   :  { %v14363_v27 = vpack.c.bf16 %v9216_v50, %v9215_v52  ;;  %v9229_v52 = vld [vmem:[#allocation7 + $0x3b40] sm:$0xff]  ;;  %v9230_v50 = vld [vmem:[#allocation7 + $0x3b48] sm:$0xff] }
0x3c36   :  { %14327 = vmatpush3.bf16.msra.mxu1 %v14326_v45  ;;  %v9200_v45 = vld [vmem:[#allocation7 + $0x3a58] sm:$0xff] }
0x3c37   :  { %14329 = vmatprep.subr.bf16.mxu1 %v14328_v55  ;;  %v9217_v55 = vld [vmem:[#allocation7 + $0x3ae0] sm:$0xff]  ;;  %v14365_v56 = vpack.c.bf16 %v9200_v45, %v9199_v53  ;;  %v14393_v53 = vpack.c.bf16 %v9230_v50, %v9229_v52  ;;  %v9506_v50 = vld [vmem:[#allocation13 + $0x50] sm:$0xff] }
0x3c3a   :  { %14331 = vmatpush3.bf16.msra.mxu1 %v14330_v40  ;;  %v14367_v40 = vpack.c.bf16 %v9218_v47, %v9217_v55  ;;  %v9231_v55 = vld [vmem:[#allocation7 + $0x3b50] sm:$0xff]  ;;  %v9232_v47 = vld [vmem:[#allocation7 + $0x3b58] sm:$0xff] }
0x3c3b   :  { %14333 = vmatprep.subr.bf16.mxu1 %v14332_v1  ;;  %v9219_v1 = vld [vmem:[#allocation7 + $0x3af0] sm:$0xff] }
0x3c3d   :  { %v11978_v14 = vpop.f32.mrb[82].mxu0 }
0x3c3e   :  { %v11979_v16 = vpop.f32.mrb[83].mxu0  ;;  %14335 = vmatpush3.bf16.msra.mxu1 %v14334_v60  ;;  %v14371_v60 = vpack.c.bf16 %v9220_v61, %v9219_v1  ;;  %v9233_v1 = vld [vmem:[#allocation7 + $0x3b60] sm:$0xff]  ;;  %v9234_v61 = vld [vmem:[#allocation7 + $0x3b68] sm:$0xff] }
0x3c3f   :  { %v15313_v17 = vadd.f32 %v11979_v16, %v11978_v14  ;;  %14337 = vmatprep.subr.bf16.mxu1 %v14336_v6  ;;  %v9189_v16 = vld [vmem:[#allocation7 + $0x3a00] sm:$0xff] }
0x3c40   :  { %v14345_v23 = vpack.c.bf16 %v9190_v19, %v9189_v16  ;;  %v9095_v6 = vld [vmem:[#allocation10 + $0x1c0] sm:$0xff] }
0x3c41   :  { %v9237_v19 = vld [vmem:[#allocation7 + $0x3b80] sm:$0xff] }
0x3c42   :  { %14339 = vmatpush3.bf16.msra.mxu1 %v14338_v8  ;;  %v14341_v8 = vpack.c.bf16 %v9096_v7, %v9095_v6  ;;  %v9236_v6 = vld [vmem:[#allocation7 + $0x3b78] sm:$0xff] }
0x3c43   :  { %14344 = vmatprep.subr.bf16.mxu1 %v14343_v58  ;;  %v14405_v7 = vpack.c.bf16 %v9236_v6, %v9235_v2  ;;  %v9404_v2 = vld [vmem:[#allocation10 + $0x1d8] sm:$0xff] }
0x3c44   :  { %14342 = vmatpush3.bf16.msra.mxu0 %v14341_v8  ;;  %v9890_v8 = vld [vmem:[#allocation11 + $0x1c] ss:$0 sm:$0xff]  ;;  %v9892_v6 = vld [vmem:[#allocation8 + $0x1d] ss:$0 sm:$0xff] }
0x3cf8   :  { %v8866_v11 = vpop.f32.mrb[86].mxu1 }
0x3cf9   :  { %v8867_v12 = vadd.f32 %v9887_v9, %v8866_v11  ;;  %v12371_v13 = vpop.f32.mrb[87].mxu1  ;;  %v9889_v9 = vld [vmem:[#allocation8 + $0x1c] ss:$0 sm:$0xff] }
0x3cfa   :  { %v9020_v58 = vadd.f32 %v15313_v17, %v9889_v9  ;;  %v9224_v17 = vld [vmem:[#allocation7 + $0x3b18] sm:$0xff] }
0x3cfb   :  { %v8870_v18 = vmax.f32 %v8867_v12, 0.0  ;;  %v14381_v36 = vpack.c.bf16 %v9224_v17, %v9223_v34  ;;  %v9512_v9 = vld [vmem:[#allocation13 + $0x80] sm:$0xff]  ;;  %v9517_v34 = vld [vmem:[#allocation13 + $0xa8] sm:$0xff] }
0x3cfd   :  { %8872 = vrot.lane.b32.xlu0 %v8870_v18, %s14761_s16 }
0x3d6f   :  { %v8873_v14 = vpop.permute.xlu0 %8872 }
0x3d70   :  { %8875 = vst.msk [vmem:[#allocation2 + $0x18] sm:$0xff] %vm1491_vm7, %v8873_v14 }
0x3d77   :  { %v8879_v30 = vld [vmem:[#allocation2 + $0x18] sm:$0xff] }
0x3d78   :  { %9087 = vmatprep.mubr.f32.mxu1 %v8879_v30  ;;  %v9222_v30 = vld [vmem:[#allocation7 + $0x3b08] sm:$0xff] }
0x3d79   :  { %9088 = vmatmul.mubr.f32.vlgmr.msra.gmra.mrb[88].mxu1 %v15287_v31  ;;  %v14377_v29 = vpack.c.bf16 %v9222_v30, %v9221_v22  ;;  %v9515_v22 = vld [vmem:[#allocation13 + $0x98] sm:$0xff] }
0x3d7a   :  { %14346 = vmatpush3.bf16.msra.mxu1 %v14345_v23  ;;  %9325 = vmatprep.mubr.f32.mxu1 %v15290_v33  ;;  %v14375_v23 = vpack.c.bf16 %v9238_v20, %v9237_v19  ;;  %v9497_v19 = vld [vmem:[#allocation13 + $0x8] sm:$0xff]  ;;  %v9514_v20 = vld [vmem:[#allocation13 + $0x90] sm:$0xff] }
0x3d7b   :  { %14348 = vmatprep.subr.bf16.mxu1 %v14347_v24  ;;  %v9239_v24 = vld [vmem:[#allocation7 + $0x3b90] sm:$0xff] }
0x3d7c   :  { %v14379_v32 = vpack.c.bf16 %v9240_v28, %v9239_v24  ;;  %14376 = vmatprep.subr.bf16.mxu0 %v14375_v23  ;;  %v14414_v24 = vpack.c.bf16 %v9515_v22, %v9514_v20  ;;  %v9498_v28 = vld [vmem:[#allocation13 + $0x10] sm:$0xff]  ;;  %v9547_v22 = vld [vmem:[#allocation13 + $0x198] sm:$0xff] }
0x3d7d   :  { %v9546_v20 = vld [vmem:[#allocation13 + $0x190] sm:$0xff] }
0x3d7e   :  { %14350 = vmatpush3.bf16.msra.mxu1 %v14349_v59  ;;  %v9241_v59 = vld [vmem:[#allocation7 + $0x3ba0] sm:$0xff] }
0x3d7f   :  { %14352 = vmatprep.subr.bf16.mxu1 %v14351_v15  ;;  %v9242_v15 = vld [vmem:[#allocation7 + $0x3ba8] sm:$0xff] }
0x3d80   :  { %v14383_v25 = vpack.c.bf16 %v9242_v15, %v9241_v59  ;;  %v9500_v15 = vld [vmem:[#allocation13 + $0x20] sm:$0xff] }
0x3d82   :  { %14354 = vmatpush3.bf16.msra.mxu1 %v14353_v39  ;;  %v9243_v39 = vld [vmem:[#allocation7 + $0x3bb0] sm:$0xff] }
0x3d83   :  { %14356 = vmatprep.subr.bf16.mxu1 %v14355_v26  ;;  %v9244_v26 = vld [vmem:[#allocation7 + $0x3bb8] sm:$0xff] }
0x3d84   :  { %v14387_v42 = vpack.c.bf16 %v9244_v26, %v9243_v39  ;;  %v9502_v26 = vld [vmem:[#allocation13 + $0x30] sm:$0xff] }
0x3d86   :  { %14358 = vmatpush3.bf16.msra.mxu1 %v14357_v46  ;;  %v9245_v46 = vld [vmem:[#allocation7 + $0x3bc0] sm:$0xff] }
0x3d87   :  { %14360 = vmatprep.subr.bf16.mxu1 %v14359_v35  ;;  %v9246_v35 = vld [vmem:[#allocation7 + $0x3bc8] sm:$0xff] }
0x3d88   :  { %v14391_v49 = vpack.c.bf16 %v9246_v35, %v9245_v46  ;;  %v9505_v46 = vld [vmem:[#allocation13 + $0x48] sm:$0xff]  ;;  %v9522_v35 = vld [vmem:[#allocation13 + $0xd0] sm:$0xff] }
0x3d8a   :  { %14362 = vmatpush3.bf16.msra.mxu1 %v14361_v44  ;;  %v9247_v44 = vld [vmem:[#allocation7 + $0x3bd0] sm:$0xff] }
0x3d8b   :  { %14364 = vmatprep.subr.bf16.mxu1 %v14363_v27  ;;  %v9248_v27 = vld [vmem:[#allocation7 + $0x3bd8] sm:$0xff] }
0x3d8c   :  { %v14395_v45 = vpack.c.bf16 %v9248_v27, %v9247_v44  ;;  %v9507_v44 = vld [vmem:[#allocation13 + $0x58] sm:$0xff]  ;;  %v9524_v27 = vld [vmem:[#allocation13 + $0xe0] sm:$0xff] }
0x3d8e   :  { %14366 = vmatpush3.bf16.msra.mxu1 %v14365_v56  ;;  %v14397_v56 = vpack.c.bf16 %v9232_v47, %v9231_v55  ;;  %v9508_v47 = vld [vmem:[#allocation13 + $0x60] sm:$0xff] }
0x3d8f   :  { %14368 = vmatprep.subr.bf16.mxu1 %v14367_v40  ;;  %v9249_v40 = vld [vmem:[#allocation7 + $0x3be0] sm:$0xff] }
0x3d90   :  { %v14399_v51 = vpack.c.bf16 %v9250_v57, %v9249_v40  ;;  %v9526_v40 = vld [vmem:[#allocation13 + $0xf0] sm:$0xff]  ;;  %v9527_v57 = vld [vmem:[#allocation13 + $0xf8] sm:$0xff] }
0x3d92   :  { %14370 = vmatpush3.bf16.msra.mxu1 %v14369_v62  ;;  %v14401_v62 = vpack.c.bf16 %v9234_v61, %v9233_v1  ;;  %v14438_v1 = vpack.c.bf16 %v9527_v57, %v9526_v40  ;;  %v9510_v61 = vld [vmem:[#allocation13 + $0x70] sm:$0xff]  ;;  %v9559_v40 = vld [vmem:[#allocation13 + $0x1f8] sm:$0xff] }
0x3d93   :  { %14372 = vmatprep.subr.bf16.mxu1 %v14371_v60  ;;  %v9251_v60 = vld [vmem:[#allocation7 + $0x3bf0] sm:$0xff] }
0x3d94   :  { %v9542_v57 = vld [vmem:[#allocation13 + $0x170] sm:$0xff] }
0x3d96   :  { %14374 = vmatpush3.bf16.msra.mxu1 %v14373_v54  ;;  %v14403_v54 = vpack.c.bf16 %v9252_v4, %v9251_v60  ;;  %v9403_v4 = vld [vmem:[#allocation10 + $0x1d0] sm:$0xff] }
0x3d97   :  { %14407 = vmatprep.subr.bf16.mxu1 %v14755_v0 }
0x3d99   :  { %9326 = vmatmul.mubr.f32.vlgmr.msra.gmra.mrb[90].mxu1 %v15294_v63 }
0x3d9a   :  { %12383 = vmatprep.mubr.msk.f32.mxu1 %vm14757_vm0, %v15223_v21 }
0x3e4c   :  { %v12013_v5 = vpop.f32.mrb[88].mxu1 }
0x3e4d   :  { %v12014_v10 = vpop.f32.mrb[89].mxu1 }
0x3e4e   :  { %v12015_v11 = vadd.f32 %v12014_v10, %v12013_v5  ;;  %v9513_v5 = vld [vmem:[#allocation13 + $0x88] sm:$0xff] }
0x3e4f   :  { %v14410_v10 = vpack.c.bf16 %v9513_v5, %v9512_v9 }
0x3e50   :  { %v9090_v12 = vadd.f32 %v12015_v11, %v9020_v58 }
0x3e52   :  { %v9093_v13 = vmax.f32 %v9090_v12, 0.0 }
0x3e54   :  { %12377 = vmatmul.mubr.msk.f32.vlgmr.msra.gmra.mrb[84].mxu0 %vm485_vm3, %v9093_v13 }
0x3e55   :  { %14378 = vmatpush3.bf16.msra.mxu0 %v14377_v29  ;;  %v9499_v29 = vld [vmem:[#allocation13 + $0x18] sm:$0xff] }
0x3e56   :  { %14380 = vmatprep.subr.bf16.mxu0 %v14379_v32  ;;  %v9516_v32 = vld [vmem:[#allocation13 + $0xa0] sm:$0xff]  ;;  %v14416_v17 = vpack.c.bf16 %v9499_v29, %v9498_v28  ;;  %v9549_v29 = vld [vmem:[#allocation13 + $0x1a8] sm:$0xff] }
0x3e57   :  { %v14418_v59 = vpack.c.bf16 %v9517_v34, %v9516_v32  ;;  %v9548_v28 = vld [vmem:[#allocation13 + $0x1a0] sm:$0xff] }
0x3e58   :  { %v14450_v34 = vpack.c.bf16 %v9549_v29, %v9548_v28 }
0x3e59   :  { %14382 = vmatpush3.bf16.msra.mxu0 %v14381_v36  ;;  %v9501_v36 = vld [vmem:[#allocation13 + $0x28] sm:$0xff] }
0x3e5a   :  { %14384 = vmatprep.subr.bf16.mxu0 %v14383_v25  ;;  %v9518_v25 = vld [vmem:[#allocation13 + $0xb0] sm:$0xff]  ;;  %v14420_v38 = vpack.c.bf16 %v9501_v36, %v9500_v15  ;;  %v9551_v36 = vld [vmem:[#allocation13 + $0x1b8] sm:$0xff] }
0x3e5b   :  { %v14422_v39 = vpack.c.bf16 %v9519_v37, %v9518_v25  ;;  %v9550_v15 = vld [vmem:[#allocation13 + $0x1b0] sm:$0xff] }
0x3e5c   :  { %v14454_v37 = vpack.c.bf16 %v9551_v36, %v9550_v15 }
0x3e5d   :  { %14386 = vmatpush3.bf16.msra.mxu0 %v14385_v3  ;;  %v9503_v3 = vld [vmem:[#allocation13 + $0x38] sm:$0xff] }
0x3e5e   :  { %14388 = vmatprep.subr.bf16.mxu0 %v14387_v42  ;;  %v9520_v42 = vld [vmem:[#allocation13 + $0xc0] sm:$0xff] }
0x3e5f   :  { %v14426_v41 = vpack.c.bf16 %v9521_v43, %v9520_v42 }
0x3e61   :  { %14390 = vmatpush3.bf16.msra.mxu0 %v14389_v48  ;;  %v9523_v48 = vld [vmem:[#allocation13 + $0xd8] sm:$0xff] }
0x3e62   :  { %14392 = vmatprep.subr.bf16.mxu0 %v14391_v49  ;;  %v14430_v52 = vpack.c.bf16 %v9523_v48, %v9522_v35 }
0x3e65   :  { %14394 = vmatpush3.bf16.msra.mxu0 %v14393_v53  ;;  %v9525_v53 = vld [vmem:[#allocation13 + $0xe8] sm:$0xff] }
0x3e66   :  { %14396 = vmatprep.subr.bf16.mxu0 %v14395_v45  ;;  %v14432_v45 = vpack.c.bf16 %v9507_v44, %v9506_v50  ;;  %v14434_v55 = vpack.c.bf16 %v9525_v53, %v9524_v27  ;;  %v9556_v44 = vld [vmem:[#allocation13 + $0x1e0] sm:$0xff]  ;;  %v9557_v27 = vld [vmem:[#allocation13 + $0x1e8] sm:$0xff] }
0x3e67   :  { %v14466_v53 = vpack.c.bf16 %v9557_v27, %v9556_v44 }
0x3e69   :  { %14398 = vmatpush3.bf16.msra.mxu0 %v14397_v56  ;;  %v9509_v56 = vld [vmem:[#allocation13 + $0x68] sm:$0xff] }
0x3e6a   :  { %14400 = vmatprep.subr.bf16.mxu0 %v14399_v51  ;;  %v14436_v51 = vpack.c.bf16 %v9509_v56, %v9508_v47  ;;  %v9558_v47 = vld [vmem:[#allocation13 + $0x1f0] sm:$0xff] }
0x3e6c   :  { %v12051_v18 = vpop.f32.mrb[90].mxu1 }
0x3e6d   :  { %v12052_v14 = vpop.f32.mrb[91].mxu1  ;;  %14402 = vmatpush3.bf16.msra.mxu0 %v14401_v62  ;;  %v9511_v62 = vld [vmem:[#allocation13 + $0x78] sm:$0xff] }
0x3e6e   :  { %v15325_v16 = vadd.f32 %v12052_v14, %v12051_v18  ;;  %14404 = vmatprep.subr.bf16.mxu0 %v14403_v54  ;;  %v9496_v14 = vld [vmem:[#allocation13] sm:$0xff]  ;;  %v14440_v60 = vpack.c.bf16 %v9511_v62, %v9510_v61  ;;  %v14408_v54 = vpack.c.bf16 %v9404_v2, %v9403_v4  ;;  %v9893_v62 = vld [vmem:[#allocation11 + $0x1d] ss:$0 sm:$0xff] }
0x3e6f   :  { %v14412_v23 = vpack.c.bf16 %v9497_v19, %v9496_v14  ;;  %v9529_v19 = vld [vmem:[#allocation13 + $0x108] sm:$0xff] }
0x3e70   :  { %14409 = vmatpush3.bf16.msra.mxu1 %v14408_v54  ;;  %v9328_v9 = vadd.f32 %v15325_v16, %v9892_v6  ;;  %v9531_v16 = vld [vmem:[#allocation13 + $0x118] sm:$0xff] }
0x3e71   :  { %14406 = vmatpush3.bf16.msra.mxu0 %v14405_v7 }
0x3e72   :  { %14411 = vmatprep.subr.bf16.mxu0 %v14410_v10 }
0x3f27   :  { %v9174_v58 = vpop.f32.mrb[84].mxu0 }
0x3f28   :  { %v9175_v11 = vadd.f32 %v9890_v8, %v9174_v58  ;;  %v12378_v12 = vpop.f32.mrb[85].mxu0 }
0x3f2a   :  { %v9178_v13 = vmax.f32 %v9175_v11, 0.0 }
0x3f2c   :  { %9180 = vrot.lane.b32.xlu1 %v9178_v13, %s14762_s4  ;;  %v9544_v13 = vld [vmem:[#allocation13 + $0x180] sm:$0xff] }
0x3f9e   :  { %v9181_v18 = vpop.permute.xlu1 %9180 }
0x3f9f   :  { %9183 = vst.msk [vmem:[#allocation2 + $0x18] sm:$0xff] %vm1800_vm8, %v9181_v18  ;;  %v9528_v18 = vld [vmem:[#allocation13 + $0x100] sm:$0xff] }
0x3fa6   :  { %v9187_v30 = vld [vmem:[#allocation2 + $0x18] sm:$0xff] }
0x3fa7   :  { %9395 = vmatprep.mubr.f32.mxu0 %v9187_v30  ;;  %v14446_v30 = vpack.c.bf16 %v9547_v22, %v9546_v20 }
0x3fa8   :  { %9396 = vmatmul.mubr.f32.vlgmr.msra.gmra.mrb[86].mxu0 %v15287_v31  ;;  %v14424_v31 = vpack.c.bf16 %v9503_v3, %v9502_v26  ;;  %v9552_v26 = vld [vmem:[#allocation13 + $0x1c0] sm:$0xff]  ;;  %v9553_v3 = vld [vmem:[#allocation13 + $0x1c8] sm:$0xff] }
0x3fa9   :  { %14413 = vmatpush3.bf16.msra.mxu0 %v14412_v23  ;;  %9631 = vmatprep.mubr.f32.mxu0 %v15290_v33  ;;  %v9504_v33 = vld [vmem:[#allocation13 + $0x40] sm:$0xff]  ;;  %v14444_v23 = vpack.c.bf16 %v9529_v19, %v9528_v18  ;;  %v14458_v43 = vpack.c.bf16 %v9553_v3, %v9552_v26 }
0x3faa   :  { %14415 = vmatprep.subr.bf16.mxu0 %v14414_v24  ;;  %v14428_v49 = vpack.c.bf16 %v9505_v46, %v9504_v33  ;;  %v9530_v24 = vld [vmem:[#allocation13 + $0x110] sm:$0xff]  ;;  %v9555_v46 = vld [vmem:[#allocation13 + $0x1d8] sm:$0xff] }
0x3fab   :  { %v14448_v32 = vpack.c.bf16 %v9531_v16, %v9530_v24  ;;  %v9554_v33 = vld [vmem:[#allocation13 + $0x1d0] sm:$0xff] }
0x3fac   :  { %v14462_v48 = vpack.c.bf16 %v9555_v46, %v9554_v33 }
0x3fad   :  { %14417 = vmatpush3.bf16.msra.mxu0 %v14416_v17  ;;  %v9532_v17 = vld [vmem:[#allocation13 + $0x120] sm:$0xff] }
0x3fae   :  { %14419 = vmatprep.subr.bf16.mxu0 %v14418_v59  ;;  %v9533_v59 = vld [vmem:[#allocation13 + $0x128] sm:$0xff] }
0x3faf   :  { %v14452_v25 = vpack.c.bf16 %v9533_v59, %v9532_v17 }
0x3fb1   :  { %14421 = vmatpush3.bf16.msra.mxu0 %v14420_v38  ;;  %v9534_v38 = vld [vmem:[#allocation13 + $0x130] sm:$0xff] }
0x3fb2   :  { %14423 = vmatprep.subr.bf16.mxu0 %v14422_v39  ;;  %v9535_v39 = vld [vmem:[#allocation13 + $0x138] sm:$0xff] }
0x3fb3   :  { %v14456_v42 = vpack.c.bf16 %v9535_v39, %v9534_v38 }
0x3fb5   :  { %14425 = vmatpush3.bf16.msra.mxu0 %v14424_v31  ;;  %v9536_v31 = vld [vmem:[#allocation13 + $0x140] sm:$0xff] }
0x3fb6   :  { %14427 = vmatprep.subr.bf16.mxu0 %v14426_v41  ;;  %v9537_v41 = vld [vmem:[#allocation13 + $0x148] sm:$0xff] }
0x3fb7   :  { %v14460_v35 = vpack.c.bf16 %v9537_v41, %v9536_v31 }
0x3fb9   :  { %14429 = vmatpush3.bf16.msra.mxu0 %v14428_v49  ;;  %v9538_v49 = vld [vmem:[#allocation13 + $0x150] sm:$0xff] }
0x3fba   :  { %14431 = vmatprep.subr.bf16.mxu0 %v14430_v52  ;;  %v9539_v52 = vld [vmem:[#allocation13 + $0x158] sm:$0xff] }
0x3fbb   :  { %v14464_v50 = vpack.c.bf16 %v9539_v52, %v9538_v49 }
0x3fbd   :  { %14433 = vmatpush3.bf16.msra.mxu0 %v14432_v45  ;;  %v9540_v45 = vld [vmem:[#allocation13 + $0x160] sm:$0xff] }
0x3fbe   :  { %14435 = vmatprep.subr.bf16.mxu0 %v14434_v55  ;;  %v9541_v55 = vld [vmem:[#allocation13 + $0x168] sm:$0xff] }
0x3fbf   :  { %v14468_v56 = vpack.c.bf16 %v9541_v55, %v9540_v45 }
0x3fc1   :  { %14437 = vmatpush3.bf16.msra.mxu0 %v14436_v51  ;;  %v9543_v51 = vld [vmem:[#allocation13 + $0x178] sm:$0xff] }
0x3fc2   :  { %14439 = vmatprep.subr.bf16.mxu0 %v14438_v1  ;;  %v14470_v1 = vpack.c.bf16 %v9559_v40, %v9558_v47  ;;  %v14472_v61 = vpack.c.bf16 %v9543_v51, %v9542_v57 }
0x3fc5   :  { %14441 = vmatpush3.bf16.msra.mxu0 %v14440_v60 }
0x3fc6   :  { %14474 = vmatprep.subr.bf16.mxu0 %v14755_v0 }
0x3fc8   :  { %9632 = vmatmul.mubr.f32.vlgmr.msra.gmra.mrb[88].mxu0 %v15294_v63 }
0x3fc9   :  { %12394 = vmatprep.mubr.msk.f32.mxu0 %vm14757_vm0, %v15223_v21  ;;  %v9545_v21 = vld [vmem:[#allocation13 + $0x188] sm:$0xff] }
0x3fca   :  { %v14442_v14 = vpack.c.bf16 %v9545_v21, %v9544_v13  ;;  %v9895_v13 = vld [vmem:[#allocation14] ss:$0 sm:$0xff] }
0x3fcc   :  { %14443 = vmatprep.subr.bf16.mxu1 %v14442_v14 }
0x407b   :  { %v12086_v7 = vpop.f32.mrb[86].mxu0 }
0x407c   :  { %v12087_v8 = vpop.f32.mrb[87].mxu0 }
0x407d   :  { %v12088_v5 = vadd.f32 %v12087_v8, %v12086_v7  ;;  %v9494_v8 = vld [vmem:[#allocation2 + $0x10] sm:$0xff] }
0x407f   :  { %v9398_v10 = vadd.f32 %v12088_v5, %v9328_v9  ;;  %v9708_v9 = vld [vmem:[#allocation16] sm:$0xff]  ;;  %v9709_v5 = vld [vmem:[#allocation16 + $0x8] sm:$0xff] }
0x4081   :  { %v9401_v58 = vmax.f32 %v9398_v10, 0.0  ;;  %v14475_v10 = vpack.c.bf16 %v9709_v5, %v9708_v9 }
0x4083   :  { %12384 = vmatmul.mubr.msk.f32.vlgmr.msra.gmra.mrb[92].mxu1 %vm485_vm3, %v9401_v58  ;;  %14476 = vmatpush3.bf16.msra.mxu0 %v14475_v10  ;;  %v9710_v58 = vld [vmem:[#allocation16 + $0x10] sm:$0xff] }
0x4084   :  { %14445 = vmatpush3.bf16.msra.mxu1 %v14444_v23  ;;  %14477 = vmatprep.subr.bf16.mxu0 %v14755_v0  ;;  %v9896_v23 = vld [vmem:[#allocation17] ss:$0 sm:$0xff] }
0x4085   :  { %14447 = vmatprep.subr.bf16.mxu1 %v14446_v30 }
0x4088   :  { %14449 = vmatpush3.bf16.msra.mxu1 %v14448_v32 }
0x4089   :  { %14451 = vmatprep.subr.bf16.mxu1 %v14450_v34 }
0x408c   :  { %14453 = vmatpush3.bf16.msra.mxu1 %v14452_v25 }
0x408d   :  { %14455 = vmatprep.subr.bf16.mxu1 %v14454_v37 }
0x4090   :  { %14457 = vmatpush3.bf16.msra.mxu1 %v14456_v42 }
0x4091   :  { %14459 = vmatprep.subr.bf16.mxu1 %v14458_v43 }
0x4094   :  { %14461 = vmatpush3.bf16.msra.mxu1 %v14460_v35 }
0x4095   :  { %14463 = vmatprep.subr.bf16.mxu1 %v14462_v48 }
0x4098   :  { %14465 = vmatpush3.bf16.msra.mxu1 %v14464_v50 }
0x4099   :  { %14467 = vmatprep.subr.bf16.mxu1 %v14466_v53 }
0x409b   :  { %v12124_v11 = vpop.f32.mrb[88].mxu0 }
0x409c   :  { %v12125_v12 = vpop.f32.mrb[89].mxu0  ;;  %14469 = vmatpush3.bf16.msra.mxu1 %v14468_v56 }
0x409d   :  { %v15337_v63 = vadd.f32 %v12125_v12, %v12124_v11  ;;  %14471 = vmatprep.subr.bf16.mxu1 %v14470_v1  ;;  %v9711_v11 = vld [vmem:[#allocation16 + $0x18] sm:$0xff] }
0x409e   :  { %v14478_v12 = vpack.c.bf16 %v9711_v11, %v9710_v58 }
0x409f   :  { %v9634_v14 = vadd.f32 %v15337_v63, %v9895_v13 }
0x40a0   :  { %14473 = vmatpush3.bf16.msra.mxu1 %v14472_v61  ;;  %14479 = vmatpush3.bf16.msra.mxu0 %v14478_v12 }
0x4156   :  { %v9482_v60 = vpop.f32.mrb[92].mxu1 }
0x4157   :  { %v9483_v4 = vadd.f32 %v9893_v62, %v9482_v60  ;;  %v12385_v2 = vpop.f32.mrb[93].mxu1 }
0x4159   :  { %v9486_v54 = vmax.f32 %v9483_v4, 0.0 }
0x415b   :  { %9488 = vrot.lane.b32.xlu0 %v9486_v54, %s14763_s20 }
0x41cd   :  { %v9489_v6 = vpop.permute.xlu0 %9488 }
0x41ce   :  { %9491 = vst.msk [vmem:[#allocation2 + $0x18] sm:$0xff] %vm2109_vm9, %v9489_v6 }
0x41d5   :  { %v9495_v7 = vld [vmem:[#allocation2 + $0x18] sm:$0xff] }
0x41d6   :  { %9701 = vmatprep.mubr.f32.mxu1 %v9495_v7 }
0x41d7   :  { %9702 = vmatmul.mubr.f32.vlgmr.msra.gmra.mrb[94].mxu1 %v9494_v8 }
0x42aa   :  { %v12159_v21 = vpop.f32.mrb[94].mxu1 }
0x42ab   :  { %v12160_v18 = vpop.f32.mrb[95].mxu1 }
0x42ac   :  { %v12161_v19 = vadd.f32 %v12160_v18, %v12159_v21 }
0x42ae   :  { %v9704_v20 = vadd.f32 %v12161_v19, %v9634_v14 }
0x42b0   :  { %v9707_v22 = vmax.f32 %v9704_v20, 0.0 }
0x42b2   :  { %12395 = vmatmul.mubr.msk.f32.vlgmr.msra.gmra.mrb[90].mxu0 %vm258_vm2, %v9707_v22 }
0x4385   :  { %v9788_v30 = vpop.f32.mrb[90].mxu0 }
0x4386   :  { %v9789_v24 = vadd.f32 %v9896_v23, %v9788_v30  ;;  %v12396_v16 = vpop.f32.mrb[91].mxu0 }
0x4388   :  { %9792 = vst [vmem:[%s15358_s11] sm:$0xff] %v9789_v24 }
0x4389   :  { %9797 = vsyncpa [#allocation4], 1 }
0x438a   :  { %9798 = vsyncpa [#allocation6], 1 }
0x438b   :  { %9799 = vsyncpa [#allocation9], 1 }
0x438c   :  { %9800 = vsyncpa [#allocation12], 1 }
0x438d   :  { %9801 = vsyncpa [#allocation15], 1 }
0x438e   :  { %9802 = vsyncpa [#allocation18], 1 }

</bundles_post_ra>
